<compile_context>
chip_gen: v7x
topology: tpu7x:2x2x1
jax: 0.10.0
libtpu: 0.0.40
codegen_flags: <defaults>
</compile_context>

<pallas_src>
import functools

import jax
import jax.numpy as jnp
from jax import lax
from jax.experimental import pallas as pl
from jax.experimental.pallas import tpu as pltpu

LANE = 128


def _cpad(c):
    """Round a channel count up to a multiple of the 128-lane width."""
    return ((c + LANE - 1) // LANE) * LANE


# ----------------------------------------------------------------------------
# Pallas kernel: fused tap-accumulated conv + folded BN (+residual) (+ReLU)
# ----------------------------------------------------------------------------
def _fused_tap_conv_kernel(*refs, n_src, taps, apply_relu, has_res):
    """One grid step computes a (tr, Wo, Cout_p) output band of one image.

    refs layout:
      src_0..src_{n_src-1}  (rows_in, cols_in, Cin_p)   input band(s) + halo
      w_ref                 (T, Cin_p, Cout_p)          per-tap weight slices
      sb_ref                (2, Cout_p) f32             folded BN scale / bias
      [res_ref]             (tr, Wo, Cout_p)            optional residual
      o_ref                 (tr, Wo, Cout_p)            output band

    `taps` is a static tuple of (src_index, dy, dx): the conv is evaluated as
        out[r] = sum_t  src[src_t][r + dy_t, dx_t : dx_t + Wo, :] @ w[t]
    accumulated in f32 on the MXU -- no im2col patch matrix is ever built.
    """
    srcs = refs[:n_src]
    w_ref = refs[n_src]
    sb_ref = refs[n_src + 1]
    res_ref = refs[n_src + 2] if has_res else None
    o_ref = refs[-1]
    TR, WO, _ = o_ref.shape

    # Hoisted out of the row loop (grid-invariant, loaded once per step).
    scale = sb_ref[0:1, :]
    bias = sb_ref[1:2, :]

    def row_body(r, carry):
        acc = None
        for t, (si, dy, dx) in enumerate(taps):
            v = srcs[si][r + dy, dx:dx + WO, :]          # (WO, Cin_p)
            d = jnp.dot(v, w_ref[t], preferred_element_type=jnp.float32)
            acc = d if acc is None else acc + d
        y = acc * scale + bias
        if has_res:
            y = y + res_ref[r].astype(jnp.float32)
        if apply_relu:
            y = jnp.maximum(y, 0.0)
        o_ref[r] = y.astype(o_ref.dtype)
        return carry

    lax.fori_loop(0, TR, row_body, 0)


def _fused_tap_conv(srcs, w_taps, sb, taps, *, out_hw, relu, residual=None):
    """pallas_call wrapper: grid over (batch, row bands), auto-pipelined."""
    B, nrb = srcs[0].shape[0], srcs[0].shape[1]
    Ho, Wo = out_hw
    T, Cin_p, Cout_p = w_taps.shape
    tr = Ho // nrb
    act_dtype = srcs[0].dtype

    kernel = functools.partial(
        _fused_tap_conv_kernel, n_src=len(srcs), taps=tuple(taps),
        apply_relu=relu, has_res=residual is not None)

    in_specs, args = [], []
    for s in srcs:
        blk = (None, None) + tuple(s.shape[2:])
        in_specs.append(pl.BlockSpec(blk, lambda b, r: (b, r, 0, 0, 0)))
        args.append(s)
    # Small weight / BN blocks stay resident (constant index map).
    in_specs.append(pl.BlockSpec((T, Cin_p, Cout_p), lambda b, r: (0, 0, 0)))
    args.append(w_taps)
    in_specs.append(pl.BlockSpec((2, Cout_p), lambda b, r: (0, 0)))
    args.append(sb)
    if residual is not None:
        in_specs.append(
            pl.BlockSpec((None, tr, Wo, Cout_p), lambda b, r: (b, r, 0, 0)))
        args.append(residual)

    return pl.pallas_call(
        kernel,
        grid=(B, nrb),
        in_specs=in_specs,
        out_specs=pl.BlockSpec((None, tr, Wo, Cout_p),
                               lambda b, r: (b, r, 0, 0)),
        out_shape=jax.ShapeDtypeStruct((B, Ho, Wo, Cout_p), act_dtype),
        compiler_params=pltpu.CompilerParams(
            dimension_semantics=("parallel", "parallel"),
            vmem_limit_bytes=32 * 1024 * 1024),
    )(*args)


# ----------------------------------------------------------------------------
# Row-band tiling helpers (pure JAX; ~1x activation re-layout, no 9x im2col)
# ----------------------------------------------------------------------------
def _pick_tr(n_rows, n_cols, target_m=2048, cap=64):
    """Largest divisor of n_rows such that tr * n_cols ~ target_m rows/step."""
    t = int(max(1, min(cap, n_rows, target_m // max(n_cols, 1))))
    for tr in range(t, 0, -1):
        if n_rows % tr == 0:
            return tr
    return 1


def _row_blocks(x, tr, halo):
    """[B, Hi, Wi, C] -> [B, nrb, tr+halo, Wi, C]; band r covers input rows
    [r*tr, r*tr + tr + halo).  (Hi == nrb*tr + halo.)"""
    B, Hi, Wi, C = x.shape
    nrb = (Hi - halo) // tr
    if nrb == 1:
        return x.reshape(B, 1, Hi, Wi, C)
    bands = [lax.slice_in_dim(x, r * tr, r * tr + tr + halo, axis=1)
             for r in range(nrb)]
    return jnp.stack(bands, axis=1)


# Tap tables (static).
_K9 = tuple((ky, kx) for ky in range(3) for kx in range(3))
_TAPS_3x3 = tuple((0, dy, dx) for dy in range(3) for dx in range(3))
# stride-2: input is split into 2x2 phases; tap (dy,dx) reads phase
# (dy%2, dx%2) at offset (dy//2, dx//2).
_TAPS_3x3_S2 = tuple((2 * (dy % 2) + (dx % 2), dy // 2, dx // 2)
                     for dy in range(3) for dx in range(3))
# ConvTranspose2d(k=3, s=2, p=1, output_padding=1) 4-phase decomposition.
# Each entry: ((py, px), (((dy, dx), (ky, kx)), ...)) meaning
#   out[2i+py, 2j+px] = sum_t w_fwd[:, :, ky, kx] . x[i+dy, j+dx]
_DECONV_PHASES = (
    ((0, 0), (((0, 0), (1, 1)),)),
    ((0, 1), (((0, 0), (1, 0)), ((0, 1), (1, 2)))),
    ((1, 0), (((0, 0), (0, 1)), ((1, 0), (2, 1)))),
    ((1, 1), (((0, 0), (0, 0)), ((0, 1), (0, 2)),
              ((1, 0), (2, 0)), ((1, 1), (2, 2)))),
)


# ----------------------------------------------------------------------------
# Layer wrappers
# ----------------------------------------------------------------------------
def conv_bn(x, layer, *, stride, relu, residual=None):
    """3x3 conv (pad=1, stride 1|2) + folded BN (+residual) (+ReLU)."""
    B, H, W, _ = x.shape
    xp = jnp.pad(x, ((0, 0), (1, 1), (1, 1), (0, 0)))
    if stride == 1:
        Ho, Wo = H, W
        tr = _pick_tr(Ho, Wo)
        srcs = [_row_blocks(xp, tr, halo=2)]
        taps = _TAPS_3x3
    else:
        Ho, Wo = H // 2, W // 2
        tr = _pick_tr(Ho, Wo)
        phases = [xp[:, p::2, q::2, :] for p in range(2) for q in range(2)]
        srcs = [_row_blocks(ph, tr, halo=1) for ph in phases]
        taps = _TAPS_3x3_S2
    return _fused_tap_conv(srcs, layer['w'], layer['sb'], taps,
                           out_hw=(Ho, Wo), relu=relu, residual=residual)


def deconv_bn(x, layer, *, relu, residual=None):
    """ConvTranspose2d(k=3, s=2, p=1, output_padding=1, bias=False) + folded
    BN (+residual) (+ReLU) via the 4-phase sub-pixel decomposition."""
    B, H, W, _ = x.shape
    xhp = jnp.pad(x, ((0, 0), (0, 1), (0, 1), (0, 0)))    # +1 high-side halo
    tr = _pick_tr(H, W)
    src = _row_blocks(xhp, tr, halo=1)
    outs = []
    for pi, ((py, px), phase_taps) in enumerate(_DECONV_PHASES):
        offsets = tuple((0, dy, dx) for (dy, dx), _ in phase_taps)
        res_p = residual[:, py::2, px::2, :] if residual is not None else None
        outs.append(_fused_tap_conv([src], layer['w'][pi], layer['sb'],
                                    offsets, out_hw=(H, W), relu=relu,
                                    residual=res_p))
    ee, eo, oe, oo = outs
    y = jnp.stack([jnp.stack([ee, eo], axis=3),
                   jnp.stack([oe, oo], axis=3)], axis=2)   # (B, H, 2, W, 2, C)
    return y.reshape(B, 2 * H, 2 * W, y.shape[-1])


# ----------------------------------------------------------------------------
# Parameter preparation (fold BN, pad channels, split weights per tap, bf16)
# ----------------------------------------------------------------------------
def _fold_bn(gamma, beta, mean, var, eps=1e-5):
    scale = gamma / jnp.sqrt(var + eps)
    return scale, beta - mean * scale


def _make_sb(scale, bias, cout_p):
    cout = scale.shape[0]
    sb = jnp.zeros((2, cout_p), jnp.float32)
    sb = sb.at[0, :cout].set(scale.astype(jnp.float32))
    sb = sb.at[1, :cout].set(bias.astype(jnp.float32))
    return sb


def _make_w_taps(w_oihw, kpos, dtype):
    cout, cin = w_oihw.shape[:2]
    cin_p, cout_p = _cpad(cin), _cpad(cout)
    wt = jnp.zeros((len(kpos), cin_p, cout_p), jnp.float32)
    for t, (ky, kx) in enumerate(kpos):
        wt = wt.at[t, :cin, :cout].set(jnp.transpose(w_oihw[:, :, ky, kx]))
    return wt.astype(dtype)


def _prep_conv(w_oihw, bn, dtype):
    scale, bias = bn
    return {'w': _make_w_taps(w_oihw, _K9, dtype),
            'sb': _make_sb(scale, bias, _cpad(w_oihw.shape[0]))}


def _prep_deconv(wT_iohw, bn, dtype):
    # equivalent forward-conv weight: flip spatially, swap in/out channels
    w_fwd = jnp.transpose(wT_iohw[:, :, ::-1, ::-1], (1, 0, 2, 3))
    scale, bias = bn
    w_ph = [_make_w_taps(w_fwd, tuple(k for _, k in phase_taps), dtype)
            for _, phase_taps in _DECONV_PHASES]
    return {'w': w_ph, 'sb': _make_sb(scale, bias, _cpad(w_fwd.shape[0]))}


def prepare_params(raw, act_dtype):
    return {
        'compress': _prep_conv(raw['w0'], raw['bn0'], act_dtype),
        'conv1': _prep_conv(raw['w1'], raw['bn1'], act_dtype),
        'conv2': _prep_conv(raw['w2'], raw['bn2'], act_dtype),
        'conv3': _prep_conv(raw['w3'], raw['bn3'], act_dtype),
        'conv4': _prep_conv(raw['w4'], raw['bn4'], act_dtype),
        'conv5': _prep_deconv(raw['w5'], raw['bn5'], act_dtype),
        'conv6': _prep_deconv(raw['w6'], raw['bn6'], act_dtype),
    }


# ----------------------------------------------------------------------------
# Module forward passes (NCHW boundary API, like the PyTorch module)
# ----------------------------------------------------------------------------
def _to_internal(x_nchw, dtype):
    x = jnp.transpose(x_nchw, (0, 2, 3, 1))
    c = x.shape[-1]
    cp = _cpad(c)
    if cp != c:
        x = jnp.pad(x, ((0, 0), (0, 0), (0, 0), (0, cp - c)))
    return x.astype(dtype)


def _to_nchw(x_nhwc_p, c):
    return jnp.transpose(x_nhwc_p[..., :c], (0, 3, 1, 2)).astype(jnp.float32)


def _hourglass_internal(prep, xh, presqu_h=None, postsqu_h=None):
    out = conv_bn(xh, prep['conv1'], stride=2, relu=True)
    pre = conv_bn(out, prep['conv2'], stride=1, relu=True,
                  residual=postsqu_h)
    out = conv_bn(pre, prep['conv3'], stride=2, relu=True)
    out = conv_bn(out, prep['conv4'], stride=1, relu=True)
    res5 = presqu_h if presqu_h is not None else pre
    post = deconv_bn(out, prep['conv5'], relu=True, residual=res5)
    outf = deconv_bn(post, prep['conv6'], relu=False)
    return outf, pre, post


@jax.jit
def hourglass2d_forward(prep, x, presqu=None, postsqu=None):
    dtype = prep['conv1']['w'].dtype
    xh = _to_internal(x, dtype)
    pres = _to_internal(presqu, dtype) if presqu is not None else None
    posts = _to_internal(postsqu, dtype) if postsqu is not None else None
    outf, pre, post = _hourglass_internal(prep, xh, pres, posts)
    c = x.shape[1]
    return _to_nchw(outf, c), _to_nchw(pre, 2 * c), _to_nchw(post, 2 * c)


@functools.partial(jax.jit, static_argnums=(2,))
def bev_hourglass_forward(prep, spatial_features, out_channels):
    """BEVHourglass.forward (output_prehg_feat=True): returns (prehg, out)."""
    dtype = prep['compress']['w'].dtype
    xh = _to_internal(spatial_features, dtype)
    xh = conv_bn(xh, prep['compress'], stride=1, relu=True)
    prehg = xh
    outf, _pre, _post = _hourglass_internal(prep, xh)
    return _to_nchw(prehg, out_channels), _to_nchw(outf, out_channels)


# ----------------------------------------------------------------------------
# Deterministic synthetic parameters (eval-mode BN, folded)
# ----------------------------------------------------------------------------
def init_raw_params(key, in_channels, out_channels):
    C, C2 = out_channels, out_channels * 2
    ks = jax.random.split(key, 7)

    def bn(c):
        i = jnp.arange(c, dtype=jnp.float32)
        return _fold_bn(1.0 + 0.1 * i, 0.1 * (i - c / 2.0),
                        0.05 * i, 1.0 + 0.05 * i)

    n = lambda k, s: 0.1 * jax.random.normal(k, s, jnp.float32)
    return {
        'w0': n(ks[0], (C, in_channels, 3, 3)), 'bn0': bn(C),
        'w1': n(ks[1], (C2, C, 3, 3)), 'bn1': bn(C2),
        'w2': n(ks[2], (C2, C2, 3, 3)), 'bn2': bn(C2),
        'w3': n(ks[3], (C2, C2, 3, 3)), 'bn3': bn(C2),
        'w4': n(ks[4], (C2, C2, 3, 3)), 'bn4': bn(C2),
        'w5': n(ks[5], (C2, C2, 3, 3)), 'bn5': bn(C2),   # ConvTranspose [Cin,Cout,3,3]
        'w6': n(ks[6], (C2, C, 3, 3)), 'bn6': bn(C),
    }


# ----------------------------------------------------------------------------
# Pure-JAX reference (lax.conv_general_dilated) for correctness checking
# ----------------------------------------------------------------------------
def _ref_convbn(x, w, scale, bias, stride, dtype):
    y = lax.conv_general_dilated(
        x.astype(dtype), w.astype(dtype), (stride, stride), [(1, 1), (1, 1)],
        dimension_numbers=('NCHW', 'OIHW', 'NCHW'),
        preferred_element_type=jnp.float32, precision=lax.Precision.HIGHEST)
    return y * scale[None, :, None, None] + bias[None, :, None, None]


def _ref_deconvbn(x, wT, scale, bias, dtype):
    w = jnp.transpose(wT[:, :, ::-1, ::-1], (1, 0, 2, 3))
    y = lax.conv_general_dilated(
        x.astype(dtype), w.astype(dtype), (1, 1), [(1, 2), (1, 2)],
        lhs_dilation=(2, 2), dimension_numbers=('NCHW', 'OIHW', 'NCHW'),
        preferred_element_type=jnp.float32, precision=lax.Precision.HIGHEST)
    return y * scale[None, :, None, None] + bias[None, :, None, None]


def ref_hourglass(raw, x, presqu=None, postsqu=None, dtype=jnp.float32):
    relu = lambda t: jnp.maximum(t, 0.0)
    store = lambda t: t.astype(dtype)          # mimic kernel activation dtype
    xs = store(x)
    out = store(relu(_ref_convbn(xs, raw['w1'], *raw['bn1'], 2, dtype)))
    pre = _ref_convbn(out, raw['w2'], *raw['bn2'], 1, dtype)
    if postsqu is not None:
        pre = pre + store(postsqu).astype(jnp.float32)
    pre = store(relu(pre))
    out = store(relu(_ref_convbn(pre, raw['w3'], *raw['bn3'], 2, dtype)))
    out = store(relu(_ref_convbn(out, raw['w4'], *raw['bn4'], 1, dtype)))
    c5 = _ref_deconvbn(out, raw['w5'], *raw['bn5'], dtype)
    res5 = store(presqu) if presqu is not None else pre
    post = store(relu(c5 + res5.astype(jnp.float32)))
    outf = store(_ref_deconvbn(post, raw['w6'], *raw['bn6'], dtype))
    return (outf.astype(jnp.float32), pre.astype(jnp.float32),
            post.astype(jnp.float32))


def ref_bev(raw, x, dtype=jnp.float32):
    relu = lambda t: jnp.maximum(t, 0.0)
    prehg = relu(_ref_convbn(x.astype(dtype), raw['w0'], *raw['bn0'],
                             1, dtype)).astype(dtype)
    out = ref_hourglass(raw, prehg.astype(jnp.float32), None, None, dtype)[0]
    return prehg.astype(jnp.float32), out


# ----------------------------------------------------------------------------
def _check(name, got, want, atol, rtol):
    assert got.shape == want.shape, (name, got.shape, want.shape)
    err = float(jnp.max(jnp.abs(got - want)))
    assert jnp.allclose(got, want, atol=atol, rtol=rtol), (name, err)


if __name__ == "__main__":
    key = jax.random.PRNGKey(0)
    k_x, k_hg, k_pre, k_post, k_w = jax.random.split(key, 5)
    B, CIN, COUT, H, W = 2, 6, 4, 16, 16

    x = jax.random.normal(k_x, (B, CIN, H, W), jnp.float32)
    xh = jax.random.normal(k_hg, (B, COUT, H, W), jnp.float32)
    presqu = jax.random.normal(k_pre, (B, 2 * COUT, H // 2, W // 2), jnp.float32)
    postsqu = jax.random.normal(k_post, (B, 2 * COUT, H // 2, W // 2), jnp.float32)
    raw = init_raw_params(k_w, CIN, COUT)

    # ---- f32 compute path: strict check against the lax reference ---------
    prep32 = prepare_params(raw, jnp.float32)

    bev32 = jax.block_until_ready(bev_hourglass_forward(prep32, x, COUT))
    bev_ref = ref_bev(raw, x, dtype=jnp.float32)
    for name, a, b in zip(("prehg", "out"), bev32, bev_ref):
        _check("bev_f32_" + name, a, b, 1e-2, 1e-2)

    hg32 = jax.block_until_ready(
        hourglass2d_forward(prep32, xh, presqu, postsqu))
    hg_ref = ref_hourglass(raw, xh, presqu, postsqu, dtype=jnp.float32)
    for name, a, b in zip(("out", "pre", "post"), hg32, hg_ref):
        _check("hg_f32_" + name, a, b, 1e-2, 1e-2)

    # ---- bf16 MXU path (production config): sanity check ------------------
    prep16 = prepare_params(raw, jnp.bfloat16)
    bev16 = jax.block_until_ready(bev_hourglass_forward(prep16, x, COUT))
    bev_ref16 = ref_bev(raw, x, dtype=jnp.bfloat16)
    for name, a, b in zip(("prehg", "out"), bev16, bev_ref16):
        _check("bev_bf16_" + name, a, b, 1e-1, 1e-1)

    print("KERNEL_OK")
</pallas_src>

<mosaic_0001>
module attributes {stable_mosaic.version = 11 : i64} {
  func.func @_fused_tap_conv_kernel(%arg0: i32, %arg1: i32, %arg2: memref<1x1x18x18x128xf32, #tpu.memory_space<vmem>>, %arg3: memref<9x128x128xf32, #tpu.memory_space<vmem>>, %arg4: memref<2x128xf32, #tpu.memory_space<vmem>>, %arg5: memref<1x16x16x128xf32, #tpu.memory_space<vmem>>) attributes {dimension_semantics = [#tpu.dimension_semantics<parallel>, #tpu.dimension_semantics<parallel>], iteration_bounds = array<i64: 2, 1>, scalar_prefetch = 0 : i64, scratch_operands = 0 : i64, tpu.core_type = #tpu.core_type<tc>, window_params = [{transform_indices = @transform_0, window_bounds = array<i64: 1, 1, 18, 18, 128>}, {pipeline_mode = #tpu.pipeline_mode<synchronous>, transform_indices = @transform_1, window_bounds = array<i64: 9, 128, 128>}, {pipeline_mode = #tpu.pipeline_mode<synchronous>, transform_indices = @transform_2, window_bounds = array<i64: 2, 128>}, {transform_indices = @transform_3, window_bounds = array<i64: 1, 16, 16, 128>}]} {
    %c0 = arith.constant 0 : index
    %c0_0 = arith.constant 0 : index
    %0 = vector.load %arg4[%c0, %c0_0] : memref<2x128xf32, #tpu.memory_space<vmem>>, vector<1x128xf32>
    %c1 = arith.constant 1 : index
    %c0_1 = arith.constant 0 : index
    %1 = vector.load %arg4[%c1, %c0_1] : memref<2x128xf32, #tpu.memory_space<vmem>>, vector<1x128xf32>
    %c0_i32 = arith.constant 0 : i32
    %c16_i32 = arith.constant 16 : i32
    %2 = arith.addi %c0_i32, %c16_i32 : i32
    %c1_i32 = arith.constant 1 : i32
    scf.for %arg6 = %c0_i32 to %2 step %c1_i32  : i32 {
      %c0_i32_3 = arith.constant 0 : i32
      %3 = arith.addi %arg6, %c0_i32_3 : i32
      %c0_4 = arith.constant 0 : index
      %c0_5 = arith.constant 0 : index
      %4 = arith.index_cast %3 : i32 to index
      %c0_6 = arith.constant 0 : index
      %c0_7 = arith.constant 0 : index
      %5 = vector.load %arg2[%c0_4, %c0_5, %4, %c0_6, %c0_7] : memref<1x1x18x18x128xf32, #tpu.memory_space<vmem>>, vector<1x1x1x16x128xf32>
      %6 = vector.shape_cast %5 : vector<1x1x1x16x128xf32> to vector<16x128xf32>
      %c0_8 = arith.constant 0 : index
      %c0_9 = arith.constant 0 : index
      %c0_10 = arith.constant 0 : index
      %7 = vector.load %arg3[%c0_8, %c0_9, %c0_10] : memref<9x128x128xf32, #tpu.memory_space<vmem>>, vector<1x128x128xf32>
      %8 = vector.shape_cast %7 : vector<1x128x128xf32> to vector<128x128xf32>
      %cst = arith.constant dense<0.000000e+00> : vector<16x128xf32>
      %9 = tpu.matmul %6, %8, %cst {dimension_numbers = #tpu.dot_dimension_numbers<[1], [0], [0], [1], [0, 0, 1, 1], [], []>} : vector<16x128xf32>, vector<128x128xf32>, vector<16x128xf32> -> vector<16x128xf32>
      %c0_i32_11 = arith.constant 0 : i32
      %10 = arith.addi %arg6, %c0_i32_11 : i32
      %c0_12 = arith.constant 0 : index
      %c0_13 = arith.constant 0 : index
      %11 = arith.index_cast %10 : i32 to index
      %c1_14 = arith.constant 1 : index
      %c0_15 = arith.constant 0 : index
      %12 = vector.load %arg2[%c0_12, %c0_13, %11, %c1_14, %c0_15] : memref<1x1x18x18x128xf32, #tpu.memory_space<vmem>>, vector<1x1x1x16x128xf32>
      %13 = vector.shape_cast %12 : vector<1x1x1x16x128xf32> to vector<16x128xf32>
      %c1_16 = arith.constant 1 : index
      %c0_17 = arith.constant 0 : index
      %c0_18 = arith.constant 0 : index
      %14 = vector.load %arg3[%c1_16, %c0_17, %c0_18] : memref<9x128x128xf32, #tpu.memory_space<vmem>>, vector<1x128x128xf32>
      %15 = vector.shape_cast %14 : vector<1x128x128xf32> to vector<128x128xf32>
      %cst_19 = arith.constant dense<0.000000e+00> : vector<16x128xf32>
      %16 = tpu.matmul %13, %15, %cst_19 {dimension_numbers = #tpu.dot_dimension_numbers<[1], [0], [0], [1], [0, 0, 1, 1], [], []>} : vector<16x128xf32>, vector<128x128xf32>, vector<16x128xf32> -> vector<16x128xf32>
      %17 = arith.addf %9, %16 : vector<16x128xf32>
      %c0_i32_20 = arith.constant 0 : i32
      %18 = arith.addi %arg6, %c0_i32_20 : i32
      %c0_21 = arith.constant 0 : index
      %c0_22 = arith.constant 0 : index
      %19 = arith.index_cast %18 : i32 to index
      %c2 = arith.constant 2 : index
      %c0_23 = arith.constant 0 : index
      %20 = vector.load %arg2[%c0_21, %c0_22, %19, %c2, %c0_23] : memref<1x1x18x18x128xf32, #tpu.memory_space<vmem>>, vector<1x1x1x16x128xf32>
      %21 = vector.shape_cast %20 : vector<1x1x1x16x128xf32> to vector<16x128xf32>
      %c2_24 = arith.constant 2 : index
      %c0_25 = arith.constant 0 : index
      %c0_26 = arith.constant 0 : index
      %22 = vector.load %arg3[%c2_24, %c0_25, %c0_26] : memref<9x128x128xf32, #tpu.memory_space<vmem>>, vector<1x128x128xf32>
      %23 = vector.shape_cast %22 : vector<1x128x128xf32> to vector<128x128xf32>
      %cst_27 = arith.constant dense<0.000000e+00> : vector<16x128xf32>
      %24 = tpu.matmul %21, %23, %cst_27 {dimension_numbers = #tpu.dot_dimension_numbers<[1], [0], [0], [1], [0, 0, 1, 1], [], []>} : vector<16x128xf32>, vector<128x128xf32>, vector<16x128xf32> -> vector<16x128xf32>
      %25 = arith.addf %17, %24 : vector<16x128xf32>
      %c1_i32_28 = arith.constant 1 : i32
      %26 = arith.addi %arg6, %c1_i32_28 : i32
      %c0_29 = arith.constant 0 : index
      %c0_30 = arith.constant 0 : index
      %27 = arith.index_cast %26 : i32 to index
      %c0_31 = arith.constant 0 : index
      %c0_32 = arith.constant 0 : index
      %28 = vector.load %arg2[%c0_29, %c0_30, %27, %c0_31, %c0_32] : memref<1x1x18x18x128xf32, #tpu.memory_space<vmem>>, vector<1x1x1x16x128xf32>
      %29 = vector.shape_cast %28 : vector<1x1x1x16x128xf32> to vector<16x128xf32>
      %c3 = arith.constant 3 : index
      %c0_33 = arith.constant 0 : index
      %c0_34 = arith.constant 0 : index
      %30 = vector.load %arg3[%c3, %c0_33, %c0_34] : memref<9x128x128xf32, #tpu.memory_space<vmem>>, vector<1x128x128xf32>
      %31 = vector.shape_cast %30 : vector<1x128x128xf32> to vector<128x128xf32>
      %cst_35 = arith.constant dense<0.000000e+00> : vector<16x128xf32>
      %32 = tpu.matmul %29, %31, %cst_35 {dimension_numbers = #tpu.dot_dimension_numbers<[1], [0], [0], [1], [0, 0, 1, 1], [], []>} : vector<16x128xf32>, vector<128x128xf32>, vector<16x128xf32> -> vector<16x128xf32>
      %33 = arith.addf %25, %32 : vector<16x128xf32>
      %c1_i32_36 = arith.constant 1 : i32
      %34 = arith.addi %arg6, %c1_i32_36 : i32
      %c0_37 = arith.constant 0 : index
      %c0_38 = arith.constant 0 : index
      %35 = arith.index_cast %34 : i32 to index
      %c1_39 = arith.constant 1 : index
      %c0_40 = arith.constant 0 : index
      %36 = vector.load %arg2[%c0_37, %c0_38, %35, %c1_39, %c0_40] : memref<1x1x18x18x128xf32, #tpu.memory_space<vmem>>, vector<1x1x1x16x128xf32>
      %37 = vector.shape_cast %36 : vector<1x1x1x16x128xf32> to vector<16x128xf32>
      %c4 = arith.constant 4 : index
      %c0_41 = arith.constant 0 : index
      %c0_42 = arith.constant 0 : index
      %38 = vector.load %arg3[%c4, %c0_41, %c0_42] : memref<9x128x128xf32, #tpu.memory_space<vmem>>, vector<1x128x128xf32>
      %39 = vector.shape_cast %38 : vector<1x128x128xf32> to vector<128x128xf32>
      %cst_43 = arith.constant dense<0.000000e+00> : vector<16x128xf32>
      %40 = tpu.matmul %37, %39, %cst_43 {dimension_numbers = #tpu.dot_dimension_numbers<[1], [0], [0], [1], [0, 0, 1, 1], [], []>} : vector<16x128xf32>, vector<128x128xf32>, vector<16x128xf32> -> vector<16x128xf32>
      %41 = arith.addf %33, %40 : vector<16x128xf32>
      %c1_i32_44 = arith.constant 1 : i32
      %42 = arith.addi %arg6, %c1_i32_44 : i32
      %c0_45 = arith.constant 0 : index
      %c0_46 = arith.constant 0 : index
      %43 = arith.index_cast %42 : i32 to index
      %c2_47 = arith.constant 2 : index
      %c0_48 = arith.constant 0 : index
      %44 = vector.load %arg2[%c0_45, %c0_46, %43, %c2_47, %c0_48] : memref<1x1x18x18x128xf32, #tpu.memory_space<vmem>>, vector<1x1x1x16x128xf32>
      %45 = vector.shape_cast %44 : vector<1x1x1x16x128xf32> to vector<16x128xf32>
      %c5 = arith.constant 5 : index
      %c0_49 = arith.constant 0 : index
      %c0_50 = arith.constant 0 : index
      %46 = vector.load %arg3[%c5, %c0_49, %c0_50] : memref<9x128x128xf32, #tpu.memory_space<vmem>>, vector<1x128x128xf32>
      %47 = vector.shape_cast %46 : vector<1x128x128xf32> to vector<128x128xf32>
      %cst_51 = arith.constant dense<0.000000e+00> : vector<16x128xf32>
      %48 = tpu.matmul %45, %47, %cst_51 {dimension_numbers = #tpu.dot_dimension_numbers<[1], [0], [0], [1], [0, 0, 1, 1], [], []>} : vector<16x128xf32>, vector<128x128xf32>, vector<16x128xf32> -> vector<16x128xf32>
      %49 = arith.addf %41, %48 : vector<16x128xf32>
      %c2_i32 = arith.constant 2 : i32
      %50 = arith.addi %arg6, %c2_i32 : i32
      %c0_52 = arith.constant 0 : index
      %c0_53 = arith.constant 0 : index
      %51 = arith.index_cast %50 : i32 to index
      %c0_54 = arith.constant 0 : index
      %c0_55 = arith.constant 0 : index
      %52 = vector.load %arg2[%c0_52, %c0_53, %51, %c0_54, %c0_55] : memref<1x1x18x18x128xf32, #tpu.memory_space<vmem>>, vector<1x1x1x16x128xf32>
      %53 = vector.shape_cast %52 : vector<1x1x1x16x128xf32> to vector<16x128xf32>
      %c6 = arith.constant 6 : index
      %c0_56 = arith.constant 0 : index
      %c0_57 = arith.constant 0 : index
      %54 = vector.load %arg3[%c6, %c0_56, %c0_57] : memref<9x128x128xf32, #tpu.memory_space<vmem>>, vector<1x128x128xf32>
      %55 = vector.shape_cast %54 : vector<1x128x128xf32> to vector<128x128xf32>
      %cst_58 = arith.constant dense<0.000000e+00> : vector<16x128xf32>
      %56 = tpu.matmul %53, %55, %cst_58 {dimension_numbers = #tpu.dot_dimension_numbers<[1], [0], [0], [1], [0, 0, 1, 1], [], []>} : vector<16x128xf32>, vector<128x128xf32>, vector<16x128xf32> -> vector<16x128xf32>
      %57 = arith.addf %49, %56 : vector<16x128xf32>
      %c2_i32_59 = arith.constant 2 : i32
      %58 = arith.addi %arg6, %c2_i32_59 : i32
      %c0_60 = arith.constant 0 : index
      %c0_61 = arith.constant 0 : index
      %59 = arith.index_cast %58 : i32 to index
      %c1_62 = arith.constant 1 : index
      %c0_63 = arith.constant 0 : index
      %60 = vector.load %arg2[%c0_60, %c0_61, %59, %c1_62, %c0_63] : memref<1x1x18x18x128xf32, #tpu.memory_space<vmem>>, vector<1x1x1x16x128xf32>
      %61 = vector.shape_cast %60 : vector<1x1x1x16x128xf32> to vector<16x128xf32>
      %c7 = arith.constant 7 : index
      %c0_64 = arith.constant 0 : index
      %c0_65 = arith.constant 0 : index
      %62 = vector.load %arg3[%c7, %c0_64, %c0_65] : memref<9x128x128xf32, #tpu.memory_space<vmem>>, vector<1x128x128xf32>
      %63 = vector.shape_cast %62 : vector<1x128x128xf32> to vector<128x128xf32>
      %cst_66 = arith.constant dense<0.000000e+00> : vector<16x128xf32>
      %64 = tpu.matmul %61, %63, %cst_66 {dimension_numbers = #tpu.dot_dimension_numbers<[1], [0], [0], [1], [0, 0, 1, 1], [], []>} : vector<16x128xf32>, vector<128x128xf32>, vector<16x128xf32> -> vector<16x128xf32>
      %65 = arith.addf %57, %64 : vector<16x128xf32>
      %c2_i32_67 = arith.constant 2 : i32
      %66 = arith.addi %arg6, %c2_i32_67 : i32
      %c0_68 = arith.constant 0 : index
      %c0_69 = arith.constant 0 : index
      %67 = arith.index_cast %66 : i32 to index
      %c2_70 = arith.constant 2 : index
      %c0_71 = arith.constant 0 : index
      %68 = vector.load %arg2[%c0_68, %c0_69, %67, %c2_70, %c0_71] : memref<1x1x18x18x128xf32, #tpu.memory_space<vmem>>, vector<1x1x1x16x128xf32>
      %69 = vector.shape_cast %68 : vector<1x1x1x16x128xf32> to vector<16x128xf32>
      %c8 = arith.constant 8 : index
      %c0_72 = arith.constant 0 : index
      %c0_73 = arith.constant 0 : index
      %70 = vector.load %arg3[%c8, %c0_72, %c0_73] : memref<9x128x128xf32, #tpu.memory_space<vmem>>, vector<1x128x128xf32>
      %71 = vector.shape_cast %70 : vector<1x128x128xf32> to vector<128x128xf32>
      %cst_74 = arith.constant dense<0.000000e+00> : vector<16x128xf32>
      %72 = tpu.matmul %69, %71, %cst_74 {dimension_numbers = #tpu.dot_dimension_numbers<[1], [0], [0], [1], [0, 0, 1, 1], [], []>} : vector<16x128xf32>, vector<128x128xf32>, vector<16x128xf32> -> vector<16x128xf32>
      %73 = arith.addf %65, %72 : vector<16x128xf32>
      %74 = vector.broadcast %0 : vector<1x128xf32> to vector<16x128xf32>
      %75 = arith.mulf %73, %74 : vector<16x128xf32>
      %76 = vector.broadcast %1 : vector<1x128xf32> to vector<16x128xf32>
      %77 = arith.addf %75, %76 : vector<16x128xf32>
      %cst_75 = arith.constant 0.000000e+00 : f32
      %78 = vector.broadcast %cst_75 : f32 to vector<16x128xf32>
      %79 = arith.maximumf %77, %78 : vector<16x128xf32>
      %c0_76 = arith.constant 0 : index
      %80 = arith.index_cast %arg6 : i32 to index
      %c0_77 = arith.constant 0 : index
      %c0_78 = arith.constant 0 : index
      %81 = vector.load %arg5[%c0_76, %80, %c0_77, %c0_78] : memref<1x16x16x128xf32, #tpu.memory_space<vmem>>, vector<1x1x16x128xf32>
      %82 = vector.shape_cast %81 : vector<1x1x16x128xf32> to vector<16x128xf32>
      %83 = vector.shape_cast %79 : vector<16x128xf32> to vector<1x1x16x128xf32>
      tpu.vector_store %arg5[%c0_76, %80, %c0_77, %c0_78], %83 {strides = array<i32>} : memref<1x16x16x128xf32, #tpu.memory_space<vmem>>, vector<1x1x16x128xf32>,
    }
    %c16_i32_2 = arith.constant 16 : i32
    return
  }
  func.func @transform_0(%arg0: i32, %arg1: i32) -> (i32, i32, i32, i32, i32) {
    %c0_i32 = arith.constant 0 : i32
    %c0_i32_0 = arith.constant 0 : i32
    %c0_i32_1 = arith.constant 0 : i32
    %c0_i32_2 = arith.constant 0 : i32
    return %arg0, %arg1, %c0_i32, %c0_i32_0, %c0_i32_1 : i32, i32, i32, i32, i32
  }
  func.func @transform_1(%arg0: i32, %arg1: i32) -> (i32, i32, i32) {
    %c0_i32 = arith.constant 0 : i32
    %c0_i32_0 = arith.constant 0 : i32
    %c0_i32_1 = arith.constant 0 : i32
    %c0_i32_2 = arith.constant 0 : i32
    return %c0_i32, %c0_i32_0, %c0_i32_1 : i32, i32, i32
  }
  func.func @transform_2(%arg0: i32, %arg1: i32) -> (i32, i32) {
    %c0_i32 = arith.constant 0 : i32
    %c0_i32_0 = arith.constant 0 : i32
    %c0_i32_1 = arith.constant 0 : i32
    return %c0_i32, %c0_i32_0 : i32, i32
  }
  func.func @transform_3(%arg0: i32, %arg1: i32) -> (i32, i32, i32, i32) {
    %c0_i32 = arith.constant 0 : i32
    %c0_i32_0 = arith.constant 0 : i32
    %c0_i32_1 = arith.constant 0 : i32
    return %arg0, %arg1, %c0_i32, %c0_i32_0 : i32, i32, i32, i32
  }
}

module attributes {stable_mosaic.version = 11 : i64} {
  func.func @_fused_tap_conv_kernel(%arg0: i32, %arg1: i32, %arg2: memref<1x1x10x10x128xf32, #tpu.memory_space<vmem>>, %arg3: memref<9x128x128xf32, #tpu.memory_space<vmem>>, %arg4: memref<2x128xf32, #tpu.memory_space<vmem>>, %arg5: memref<1x8x8x128xf32, #tpu.memory_space<vmem>>) attributes {dimension_semantics = [#tpu.dimension_semantics<parallel>, #tpu.dimension_semantics<parallel>], iteration_bounds = array<i64: 2, 1>, scalar_prefetch = 0 : i64, scratch_operands = 0 : i64, tpu.core_type = #tpu.core_type<tc>, window_params = [{transform_indices = @transform_0, window_bounds = array<i64: 1, 1, 10, 10, 128>}, {pipeline_mode = #tpu.pipeline_mode<synchronous>, transform_indices = @transform_1, window_bounds = array<i64: 9, 128, 128>}, {pipeline_mode = #tpu.pipeline_mode<synchronous>, transform_indices = @transform_2, window_bounds = array<i64: 2, 128>}, {transform_indices = @transform_3, window_bounds = array<i64: 1, 8, 8, 128>}]} {
    %c0 = arith.constant 0 : index
    %c0_0 = arith.constant 0 : index
    %0 = vector.load %arg4[%c0, %c0_0] : memref<2x128xf32, #tpu.memory_space<vmem>>, vector<1x128xf32>
    %c1 = arith.constant 1 : index
    %c0_1 = arith.constant 0 : index
    %1 = vector.load %arg4[%c1, %c0_1] : memref<2x128xf32, #tpu.memory_space<vmem>>, vector<1x128xf32>
    %c0_i32 = arith.constant 0 : i32
    %c8_i32 = arith.constant 8 : i32
    %2 = arith.addi %c0_i32, %c8_i32 : i32
    %c1_i32 = arith.constant 1 : i32
    scf.for %arg6 = %c0_i32 to %2 step %c1_i32  : i32 {
      %c0_i32_3 = arith.constant 0 : i32
      %3 = arith.addi %arg6, %c0_i32_3 : i32
      %c0_4 = arith.constant 0 : index
      %c0_5 = arith.constant 0 : index
      %4 = arith.index_cast %3 : i32 to index
      %c0_6 = arith.constant 0 : index
      %c0_7 = arith.constant 0 : index
      %5 = vector.load %arg2[%c0_4, %c0_5, %4, %c0_6, %c0_7] : memref<1x1x10x10x128xf32, #tpu.memory_space<vmem>>, vector<1x1x1x8x128xf32>
      %6 = vector.shape_cast %5 : vector<1x1x1x8x128xf32> to vector<8x128xf32>
      %c0_8 = arith.constant 0 : index
      %c0_9 = arith.constant 0 : index
      %c0_10 = arith.constant 0 : index
      %7 = vector.load %arg3[%c0_8, %c0_9, %c0_10] : memref<9x128x128xf32, #tpu.memory_space<vmem>>, vector<1x128x128xf32>
      %8 = vector.shape_cast %7 : vector<1x128x128xf32> to vector<128x128xf32>
      %cst = arith.constant dense<0.000000e+00> : vector<8x128xf32>
      %9 = tpu.matmul %6, %8, %cst {dimension_numbers = #tpu.dot_dimension_numbers<[1], [0], [0], [1], [0, 0, 1, 1], [], []>} : vector<8x128xf32>, vector<128x128xf32>, vector<8x128xf32> -> vector<8x128xf32>
      %c0_i32_11 = arith.constant 0 : i32
      %10 = arith.addi %arg6, %c0_i32_11 : i32
      %c0_12 = arith.constant 0 : index
      %c0_13 = arith.constant 0 : index
      %11 = arith.index_cast %10 : i32 to index
      %c1_14 = arith.constant 1 : index
      %c0_15 = arith.constant 0 : index
      %12 = vector.load %arg2[%c0_12, %c0_13, %11, %c1_14, %c0_15] : memref<1x1x10x10x128xf32, #tpu.memory_space<vmem>>, vector<1x1x1x8x128xf32>
      %13 = vector.shape_cast %12 : vector<1x1x1x8x128xf32> to vector<8x128xf32>
      %c1_16 = arith.constant 1 : index
      %c0_17 = arith.constant 0 : index
      %c0_18 = arith.constant 0 : index
      %14 = vector.load %arg3[%c1_16, %c0_17, %c0_18] : memref<9x128x128xf32, #tpu.memory_space<vmem>>, vector<1x128x128xf32>
      %15 = vector.shape_cast %14 : vector<1x128x128xf32> to vector<128x128xf32>
      %cst_19 = arith.constant dense<0.000000e+00> : vector<8x128xf32>
      %16 = tpu.matmul %13, %15, %cst_19 {dimension_numbers = #tpu.dot_dimension_numbers<[1], [0], [0], [1], [0, 0, 1, 1], [], []>} : vector<8x128xf32>, vector<128x128xf32>, vector<8x128xf32> -> vector<8x128xf32>
      %17 = arith.addf %9, %16 : vector<8x128xf32>
      %c0_i32_20 = arith.constant 0 : i32
      %18 = arith.addi %arg6, %c0_i32_20 : i32
      %c0_21 = arith.constant 0 : index
      %c0_22 = arith.constant 0 : index
      %19 = arith.index_cast %18 : i32 to index
      %c2 = arith.constant 2 : index
      %c0_23 = arith.constant 0 : index
      %20 = vector.load %arg2[%c0_21, %c0_22, %19, %c2, %c0_23] : memref<1x1x10x10x128xf32, #tpu.memory_space<vmem>>, vector<1x1x1x8x128xf32>
      %21 = vector.shape_cast %20 : vector<1x1x1x8x128xf32> to vector<8x128xf32>
      %c2_24 = arith.constant 2 : index
      %c0_25 = arith.constant 0 : index
      %c0_26 = arith.constant 0 : index
      %22 = vector.load %arg3[%c2_24, %c0_25, %c0_26] : memref<9x128x128xf32, #tpu.memory_space<vmem>>, vector<1x128x128xf32>
      %23 = vector.shape_cast %22 : vector<1x128x128xf32> to vector<128x128xf32>
      %cst_27 = arith.constant dense<0.000000e+00> : vector<8x128xf32>
      %24 = tpu.matmul %21, %23, %cst_27 {dimension_numbers = #tpu.dot_dimension_numbers<[1], [0], [0], [1], [0, 0, 1, 1], [], []>} : vector<8x128xf32>, vector<128x128xf32>, vector<8x128xf32> -> vector<8x128xf32>
      %25 = arith.addf %17, %24 : vector<8x128xf32>
      %c1_i32_28 = arith.constant 1 : i32
      %26 = arith.addi %arg6, %c1_i32_28 : i32
      %c0_29 = arith.constant 0 : index
      %c0_30 = arith.constant 0 : index
      %27 = arith.index_cast %26 : i32 to index
      %c0_31 = arith.constant 0 : index
      %c0_32 = arith.constant 0 : index
      %28 = vector.load %arg2[%c0_29, %c0_30, %27, %c0_31, %c0_32] : memref<1x1x10x10x128xf32, #tpu.memory_space<vmem>>, vector<1x1x1x8x128xf32>
      %29 = vector.shape_cast %28 : vector<1x1x1x8x128xf32> to vector<8x128xf32>
      %c3 = arith.constant 3 : index
      %c0_33 = arith.constant 0 : index
      %c0_34 = arith.constant 0 : index
      %30 = vector.load %arg3[%c3, %c0_33, %c0_34] : memref<9x128x128xf32, #tpu.memory_space<vmem>>, vector<1x128x128xf32>
      %31 = vector.shape_cast %30 : vector<1x128x128xf32> to vector<128x128xf32>
      %cst_35 = arith.constant dense<0.000000e+00> : vector<8x128xf32>
      %32 = tpu.matmul %29, %31, %cst_35 {dimension_numbers = #tpu.dot_dimension_numbers<[1], [0], [0], [1], [0, 0, 1, 1], [], []>} : vector<8x128xf32>, vector<128x128xf32>, vector<8x128xf32> -> vector<8x128xf32>
      %33 = arith.addf %25, %32 : vector<8x128xf32>
      %c1_i32_36 = arith.constant 1 : i32
      %34 = arith.addi %arg6, %c1_i32_36 : i32
      %c0_37 = arith.constant 0 : index
      %c0_38 = arith.constant 0 : index
      %35 = arith.index_cast %34 : i32 to index
      %c1_39 = arith.constant 1 : index
      %c0_40 = arith.constant 0 : index
      %36 = vector.load %arg2[%c0_37, %c0_38, %35, %c1_39, %c0_40] : memref<1x1x10x10x128xf32, #tpu.memory_space<vmem>>, vector<1x1x1x8x128xf32>
      %37 = vector.shape_cast %36 : vector<1x1x1x8x128xf32> to vector<8x128xf32>
      %c4 = arith.constant 4 : index
      %c0_41 = arith.constant 0 : index
      %c0_42 = arith.constant 0 : index
      %38 = vector.load %arg3[%c4, %c0_41, %c0_42] : memref<9x128x128xf32, #tpu.memory_space<vmem>>, vector<1x128x128xf32>
      %39 = vector.shape_cast %38 : vector<1x128x128xf32> to vector<128x128xf32>
      %cst_43 = arith.constant dense<0.000000e+00> : vector<8x128xf32>
      %40 = tpu.matmul %37, %39, %cst_43 {dimension_numbers = #tpu.dot_dimension_numbers<[1], [0], [0], [1], [0, 0, 1, 1], [], []>} : vector<8x128xf32>, vector<128x128xf32>, vector<8x128xf32> -> vector<8x128xf32>
      %41 = arith.addf %33, %40 : vector<8x128xf32>
      %c1_i32_44 = arith.constant 1 : i32
      %42 = arith.addi %arg6, %c1_i32_44 : i32
      %c0_45 = arith.constant 0 : index
      %c0_46 = arith.constant 0 : index
      %43 = arith.index_cast %42 : i32 to index
      %c2_47 = arith.constant 2 : index
      %c0_48 = arith.constant 0 : index
      %44 = vector.load %arg2[%c0_45, %c0_46, %43, %c2_47, %c0_48] : memref<1x1x10x10x128xf32, #tpu.memory_space<vmem>>, vector<1x1x1x8x128xf32>
      %45 = vector.shape_cast %44 : vector<1x1x1x8x128xf32> to vector<8x128xf32>
      %c5 = arith.constant 5 : index
      %c0_49 = arith.constant 0 : index
      %c0_50 = arith.constant 0 : index
      %46 = vector.load %arg3[%c5, %c0_49, %c0_50] : memref<9x128x128xf32, #tpu.memory_space<vmem>>, vector<1x128x128xf32>
      %47 = vector.shape_cast %46 : vector<1x128x128xf32> to vector<128x128xf32>
      %cst_51 = arith.constant dense<0.000000e+00> : vector<8x128xf32>
      %48 = tpu.matmul %45, %47, %cst_51 {dimension_numbers = #tpu.dot_dimension_numbers<[1], [0], [0], [1], [0, 0, 1, 1], [], []>} : vector<8x128xf32>, vector<128x128xf32>, vector<8x128xf32> -> vector<8x128xf32>
      %49 = arith.addf %41, %48 : vector<8x128xf32>
      %c2_i32 = arith.constant 2 : i32
      %50 = arith.addi %arg6, %c2_i32 : i32
      %c0_52 = arith.constant 0 : index
      %c0_53 = arith.constant 0 : index
      %51 = arith.index_cast %50 : i32 to index
      %c0_54 = arith.constant 0 : index
      %c0_55 = arith.constant 0 : index
      %52 = vector.load %arg2[%c0_52, %c0_53, %51, %c0_54, %c0_55] : memref<1x1x10x10x128xf32, #tpu.memory_space<vmem>>, vector<1x1x1x8x128xf32>
      %53 = vector.shape_cast %52 : vector<1x1x1x8x128xf32> to vector<8x128xf32>
      %c6 = arith.constant 6 : index
      %c0_56 = arith.constant 0 : index
      %c0_57 = arith.constant 0 : index
      %54 = vector.load %arg3[%c6, %c0_56, %c0_57] : memref<9x128x128xf32, #tpu.memory_space<vmem>>, vector<1x128x128xf32>
      %55 = vector.shape_cast %54 : vector<1x128x128xf32> to vector<128x128xf32>
      %cst_58 = arith.constant dense<0.000000e+00> : vector<8x128xf32>
      %56 = tpu.matmul %53, %55, %cst_58 {dimension_numbers = #tpu.dot_dimension_numbers<[1], [0], [0], [1], [0, 0, 1, 1], [], []>} : vector<8x128xf32>, vector<128x128xf32>, vector<8x128xf32> -> vector<8x128xf32>
      %57 = arith.addf %49, %56 : vector<8x128xf32>
      %c2_i32_59 = arith.constant 2 : i32
      %58 = arith.addi %arg6, %c2_i32_59 : i32
      %c0_60 = arith.constant 0 : index
      %c0_61 = arith.constant 0 : index
      %59 = arith.index_cast %58 : i32 to index
      %c1_62 = arith.constant 1 : index
      %c0_63 = arith.constant 0 : index
      %60 = vector.load %arg2[%c0_60, %c0_61, %59, %c1_62, %c0_63] : memref<1x1x10x10x128xf32, #tpu.memory_space<vmem>>, vector<1x1x1x8x128xf32>
      %61 = vector.shape_cast %60 : vector<1x1x1x8x128xf32> to vector<8x128xf32>
      %c7 = arith.constant 7 : index
      %c0_64 = arith.constant 0 : index
      %c0_65 = arith.constant 0 : index
      %62 = vector.load %arg3[%c7, %c0_64, %c0_65] : memref<9x128x128xf32, #tpu.memory_space<vmem>>, vector<1x128x128xf32>
      %63 = vector.shape_cast %62 : vector<1x128x128xf32> to vector<128x128xf32>
      %cst_66 = arith.constant dense<0.000000e+00> : vector<8x128xf32>
      %64 = tpu.matmul %61, %63, %cst_66 {dimension_numbers = #tpu.dot_dimension_numbers<[1], [0], [0], [1], [0, 0, 1, 1], [], []>} : vector<8x128xf32>, vector<128x128xf32>, vector<8x128xf32> -> vector<8x128xf32>
      %65 = arith.addf %57, %64 : vector<8x128xf32>
      %c2_i32_67 = arith.constant 2 : i32
      %66 = arith.addi %arg6, %c2_i32_67 : i32
      %c0_68 = arith.constant 0 : index
      %c0_69 = arith.constant 0 : index
      %67 = arith.index_cast %66 : i32 to index
      %c2_70 = arith.constant 2 : index
      %c0_71 = arith.constant 0 : index
      %68 = vector.load %arg2[%c0_68, %c0_69, %67, %c2_70, %c0_71] : memref<1x1x10x10x128xf32, #tpu.memory_space<vmem>>, vector<1x1x1x8x128xf32>
      %69 = vector.shape_cast %68 : vector<1x1x1x8x128xf32> to vector<8x128xf32>
      %c8 = arith.constant 8 : index
      %c0_72 = arith.constant 0 : index
      %c0_73 = arith.constant 0 : index
      %70 = vector.load %arg3[%c8, %c0_72, %c0_73] : memref<9x128x128xf32, #tpu.memory_space<vmem>>, vector<1x128x128xf32>
      %71 = vector.shape_cast %70 : vector<1x128x128xf32> to vector<128x128xf32>
      %cst_74 = arith.constant dense<0.000000e+00> : vector<8x128xf32>
      %72 = tpu.matmul %69, %71, %cst_74 {dimension_numbers = #tpu.dot_dimension_numbers<[1], [0], [0], [1], [0, 0, 1, 1], [], []>} : vector<8x128xf32>, vector<128x128xf32>, vector<8x128xf32> -> vector<8x128xf32>
      %73 = arith.addf %65, %72 : vector<8x128xf32>
      %74 = vector.broadcast %0 : vector<1x128xf32> to vector<8x128xf32>
      %75 = arith.mulf %73, %74 : vector<8x128xf32>
      %76 = vector.broadcast %1 : vector<1x128xf32> to vector<8x128xf32>
      %77 = arith.addf %75, %76 : vector<8x128xf32>
      %cst_75 = arith.constant 0.000000e+00 : f32
      %78 = vector.broadcast %cst_75 : f32 to vector<8x128xf32>
      %79 = arith.maximumf %77, %78 : vector<8x128xf32>
      %c0_76 = arith.constant 0 : index
      %80 = arith.index_cast %arg6 : i32 to index
      %c0_77 = arith.constant 0 : index
      %c0_78 = arith.constant 0 : index
      %81 = vector.load %arg5[%c0_76, %80, %c0_77, %c0_78] : memref<1x8x8x128xf32, #tpu.memory_space<vmem>>, vector<1x1x8x128xf32>
      %82 = vector.shape_cast %81 : vector<1x1x8x128xf32> to vector<8x128xf32>
      %83 = vector.shape_cast %79 : vector<8x128xf32> to vector<1x1x8x128xf32>
      tpu.vector_store %arg5[%c0_76, %80, %c0_77, %c0_78], %83 {strides = array<i32>} : memref<1x8x8x128xf32, #tpu.memory_space<vmem>>, vector<1x1x8x128xf32>,
    }
    %c8_i32_2 = arith.constant 8 : i32
    return
  }
  func.func @transform_0(%arg0: i32, %arg1: i32) -> (i32, i32, i32, i32, i32) {
    %c0_i32 = arith.constant 0 : i32
    %c0_i32_0 = arith.constant 0 : i32
    %c0_i32_1 = arith.constant 0 : i32
    %c0_i32_2 = arith.constant 0 : i32
    return %arg0, %arg1, %c0_i32, %c0_i32_0, %c0_i32_1 : i32, i32, i32, i32, i32
  }
  func.func @transform_1(%arg0: i32, %arg1: i32) -> (i32, i32, i32) {
    %c0_i32 = arith.constant 0 : i32
    %c0_i32_0 = arith.constant 0 : i32
    %c0_i32_1 = arith.constant 0 : i32
    %c0_i32_2 = arith.constant 0 : i32
    return %c0_i32, %c0_i32_0, %c0_i32_1 : i32, i32, i32
  }
  func.func @transform_2(%arg0: i32, %arg1: i32) -> (i32, i32) {
    %c0_i32 = arith.constant 0 : i32
    %c0_i32_0 = arith.constant 0 : i32
    %c0_i32_1 = arith.constant 0 : i32
    return %c0_i32, %c0_i32_0 : i32, i32
  }
  func.func @transform_3(%arg0: i32, %arg1: i32) -> (i32, i32, i32, i32) {
    %c0_i32 = arith.constant 0 : i32
    %c0_i32_0 = arith.constant 0 : i32
    %c0_i32_1 = arith.constant 0 : i32
    return %arg0, %arg1, %c0_i32, %c0_i32_0 : i32, i32, i32, i32
  }
}

module attributes {stable_mosaic.version = 11 : i64} {
  func.func @_fused_tap_conv_kernel(%arg0: i32, %arg1: i32, %arg2: memref<1x1x9x9x128xf32, #tpu.memory_space<vmem>>, %arg3: memref<1x1x9x9x128xf32, #tpu.memory_space<vmem>>, %arg4: memref<1x1x9x9x128xf32, #tpu.memory_space<vmem>>, %arg5: memref<1x1x9x9x128xf32, #tpu.memory_space<vmem>>, %arg6: memref<9x128x128xf32, #tpu.memory_space<vmem>>, %arg7: memref<2x128xf32, #tpu.memory_space<vmem>>, %arg8: memref<1x8x8x128xf32, #tpu.memory_space<vmem>>) attributes {dimension_semantics = [#tpu.dimension_semantics<parallel>, #tpu.dimension_semantics<parallel>], iteration_bounds = array<i64: 2, 1>, scalar_prefetch = 0 : i64, scratch_operands = 0 : i64, tpu.core_type = #tpu.core_type<tc>, window_params = [{transform_indices = @transform_0, window_bounds = array<i64: 1, 1, 9, 9, 128>}, {transform_indices = @transform_1, window_bounds = array<i64: 1, 1, 9, 9, 128>}, {transform_indices = @transform_2, window_bounds = array<i64: 1, 1, 9, 9, 128>}, {transform_indices = @transform_3, window_bounds = array<i64: 1, 1, 9, 9, 128>}, {pipeline_mode = #tpu.pipeline_mode<synchronous>, transform_indices = @transform_4, window_bounds = array<i64: 9, 128, 128>}, {pipeline_mode = #tpu.pipeline_mode<synchronous>, transform_indices = @transform_5, window_bounds = array<i64: 2, 128>}, {transform_indices = @transform_6, window_bounds = array<i64: 1, 8, 8, 128>}]} {
    %c0 = arith.constant 0 : index
    %c0_0 = arith.constant 0 : index
    %0 = vector.load %arg7[%c0, %c0_0] : memref<2x128xf32, #tpu.memory_space<vmem>>, vector<1x128xf32>
    %c1 = arith.constant 1 : index
    %c0_1 = arith.constant 0 : index
    %1 = vector.load %arg7[%c1, %c0_1] : memref<2x128xf32, #tpu.memory_space<vmem>>, vector<1x128xf32>
    %c0_i32 = arith.constant 0 : i32
    %c8_i32 = arith.constant 8 : i32
    %2 = arith.addi %c0_i32, %c8_i32 : i32
    %c1_i32 = arith.constant 1 : i32
    scf.for %arg9 = %c0_i32 to %2 step %c1_i32  : i32 {
      %c0_i32_3 = arith.constant 0 : i32
      %3 = arith.addi %arg9, %c0_i32_3 : i32
      %c0_4 = arith.constant 0 : index
      %c0_5 = arith.constant 0 : index
      %4 = arith.index_cast %3 : i32 to index
      %c0_6 = arith.constant 0 : index
      %c0_7 = arith.constant 0 : index
      %5 = vector.load %arg2[%c0_4, %c0_5, %4, %c0_6, %c0_7] : memref<1x1x9x9x128xf32, #tpu.memory_space<vmem>>, vector<1x1x1x8x128xf32>
      %6 = vector.shape_cast %5 : vector<1x1x1x8x128xf32> to vector<8x128xf32>
      %c0_8 = arith.constant 0 : index
      %c0_9 = arith.constant 0 : index
      %c0_10 = arith.constant 0 : index
      %7 = vector.load %arg6[%c0_8, %c0_9, %c0_10] : memref<9x128x128xf32, #tpu.memory_space<vmem>>, vector<1x128x128xf32>
      %8 = vector.shape_cast %7 : vector<1x128x128xf32> to vector<128x128xf32>
      %cst = arith.constant dense<0.000000e+00> : vector<8x128xf32>
      %9 = tpu.matmul %6, %8, %cst {dimension_numbers = #tpu.dot_dimension_numbers<[1], [0], [0], [1], [0, 0, 1, 1], [], []>} : vector<8x128xf32>, vector<128x128xf32>, vector<8x128xf32> -> vector<8x128xf32>
      %c0_i32_11 = arith.constant 0 : i32
      %10 = arith.addi %arg9, %c0_i32_11 : i32
      %c0_12 = arith.constant 0 : index
      %c0_13 = arith.constant 0 : index
      %11 = arith.index_cast %10 : i32 to index
      %c0_14 = arith.constant 0 : index
      %c0_15 = arith.constant 0 : index
      %12 = vector.load %arg3[%c0_12, %c0_13, %11, %c0_14, %c0_15] : memref<1x1x9x9x128xf32, #tpu.memory_space<vmem>>, vector<1x1x1x8x128xf32>
      %13 = vector.shape_cast %12 : vector<1x1x1x8x128xf32> to vector<8x128xf32>
      %c1_16 = arith.constant 1 : index
      %c0_17 = arith.constant 0 : index
      %c0_18 = arith.constant 0 : index
      %14 = vector.load %arg6[%c1_16, %c0_17, %c0_18] : memref<9x128x128xf32, #tpu.memory_space<vmem>>, vector<1x128x128xf32>
      %15 = vector.shape_cast %14 : vector<1x128x128xf32> to vector<128x128xf32>
      %cst_19 = arith.constant dense<0.000000e+00> : vector<8x128xf32>
      %16 = tpu.matmul %13, %15, %cst_19 {dimension_numbers = #tpu.dot_dimension_numbers<[1], [0], [0], [1], [0, 0, 1, 1], [], []>} : vector<8x128xf32>, vector<128x128xf32>, vector<8x128xf32> -> vector<8x128xf32>
      %17 = arith.addf %9, %16 : vector<8x128xf32>
      %c0_i32_20 = arith.constant 0 : i32
      %18 = arith.addi %arg9, %c0_i32_20 : i32
      %c0_21 = arith.constant 0 : index
      %c0_22 = arith.constant 0 : index
      %19 = arith.index_cast %18 : i32 to index
      %c1_23 = arith.constant 1 : index
      %c0_24 = arith.constant 0 : index
      %20 = vector.load %arg2[%c0_21, %c0_22, %19, %c1_23, %c0_24] : memref<1x1x9x9x128xf32, #tpu.memory_space<vmem>>, vector<1x1x1x8x128xf32>
      %21 = vector.shape_cast %20 : vector<1x1x1x8x128xf32> to vector<8x128xf32>
      %c2 = arith.constant 2 : index
      %c0_25 = arith.constant 0 : index
      %c0_26 = arith.constant 0 : index
      %22 = vector.load %arg6[%c2, %c0_25, %c0_26] : memref<9x128x128xf32, #tpu.memory_space<vmem>>, vector<1x128x128xf32>
      %23 = vector.shape_cast %22 : vector<1x128x128xf32> to vector<128x128xf32>
      %cst_27 = arith.constant dense<0.000000e+00> : vector<8x128xf32>
      %24 = tpu.matmul %21, %23, %cst_27 {dimension_numbers = #tpu.dot_dimension_numbers<[1], [0], [0], [1], [0, 0, 1, 1], [], []>} : vector<8x128xf32>, vector<128x128xf32>, vector<8x128xf32> -> vector<8x128xf32>
      %25 = arith.addf %17, %24 : vector<8x128xf32>
      %c0_i32_28 = arith.constant 0 : i32
      %26 = arith.addi %arg9, %c0_i32_28 : i32
      %c0_29 = arith.constant 0 : index
      %c0_30 = arith.constant 0 : index
      %27 = arith.index_cast %26 : i32 to index
      %c0_31 = arith.constant 0 : index
      %c0_32 = arith.constant 0 : index
      %28 = vector.load %arg4[%c0_29, %c0_30, %27, %c0_31, %c0_32] : memref<1x1x9x9x128xf32, #tpu.memory_space<vmem>>, vector<1x1x1x8x128xf32>
      %29 = vector.shape_cast %28 : vector<1x1x1x8x128xf32> to vector<8x128xf32>
      %c3 = arith.constant 3 : index
      %c0_33 = arith.constant 0 : index
      %c0_34 = arith.constant 0 : index
      %30 = vector.load %arg6[%c3, %c0_33, %c0_34] : memref<9x128x128xf32, #tpu.memory_space<vmem>>, vector<1x128x128xf32>
      %31 = vector.shape_cast %30 : vector<1x128x128xf32> to vector<128x128xf32>
      %cst_35 = arith.constant dense<0.000000e+00> : vector<8x128xf32>
      %32 = tpu.matmul %29, %31, %cst_35 {dimension_numbers = #tpu.dot_dimension_numbers<[1], [0], [0], [1], [0, 0, 1, 1], [], []>} : vector<8x128xf32>, vector<128x128xf32>, vector<8x128xf32> -> vector<8x128xf32>
      %33 = arith.addf %25, %32 : vector<8x128xf32>
      %c0_i32_36 = arith.constant 0 : i32
      %34 = arith.addi %arg9, %c0_i32_36 : i32
      %c0_37 = arith.constant 0 : index
      %c0_38 = arith.constant 0 : index
      %35 = arith.index_cast %34 : i32 to index
      %c0_39 = arith.constant 0 : index
      %c0_40 = arith.constant 0 : index
      %36 = vector.load %arg5[%c0_37, %c0_38, %35, %c0_39, %c0_40] : memref<1x1x9x9x128xf32, #tpu.memory_space<vmem>>, vector<1x1x1x8x128xf32>
      %37 = vector.shape_cast %36 : vector<1x1x1x8x128xf32> to vector<8x128xf32>
      %c4 = arith.constant 4 : index
      %c0_41 = arith.constant 0 : index
      %c0_42 = arith.constant 0 : index
      %38 = vector.load %arg6[%c4, %c0_41, %c0_42] : memref<9x128x128xf32, #tpu.memory_space<vmem>>, vector<1x128x128xf32>
      %39 = vector.shape_cast %38 : vector<1x128x128xf32> to vector<128x128xf32>
      %cst_43 = arith.constant dense<0.000000e+00> : vector<8x128xf32>
      %40 = tpu.matmul %37, %39, %cst_43 {dimension_numbers = #tpu.dot_dimension_numbers<[1], [0], [0], [1], [0, 0, 1, 1], [], []>} : vector<8x128xf32>, vector<128x128xf32>, vector<8x128xf32> -> vector<8x128xf32>
      %41 = arith.addf %33, %40 : vector<8x128xf32>
      %c0_i32_44 = arith.constant 0 : i32
      %42 = arith.addi %arg9, %c0_i32_44 : i32
      %c0_45 = arith.constant 0 : index
      %c0_46 = arith.constant 0 : index
      %43 = arith.index_cast %42 : i32 to index
      %c1_47 = arith.constant 1 : index
      %c0_48 = arith.constant 0 : index
      %44 = vector.load %arg4[%c0_45, %c0_46, %43, %c1_47, %c0_48] : memref<1x1x9x9x128xf32, #tpu.memory_space<vmem>>, vector<1x1x1x8x128xf32>
      %45 = vector.shape_cast %44 : vector<1x1x1x8x128xf32> to vector<8x128xf32>
      %c5 = arith.constant 5 : index
      %c0_49 = arith.constant 0 : index
      %c0_50 = arith.constant 0 : index
      %46 = vector.load %arg6[%c5, %c0_49, %c0_50] : memref<9x128x128xf32, #tpu.memory_space<vmem>>, vector<1x128x128xf32>
      %47 = vector.shape_cast %46 : vector<1x128x128xf32> to vector<128x128xf32>
      %cst_51 = arith.constant dense<0.000000e+00> : vector<8x128xf32>
      %48 = tpu.matmul %45, %47, %cst_51 {dimension_numbers = #tpu.dot_dimension_numbers<[1], [0], [0], [1], [0, 0, 1, 1], [], []>} : vector<8x128xf32>, vector<128x128xf32>, vector<8x128xf32> -> vector<8x128xf32>
      %49 = arith.addf %41, %48 : vector<8x128xf32>
      %c1_i32_52 = arith.constant 1 : i32
      %50 = arith.addi %arg9, %c1_i32_52 : i32
      %c0_53 = arith.constant 0 : index
      %c0_54 = arith.constant 0 : index
      %51 = arith.index_cast %50 : i32 to index
      %c0_55 = arith.constant 0 : index
      %c0_56 = arith.constant 0 : index
      %52 = vector.load %arg2[%c0_53, %c0_54, %51, %c0_55, %c0_56] : memref<1x1x9x9x128xf32, #tpu.memory_space<vmem>>, vector<1x1x1x8x128xf32>
      %53 = vector.shape_cast %52 : vector<1x1x1x8x128xf32> to vector<8x128xf32>
      %c6 = arith.constant 6 : index
      %c0_57 = arith.constant 0 : index
      %c0_58 = arith.constant 0 : index
      %54 = vector.load %arg6[%c6, %c0_57, %c0_58] : memref<9x128x128xf32, #tpu.memory_space<vmem>>, vector<1x128x128xf32>
      %55 = vector.shape_cast %54 : vector<1x128x128xf32> to vector<128x128xf32>
      %cst_59 = arith.constant dense<0.000000e+00> : vector<8x128xf32>
      %56 = tpu.matmul %53, %55, %cst_59 {dimension_numbers = #tpu.dot_dimension_numbers<[1], [0], [0], [1], [0, 0, 1, 1], [], []>} : vector<8x128xf32>, vector<128x128xf32>, vector<8x128xf32> -> vector<8x128xf32>
      %57 = arith.addf %49, %56 : vector<8x128xf32>
      %c1_i32_60 = arith.constant 1 : i32
      %58 = arith.addi %arg9, %c1_i32_60 : i32
      %c0_61 = arith.constant 0 : index
      %c0_62 = arith.constant 0 : index
      %59 = arith.index_cast %58 : i32 to index
      %c0_63 = arith.constant 0 : index
      %c0_64 = arith.constant 0 : index
      %60 = vector.load %arg3[%c0_61, %c0_62, %59, %c0_63, %c0_64] : memref<1x1x9x9x128xf32, #tpu.memory_space<vmem>>, vector<1x1x1x8x128xf32>
      %61 = vector.shape_cast %60 : vector<1x1x1x8x128xf32> to vector<8x128xf32>
      %c7 = arith.constant 7 : index
      %c0_65 = arith.constant 0 : index
      %c0_66 = arith.constant 0 : index
      %62 = vector.load %arg6[%c7, %c0_65, %c0_66] : memref<9x128x128xf32, #tpu.memory_space<vmem>>, vector<1x128x128xf32>
      %63 = vector.shape_cast %62 : vector<1x128x128xf32> to vector<128x128xf32>
      %cst_67 = arith.constant dense<0.000000e+00> : vector<8x128xf32>
      %64 = tpu.matmul %61, %63, %cst_67 {dimension_numbers = #tpu.dot_dimension_numbers<[1], [0], [0], [1], [0, 0, 1, 1], [], []>} : vector<8x128xf32>, vector<128x128xf32>, vector<8x128xf32> -> vector<8x128xf32>
      %65 = arith.addf %57, %64 : vector<8x128xf32>
      %c1_i32_68 = arith.constant 1 : i32
      %66 = arith.addi %arg9, %c1_i32_68 : i32
      %c0_69 = arith.constant 0 : index
      %c0_70 = arith.constant 0 : index
      %67 = arith.index_cast %66 : i32 to index
      %c1_71 = arith.constant 1 : index
      %c0_72 = arith.constant 0 : index
      %68 = vector.load %arg2[%c0_69, %c0_70, %67, %c1_71, %c0_72] : memref<1x1x9x9x128xf32, #tpu.memory_space<vmem>>, vector<1x1x1x8x128xf32>
      %69 = vector.shape_cast %68 : vector<1x1x1x8x128xf32> to vector<8x128xf32>
      %c8 = arith.constant 8 : index
      %c0_73 = arith.constant 0 : index
      %c0_74 = arith.constant 0 : index
      %70 = vector.load %arg6[%c8, %c0_73, %c0_74] : memref<9x128x128xf32, #tpu.memory_space<vmem>>, vector<1x128x128xf32>
      %71 = vector.shape_cast %70 : vector<1x128x128xf32> to vector<128x128xf32>
      %cst_75 = arith.constant dense<0.000000e+00> : vector<8x128xf32>
      %72 = tpu.matmul %69, %71, %cst_75 {dimension_numbers = #tpu.dot_dimension_numbers<[1], [0], [0], [1], [0, 0, 1, 1], [], []>} : vector<8x128xf32>, vector<128x128xf32>, vector<8x128xf32> -> vector<8x128xf32>
      %73 = arith.addf %65, %72 : vector<8x128xf32>
      %74 = vector.broadcast %0 : vector<1x128xf32> to vector<8x128xf32>
      %75 = arith.mulf %73, %74 : vector<8x128xf32>
      %76 = vector.broadcast %1 : vector<1x128xf32> to vector<8x128xf32>
      %77 = arith.addf %75, %76 : vector<8x128xf32>
      %cst_76 = arith.constant 0.000000e+00 : f32
      %78 = vector.broadcast %cst_76 : f32 to vector<8x128xf32>
      %79 = arith.maximumf %77, %78 : vector<8x128xf32>
      %c0_77 = arith.constant 0 : index
      %80 = arith.index_cast %arg9 : i32 to index
      %c0_78 = arith.constant 0 : index
      %c0_79 = arith.constant 0 : index
      %81 = vector.load %arg8[%c0_77, %80, %c0_78, %c0_79] : memref<1x8x8x128xf32, #tpu.memory_space<vmem>>, vector<1x1x8x128xf32>
      %82 = vector.shape_cast %81 : vector<1x1x8x128xf32> to vector<8x128xf32>
      %83 = vector.shape_cast %79 : vector<8x128xf32> to vector<1x1x8x128xf32>
      tpu.vector_store %arg8[%c0_77, %80, %c0_78, %c0_79], %83 {strides = array<i32>} : memref<1x8x8x128xf32, #tpu.memory_space<vmem>>, vector<1x1x8x128xf32>,
    }
    %c8_i32_2 = arith.constant 8 : i32
    return
  }
  func.func @transform_0(%arg0: i32, %arg1: i32) -> (i32, i32, i32, i32, i32) {
    %c0_i32 = arith.constant 0 : i32
    %c0_i32_0 = arith.constant 0 : i32
    %c0_i32_1 = arith.constant 0 : i32
    %c0_i32_2 = arith.constant 0 : i32
    return %arg0, %arg1, %c0_i32, %c0_i32_0, %c0_i32_1 : i32, i32, i32, i32, i32
  }
  func.func @transform_1(%arg0: i32, %arg1: i32) -> (i32, i32, i32, i32, i32) {
    %c0_i32 = arith.constant 0 : i32
    %c0_i32_0 = arith.constant 0 : i32
    %c0_i32_1 = arith.constant 0 : i32
    %c0_i32_2 = arith.constant 0 : i32
    return %arg0, %arg1, %c0_i32, %c0_i32_0, %c0_i32_1 : i32, i32, i32, i32, i32
  }
  func.func @transform_2(%arg0: i32, %arg1: i32) -> (i32, i32, i32, i32, i32) {
    %c0_i32 = arith.constant 0 : i32
    %c0_i32_0 = arith.constant 0 : i32
    %c0_i32_1 = arith.constant 0 : i32
    %c0_i32_2 = arith.constant 0 : i32
    return %arg0, %arg1, %c0_i32, %c0_i32_0, %c0_i32_1 : i32, i32, i32, i32, i32
  }
  func.func @transform_3(%arg0: i32, %arg1: i32) -> (i32, i32, i32, i32, i32) {
    %c0_i32 = arith.constant 0 : i32
    %c0_i32_0 = arith.constant 0 : i32
    %c0_i32_1 = arith.constant 0 : i32
    %c0_i32_2 = arith.constant 0 : i32
    return %arg0, %arg1, %c0_i32, %c0_i32_0, %c0_i32_1 : i32, i32, i32, i32, i32
  }
  func.func @transform_4(%arg0: i32, %arg1: i32) -> (i32, i32, i32) {
    %c0_i32 = arith.constant 0 : i32
    %c0_i32_0 = arith.constant 0 : i32
    %c0_i32_1 = arith.constant 0 : i32
    %c0_i32_2 = arith.constant 0 : i32
    return %c0_i32, %c0_i32_0, %c0_i32_1 : i32, i32, i32
  }
  func.func @transform_5(%arg0: i32, %arg1: i32) -> (i32, i32) {
    %c0_i32 = arith.constant 0 : i32
    %c0_i32_0 = arith.constant 0 : i32
    %c0_i32_1 = arith.constant 0 : i32
    return %c0_i32, %c0_i32_0 : i32, i32
  }
  func.func @transform_6(%arg0: i32, %arg1: i32) -> (i32, i32, i32, i32) {
    %c0_i32 = arith.constant 0 : i32
    %c0_i32_0 = arith.constant 0 : i32
    %c0_i32_1 = arith.constant 0 : i32
    return %arg0, %arg1, %c0_i32, %c0_i32_0 : i32, i32, i32, i32
  }
}

module attributes {stable_mosaic.version = 11 : i64} {
  func.func @_fused_tap_conv_kernel(%arg0: i32, %arg1: i32, %arg2: memref<1x1x5x5x128xf32, #tpu.memory_space<vmem>>, %arg3: memref<1x1x5x5x128xf32, #tpu.memory_space<vmem>>, %arg4: memref<1x1x5x5x128xf32, #tpu.memory_space<vmem>>, %arg5: memref<1x1x5x5x128xf32, #tpu.memory_space<vmem>>, %arg6: memref<9x128x128xf32, #tpu.memory_space<vmem>>, %arg7: memref<2x128xf32, #tpu.memory_space<vmem>>, %arg8: memref<1x4x4x128xf32, #tpu.memory_space<vmem>>) attributes {dimension_semantics = [#tpu.dimension_semantics<parallel>, #tpu.dimension_semantics<parallel>], iteration_bounds = array<i64: 2, 1>, scalar_prefetch = 0 : i64, scratch_operands = 0 : i64, tpu.core_type = #tpu.core_type<tc>, window_params = [{transform_indices = @transform_0, window_bounds = array<i64: 1, 1, 5, 5, 128>}, {transform_indices = @transform_1, window_bounds = array<i64: 1, 1, 5, 5, 128>}, {transform_indices = @transform_2, window_bounds = array<i64: 1, 1, 5, 5, 128>}, {transform_indices = @transform_3, window_bounds = array<i64: 1, 1, 5, 5, 128>}, {pipeline_mode = #tpu.pipeline_mode<synchronous>, transform_indices = @transform_4, window_bounds = array<i64: 9, 128, 128>}, {pipeline_mode = #tpu.pipeline_mode<synchronous>, transform_indices = @transform_5, window_bounds = array<i64: 2, 128>}, {transform_indices = @transform_6, window_bounds = array<i64: 1, 4, 4, 128>}]} {
    %c0 = arith.constant 0 : index
    %c0_0 = arith.constant 0 : index
    %0 = vector.load %arg7[%c0, %c0_0] : memref<2x128xf32, #tpu.memory_space<vmem>>, vector<1x128xf32>
    %c1 = arith.constant 1 : index
    %c0_1 = arith.constant 0 : index
    %1 = vector.load %arg7[%c1, %c0_1] : memref<2x128xf32, #tpu.memory_space<vmem>>, vector<1x128xf32>
    %c0_i32 = arith.constant 0 : i32
    %c4_i32 = arith.constant 4 : i32
    %2 = arith.addi %c0_i32, %c4_i32 : i32
    %c1_i32 = arith.constant 1 : i32
    scf.for %arg9 = %c0_i32 to %2 step %c1_i32  : i32 {
      %c0_i32_3 = arith.constant 0 : i32
      %3 = arith.addi %arg9, %c0_i32_3 : i32
      %c0_4 = arith.constant 0 : index
      %c0_5 = arith.constant 0 : index
      %4 = arith.index_cast %3 : i32 to index
      %c0_6 = arith.constant 0 : index
      %c0_7 = arith.constant 0 : index
      %5 = vector.load %arg2[%c0_4, %c0_5, %4, %c0_6, %c0_7] : memref<1x1x5x5x128xf32, #tpu.memory_space<vmem>>, vector<1x1x1x4x128xf32>
      %6 = vector.shape_cast %5 : vector<1x1x1x4x128xf32> to vector<4x128xf32>
      %c0_8 = arith.constant 0 : index
      %c0_9 = arith.constant 0 : index
      %c0_10 = arith.constant 0 : index
      %7 = vector.load %arg6[%c0_8, %c0_9, %c0_10] : memref<9x128x128xf32, #tpu.memory_space<vmem>>, vector<1x128x128xf32>
      %8 = vector.shape_cast %7 : vector<1x128x128xf32> to vector<128x128xf32>
      %cst = arith.constant dense<0.000000e+00> : vector<4x128xf32>
      %9 = tpu.matmul %6, %8, %cst {dimension_numbers = #tpu.dot_dimension_numbers<[1], [0], [0], [1], [0, 0, 1, 1], [], []>} : vector<4x128xf32>, vector<128x128xf32>, vector<4x128xf32> -> vector<4x128xf32>
      %c0_i32_11 = arith.constant 0 : i32
      %10 = arith.addi %arg9, %c0_i32_11 : i32
      %c0_12 = arith.constant 0 : index
      %c0_13 = arith.constant 0 : index
      %11 = arith.index_cast %10 : i32 to index
      %c0_14 = arith.constant 0 : index
      %c0_15 = arith.constant 0 : index
      %12 = vector.load %arg3[%c0_12, %c0_13, %11, %c0_14, %c0_15] : memref<1x1x5x5x128xf32, #tpu.memory_space<vmem>>, vector<1x1x1x4x128xf32>
      %13 = vector.shape_cast %12 : vector<1x1x1x4x128xf32> to vector<4x128xf32>
      %c1_16 = arith.constant 1 : index
      %c0_17 = arith.constant 0 : index
      %c0_18 = arith.constant 0 : index
      %14 = vector.load %arg6[%c1_16, %c0_17, %c0_18] : memref<9x128x128xf32, #tpu.memory_space<vmem>>, vector<1x128x128xf32>
      %15 = vector.shape_cast %14 : vector<1x128x128xf32> to vector<128x128xf32>
      %cst_19 = arith.constant dense<0.000000e+00> : vector<4x128xf32>
      %16 = tpu.matmul %13, %15, %cst_19 {dimension_numbers = #tpu.dot_dimension_numbers<[1], [0], [0], [1], [0, 0, 1, 1], [], []>} : vector<4x128xf32>, vector<128x128xf32>, vector<4x128xf32> -> vector<4x128xf32>
      %17 = arith.addf %9, %16 : vector<4x128xf32>
      %c0_i32_20 = arith.constant 0 : i32
      %18 = arith.addi %arg9, %c0_i32_20 : i32
      %c0_21 = arith.constant 0 : index
      %c0_22 = arith.constant 0 : index
      %19 = arith.index_cast %18 : i32 to index
      %c1_23 = arith.constant 1 : index
      %c0_24 = arith.constant 0 : index
      %20 = vector.load %arg2[%c0_21, %c0_22, %19, %c1_23, %c0_24] : memref<1x1x5x5x128xf32, #tpu.memory_space<vmem>>, vector<1x1x1x4x128xf32>
      %21 = vector.shape_cast %20 : vector<1x1x1x4x128xf32> to vector<4x128xf32>
      %c2 = arith.constant 2 : index
      %c0_25 = arith.constant 0 : index
      %c0_26 = arith.constant 0 : index
      %22 = vector.load %arg6[%c2, %c0_25, %c0_26] : memref<9x128x128xf32, #tpu.memory_space<vmem>>, vector<1x128x128xf32>
      %23 = vector.shape_cast %22 : vector<1x128x128xf32> to vector<128x128xf32>
      %cst_27 = arith.constant dense<0.000000e+00> : vector<4x128xf32>
      %24 = tpu.matmul %21, %23, %cst_27 {dimension_numbers = #tpu.dot_dimension_numbers<[1], [0], [0], [1], [0, 0, 1, 1], [], []>} : vector<4x128xf32>, vector<128x128xf32>, vector<4x128xf32> -> vector<4x128xf32>
      %25 = arith.addf %17, %24 : vector<4x128xf32>
      %c0_i32_28 = arith.constant 0 : i32
      %26 = arith.addi %arg9, %c0_i32_28 : i32
      %c0_29 = arith.constant 0 : index
      %c0_30 = arith.constant 0 : index
      %27 = arith.index_cast %26 : i32 to index
      %c0_31 = arith.constant 0 : index
      %c0_32 = arith.constant 0 : index
      %28 = vector.load %arg4[%c0_29, %c0_30, %27, %c0_31, %c0_32] : memref<1x1x5x5x128xf32, #tpu.memory_space<vmem>>, vector<1x1x1x4x128xf32>
      %29 = vector.shape_cast %28 : vector<1x1x1x4x128xf32> to vector<4x128xf32>
      %c3 = arith.constant 3 : index
      %c0_33 = arith.constant 0 : index
      %c0_34 = arith.constant 0 : index
      %30 = vector.load %arg6[%c3, %c0_33, %c0_34] : memref<9x128x128xf32, #tpu.memory_space<vmem>>, vector<1x128x128xf32>
      %31 = vector.shape_cast %30 : vector<1x128x128xf32> to vector<128x128xf32>
      %cst_35 = arith.constant dense<0.000000e+00> : vector<4x128xf32>
      %32 = tpu.matmul %29, %31, %cst_35 {dimension_numbers = #tpu.dot_dimension_numbers<[1], [0], [0], [1], [0, 0, 1, 1], [], []>} : vector<4x128xf32>, vector<128x128xf32>, vector<4x128xf32> -> vector<4x128xf32>
      %33 = arith.addf %25, %32 : vector<4x128xf32>
      %c0_i32_36 = arith.constant 0 : i32
      %34 = arith.addi %arg9, %c0_i32_36 : i32
      %c0_37 = arith.constant 0 : index
      %c0_38 = arith.constant 0 : index
      %35 = arith.index_cast %34 : i32 to index
      %c0_39 = arith.constant 0 : index
      %c0_40 = arith.constant 0 : index
      %36 = vector.load %arg5[%c0_37, %c0_38, %35, %c0_39, %c0_40] : memref<1x1x5x5x128xf32, #tpu.memory_space<vmem>>, vector<1x1x1x4x128xf32>
      %37 = vector.shape_cast %36 : vector<1x1x1x4x128xf32> to vector<4x128xf32>
      %c4 = arith.constant 4 : index
      %c0_41 = arith.constant 0 : index
      %c0_42 = arith.constant 0 : index
      %38 = vector.load %arg6[%c4, %c0_41, %c0_42] : memref<9x128x128xf32, #tpu.memory_space<vmem>>, vector<1x128x128xf32>
      %39 = vector.shape_cast %38 : vector<1x128x128xf32> to vector<128x128xf32>
      %cst_43 = arith.constant dense<0.000000e+00> : vector<4x128xf32>
      %40 = tpu.matmul %37, %39, %cst_43 {dimension_numbers = #tpu.dot_dimension_numbers<[1], [0], [0], [1], [0, 0, 1, 1], [], []>} : vector<4x128xf32>, vector<128x128xf32>, vector<4x128xf32> -> vector<4x128xf32>
      %41 = arith.addf %33, %40 : vector<4x128xf32>
      %c0_i32_44 = arith.constant 0 : i32
      %42 = arith.addi %arg9, %c0_i32_44 : i32
      %c0_45 = arith.constant 0 : index
      %c0_46 = arith.constant 0 : index
      %43 = arith.index_cast %42 : i32 to index
      %c1_47 = arith.constant 1 : index
      %c0_48 = arith.constant 0 : index
      %44 = vector.load %arg4[%c0_45, %c0_46, %43, %c1_47, %c0_48] : memref<1x1x5x5x128xf32, #tpu.memory_space<vmem>>, vector<1x1x1x4x128xf32>
      %45 = vector.shape_cast %44 : vector<1x1x1x4x128xf32> to vector<4x128xf32>
      %c5 = arith.constant 5 : index
      %c0_49 = arith.constant 0 : index
      %c0_50 = arith.constant 0 : index
      %46 = vector.load %arg6[%c5, %c0_49, %c0_50] : memref<9x128x128xf32, #tpu.memory_space<vmem>>, vector<1x128x128xf32>
      %47 = vector.shape_cast %46 : vector<1x128x128xf32> to vector<128x128xf32>
      %cst_51 = arith.constant dense<0.000000e+00> : vector<4x128xf32>
      %48 = tpu.matmul %45, %47, %cst_51 {dimension_numbers = #tpu.dot_dimension_numbers<[1], [0], [0], [1], [0, 0, 1, 1], [], []>} : vector<4x128xf32>, vector<128x128xf32>, vector<4x128xf32> -> vector<4x128xf32>
      %49 = arith.addf %41, %48 : vector<4x128xf32>
      %c1_i32_52 = arith.constant 1 : i32
      %50 = arith.addi %arg9, %c1_i32_52 : i32
      %c0_53 = arith.constant 0 : index
      %c0_54 = arith.constant 0 : index
      %51 = arith.index_cast %50 : i32 to index
      %c0_55 = arith.constant 0 : index
      %c0_56 = arith.constant 0 : index
      %52 = vector.load %arg2[%c0_53, %c0_54, %51, %c0_55, %c0_56] : memref<1x1x5x5x128xf32, #tpu.memory_space<vmem>>, vector<1x1x1x4x128xf32>
      %53 = vector.shape_cast %52 : vector<1x1x1x4x128xf32> to vector<4x128xf32>
      %c6 = arith.constant 6 : index
      %c0_57 = arith.constant 0 : index
      %c0_58 = arith.constant 0 : index
      %54 = vector.load %arg6[%c6, %c0_57, %c0_58] : memref<9x128x128xf32, #tpu.memory_space<vmem>>, vector<1x128x128xf32>
      %55 = vector.shape_cast %54 : vector<1x128x128xf32> to vector<128x128xf32>
      %cst_59 = arith.constant dense<0.000000e+00> : vector<4x128xf32>
      %56 = tpu.matmul %53, %55, %cst_59 {dimension_numbers = #tpu.dot_dimension_numbers<[1], [0], [0], [1], [0, 0, 1, 1], [], []>} : vector<4x128xf32>, vector<128x128xf32>, vector<4x128xf32> -> vector<4x128xf32>
      %57 = arith.addf %49, %56 : vector<4x128xf32>
      %c1_i32_60 = arith.constant 1 : i32
      %58 = arith.addi %arg9, %c1_i32_60 : i32
      %c0_61 = arith.constant 0 : index
      %c0_62 = arith.constant 0 : index
      %59 = arith.index_cast %58 : i32 to index
      %c0_63 = arith.constant 0 : index
      %c0_64 = arith.constant 0 : index
      %60 = vector.load %arg3[%c0_61, %c0_62, %59, %c0_63, %c0_64] : memref<1x1x5x5x128xf32, #tpu.memory_space<vmem>>, vector<1x1x1x4x128xf32>
      %61 = vector.shape_cast %60 : vector<1x1x1x4x128xf32> to vector<4x128xf32>
      %c7 = arith.constant 7 : index
      %c0_65 = arith.constant 0 : index
      %c0_66 = arith.constant 0 : index
      %62 = vector.load %arg6[%c7, %c0_65, %c0_66] : memref<9x128x128xf32, #tpu.memory_space<vmem>>, vector<1x128x128xf32>
      %63 = vector.shape_cast %62 : vector<1x128x128xf32> to vector<128x128xf32>
      %cst_67 = arith.constant dense<0.000000e+00> : vector<4x128xf32>
      %64 = tpu.matmul %61, %63, %cst_67 {dimension_numbers = #tpu.dot_dimension_numbers<[1], [0], [0], [1], [0, 0, 1, 1], [], []>} : vector<4x128xf32>, vector<128x128xf32>, vector<4x128xf32> -> vector<4x128xf32>
      %65 = arith.addf %57, %64 : vector<4x128xf32>
      %c1_i32_68 = arith.constant 1 : i32
      %66 = arith.addi %arg9, %c1_i32_68 : i32
      %c0_69 = arith.constant 0 : index
      %c0_70 = arith.constant 0 : index
      %67 = arith.index_cast %66 : i32 to index
      %c1_71 = arith.constant 1 : index
      %c0_72 = arith.constant 0 : index
      %68 = vector.load %arg2[%c0_69, %c0_70, %67, %c1_71, %c0_72] : memref<1x1x5x5x128xf32, #tpu.memory_space<vmem>>, vector<1x1x1x4x128xf32>
      %69 = vector.shape_cast %68 : vector<1x1x1x4x128xf32> to vector<4x128xf32>
      %c8 = arith.constant 8 : index
      %c0_73 = arith.constant 0 : index
      %c0_74 = arith.constant 0 : index
      %70 = vector.load %arg6[%c8, %c0_73, %c0_74] : memref<9x128x128xf32, #tpu.memory_space<vmem>>, vector<1x128x128xf32>
      %71 = vector.shape_cast %70 : vector<1x128x128xf32> to vector<128x128xf32>
      %cst_75 = arith.constant dense<0.000000e+00> : vector<4x128xf32>
      %72 = tpu.matmul %69, %71, %cst_75 {dimension_numbers = #tpu.dot_dimension_numbers<[1], [0], [0], [1], [0, 0, 1, 1], [], []>} : vector<4x128xf32>, vector<128x128xf32>, vector<4x128xf32> -> vector<4x128xf32>
      %73 = arith.addf %65, %72 : vector<4x128xf32>
      %74 = vector.broadcast %0 : vector<1x128xf32> to vector<4x128xf32>
      %75 = arith.mulf %73, %74 : vector<4x128xf32>
      %76 = vector.broadcast %1 : vector<1x128xf32> to vector<4x128xf32>
      %77 = arith.addf %75, %76 : vector<4x128xf32>
      %cst_76 = arith.constant 0.000000e+00 : f32
      %78 = vector.broadcast %cst_76 : f32 to vector<4x128xf32>
      %79 = arith.maximumf %77, %78 : vector<4x128xf32>
      %c0_77 = arith.constant 0 : index
      %80 = arith.index_cast %arg9 : i32 to index
      %c0_78 = arith.constant 0 : index
      %c0_79 = arith.constant 0 : index
      %81 = vector.load %arg8[%c0_77, %80, %c0_78, %c0_79] : memref<1x4x4x128xf32, #tpu.memory_space<vmem>>, vector<1x1x4x128xf32>
      %82 = vector.shape_cast %81 : vector<1x1x4x128xf32> to vector<4x128xf32>
      %83 = vector.shape_cast %79 : vector<4x128xf32> to vector<1x1x4x128xf32>
      tpu.vector_store %arg8[%c0_77, %80, %c0_78, %c0_79], %83 {strides = array<i32>} : memref<1x4x4x128xf32, #tpu.memory_space<vmem>>, vector<1x1x4x128xf32>,
    }
    %c4_i32_2 = arith.constant 4 : i32
    return
  }
  func.func @transform_0(%arg0: i32, %arg1: i32) -> (i32, i32, i32, i32, i32) {
    %c0_i32 = arith.constant 0 : i32
    %c0_i32_0 = arith.constant 0 : i32
    %c0_i32_1 = arith.constant 0 : i32
    %c0_i32_2 = arith.constant 0 : i32
    return %arg0, %arg1, %c0_i32, %c0_i32_0, %c0_i32_1 : i32, i32, i32, i32, i32
  }
  func.func @transform_1(%arg0: i32, %arg1: i32) -> (i32, i32, i32, i32, i32) {
    %c0_i32 = arith.constant 0 : i32
    %c0_i32_0 = arith.constant 0 : i32
    %c0_i32_1 = arith.constant 0 : i32
    %c0_i32_2 = arith.constant 0 : i32
    return %arg0, %arg1, %c0_i32, %c0_i32_0, %c0_i32_1 : i32, i32, i32, i32, i32
  }
  func.func @transform_2(%arg0: i32, %arg1: i32) -> (i32, i32, i32, i32, i32) {
    %c0_i32 = arith.constant 0 : i32
    %c0_i32_0 = arith.constant 0 : i32
    %c0_i32_1 = arith.constant 0 : i32
    %c0_i32_2 = arith.constant 0 : i32
    return %arg0, %arg1, %c0_i32, %c0_i32_0, %c0_i32_1 : i32, i32, i32, i32, i32
  }
  func.func @transform_3(%arg0: i32, %arg1: i32) -> (i32, i32, i32, i32, i32) {
    %c0_i32 = arith.constant 0 : i32
    %c0_i32_0 = arith.constant 0 : i32
    %c0_i32_1 = arith.constant 0 : i32
    %c0_i32_2 = arith.constant 0 : i32
    return %arg0, %arg1, %c0_i32, %c0_i32_0, %c0_i32_1 : i32, i32, i32, i32, i32
  }
  func.func @transform_4(%arg0: i32, %arg1: i32) -> (i32, i32, i32) {
    %c0_i32 = arith.constant 0 : i32
    %c0_i32_0 = arith.constant 0 : i32
    %c0_i32_1 = arith.constant 0 : i32
    %c0_i32_2 = arith.constant 0 : i32
    return %c0_i32, %c0_i32_0, %c0_i32_1 : i32, i32, i32
  }
  func.func @transform_5(%arg0: i32, %arg1: i32) -> (i32, i32) {
    %c0_i32 = arith.constant 0 : i32
    %c0_i32_0 = arith.constant 0 : i32
    %c0_i32_1 = arith.constant 0 : i32
    return %c0_i32, %c0_i32_0 : i32, i32
  }
  func.func @transform_6(%arg0: i32, %arg1: i32) -> (i32, i32, i32, i32) {
    %c0_i32 = arith.constant 0 : i32
    %c0_i32_0 = arith.constant 0 : i32
    %c0_i32_1 = arith.constant 0 : i32
    return %arg0, %arg1, %c0_i32, %c0_i32_0 : i32, i32, i32, i32
  }
}

module attributes {stable_mosaic.version = 11 : i64} {
  func.func @_fused_tap_conv_kernel(%arg0: i32, %arg1: i32, %arg2: memref<1x1x6x6x128xf32, #tpu.memory_space<vmem>>, %arg3: memref<9x128x128xf32, #tpu.memory_space<vmem>>, %arg4: memref<2x128xf32, #tpu.memory_space<vmem>>, %arg5: memref<1x4x4x128xf32, #tpu.memory_space<vmem>>) attributes {dimension_semantics = [#tpu.dimension_semantics<parallel>, #tpu.dimension_semantics<parallel>], iteration_bounds = array<i64: 2, 1>, scalar_prefetch = 0 : i64, scratch_operands = 0 : i64, tpu.core_type = #tpu.core_type<tc>, window_params = [{transform_indices = @transform_0, window_bounds = array<i64: 1, 1, 6, 6, 128>}, {pipeline_mode = #tpu.pipeline_mode<synchronous>, transform_indices = @transform_1, window_bounds = array<i64: 9, 128, 128>}, {pipeline_mode = #tpu.pipeline_mode<synchronous>, transform_indices = @transform_2, window_bounds = array<i64: 2, 128>}, {transform_indices = @transform_3, window_bounds = array<i64: 1, 4, 4, 128>}]} {
    %c0 = arith.constant 0 : index
    %c0_0 = arith.constant 0 : index
    %0 = vector.load %arg4[%c0, %c0_0] : memref<2x128xf32, #tpu.memory_space<vmem>>, vector<1x128xf32>
    %c1 = arith.constant 1 : index
    %c0_1 = arith.constant 0 : index
    %1 = vector.load %arg4[%c1, %c0_1] : memref<2x128xf32, #tpu.memory_space<vmem>>, vector<1x128xf32>
    %c0_i32 = arith.constant 0 : i32
    %c4_i32 = arith.constant 4 : i32
    %2 = arith.addi %c0_i32, %c4_i32 : i32
    %c1_i32 = arith.constant 1 : i32
    scf.for %arg6 = %c0_i32 to %2 step %c1_i32  : i32 {
      %c0_i32_3 = arith.constant 0 : i32
      %3 = arith.addi %arg6, %c0_i32_3 : i32
      %c0_4 = arith.constant 0 : index
      %c0_5 = arith.constant 0 : index
      %4 = arith.index_cast %3 : i32 to index
      %c0_6 = arith.constant 0 : index
      %c0_7 = arith.constant 0 : index
      %5 = vector.load %arg2[%c0_4, %c0_5, %4, %c0_6, %c0_7] : memref<1x1x6x6x128xf32, #tpu.memory_space<vmem>>, vector<1x1x1x4x128xf32>
      %6 = vector.shape_cast %5 : vector<1x1x1x4x128xf32> to vector<4x128xf32>
      %c0_8 = arith.constant 0 : index
      %c0_9 = arith.constant 0 : index
      %c0_10 = arith.constant 0 : index
      %7 = vector.load %arg3[%c0_8, %c0_9, %c0_10] : memref<9x128x128xf32, #tpu.memory_space<vmem>>, vector<1x128x128xf32>
      %8 = vector.shape_cast %7 : vector<1x128x128xf32> to vector<128x128xf32>
      %cst = arith.constant dense<0.000000e+00> : vector<4x128xf32>
      %9 = tpu.matmul %6, %8, %cst {dimension_numbers = #tpu.dot_dimension_numbers<[1], [0], [0], [1], [0, 0, 1, 1], [], []>} : vector<4x128xf32>, vector<128x128xf32>, vector<4x128xf32> -> vector<4x128xf32>
      %c0_i32_11 = arith.constant 0 : i32
      %10 = arith.addi %arg6, %c0_i32_11 : i32
      %c0_12 = arith.constant 0 : index
      %c0_13 = arith.constant 0 : index
      %11 = arith.index_cast %10 : i32 to index
      %c1_14 = arith.constant 1 : index
      %c0_15 = arith.constant 0 : index
      %12 = vector.load %arg2[%c0_12, %c0_13, %11, %c1_14, %c0_15] : memref<1x1x6x6x128xf32, #tpu.memory_space<vmem>>, vector<1x1x1x4x128xf32>
      %13 = vector.shape_cast %12 : vector<1x1x1x4x128xf32> to vector<4x128xf32>
      %c1_16 = arith.constant 1 : index
      %c0_17 = arith.constant 0 : index
      %c0_18 = arith.constant 0 : index
      %14 = vector.load %arg3[%c1_16, %c0_17, %c0_18] : memref<9x128x128xf32, #tpu.memory_space<vmem>>, vector<1x128x128xf32>
      %15 = vector.shape_cast %14 : vector<1x128x128xf32> to vector<128x128xf32>
      %cst_19 = arith.constant dense<0.000000e+00> : vector<4x128xf32>
      %16 = tpu.matmul %13, %15, %cst_19 {dimension_numbers = #tpu.dot_dimension_numbers<[1], [0], [0], [1], [0, 0, 1, 1], [], []>} : vector<4x128xf32>, vector<128x128xf32>, vector<4x128xf32> -> vector<4x128xf32>
      %17 = arith.addf %9, %16 : vector<4x128xf32>
      %c0_i32_20 = arith.constant 0 : i32
      %18 = arith.addi %arg6, %c0_i32_20 : i32
      %c0_21 = arith.constant 0 : index
      %c0_22 = arith.constant 0 : index
      %19 = arith.index_cast %18 : i32 to index
      %c2 = arith.constant 2 : index
      %c0_23 = arith.constant 0 : index
      %20 = vector.load %arg2[%c0_21, %c0_22, %19, %c2, %c0_23] : memref<1x1x6x6x128xf32, #tpu.memory_space<vmem>>, vector<1x1x1x4x128xf32>
      %21 = vector.shape_cast %20 : vector<1x1x1x4x128xf32> to vector<4x128xf32>
      %c2_24 = arith.constant 2 : index
      %c0_25 = arith.constant 0 : index
      %c0_26 = arith.constant 0 : index
      %22 = vector.load %arg3[%c2_24, %c0_25, %c0_26] : memref<9x128x128xf32, #tpu.memory_space<vmem>>, vector<1x128x128xf32>
      %23 = vector.shape_cast %22 : vector<1x128x128xf32> to vector<128x128xf32>
      %cst_27 = arith.constant dense<0.000000e+00> : vector<4x128xf32>
      %24 = tpu.matmul %21, %23, %cst_27 {dimension_numbers = #tpu.dot_dimension_numbers<[1], [0], [0], [1], [0, 0, 1, 1], [], []>} : vector<4x128xf32>, vector<128x128xf32>, vector<4x128xf32> -> vector<4x128xf32>
      %25 = arith.addf %17, %24 : vector<4x128xf32>
      %c1_i32_28 = arith.constant 1 : i32
      %26 = arith.addi %arg6, %c1_i32_28 : i32
      %c0_29 = arith.constant 0 : index
      %c0_30 = arith.constant 0 : index
      %27 = arith.index_cast %26 : i32 to index
      %c0_31 = arith.constant 0 : index
      %c0_32 = arith.constant 0 : index
      %28 = vector.load %arg2[%c0_29, %c0_30, %27, %c0_31, %c0_32] : memref<1x1x6x6x128xf32, #tpu.memory_space<vmem>>, vector<1x1x1x4x128xf32>
      %29 = vector.shape_cast %28 : vector<1x1x1x4x128xf32> to vector<4x128xf32>
      %c3 = arith.constant 3 : index
      %c0_33 = arith.constant 0 : index
      %c0_34 = arith.constant 0 : index
      %30 = vector.load %arg3[%c3, %c0_33, %c0_34] : memref<9x128x128xf32, #tpu.memory_space<vmem>>, vector<1x128x128xf32>
      %31 = vector.shape_cast %30 : vector<1x128x128xf32> to vector<128x128xf32>
      %cst_35 = arith.constant dense<0.000000e+00> : vector<4x128xf32>
      %32 = tpu.matmul %29, %31, %cst_35 {dimension_numbers = #tpu.dot_dimension_numbers<[1], [0], [0], [1], [0, 0, 1, 1], [], []>} : vector<4x128xf32>, vector<128x128xf32>, vector<4x128xf32> -> vector<4x128xf32>
      %33 = arith.addf %25, %32 : vector<4x128xf32>
      %c1_i32_36 = arith.constant 1 : i32
      %34 = arith.addi %arg6, %c1_i32_36 : i32
      %c0_37 = arith.constant 0 : index
      %c0_38 = arith.constant 0 : index
      %35 = arith.index_cast %34 : i32 to index
      %c1_39 = arith.constant 1 : index
      %c0_40 = arith.constant 0 : index
      %36 = vector.load %arg2[%c0_37, %c0_38, %35, %c1_39, %c0_40] : memref<1x1x6x6x128xf32, #tpu.memory_space<vmem>>, vector<1x1x1x4x128xf32>
      %37 = vector.shape_cast %36 : vector<1x1x1x4x128xf32> to vector<4x128xf32>
      %c4 = arith.constant 4 : index
      %c0_41 = arith.constant 0 : index
      %c0_42 = arith.constant 0 : index
      %38 = vector.load %arg3[%c4, %c0_41, %c0_42] : memref<9x128x128xf32, #tpu.memory_space<vmem>>, vector<1x128x128xf32>
      %39 = vector.shape_cast %38 : vector<1x128x128xf32> to vector<128x128xf32>
      %cst_43 = arith.constant dense<0.000000e+00> : vector<4x128xf32>
      %40 = tpu.matmul %37, %39, %cst_43 {dimension_numbers = #tpu.dot_dimension_numbers<[1], [0], [0], [1], [0, 0, 1, 1], [], []>} : vector<4x128xf32>, vector<128x128xf32>, vector<4x128xf32> -> vector<4x128xf32>
      %41 = arith.addf %33, %40 : vector<4x128xf32>
      %c1_i32_44 = arith.constant 1 : i32
      %42 = arith.addi %arg6, %c1_i32_44 : i32
      %c0_45 = arith.constant 0 : index
      %c0_46 = arith.constant 0 : index
      %43 = arith.index_cast %42 : i32 to index
      %c2_47 = arith.constant 2 : index
      %c0_48 = arith.constant 0 : index
      %44 = vector.load %arg2[%c0_45, %c0_46, %43, %c2_47, %c0_48] : memref<1x1x6x6x128xf32, #tpu.memory_space<vmem>>, vector<1x1x1x4x128xf32>
      %45 = vector.shape_cast %44 : vector<1x1x1x4x128xf32> to vector<4x128xf32>
      %c5 = arith.constant 5 : index
      %c0_49 = arith.constant 0 : index
      %c0_50 = arith.constant 0 : index
      %46 = vector.load %arg3[%c5, %c0_49, %c0_50] : memref<9x128x128xf32, #tpu.memory_space<vmem>>, vector<1x128x128xf32>
      %47 = vector.shape_cast %46 : vector<1x128x128xf32> to vector<128x128xf32>
      %cst_51 = arith.constant dense<0.000000e+00> : vector<4x128xf32>
      %48 = tpu.matmul %45, %47, %cst_51 {dimension_numbers = #tpu.dot_dimension_numbers<[1], [0], [0], [1], [0, 0, 1, 1], [], []>} : vector<4x128xf32>, vector<128x128xf32>, vector<4x128xf32> -> vector<4x128xf32>
      %49 = arith.addf %41, %48 : vector<4x128xf32>
      %c2_i32 = arith.constant 2 : i32
      %50 = arith.addi %arg6, %c2_i32 : i32
      %c0_52 = arith.constant 0 : index
      %c0_53 = arith.constant 0 : index
      %51 = arith.index_cast %50 : i32 to index
      %c0_54 = arith.constant 0 : index
      %c0_55 = arith.constant 0 : index
      %52 = vector.load %arg2[%c0_52, %c0_53, %51, %c0_54, %c0_55] : memref<1x1x6x6x128xf32, #tpu.memory_space<vmem>>, vector<1x1x1x4x128xf32>
      %53 = vector.shape_cast %52 : vector<1x1x1x4x128xf32> to vector<4x128xf32>
      %c6 = arith.constant 6 : index
      %c0_56 = arith.constant 0 : index
      %c0_57 = arith.constant 0 : index
      %54 = vector.load %arg3[%c6, %c0_56, %c0_57] : memref<9x128x128xf32, #tpu.memory_space<vmem>>, vector<1x128x128xf32>
      %55 = vector.shape_cast %54 : vector<1x128x128xf32> to vector<128x128xf32>
      %cst_58 = arith.constant dense<0.000000e+00> : vector<4x128xf32>
      %56 = tpu.matmul %53, %55, %cst_58 {dimension_numbers = #tpu.dot_dimension_numbers<[1], [0], [0], [1], [0, 0, 1, 1], [], []>} : vector<4x128xf32>, vector<128x128xf32>, vector<4x128xf32> -> vector<4x128xf32>
      %57 = arith.addf %49, %56 : vector<4x128xf32>
      %c2_i32_59 = arith.constant 2 : i32
      %58 = arith.addi %arg6, %c2_i32_59 : i32
      %c0_60 = arith.constant 0 : index
      %c0_61 = arith.constant 0 : index
      %59 = arith.index_cast %58 : i32 to index
      %c1_62 = arith.constant 1 : index
      %c0_63 = arith.constant 0 : index
      %60 = vector.load %arg2[%c0_60, %c0_61, %59, %c1_62, %c0_63] : memref<1x1x6x6x128xf32, #tpu.memory_space<vmem>>, vector<1x1x1x4x128xf32>
      %61 = vector.shape_cast %60 : vector<1x1x1x4x128xf32> to vector<4x128xf32>
      %c7 = arith.constant 7 : index
      %c0_64 = arith.constant 0 : index
      %c0_65 = arith.constant 0 : index
      %62 = vector.load %arg3[%c7, %c0_64, %c0_65] : memref<9x128x128xf32, #tpu.memory_space<vmem>>, vector<1x128x128xf32>
      %63 = vector.shape_cast %62 : vector<1x128x128xf32> to vector<128x128xf32>
      %cst_66 = arith.constant dense<0.000000e+00> : vector<4x128xf32>
      %64 = tpu.matmul %61, %63, %cst_66 {dimension_numbers = #tpu.dot_dimension_numbers<[1], [0], [0], [1], [0, 0, 1, 1], [], []>} : vector<4x128xf32>, vector<128x128xf32>, vector<4x128xf32> -> vector<4x128xf32>
      %65 = arith.addf %57, %64 : vector<4x128xf32>
      %c2_i32_67 = arith.constant 2 : i32
      %66 = arith.addi %arg6, %c2_i32_67 : i32
      %c0_68 = arith.constant 0 : index
      %c0_69 = arith.constant 0 : index
      %67 = arith.index_cast %66 : i32 to index
      %c2_70 = arith.constant 2 : index
      %c0_71 = arith.constant 0 : index
      %68 = vector.load %arg2[%c0_68, %c0_69, %67, %c2_70, %c0_71] : memref<1x1x6x6x128xf32, #tpu.memory_space<vmem>>, vector<1x1x1x4x128xf32>
      %69 = vector.shape_cast %68 : vector<1x1x1x4x128xf32> to vector<4x128xf32>
      %c8 = arith.constant 8 : index
      %c0_72 = arith.constant 0 : index
      %c0_73 = arith.constant 0 : index
      %70 = vector.load %arg3[%c8, %c0_72, %c0_73] : memref<9x128x128xf32, #tpu.memory_space<vmem>>, vector<1x128x128xf32>
      %71 = vector.shape_cast %70 : vector<1x128x128xf32> to vector<128x128xf32>
      %cst_74 = arith.constant dense<0.000000e+00> : vector<4x128xf32>
      %72 = tpu.matmul %69, %71, %cst_74 {dimension_numbers = #tpu.dot_dimension_numbers<[1], [0], [0], [1], [0, 0, 1, 1], [], []>} : vector<4x128xf32>, vector<128x128xf32>, vector<4x128xf32> -> vector<4x128xf32>
      %73 = arith.addf %65, %72 : vector<4x128xf32>
      %74 = vector.broadcast %0 : vector<1x128xf32> to vector<4x128xf32>
      %75 = arith.mulf %73, %74 : vector<4x128xf32>
      %76 = vector.broadcast %1 : vector<1x128xf32> to vector<4x128xf32>
      %77 = arith.addf %75, %76 : vector<4x128xf32>
      %cst_75 = arith.constant 0.000000e+00 : f32
      %78 = vector.broadcast %cst_75 : f32 to vector<4x128xf32>
      %79 = arith.maximumf %77, %78 : vector<4x128xf32>
      %c0_76 = arith.constant 0 : index
      %80 = arith.index_cast %arg6 : i32 to index
      %c0_77 = arith.constant 0 : index
      %c0_78 = arith.constant 0 : index
      %81 = vector.load %arg5[%c0_76, %80, %c0_77, %c0_78] : memref<1x4x4x128xf32, #tpu.memory_space<vmem>>, vector<1x1x4x128xf32>
      %82 = vector.shape_cast %81 : vector<1x1x4x128xf32> to vector<4x128xf32>
      %83 = vector.shape_cast %79 : vector<4x128xf32> to vector<1x1x4x128xf32>
      tpu.vector_store %arg5[%c0_76, %80, %c0_77, %c0_78], %83 {strides = array<i32>} : memref<1x4x4x128xf32, #tpu.memory_space<vmem>>, vector<1x1x4x128xf32>,
    }
    %c4_i32_2 = arith.constant 4 : i32
    return
  }
  func.func @transform_0(%arg0: i32, %arg1: i32) -> (i32, i32, i32, i32, i32) {
    %c0_i32 = arith.constant 0 : i32
    %c0_i32_0 = arith.constant 0 : i32
    %c0_i32_1 = arith.constant 0 : i32
    %c0_i32_2 = arith.constant 0 : i32
    return %arg0, %arg1, %c0_i32, %c0_i32_0, %c0_i32_1 : i32, i32, i32, i32, i32
  }
  func.func @transform_1(%arg0: i32, %arg1: i32) -> (i32, i32, i32) {
    %c0_i32 = arith.constant 0 : i32
    %c0_i32_0 = arith.constant 0 : i32
    %c0_i32_1 = arith.constant 0 : i32
    %c0_i32_2 = arith.constant 0 : i32
    return %c0_i32, %c0_i32_0, %c0_i32_1 : i32, i32, i32
  }
  func.func @transform_2(%arg0: i32, %arg1: i32) -> (i32, i32) {
    %c0_i32 = arith.constant 0 : i32
    %c0_i32_0 = arith.constant 0 : i32
    %c0_i32_1 = arith.constant 0 : i32
    return %c0_i32, %c0_i32_0 : i32, i32
  }
  func.func @transform_3(%arg0: i32, %arg1: i32) -> (i32, i32, i32, i32) {
    %c0_i32 = arith.constant 0 : i32
    %c0_i32_0 = arith.constant 0 : i32
    %c0_i32_1 = arith.constant 0 : i32
    return %arg0, %arg1, %c0_i32, %c0_i32_0 : i32, i32, i32, i32
  }
}

module attributes {stable_mosaic.version = 11 : i64} {
  func.func @_fused_tap_conv_kernel(%arg0: i32, %arg1: i32, %arg2: memref<1x1x5x5x128xf32, #tpu.memory_space<vmem>>, %arg3: memref<4x128x128xf32, #tpu.memory_space<vmem>>, %arg4: memref<2x128xf32, #tpu.memory_space<vmem>>, %arg5: memref<1x4x4x128xf32, #tpu.memory_space<vmem>>, %arg6: memref<1x4x4x128xf32, #tpu.memory_space<vmem>>) attributes {dimension_semantics = [#tpu.dimension_semantics<parallel>, #tpu.dimension_semantics<parallel>], iteration_bounds = array<i64: 2, 1>, scalar_prefetch = 0 : i64, scratch_operands = 0 : i64, tpu.core_type = #tpu.core_type<tc>, window_params = [{transform_indices = @transform_0, window_bounds = array<i64: 1, 1, 5, 5, 128>}, {pipeline_mode = #tpu.pipeline_mode<synchronous>, transform_indices = @transform_1, window_bounds = array<i64: 4, 128, 128>}, {pipeline_mode = #tpu.pipeline_mode<synchronous>, transform_indices = @transform_2, window_bounds = array<i64: 2, 128>}, {transform_indices = @transform_3, window_bounds = array<i64: 1, 4, 4, 128>}, {transform_indices = @transform_4, window_bounds = array<i64: 1, 4, 4, 128>}]} {
    %c0 = arith.constant 0 : index
    %c0_0 = arith.constant 0 : index
    %0 = vector.load %arg4[%c0, %c0_0] : memref<2x128xf32, #tpu.memory_space<vmem>>, vector<1x128xf32>
    %c1 = arith.constant 1 : index
    %c0_1 = arith.constant 0 : index
    %1 = vector.load %arg4[%c1, %c0_1] : memref<2x128xf32, #tpu.memory_space<vmem>>, vector<1x128xf32>
    %c0_i32 = arith.constant 0 : i32
    %c4_i32 = arith.constant 4 : i32
    %2 = arith.addi %c0_i32, %c4_i32 : i32
    %c1_i32 = arith.constant 1 : i32
    scf.for %arg7 = %c0_i32 to %2 step %c1_i32  : i32 {
      %c0_i32_3 = arith.constant 0 : i32
      %3 = arith.addi %arg7, %c0_i32_3 : i32
      %c0_4 = arith.constant 0 : index
      %c0_5 = arith.constant 0 : index
      %4 = arith.index_cast %3 : i32 to index
      %c0_6 = arith.constant 0 : index
      %c0_7 = arith.constant 0 : index
      %5 = vector.load %arg2[%c0_4, %c0_5, %4, %c0_6, %c0_7] : memref<1x1x5x5x128xf32, #tpu.memory_space<vmem>>, vector<1x1x1x4x128xf32>
      %6 = vector.shape_cast %5 : vector<1x1x1x4x128xf32> to vector<4x128xf32>
      %c0_8 = arith.constant 0 : index
      %c0_9 = arith.constant 0 : index
      %c0_10 = arith.constant 0 : index
      %7 = vector.load %arg3[%c0_8, %c0_9, %c0_10] : memref<4x128x128xf32, #tpu.memory_space<vmem>>, vector<1x128x128xf32>
      %8 = vector.shape_cast %7 : vector<1x128x128xf32> to vector<128x128xf32>
      %cst = arith.constant dense<0.000000e+00> : vector<4x128xf32>
      %9 = tpu.matmul %6, %8, %cst {dimension_numbers = #tpu.dot_dimension_numbers<[1], [0], [0], [1], [0, 0, 1, 1], [], []>} : vector<4x128xf32>, vector<128x128xf32>, vector<4x128xf32> -> vector<4x128xf32>
      %c0_i32_11 = arith.constant 0 : i32
      %10 = arith.addi %arg7, %c0_i32_11 : i32
      %c0_12 = arith.constant 0 : index
      %c0_13 = arith.constant 0 : index
      %11 = arith.index_cast %10 : i32 to index
      %c1_14 = arith.constant 1 : index
      %c0_15 = arith.constant 0 : index
      %12 = vector.load %arg2[%c0_12, %c0_13, %11, %c1_14, %c0_15] : memref<1x1x5x5x128xf32, #tpu.memory_space<vmem>>, vector<1x1x1x4x128xf32>
      %13 = vector.shape_cast %12 : vector<1x1x1x4x128xf32> to vector<4x128xf32>
      %c1_16 = arith.constant 1 : index
      %c0_17 = arith.constant 0 : index
      %c0_18 = arith.constant 0 : index
      %14 = vector.load %arg3[%c1_16, %c0_17, %c0_18] : memref<4x128x128xf32, #tpu.memory_space<vmem>>, vector<1x128x128xf32>
      %15 = vector.shape_cast %14 : vector<1x128x128xf32> to vector<128x128xf32>
      %cst_19 = arith.constant dense<0.000000e+00> : vector<4x128xf32>
      %16 = tpu.matmul %13, %15, %cst_19 {dimension_numbers = #tpu.dot_dimension_numbers<[1], [0], [0], [1], [0, 0, 1, 1], [], []>} : vector<4x128xf32>, vector<128x128xf32>, vector<4x128xf32> -> vector<4x128xf32>
      %17 = arith.addf %9, %16 : vector<4x128xf32>
      %c1_i32_20 = arith.constant 1 : i32
      %18 = arith.addi %arg7, %c1_i32_20 : i32
      %c0_21 = arith.constant 0 : index
      %c0_22 = arith.constant 0 : index
      %19 = arith.index_cast %18 : i32 to index
      %c0_23 = arith.constant 0 : index
      %c0_24 = arith.constant 0 : index
      %20 = vector.load %arg2[%c0_21, %c0_22, %19, %c0_23, %c0_24] : memref<1x1x5x5x128xf32, #tpu.memory_space<vmem>>, vector<1x1x1x4x128xf32>
      %21 = vector.shape_cast %20 : vector<1x1x1x4x128xf32> to vector<4x128xf32>
      %c2 = arith.constant 2 : index
      %c0_25 = arith.constant 0 : index
      %c0_26 = arith.constant 0 : index
      %22 = vector.load %arg3[%c2, %c0_25, %c0_26] : memref<4x128x128xf32, #tpu.memory_space<vmem>>, vector<1x128x128xf32>
      %23 = vector.shape_cast %22 : vector<1x128x128xf32> to vector<128x128xf32>
      %cst_27 = arith.constant dense<0.000000e+00> : vector<4x128xf32>
      %24 = tpu.matmul %21, %23, %cst_27 {dimension_numbers = #tpu.dot_dimension_numbers<[1], [0], [0], [1], [0, 0, 1, 1], [], []>} : vector<4x128xf32>, vector<128x128xf32>, vector<4x128xf32> -> vector<4x128xf32>
      %25 = arith.addf %17, %24 : vector<4x128xf32>
      %c1_i32_28 = arith.constant 1 : i32
      %26 = arith.addi %arg7, %c1_i32_28 : i32
      %c0_29 = arith.constant 0 : index
      %c0_30 = arith.constant 0 : index
      %27 = arith.index_cast %26 : i32 to index
      %c1_31 = arith.constant 1 : index
      %c0_32 = arith.constant 0 : index
      %28 = vector.load %arg2[%c0_29, %c0_30, %27, %c1_31, %c0_32] : memref<1x1x5x5x128xf32, #tpu.memory_space<vmem>>, vector<1x1x1x4x128xf32>
      %29 = vector.shape_cast %28 : vector<1x1x1x4x128xf32> to vector<4x128xf32>
      %c3 = arith.constant 3 : index
      %c0_33 = arith.constant 0 : index
      %c0_34 = arith.constant 0 : index
      %30 = vector.load %arg3[%c3, %c0_33, %c0_34] : memref<4x128x128xf32, #tpu.memory_space<vmem>>, vector<1x128x128xf32>
      %31 = vector.shape_cast %30 : vector<1x128x128xf32> to vector<128x128xf32>
      %cst_35 = arith.constant dense<0.000000e+00> : vector<4x128xf32>
      %32 = tpu.matmul %29, %31, %cst_35 {dimension_numbers = #tpu.dot_dimension_numbers<[1], [0], [0], [1], [0, 0, 1, 1], [], []>} : vector<4x128xf32>, vector<128x128xf32>, vector<4x128xf32> -> vector<4x128xf32>
      %33 = arith.addf %25, %32 : vector<4x128xf32>
      %34 = vector.broadcast %0 : vector<1x128xf32> to vector<4x128xf32>
      %35 = arith.mulf %33, %34 : vector<4x128xf32>
      %36 = vector.broadcast %1 : vector<1x128xf32> to vector<4x128xf32>
      %37 = arith.addf %35, %36 : vector<4x128xf32>
      %c0_36 = arith.constant 0 : index
      %38 = arith.index_cast %arg7 : i32 to index
      %c0_37 = arith.constant 0 : index
      %c0_38 = arith.constant 0 : index
      %39 = vector.load %arg5[%c0_36, %38, %c0_37, %c0_38] : memref<1x4x4x128xf32, #tpu.memory_space<vmem>>, vector<1x1x4x128xf32>
      %40 = vector.shape_cast %39 : vector<1x1x4x128xf32> to vector<4x128xf32>
      %41 = arith.addf %37, %40 : vector<4x128xf32>
      %cst_39 = arith.constant 0.000000e+00 : f32
      %42 = vector.broadcast %cst_39 : f32 to vector<4x128xf32>
      %43 = arith.maximumf %41, %42 : vector<4x128xf32>
      %c0_40 = arith.constant 0 : index
      %44 = arith.index_cast %arg7 : i32 to index
      %c0_41 = arith.constant 0 : index
      %c0_42 = arith.constant 0 : index
      %45 = vector.load %arg6[%c0_40, %44, %c0_41, %c0_42] : memref<1x4x4x128xf32, #tpu.memory_space<vmem>>, vector<1x1x4x128xf32>
      %46 = vector.shape_cast %45 : vector<1x1x4x128xf32> to vector<4x128xf32>
      %47 = vector.shape_cast %43 : vector<4x128xf32> to vector<1x1x4x128xf32>
      tpu.vector_store %arg6[%c0_40, %44, %c0_41, %c0_42], %47 {strides = array<i32>} : memref<1x4x4x128xf32, #tpu.memory_space<vmem>>, vector<1x1x4x128xf32>,
    }
    %c4_i32_2 = arith.constant 4 : i32
    return
  }
  func.func @transform_0(%arg0: i32, %arg1: i32) -> (i32, i32, i32, i32, i32) {
    %c0_i32 = arith.constant 0 : i32
    %c0_i32_0 = arith.constant 0 : i32
    %c0_i32_1 = arith.constant 0 : i32
    %c0_i32_2 = arith.constant 0 : i32
    return %arg0, %arg1, %c0_i32, %c0_i32_0, %c0_i32_1 : i32, i32, i32, i32, i32
  }
  func.func @transform_1(%arg0: i32, %arg1: i32) -> (i32, i32, i32) {
    %c0_i32 = arith.constant 0 : i32
    %c0_i32_0 = arith.constant 0 : i32
    %c0_i32_1 = arith.constant 0 : i32
    %c0_i32_2 = arith.constant 0 : i32
    return %c0_i32, %c0_i32_0, %c0_i32_1 : i32, i32, i32
  }
  func.func @transform_2(%arg0: i32, %arg1: i32) -> (i32, i32) {
    %c0_i32 = arith.constant 0 : i32
    %c0_i32_0 = arith.constant 0 : i32
    %c0_i32_1 = arith.constant 0 : i32
    return %c0_i32, %c0_i32_0 : i32, i32
  }
  func.func @transform_3(%arg0: i32, %arg1: i32) -> (i32, i32, i32, i32) {
    %c0_i32 = arith.constant 0 : i32
    %c0_i32_0 = arith.constant 0 : i32
    %c0_i32_1 = arith.constant 0 : i32
    return %arg0, %arg1, %c0_i32, %c0_i32_0 : i32, i32, i32, i32
  }
  func.func @transform_4(%arg0: i32, %arg1: i32) -> (i32, i32, i32, i32) {
    %c0_i32 = arith.constant 0 : i32
    %c0_i32_0 = arith.constant 0 : i32
    %c0_i32_1 = arith.constant 0 : i32
    return %arg0, %arg1, %c0_i32, %c0_i32_0 : i32, i32, i32, i32
  }
}

module attributes {stable_mosaic.version = 11 : i64} {
  func.func @_fused_tap_conv_kernel(%arg0: i32, %arg1: i32, %arg2: memref<1x1x5x5x128xf32, #tpu.memory_space<vmem>>, %arg3: memref<2x128x128xf32, #tpu.memory_space<vmem>>, %arg4: memref<2x128xf32, #tpu.memory_space<vmem>>, %arg5: memref<1x4x4x128xf32, #tpu.memory_space<vmem>>, %arg6: memref<1x4x4x128xf32, #tpu.memory_space<vmem>>) attributes {dimension_semantics = [#tpu.dimension_semantics<parallel>, #tpu.dimension_semantics<parallel>], iteration_bounds = array<i64: 2, 1>, scalar_prefetch = 0 : i64, scratch_operands = 0 : i64, tpu.core_type = #tpu.core_type<tc>, window_params = [{transform_indices = @transform_0, window_bounds = array<i64: 1, 1, 5, 5, 128>}, {pipeline_mode = #tpu.pipeline_mode<synchronous>, transform_indices = @transform_1, window_bounds = array<i64: 2, 128, 128>}, {pipeline_mode = #tpu.pipeline_mode<synchronous>, transform_indices = @transform_2, window_bounds = array<i64: 2, 128>}, {transform_indices = @transform_3, window_bounds = array<i64: 1, 4, 4, 128>}, {transform_indices = @transform_4, window_bounds = array<i64: 1, 4, 4, 128>}]} {
    %c0 = arith.constant 0 : index
    %c0_0 = arith.constant 0 : index
    %0 = vector.load %arg4[%c0, %c0_0] : memref<2x128xf32, #tpu.memory_space<vmem>>, vector<1x128xf32>
    %c1 = arith.constant 1 : index
    %c0_1 = arith.constant 0 : index
    %1 = vector.load %arg4[%c1, %c0_1] : memref<2x128xf32, #tpu.memory_space<vmem>>, vector<1x128xf32>
    %c0_i32 = arith.constant 0 : i32
    %c4_i32 = arith.constant 4 : i32
    %2 = arith.addi %c0_i32, %c4_i32 : i32
    %c1_i32 = arith.constant 1 : i32
    scf.for %arg7 = %c0_i32 to %2 step %c1_i32  : i32 {
      %c0_i32_3 = arith.constant 0 : i32
      %3 = arith.addi %arg7, %c0_i32_3 : i32
      %c0_4 = arith.constant 0 : index
      %c0_5 = arith.constant 0 : index
      %4 = arith.index_cast %3 : i32 to index
      %c0_6 = arith.constant 0 : index
      %c0_7 = arith.constant 0 : index
      %5 = vector.load %arg2[%c0_4, %c0_5, %4, %c0_6, %c0_7] : memref<1x1x5x5x128xf32, #tpu.memory_space<vmem>>, vector<1x1x1x4x128xf32>
      %6 = vector.shape_cast %5 : vector<1x1x1x4x128xf32> to vector<4x128xf32>
      %c0_8 = arith.constant 0 : index
      %c0_9 = arith.constant 0 : index
      %c0_10 = arith.constant 0 : index
      %7 = vector.load %arg3[%c0_8, %c0_9, %c0_10] : memref<2x128x128xf32, #tpu.memory_space<vmem>>, vector<1x128x128xf32>
      %8 = vector.shape_cast %7 : vector<1x128x128xf32> to vector<128x128xf32>
      %cst = arith.constant dense<0.000000e+00> : vector<4x128xf32>
      %9 = tpu.matmul %6, %8, %cst {dimension_numbers = #tpu.dot_dimension_numbers<[1], [0], [0], [1], [0, 0, 1, 1], [], []>} : vector<4x128xf32>, vector<128x128xf32>, vector<4x128xf32> -> vector<4x128xf32>
      %c1_i32_11 = arith.constant 1 : i32
      %10 = arith.addi %arg7, %c1_i32_11 : i32
      %c0_12 = arith.constant 0 : index
      %c0_13 = arith.constant 0 : index
      %11 = arith.index_cast %10 : i32 to index
      %c0_14 = arith.constant 0 : index
      %c0_15 = arith.constant 0 : index
      %12 = vector.load %arg2[%c0_12, %c0_13, %11, %c0_14, %c0_15] : memref<1x1x5x5x128xf32, #tpu.memory_space<vmem>>, vector<1x1x1x4x128xf32>
      %13 = vector.shape_cast %12 : vector<1x1x1x4x128xf32> to vector<4x128xf32>
      %c1_16 = arith.constant 1 : index
      %c0_17 = arith.constant 0 : index
      %c0_18 = arith.constant 0 : index
      %14 = vector.load %arg3[%c1_16, %c0_17, %c0_18] : memref<2x128x128xf32, #tpu.memory_space<vmem>>, vector<1x128x128xf32>
      %15 = vector.shape_cast %14 : vector<1x128x128xf32> to vector<128x128xf32>
      %cst_19 = arith.constant dense<0.000000e+00> : vector<4x128xf32>
      %16 = tpu.matmul %13, %15, %cst_19 {dimension_numbers = #tpu.dot_dimension_numbers<[1], [0], [0], [1], [0, 0, 1, 1], [], []>} : vector<4x128xf32>, vector<128x128xf32>, vector<4x128xf32> -> vector<4x128xf32>
      %17 = arith.addf %9, %16 : vector<4x128xf32>
      %18 = vector.broadcast %0 : vector<1x128xf32> to vector<4x128xf32>
      %19 = arith.mulf %17, %18 : vector<4x128xf32>
      %20 = vector.broadcast %1 : vector<1x128xf32> to vector<4x128xf32>
      %21 = arith.addf %19, %20 : vector<4x128xf32>
      %c0_20 = arith.constant 0 : index
      %22 = arith.index_cast %arg7 : i32 to index
      %c0_21 = arith.constant 0 : index
      %c0_22 = arith.constant 0 : index
      %23 = vector.load %arg5[%c0_20, %22, %c0_21, %c0_22] : memref<1x4x4x128xf32, #tpu.memory_space<vmem>>, vector<1x1x4x128xf32>
      %24 = vector.shape_cast %23 : vector<1x1x4x128xf32> to vector<4x128xf32>
      %25 = arith.addf %21, %24 : vector<4x128xf32>
      %cst_23 = arith.constant 0.000000e+00 : f32
      %26 = vector.broadcast %cst_23 : f32 to vector<4x128xf32>
      %27 = arith.maximumf %25, %26 : vector<4x128xf32>
      %c0_24 = arith.constant 0 : index
      %28 = arith.index_cast %arg7 : i32 to index
      %c0_25 = arith.constant 0 : index
      %c0_26 = arith.constant 0 : index
      %29 = vector.load %arg6[%c0_24, %28, %c0_25, %c0_26] : memref<1x4x4x128xf32, #tpu.memory_space<vmem>>, vector<1x1x4x128xf32>
      %30 = vector.shape_cast %29 : vector<1x1x4x128xf32> to vector<4x128xf32>
      %31 = vector.shape_cast %27 : vector<4x128xf32> to vector<1x1x4x128xf32>
      tpu.vector_store %arg6[%c0_24, %28, %c0_25, %c0_26], %31 {strides = array<i32>} : memref<1x4x4x128xf32, #tpu.memory_space<vmem>>, vector<1x1x4x128xf32>,
    }
    %c4_i32_2 = arith.constant 4 : i32
    return
  }
  func.func @transform_0(%arg0: i32, %arg1: i32) -> (i32, i32, i32, i32, i32) {
    %c0_i32 = arith.constant 0 : i32
    %c0_i32_0 = arith.constant 0 : i32
    %c0_i32_1 = arith.constant 0 : i32
    %c0_i32_2 = arith.constant 0 : i32
    return %arg0, %arg1, %c0_i32, %c0_i32_0, %c0_i32_1 : i32, i32, i32, i32, i32
  }
  func.func @transform_1(%arg0: i32, %arg1: i32) -> (i32, i32, i32) {
    %c0_i32 = arith.constant 0 : i32
    %c0_i32_0 = arith.constant 0 : i32
    %c0_i32_1 = arith.constant 0 : i32
    %c0_i32_2 = arith.constant 0 : i32
    return %c0_i32, %c0_i32_0, %c0_i32_1 : i32, i32, i32
  }
  func.func @transform_2(%arg0: i32, %arg1: i32) -> (i32, i32) {
    %c0_i32 = arith.constant 0 : i32
    %c0_i32_0 = arith.constant 0 : i32
    %c0_i32_1 = arith.constant 0 : i32
    return %c0_i32, %c0_i32_0 : i32, i32
  }
  func.func @transform_3(%arg0: i32, %arg1: i32) -> (i32, i32, i32, i32) {
    %c0_i32 = arith.constant 0 : i32
    %c0_i32_0 = arith.constant 0 : i32
    %c0_i32_1 = arith.constant 0 : i32
    return %arg0, %arg1, %c0_i32, %c0_i32_0 : i32, i32, i32, i32
  }
  func.func @transform_4(%arg0: i32, %arg1: i32) -> (i32, i32, i32, i32) {
    %c0_i32 = arith.constant 0 : i32
    %c0_i32_0 = arith.constant 0 : i32
    %c0_i32_1 = arith.constant 0 : i32
    return %arg0, %arg1, %c0_i32, %c0_i32_0 : i32, i32, i32, i32
  }
}

module attributes {stable_mosaic.version = 11 : i64} {
  func.func @_fused_tap_conv_kernel(%arg0: i32, %arg1: i32, %arg2: memref<1x1x5x5x128xf32, #tpu.memory_space<vmem>>, %arg3: memref<2x128x128xf32, #tpu.memory_space<vmem>>, %arg4: memref<2x128xf32, #tpu.memory_space<vmem>>, %arg5: memref<1x4x4x128xf32, #tpu.memory_space<vmem>>, %arg6: memref<1x4x4x128xf32, #tpu.memory_space<vmem>>) attributes {dimension_semantics = [#tpu.dimension_semantics<parallel>, #tpu.dimension_semantics<parallel>], iteration_bounds = array<i64: 2, 1>, scalar_prefetch = 0 : i64, scratch_operands = 0 : i64, tpu.core_type = #tpu.core_type<tc>, window_params = [{transform_indices = @transform_0, window_bounds = array<i64: 1, 1, 5, 5, 128>}, {pipeline_mode = #tpu.pipeline_mode<synchronous>, transform_indices = @transform_1, window_bounds = array<i64: 2, 128, 128>}, {pipeline_mode = #tpu.pipeline_mode<synchronous>, transform_indices = @transform_2, window_bounds = array<i64: 2, 128>}, {transform_indices = @transform_3, window_bounds = array<i64: 1, 4, 4, 128>}, {transform_indices = @transform_4, window_bounds = array<i64: 1, 4, 4, 128>}]} {
    %c0 = arith.constant 0 : index
    %c0_0 = arith.constant 0 : index
    %0 = vector.load %arg4[%c0, %c0_0] : memref<2x128xf32, #tpu.memory_space<vmem>>, vector<1x128xf32>
    %c1 = arith.constant 1 : index
    %c0_1 = arith.constant 0 : index
    %1 = vector.load %arg4[%c1, %c0_1] : memref<2x128xf32, #tpu.memory_space<vmem>>, vector<1x128xf32>
    %c0_i32 = arith.constant 0 : i32
    %c4_i32 = arith.constant 4 : i32
    %2 = arith.addi %c0_i32, %c4_i32 : i32
    %c1_i32 = arith.constant 1 : i32
    scf.for %arg7 = %c0_i32 to %2 step %c1_i32  : i32 {
      %c0_i32_3 = arith.constant 0 : i32
      %3 = arith.addi %arg7, %c0_i32_3 : i32
      %c0_4 = arith.constant 0 : index
      %c0_5 = arith.constant 0 : index
      %4 = arith.index_cast %3 : i32 to index
      %c0_6 = arith.constant 0 : index
      %c0_7 = arith.constant 0 : index
      %5 = vector.load %arg2[%c0_4, %c0_5, %4, %c0_6, %c0_7] : memref<1x1x5x5x128xf32, #tpu.memory_space<vmem>>, vector<1x1x1x4x128xf32>
      %6 = vector.shape_cast %5 : vector<1x1x1x4x128xf32> to vector<4x128xf32>
      %c0_8 = arith.constant 0 : index
      %c0_9 = arith.constant 0 : index
      %c0_10 = arith.constant 0 : index
      %7 = vector.load %arg3[%c0_8, %c0_9, %c0_10] : memref<2x128x128xf32, #tpu.memory_space<vmem>>, vector<1x128x128xf32>
      %8 = vector.shape_cast %7 : vector<1x128x128xf32> to vector<128x128xf32>
      %cst = arith.constant dense<0.000000e+00> : vector<4x128xf32>
      %9 = tpu.matmul %6, %8, %cst {dimension_numbers = #tpu.dot_dimension_numbers<[1], [0], [0], [1], [0, 0, 1, 1], [], []>} : vector<4x128xf32>, vector<128x128xf32>, vector<4x128xf32> -> vector<4x128xf32>
      %c0_i32_11 = arith.constant 0 : i32
      %10 = arith.addi %arg7, %c0_i32_11 : i32
      %c0_12 = arith.constant 0 : index
      %c0_13 = arith.constant 0 : index
      %11 = arith.index_cast %10 : i32 to index
      %c1_14 = arith.constant 1 : index
      %c0_15 = arith.constant 0 : index
      %12 = vector.load %arg2[%c0_12, %c0_13, %11, %c1_14, %c0_15] : memref<1x1x5x5x128xf32, #tpu.memory_space<vmem>>, vector<1x1x1x4x128xf32>
      %13 = vector.shape_cast %12 : vector<1x1x1x4x128xf32> to vector<4x128xf32>
      %c1_16 = arith.constant 1 : index
      %c0_17 = arith.constant 0 : index
      %c0_18 = arith.constant 0 : index
      %14 = vector.load %arg3[%c1_16, %c0_17, %c0_18] : memref<2x128x128xf32, #tpu.memory_space<vmem>>, vector<1x128x128xf32>
      %15 = vector.shape_cast %14 : vector<1x128x128xf32> to vector<128x128xf32>
      %cst_19 = arith.constant dense<0.000000e+00> : vector<4x128xf32>
      %16 = tpu.matmul %13, %15, %cst_19 {dimension_numbers = #tpu.dot_dimension_numbers<[1], [0], [0], [1], [0, 0, 1, 1], [], []>} : vector<4x128xf32>, vector<128x128xf32>, vector<4x128xf32> -> vector<4x128xf32>
      %17 = arith.addf %9, %16 : vector<4x128xf32>
      %18 = vector.broadcast %0 : vector<1x128xf32> to vector<4x128xf32>
      %19 = arith.mulf %17, %18 : vector<4x128xf32>
      %20 = vector.broadcast %1 : vector<1x128xf32> to vector<4x128xf32>
      %21 = arith.addf %19, %20 : vector<4x128xf32>
      %c0_20 = arith.constant 0 : index
      %22 = arith.index_cast %arg7 : i32 to index
      %c0_21 = arith.constant 0 : index
      %c0_22 = arith.constant 0 : index
      %23 = vector.load %arg5[%c0_20, %22, %c0_21, %c0_22] : memref<1x4x4x128xf32, #tpu.memory_space<vmem>>, vector<1x1x4x128xf32>
      %24 = vector.shape_cast %23 : vector<1x1x4x128xf32> to vector<4x128xf32>
      %25 = arith.addf %21, %24 : vector<4x128xf32>
      %cst_23 = arith.constant 0.000000e+00 : f32
      %26 = vector.broadcast %cst_23 : f32 to vector<4x128xf32>
      %27 = arith.maximumf %25, %26 : vector<4x128xf32>
      %c0_24 = arith.constant 0 : index
      %28 = arith.index_cast %arg7 : i32 to index
      %c0_25 = arith.constant 0 : index
      %c0_26 = arith.constant 0 : index
      %29 = vector.load %arg6[%c0_24, %28, %c0_25, %c0_26] : memref<1x4x4x128xf32, #tpu.memory_space<vmem>>, vector<1x1x4x128xf32>
      %30 = vector.shape_cast %29 : vector<1x1x4x128xf32> to vector<4x128xf32>
      %31 = vector.shape_cast %27 : vector<4x128xf32> to vector<1x1x4x128xf32>
      tpu.vector_store %arg6[%c0_24, %28, %c0_25, %c0_26], %31 {strides = array<i32>} : memref<1x4x4x128xf32, #tpu.memory_space<vmem>>, vector<1x1x4x128xf32>,
    }
    %c4_i32_2 = arith.constant 4 : i32
    return
  }
  func.func @transform_0(%arg0: i32, %arg1: i32) -> (i32, i32, i32, i32, i32) {
    %c0_i32 = arith.constant 0 : i32
    %c0_i32_0 = arith.constant 0 : i32
    %c0_i32_1 = arith.constant 0 : i32
    %c0_i32_2 = arith.constant 0 : i32
    return %arg0, %arg1, %c0_i32, %c0_i32_0, %c0_i32_1 : i32, i32, i32, i32, i32
  }
  func.func @transform_1(%arg0: i32, %arg1: i32) -> (i32, i32, i32) {
    %c0_i32 = arith.constant 0 : i32
    %c0_i32_0 = arith.constant 0 : i32
    %c0_i32_1 = arith.constant 0 : i32
    %c0_i32_2 = arith.constant 0 : i32
    return %c0_i32, %c0_i32_0, %c0_i32_1 : i32, i32, i32
  }
  func.func @transform_2(%arg0: i32, %arg1: i32) -> (i32, i32) {
    %c0_i32 = arith.constant 0 : i32
    %c0_i32_0 = arith.constant 0 : i32
    %c0_i32_1 = arith.constant 0 : i32
    return %c0_i32, %c0_i32_0 : i32, i32
  }
  func.func @transform_3(%arg0: i32, %arg1: i32) -> (i32, i32, i32, i32) {
    %c0_i32 = arith.constant 0 : i32
    %c0_i32_0 = arith.constant 0 : i32
    %c0_i32_1 = arith.constant 0 : i32
    return %arg0, %arg1, %c0_i32, %c0_i32_0 : i32, i32, i32, i32
  }
  func.func @transform_4(%arg0: i32, %arg1: i32) -> (i32, i32, i32, i32) {
    %c0_i32 = arith.constant 0 : i32
    %c0_i32_0 = arith.constant 0 : i32
    %c0_i32_1 = arith.constant 0 : i32
    return %arg0, %arg1, %c0_i32, %c0_i32_0 : i32, i32, i32, i32
  }
}

module attributes {stable_mosaic.version = 11 : i64} {
  func.func @_fused_tap_conv_kernel(%arg0: i32, %arg1: i32, %arg2: memref<1x1x5x5x128xf32, #tpu.memory_space<vmem>>, %arg3: memref<1x128x128xf32, #tpu.memory_space<vmem>>, %arg4: memref<2x128xf32, #tpu.memory_space<vmem>>, %arg5: memref<1x4x4x128xf32, #tpu.memory_space<vmem>>, %arg6: memref<1x4x4x128xf32, #tpu.memory_space<vmem>>) attributes {dimension_semantics = [#tpu.dimension_semantics<parallel>, #tpu.dimension_semantics<parallel>], iteration_bounds = array<i64: 2, 1>, scalar_prefetch = 0 : i64, scratch_operands = 0 : i64, tpu.core_type = #tpu.core_type<tc>, window_params = [{transform_indices = @transform_0, window_bounds = array<i64: 1, 1, 5, 5, 128>}, {pipeline_mode = #tpu.pipeline_mode<synchronous>, transform_indices = @transform_1, window_bounds = array<i64: 1, 128, 128>}, {pipeline_mode = #tpu.pipeline_mode<synchronous>, transform_indices = @transform_2, window_bounds = array<i64: 2, 128>}, {transform_indices = @transform_3, window_bounds = array<i64: 1, 4, 4, 128>}, {transform_indices = @transform_4, window_bounds = array<i64: 1, 4, 4, 128>}]} {
    %c0 = arith.constant 0 : index
    %c0_0 = arith.constant 0 : index
    %0 = vector.load %arg4[%c0, %c0_0] : memref<2x128xf32, #tpu.memory_space<vmem>>, vector<1x128xf32>
    %c1 = arith.constant 1 : index
    %c0_1 = arith.constant 0 : index
    %1 = vector.load %arg4[%c1, %c0_1] : memref<2x128xf32, #tpu.memory_space<vmem>>, vector<1x128xf32>
    %c0_i32 = arith.constant 0 : i32
    %c4_i32 = arith.constant 4 : i32
    %2 = arith.addi %c0_i32, %c4_i32 : i32
    %c1_i32 = arith.constant 1 : i32
    scf.for %arg7 = %c0_i32 to %2 step %c1_i32  : i32 {
      %c0_i32_3 = arith.constant 0 : i32
      %3 = arith.addi %arg7, %c0_i32_3 : i32
      %c0_4 = arith.constant 0 : index
      %c0_5 = arith.constant 0 : index
      %4 = arith.index_cast %3 : i32 to index
      %c0_6 = arith.constant 0 : index
      %c0_7 = arith.constant 0 : index
      %5 = vector.load %arg2[%c0_4, %c0_5, %4, %c0_6, %c0_7] : memref<1x1x5x5x128xf32, #tpu.memory_space<vmem>>, vector<1x1x1x4x128xf32>
      %6 = vector.shape_cast %5 : vector<1x1x1x4x128xf32> to vector<4x128xf32>
      %c0_8 = arith.constant 0 : index
      %c0_9 = arith.constant 0 : index
      %c0_10 = arith.constant 0 : index
      %7 = vector.load %arg3[%c0_8, %c0_9, %c0_10] : memref<1x128x128xf32, #tpu.memory_space<vmem>>, vector<1x128x128xf32>
      %8 = vector.shape_cast %7 : vector<1x128x128xf32> to vector<128x128xf32>
      %cst = arith.constant dense<0.000000e+00> : vector<4x128xf32>
      %9 = tpu.matmul %6, %8, %cst {dimension_numbers = #tpu.dot_dimension_numbers<[1], [0], [0], [1], [0, 0, 1, 1], [], []>} : vector<4x128xf32>, vector<128x128xf32>, vector<4x128xf32> -> vector<4x128xf32>
      %10 = vector.broadcast %0 : vector<1x128xf32> to vector<4x128xf32>
      %11 = arith.mulf %9, %10 : vector<4x128xf32>
      %12 = vector.broadcast %1 : vector<1x128xf32> to vector<4x128xf32>
      %13 = arith.addf %11, %12 : vector<4x128xf32>
      %c0_11 = arith.constant 0 : index
      %14 = arith.index_cast %arg7 : i32 to index
      %c0_12 = arith.constant 0 : index
      %c0_13 = arith.constant 0 : index
      %15 = vector.load %arg5[%c0_11, %14, %c0_12, %c0_13] : memref<1x4x4x128xf32, #tpu.memory_space<vmem>>, vector<1x1x4x128xf32>
      %16 = vector.shape_cast %15 : vector<1x1x4x128xf32> to vector<4x128xf32>
      %17 = arith.addf %13, %16 : vector<4x128xf32>
      %cst_14 = arith.constant 0.000000e+00 : f32
      %18 = vector.broadcast %cst_14 : f32 to vector<4x128xf32>
      %19 = arith.maximumf %17, %18 : vector<4x128xf32>
      %c0_15 = arith.constant 0 : index
      %20 = arith.index_cast %arg7 : i32 to index
      %c0_16 = arith.constant 0 : index
      %c0_17 = arith.constant 0 : index
      %21 = vector.load %arg6[%c0_15, %20, %c0_16, %c0_17] : memref<1x4x4x128xf32, #tpu.memory_space<vmem>>, vector<1x1x4x128xf32>
      %22 = vector.shape_cast %21 : vector<1x1x4x128xf32> to vector<4x128xf32>
      %23 = vector.shape_cast %19 : vector<4x128xf32> to vector<1x1x4x128xf32>
      tpu.vector_store %arg6[%c0_15, %20, %c0_16, %c0_17], %23 {strides = array<i32>} : memref<1x4x4x128xf32, #tpu.memory_space<vmem>>, vector<1x1x4x128xf32>,
    }
    %c4_i32_2 = arith.constant 4 : i32
    return
  }
  func.func @transform_0(%arg0: i32, %arg1: i32) -> (i32, i32, i32, i32, i32) {
    %c0_i32 = arith.constant 0 : i32
    %c0_i32_0 = arith.constant 0 : i32
    %c0_i32_1 = arith.constant 0 : i32
    %c0_i32_2 = arith.constant 0 : i32
    return %arg0, %arg1, %c0_i32, %c0_i32_0, %c0_i32_1 : i32, i32, i32, i32, i32
  }
  func.func @transform_1(%arg0: i32, %arg1: i32) -> (i32, i32, i32) {
    %c0_i32 = arith.constant 0 : i32
    %c0_i32_0 = arith.constant 0 : i32
    %c0_i32_1 = arith.constant 0 : i32
    %c0_i32_2 = arith.constant 0 : i32
    return %c0_i32, %c0_i32_0, %c0_i32_1 : i32, i32, i32
  }
  func.func @transform_2(%arg0: i32, %arg1: i32) -> (i32, i32) {
    %c0_i32 = arith.constant 0 : i32
    %c0_i32_0 = arith.constant 0 : i32
    %c0_i32_1 = arith.constant 0 : i32
    return %c0_i32, %c0_i32_0 : i32, i32
  }
  func.func @transform_3(%arg0: i32, %arg1: i32) -> (i32, i32, i32, i32) {
    %c0_i32 = arith.constant 0 : i32
    %c0_i32_0 = arith.constant 0 : i32
    %c0_i32_1 = arith.constant 0 : i32
    return %arg0, %arg1, %c0_i32, %c0_i32_0 : i32, i32, i32, i32
  }
  func.func @transform_4(%arg0: i32, %arg1: i32) -> (i32, i32, i32, i32) {
    %c0_i32 = arith.constant 0 : i32
    %c0_i32_0 = arith.constant 0 : i32
    %c0_i32_1 = arith.constant 0 : i32
    return %arg0, %arg1, %c0_i32, %c0_i32_0 : i32, i32, i32, i32
  }
}

module attributes {stable_mosaic.version = 11 : i64} {
  func.func @_fused_tap_conv_kernel(%arg0: i32, %arg1: i32, %arg2: memref<1x1x9x9x128xf32, #tpu.memory_space<vmem>>, %arg3: memref<2x128x128xf32, #tpu.memory_space<vmem>>, %arg4: memref<2x128xf32, #tpu.memory_space<vmem>>, %arg5: memref<1x8x8x128xf32, #tpu.memory_space<vmem>>) attributes {dimension_semantics = [#tpu.dimension_semantics<parallel>, #tpu.dimension_semantics<parallel>], iteration_bounds = array<i64: 2, 1>, scalar_prefetch = 0 : i64, scratch_operands = 0 : i64, tpu.core_type = #tpu.core_type<tc>, window_params = [{transform_indices = @transform_0, window_bounds = array<i64: 1, 1, 9, 9, 128>}, {pipeline_mode = #tpu.pipeline_mode<synchronous>, transform_indices = @transform_1, window_bounds = array<i64: 2, 128, 128>}, {pipeline_mode = #tpu.pipeline_mode<synchronous>, transform_indices = @transform_2, window_bounds = array<i64: 2, 128>}, {transform_indices = @transform_3, window_bounds = array<i64: 1, 8, 8, 128>}]} {
    %c0 = arith.constant 0 : index
    %c0_0 = arith.constant 0 : index
    %0 = vector.load %arg4[%c0, %c0_0] : memref<2x128xf32, #tpu.memory_space<vmem>>, vector<1x128xf32>
    %c1 = arith.constant 1 : index
    %c0_1 = arith.constant 0 : index
    %1 = vector.load %arg4[%c1, %c0_1] : memref<2x128xf32, #tpu.memory_space<vmem>>, vector<1x128xf32>
    %c0_i32 = arith.constant 0 : i32
    %c8_i32 = arith.constant 8 : i32
    %2 = arith.addi %c0_i32, %c8_i32 : i32
    %c1_i32 = arith.constant 1 : i32
    scf.for %arg6 = %c0_i32 to %2 step %c1_i32  : i32 {
      %c0_i32_3 = arith.constant 0 : i32
      %3 = arith.addi %arg6, %c0_i32_3 : i32
      %c0_4 = arith.constant 0 : index
      %c0_5 = arith.constant 0 : index
      %4 = arith.index_cast %3 : i32 to index
      %c0_6 = arith.constant 0 : index
      %c0_7 = arith.constant 0 : index
      %5 = vector.load %arg2[%c0_4, %c0_5, %4, %c0_6, %c0_7] : memref<1x1x9x9x128xf32, #tpu.memory_space<vmem>>, vector<1x1x1x8x128xf32>
      %6 = vector.shape_cast %5 : vector<1x1x1x8x128xf32> to vector<8x128xf32>
      %c0_8 = arith.constant 0 : index
      %c0_9 = arith.constant 0 : index
      %c0_10 = arith.constant 0 : index
      %7 = vector.load %arg3[%c0_8, %c0_9, %c0_10] : memref<2x128x128xf32, #tpu.memory_space<vmem>>, vector<1x128x128xf32>
      %8 = vector.shape_cast %7 : vector<1x128x128xf32> to vector<128x128xf32>
      %cst = arith.constant dense<0.000000e+00> : vector<8x128xf32>
      %9 = tpu.matmul %6, %8, %cst {dimension_numbers = #tpu.dot_dimension_numbers<[1], [0], [0], [1], [0, 0, 1, 1], [], []>} : vector<8x128xf32>, vector<128x128xf32>, vector<8x128xf32> -> vector<8x128xf32>
      %c1_i32_11 = arith.constant 1 : i32
      %10 = arith.addi %arg6, %c1_i32_11 : i32
      %c0_12 = arith.constant 0 : index
      %c0_13 = arith.constant 0 : index
      %11 = arith.index_cast %10 : i32 to index
      %c0_14 = arith.constant 0 : index
      %c0_15 = arith.constant 0 : index
      %12 = vector.load %arg2[%c0_12, %c0_13, %11, %c0_14, %c0_15] : memref<1x1x9x9x128xf32, #tpu.memory_space<vmem>>, vector<1x1x1x8x128xf32>
      %13 = vector.shape_cast %12 : vector<1x1x1x8x128xf32> to vector<8x128xf32>
      %c1_16 = arith.constant 1 : index
      %c0_17 = arith.constant 0 : index
      %c0_18 = arith.constant 0 : index
      %14 = vector.load %arg3[%c1_16, %c0_17, %c0_18] : memref<2x128x128xf32, #tpu.memory_space<vmem>>, vector<1x128x128xf32>
      %15 = vector.shape_cast %14 : vector<1x128x128xf32> to vector<128x128xf32>
      %cst_19 = arith.constant dense<0.000000e+00> : vector<8x128xf32>
      %16 = tpu.matmul %13, %15, %cst_19 {dimension_numbers = #tpu.dot_dimension_numbers<[1], [0], [0], [1], [0, 0, 1, 1], [], []>} : vector<8x128xf32>, vector<128x128xf32>, vector<8x128xf32> -> vector<8x128xf32>
      %17 = arith.addf %9, %16 : vector<8x128xf32>
      %18 = vector.broadcast %0 : vector<1x128xf32> to vector<8x128xf32>
      %19 = arith.mulf %17, %18 : vector<8x128xf32>
      %20 = vector.broadcast %1 : vector<1x128xf32> to vector<8x128xf32>
      %21 = arith.addf %19, %20 : vector<8x128xf32>
      %c0_20 = arith.constant 0 : index
      %22 = arith.index_cast %arg6 : i32 to index
      %c0_21 = arith.constant 0 : index
      %c0_22 = arith.constant 0 : index
      %23 = vector.load %arg5[%c0_20, %22, %c0_21, %c0_22] : memref<1x8x8x128xf32, #tpu.memory_space<vmem>>, vector<1x1x8x128xf32>
      %24 = vector.shape_cast %23 : vector<1x1x8x128xf32> to vector<8x128xf32>
      %25 = vector.shape_cast %21 : vector<8x128xf32> to vector<1x1x8x128xf32>
      tpu.vector_store %arg5[%c0_20, %22, %c0_21, %c0_22], %25 {strides = array<i32>} : memref<1x8x8x128xf32, #tpu.memory_space<vmem>>, vector<1x1x8x128xf32>,
    }
    %c8_i32_2 = arith.constant 8 : i32
    return
  }
  func.func @transform_0(%arg0: i32, %arg1: i32) -> (i32, i32, i32, i32, i32) {
    %c0_i32 = arith.constant 0 : i32
    %c0_i32_0 = arith.constant 0 : i32
    %c0_i32_1 = arith.constant 0 : i32
    %c0_i32_2 = arith.constant 0 : i32
    return %arg0, %arg1, %c0_i32, %c0_i32_0, %c0_i32_1 : i32, i32, i32, i32, i32
  }
  func.func @transform_1(%arg0: i32, %arg1: i32) -> (i32, i32, i32) {
    %c0_i32 = arith.constant 0 : i32
    %c0_i32_0 = arith.constant 0 : i32
    %c0_i32_1 = arith.constant 0 : i32
    %c0_i32_2 = arith.constant 0 : i32
    return %c0_i32, %c0_i32_0, %c0_i32_1 : i32, i32, i32
  }
  func.func @transform_2(%arg0: i32, %arg1: i32) -> (i32, i32) {
    %c0_i32 = arith.constant 0 : i32
    %c0_i32_0 = arith.constant 0 : i32
    %c0_i32_1 = arith.constant 0 : i32
    return %c0_i32, %c0_i32_0 : i32, i32
  }
  func.func @transform_3(%arg0: i32, %arg1: i32) -> (i32, i32, i32, i32) {
    %c0_i32 = arith.constant 0 : i32
    %c0_i32_0 = arith.constant 0 : i32
    %c0_i32_1 = arith.constant 0 : i32
    return %arg0, %arg1, %c0_i32, %c0_i32_0 : i32, i32, i32, i32
  }
}

module attributes {stable_mosaic.version = 11 : i64} {
  func.func @_fused_tap_conv_kernel(%arg0: i32, %arg1: i32, %arg2: memref<1x1x9x9x128xf32, #tpu.memory_space<vmem>>, %arg3: memref<4x128x128xf32, #tpu.memory_space<vmem>>, %arg4: memref<2x128xf32, #tpu.memory_space<vmem>>, %arg5: memref<1x8x8x128xf32, #tpu.memory_space<vmem>>) attributes {dimension_semantics = [#tpu.dimension_semantics<parallel>, #tpu.dimension_semantics<parallel>], iteration_bounds = array<i64: 2, 1>, scalar_prefetch = 0 : i64, scratch_operands = 0 : i64, tpu.core_type = #tpu.core_type<tc>, window_params = [{transform_indices = @transform_0, window_bounds = array<i64: 1, 1, 9, 9, 128>}, {pipeline_mode = #tpu.pipeline_mode<synchronous>, transform_indices = @transform_1, window_bounds = array<i64: 4, 128, 128>}, {pipeline_mode = #tpu.pipeline_mode<synchronous>, transform_indices = @transform_2, window_bounds = array<i64: 2, 128>}, {transform_indices = @transform_3, window_bounds = array<i64: 1, 8, 8, 128>}]} {
    %c0 = arith.constant 0 : index
    %c0_0 = arith.constant 0 : index
    %0 = vector.load %arg4[%c0, %c0_0] : memref<2x128xf32, #tpu.memory_space<vmem>>, vector<1x128xf32>
    %c1 = arith.constant 1 : index
    %c0_1 = arith.constant 0 : index
    %1 = vector.load %arg4[%c1, %c0_1] : memref<2x128xf32, #tpu.memory_space<vmem>>, vector<1x128xf32>
    %c0_i32 = arith.constant 0 : i32
    %c8_i32 = arith.constant 8 : i32
    %2 = arith.addi %c0_i32, %c8_i32 : i32
    %c1_i32 = arith.constant 1 : i32
    scf.for %arg6 = %c0_i32 to %2 step %c1_i32  : i32 {
      %c0_i32_3 = arith.constant 0 : i32
      %3 = arith.addi %arg6, %c0_i32_3 : i32
      %c0_4 = arith.constant 0 : index
      %c0_5 = arith.constant 0 : index
      %4 = arith.index_cast %3 : i32 to index
      %c0_6 = arith.constant 0 : index
      %c0_7 = arith.constant 0 : index
      %5 = vector.load %arg2[%c0_4, %c0_5, %4, %c0_6, %c0_7] : memref<1x1x9x9x128xf32, #tpu.memory_space<vmem>>, vector<1x1x1x8x128xf32>
      %6 = vector.shape_cast %5 : vector<1x1x1x8x128xf32> to vector<8x128xf32>
      %c0_8 = arith.constant 0 : index
      %c0_9 = arith.constant 0 : index
      %c0_10 = arith.constant 0 : index
      %7 = vector.load %arg3[%c0_8, %c0_9, %c0_10] : memref<4x128x128xf32, #tpu.memory_space<vmem>>, vector<1x128x128xf32>
      %8 = vector.shape_cast %7 : vector<1x128x128xf32> to vector<128x128xf32>
      %cst = arith.constant dense<0.000000e+00> : vector<8x128xf32>
      %9 = tpu.matmul %6, %8, %cst {dimension_numbers = #tpu.dot_dimension_numbers<[1], [0], [0], [1], [0, 0, 1, 1], [], []>} : vector<8x128xf32>, vector<128x128xf32>, vector<8x128xf32> -> vector<8x128xf32>
      %c0_i32_11 = arith.constant 0 : i32
      %10 = arith.addi %arg6, %c0_i32_11 : i32
      %c0_12 = arith.constant 0 : index
      %c0_13 = arith.constant 0 : index
      %11 = arith.index_cast %10 : i32 to index
      %c1_14 = arith.constant 1 : index
      %c0_15 = arith.constant 0 : index
      %12 = vector.load %arg2[%c0_12, %c0_13, %11, %c1_14, %c0_15] : memref<1x1x9x9x128xf32, #tpu.memory_space<vmem>>, vector<1x1x1x8x128xf32>
      %13 = vector.shape_cast %12 : vector<1x1x1x8x128xf32> to vector<8x128xf32>
      %c1_16 = arith.constant 1 : index
      %c0_17 = arith.constant 0 : index
      %c0_18 = arith.constant 0 : index
      %14 = vector.load %arg3[%c1_16, %c0_17, %c0_18] : memref<4x128x128xf32, #tpu.memory_space<vmem>>, vector<1x128x128xf32>
      %15 = vector.shape_cast %14 : vector<1x128x128xf32> to vector<128x128xf32>
      %cst_19 = arith.constant dense<0.000000e+00> : vector<8x128xf32>
      %16 = tpu.matmul %13, %15, %cst_19 {dimension_numbers = #tpu.dot_dimension_numbers<[1], [0], [0], [1], [0, 0, 1, 1], [], []>} : vector<8x128xf32>, vector<128x128xf32>, vector<8x128xf32> -> vector<8x128xf32>
      %17 = arith.addf %9, %16 : vector<8x128xf32>
      %c1_i32_20 = arith.constant 1 : i32
      %18 = arith.addi %arg6, %c1_i32_20 : i32
      %c0_21 = arith.constant 0 : index
      %c0_22 = arith.constant 0 : index
      %19 = arith.index_cast %18 : i32 to index
      %c0_23 = arith.constant 0 : index
      %c0_24 = arith.constant 0 : index
      %20 = vector.load %arg2[%c0_21, %c0_22, %19, %c0_23, %c0_24] : memref<1x1x9x9x128xf32, #tpu.memory_space<vmem>>, vector<1x1x1x8x128xf32>
      %21 = vector.shape_cast %20 : vector<1x1x1x8x128xf32> to vector<8x128xf32>
      %c2 = arith.constant 2 : index
      %c0_25 = arith.constant 0 : index
      %c0_26 = arith.constant 0 : index
      %22 = vector.load %arg3[%c2, %c0_25, %c0_26] : memref<4x128x128xf32, #tpu.memory_space<vmem>>, vector<1x128x128xf32>
      %23 = vector.shape_cast %22 : vector<1x128x128xf32> to vector<128x128xf32>
      %cst_27 = arith.constant dense<0.000000e+00> : vector<8x128xf32>
      %24 = tpu.matmul %21, %23, %cst_27 {dimension_numbers = #tpu.dot_dimension_numbers<[1], [0], [0], [1], [0, 0, 1, 1], [], []>} : vector<8x128xf32>, vector<128x128xf32>, vector<8x128xf32> -> vector<8x128xf32>
      %25 = arith.addf %17, %24 : vector<8x128xf32>
      %c1_i32_28 = arith.constant 1 : i32
      %26 = arith.addi %arg6, %c1_i32_28 : i32
      %c0_29 = arith.constant 0 : index
      %c0_30 = arith.constant 0 : index
      %27 = arith.index_cast %26 : i32 to index
      %c1_31 = arith.constant 1 : index
      %c0_32 = arith.constant 0 : index
      %28 = vector.load %arg2[%c0_29, %c0_30, %27, %c1_31, %c0_32] : memref<1x1x9x9x128xf32, #tpu.memory_space<vmem>>, vector<1x1x1x8x128xf32>
      %29 = vector.shape_cast %28 : vector<1x1x1x8x128xf32> to vector<8x128xf32>
      %c3 = arith.constant 3 : index
      %c0_33 = arith.constant 0 : index
      %c0_34 = arith.constant 0 : index
      %30 = vector.load %arg3[%c3, %c0_33, %c0_34] : memref<4x128x128xf32, #tpu.memory_space<vmem>>, vector<1x128x128xf32>
      %31 = vector.shape_cast %30 : vector<1x128x128xf32> to vector<128x128xf32>
      %cst_35 = arith.constant dense<0.000000e+00> : vector<8x128xf32>
      %32 = tpu.matmul %29, %31, %cst_35 {dimension_numbers = #tpu.dot_dimension_numbers<[1], [0], [0], [1], [0, 0, 1, 1], [], []>} : vector<8x128xf32>, vector<128x128xf32>, vector<8x128xf32> -> vector<8x128xf32>
      %33 = arith.addf %25, %32 : vector<8x128xf32>
      %34 = vector.broadcast %0 : vector<1x128xf32> to vector<8x128xf32>
      %35 = arith.mulf %33, %34 : vector<8x128xf32>
      %36 = vector.broadcast %1 : vector<1x128xf32> to vector<8x128xf32>
      %37 = arith.addf %35, %36 : vector<8x128xf32>
      %c0_36 = arith.constant 0 : index
      %38 = arith.index_cast %arg6 : i32 to index
      %c0_37 = arith.constant 0 : index
      %c0_38 = arith.constant 0 : index
      %39 = vector.load %arg5[%c0_36, %38, %c0_37, %c0_38] : memref<1x8x8x128xf32, #tpu.memory_space<vmem>>, vector<1x1x8x128xf32>
      %40 = vector.shape_cast %39 : vector<1x1x8x128xf32> to vector<8x128xf32>
      %41 = vector.shape_cast %37 : vector<8x128xf32> to vector<1x1x8x128xf32>
      tpu.vector_store %arg5[%c0_36, %38, %c0_37, %c0_38], %41 {strides = array<i32>} : memref<1x8x8x128xf32, #tpu.memory_space<vmem>>, vector<1x1x8x128xf32>,
    }
    %c8_i32_2 = arith.constant 8 : i32
    return
  }
  func.func @transform_0(%arg0: i32, %arg1: i32) -> (i32, i32, i32, i32, i32) {
    %c0_i32 = arith.constant 0 : i32
    %c0_i32_0 = arith.constant 0 : i32
    %c0_i32_1 = arith.constant 0 : i32
    %c0_i32_2 = arith.constant 0 : i32
    return %arg0, %arg1, %c0_i32, %c0_i32_0, %c0_i32_1 : i32, i32, i32, i32, i32
  }
  func.func @transform_1(%arg0: i32, %arg1: i32) -> (i32, i32, i32) {
    %c0_i32 = arith.constant 0 : i32
    %c0_i32_0 = arith.constant 0 : i32
    %c0_i32_1 = arith.constant 0 : i32
    %c0_i32_2 = arith.constant 0 : i32
    return %c0_i32, %c0_i32_0, %c0_i32_1 : i32, i32, i32
  }
  func.func @transform_2(%arg0: i32, %arg1: i32) -> (i32, i32) {
    %c0_i32 = arith.constant 0 : i32
    %c0_i32_0 = arith.constant 0 : i32
    %c0_i32_1 = arith.constant 0 : i32
    return %c0_i32, %c0_i32_0 : i32, i32
  }
  func.func @transform_3(%arg0: i32, %arg1: i32) -> (i32, i32, i32, i32) {
    %c0_i32 = arith.constant 0 : i32
    %c0_i32_0 = arith.constant 0 : i32
    %c0_i32_1 = arith.constant 0 : i32
    return %arg0, %arg1, %c0_i32, %c0_i32_0 : i32, i32, i32, i32
  }
}

module attributes {stable_mosaic.version = 11 : i64} {
  func.func @_fused_tap_conv_kernel(%arg0: i32, %arg1: i32, %arg2: memref<1x1x9x9x128xf32, #tpu.memory_space<vmem>>, %arg3: memref<1x128x128xf32, #tpu.memory_space<vmem>>, %arg4: memref<2x128xf32, #tpu.memory_space<vmem>>, %arg5: memref<1x8x8x128xf32, #tpu.memory_space<vmem>>) attributes {dimension_semantics = [#tpu.dimension_semantics<parallel>, #tpu.dimension_semantics<parallel>], iteration_bounds = array<i64: 2, 1>, scalar_prefetch = 0 : i64, scratch_operands = 0 : i64, tpu.core_type = #tpu.core_type<tc>, window_params = [{transform_indices = @transform_0, window_bounds = array<i64: 1, 1, 9, 9, 128>}, {pipeline_mode = #tpu.pipeline_mode<synchronous>, transform_indices = @transform_1, window_bounds = array<i64: 1, 128, 128>}, {pipeline_mode = #tpu.pipeline_mode<synchronous>, transform_indices = @transform_2, window_bounds = array<i64: 2, 128>}, {transform_indices = @transform_3, window_bounds = array<i64: 1, 8, 8, 128>}]} {
    %c0 = arith.constant 0 : index
    %c0_0 = arith.constant 0 : index
    %0 = vector.load %arg4[%c0, %c0_0] : memref<2x128xf32, #tpu.memory_space<vmem>>, vector<1x128xf32>
    %c1 = arith.constant 1 : index
    %c0_1 = arith.constant 0 : index
    %1 = vector.load %arg4[%c1, %c0_1] : memref<2x128xf32, #tpu.memory_space<vmem>>, vector<1x128xf32>
    %c0_i32 = arith.constant 0 : i32
    %c8_i32 = arith.constant 8 : i32
    %2 = arith.addi %c0_i32, %c8_i32 : i32
    %c1_i32 = arith.constant 1 : i32
    scf.for %arg6 = %c0_i32 to %2 step %c1_i32  : i32 {
      %c0_i32_3 = arith.constant 0 : i32
      %3 = arith.addi %arg6, %c0_i32_3 : i32
      %c0_4 = arith.constant 0 : index
      %c0_5 = arith.constant 0 : index
      %4 = arith.index_cast %3 : i32 to index
      %c0_6 = arith.constant 0 : index
      %c0_7 = arith.constant 0 : index
      %5 = vector.load %arg2[%c0_4, %c0_5, %4, %c0_6, %c0_7] : memref<1x1x9x9x128xf32, #tpu.memory_space<vmem>>, vector<1x1x1x8x128xf32>
      %6 = vector.shape_cast %5 : vector<1x1x1x8x128xf32> to vector<8x128xf32>
      %c0_8 = arith.constant 0 : index
      %c0_9 = arith.constant 0 : index
      %c0_10 = arith.constant 0 : index
      %7 = vector.load %arg3[%c0_8, %c0_9, %c0_10] : memref<1x128x128xf32, #tpu.memory_space<vmem>>, vector<1x128x128xf32>
      %8 = vector.shape_cast %7 : vector<1x128x128xf32> to vector<128x128xf32>
      %cst = arith.constant dense<0.000000e+00> : vector<8x128xf32>
      %9 = tpu.matmul %6, %8, %cst {dimension_numbers = #tpu.dot_dimension_numbers<[1], [0], [0], [1], [0, 0, 1, 1], [], []>} : vector<8x128xf32>, vector<128x128xf32>, vector<8x128xf32> -> vector<8x128xf32>
      %10 = vector.broadcast %0 : vector<1x128xf32> to vector<8x128xf32>
      %11 = arith.mulf %9, %10 : vector<8x128xf32>
      %12 = vector.broadcast %1 : vector<1x128xf32> to vector<8x128xf32>
      %13 = arith.addf %11, %12 : vector<8x128xf32>
      %c0_11 = arith.constant 0 : index
      %14 = arith.index_cast %arg6 : i32 to index
      %c0_12 = arith.constant 0 : index
      %c0_13 = arith.constant 0 : index
      %15 = vector.load %arg5[%c0_11, %14, %c0_12, %c0_13] : memref<1x8x8x128xf32, #tpu.memory_space<vmem>>, vector<1x1x8x128xf32>
      %16 = vector.shape_cast %15 : vector<1x1x8x128xf32> to vector<8x128xf32>
      %17 = vector.shape_cast %13 : vector<8x128xf32> to vector<1x1x8x128xf32>
      tpu.vector_store %arg5[%c0_11, %14, %c0_12, %c0_13], %17 {strides = array<i32>} : memref<1x8x8x128xf32, #tpu.memory_space<vmem>>, vector<1x1x8x128xf32>,
    }
    %c8_i32_2 = arith.constant 8 : i32
    return
  }
  func.func @transform_0(%arg0: i32, %arg1: i32) -> (i32, i32, i32, i32, i32) {
    %c0_i32 = arith.constant 0 : i32
    %c0_i32_0 = arith.constant 0 : i32
    %c0_i32_1 = arith.constant 0 : i32
    %c0_i32_2 = arith.constant 0 : i32
    return %arg0, %arg1, %c0_i32, %c0_i32_0, %c0_i32_1 : i32, i32, i32, i32, i32
  }
  func.func @transform_1(%arg0: i32, %arg1: i32) -> (i32, i32, i32) {
    %c0_i32 = arith.constant 0 : i32
    %c0_i32_0 = arith.constant 0 : i32
    %c0_i32_1 = arith.constant 0 : i32
    %c0_i32_2 = arith.constant 0 : i32
    return %c0_i32, %c0_i32_0, %c0_i32_1 : i32, i32, i32
  }
  func.func @transform_2(%arg0: i32, %arg1: i32) -> (i32, i32) {
    %c0_i32 = arith.constant 0 : i32
    %c0_i32_0 = arith.constant 0 : i32
    %c0_i32_1 = arith.constant 0 : i32
    return %c0_i32, %c0_i32_0 : i32, i32
  }
  func.func @transform_3(%arg0: i32, %arg1: i32) -> (i32, i32, i32, i32) {
    %c0_i32 = arith.constant 0 : i32
    %c0_i32_0 = arith.constant 0 : i32
    %c0_i32_1 = arith.constant 0 : i32
    return %arg0, %arg1, %c0_i32, %c0_i32_0 : i32, i32, i32, i32
  }
}

module attributes {stable_mosaic.version = 11 : i64} {
  func.func @_fused_tap_conv_kernel(%arg0: i32, %arg1: i32, %arg2: memref<1x1x9x9x128xf32, #tpu.memory_space<vmem>>, %arg3: memref<2x128x128xf32, #tpu.memory_space<vmem>>, %arg4: memref<2x128xf32, #tpu.memory_space<vmem>>, %arg5: memref<1x8x8x128xf32, #tpu.memory_space<vmem>>) attributes {dimension_semantics = [#tpu.dimension_semantics<parallel>, #tpu.dimension_semantics<parallel>], iteration_bounds = array<i64: 2, 1>, scalar_prefetch = 0 : i64, scratch_operands = 0 : i64, tpu.core_type = #tpu.core_type<tc>, window_params = [{transform_indices = @transform_0, window_bounds = array<i64: 1, 1, 9, 9, 128>}, {pipeline_mode = #tpu.pipeline_mode<synchronous>, transform_indices = @transform_1, window_bounds = array<i64: 2, 128, 128>}, {pipeline_mode = #tpu.pipeline_mode<synchronous>, transform_indices = @transform_2, window_bounds = array<i64: 2, 128>}, {transform_indices = @transform_3, window_bounds = array<i64: 1, 8, 8, 128>}]} {
    %c0 = arith.constant 0 : index
    %c0_0 = arith.constant 0 : index
    %0 = vector.load %arg4[%c0, %c0_0] : memref<2x128xf32, #tpu.memory_space<vmem>>, vector<1x128xf32>
    %c1 = arith.constant 1 : index
    %c0_1 = arith.constant 0 : index
    %1 = vector.load %arg4[%c1, %c0_1] : memref<2x128xf32, #tpu.memory_space<vmem>>, vector<1x128xf32>
    %c0_i32 = arith.constant 0 : i32
    %c8_i32 = arith.constant 8 : i32
    %2 = arith.addi %c0_i32, %c8_i32 : i32
    %c1_i32 = arith.constant 1 : i32
    scf.for %arg6 = %c0_i32 to %2 step %c1_i32  : i32 {
      %c0_i32_3 = arith.constant 0 : i32
      %3 = arith.addi %arg6, %c0_i32_3 : i32
      %c0_4 = arith.constant 0 : index
      %c0_5 = arith.constant 0 : index
      %4 = arith.index_cast %3 : i32 to index
      %c0_6 = arith.constant 0 : index
      %c0_7 = arith.constant 0 : index
      %5 = vector.load %arg2[%c0_4, %c0_5, %4, %c0_6, %c0_7] : memref<1x1x9x9x128xf32, #tpu.memory_space<vmem>>, vector<1x1x1x8x128xf32>
      %6 = vector.shape_cast %5 : vector<1x1x1x8x128xf32> to vector<8x128xf32>
      %c0_8 = arith.constant 0 : index
      %c0_9 = arith.constant 0 : index
      %c0_10 = arith.constant 0 : index
      %7 = vector.load %arg3[%c0_8, %c0_9, %c0_10] : memref<2x128x128xf32, #tpu.memory_space<vmem>>, vector<1x128x128xf32>
      %8 = vector.shape_cast %7 : vector<1x128x128xf32> to vector<128x128xf32>
      %cst = arith.constant dense<0.000000e+00> : vector<8x128xf32>
      %9 = tpu.matmul %6, %8, %cst {dimension_numbers = #tpu.dot_dimension_numbers<[1], [0], [0], [1], [0, 0, 1, 1], [], []>} : vector<8x128xf32>, vector<128x128xf32>, vector<8x128xf32> -> vector<8x128xf32>
      %c0_i32_11 = arith.constant 0 : i32
      %10 = arith.addi %arg6, %c0_i32_11 : i32
      %c0_12 = arith.constant 0 : index
      %c0_13 = arith.constant 0 : index
      %11 = arith.index_cast %10 : i32 to index
      %c1_14 = arith.constant 1 : index
      %c0_15 = arith.constant 0 : index
      %12 = vector.load %arg2[%c0_12, %c0_13, %11, %c1_14, %c0_15] : memref<1x1x9x9x128xf32, #tpu.memory_space<vmem>>, vector<1x1x1x8x128xf32>
      %13 = vector.shape_cast %12 : vector<1x1x1x8x128xf32> to vector<8x128xf32>
      %c1_16 = arith.constant 1 : index
      %c0_17 = arith.constant 0 : index
      %c0_18 = arith.constant 0 : index
      %14 = vector.load %arg3[%c1_16, %c0_17, %c0_18] : memref<2x128x128xf32, #tpu.memory_space<vmem>>, vector<1x128x128xf32>
      %15 = vector.shape_cast %14 : vector<1x128x128xf32> to vector<128x128xf32>
      %cst_19 = arith.constant dense<0.000000e+00> : vector<8x128xf32>
      %16 = tpu.matmul %13, %15, %cst_19 {dimension_numbers = #tpu.dot_dimension_numbers<[1], [0], [0], [1], [0, 0, 1, 1], [], []>} : vector<8x128xf32>, vector<128x128xf32>, vector<8x128xf32> -> vector<8x128xf32>
      %17 = arith.addf %9, %16 : vector<8x128xf32>
      %18 = vector.broadcast %0 : vector<1x128xf32> to vector<8x128xf32>
      %19 = arith.mulf %17, %18 : vector<8x128xf32>
      %20 = vector.broadcast %1 : vector<1x128xf32> to vector<8x128xf32>
      %21 = arith.addf %19, %20 : vector<8x128xf32>
      %c0_20 = arith.constant 0 : index
      %22 = arith.index_cast %arg6 : i32 to index
      %c0_21 = arith.constant 0 : index
      %c0_22 = arith.constant 0 : index
      %23 = vector.load %arg5[%c0_20, %22, %c0_21, %c0_22] : memref<1x8x8x128xf32, #tpu.memory_space<vmem>>, vector<1x1x8x128xf32>
      %24 = vector.shape_cast %23 : vector<1x1x8x128xf32> to vector<8x128xf32>
      %25 = vector.shape_cast %21 : vector<8x128xf32> to vector<1x1x8x128xf32>
      tpu.vector_store %arg5[%c0_20, %22, %c0_21, %c0_22], %25 {strides = array<i32>} : memref<1x8x8x128xf32, #tpu.memory_space<vmem>>, vector<1x1x8x128xf32>,
    }
    %c8_i32_2 = arith.constant 8 : i32
    return
  }
  func.func @transform_0(%arg0: i32, %arg1: i32) -> (i32, i32, i32, i32, i32) {
    %c0_i32 = arith.constant 0 : i32
    %c0_i32_0 = arith.constant 0 : i32
    %c0_i32_1 = arith.constant 0 : i32
    %c0_i32_2 = arith.constant 0 : i32
    return %arg0, %arg1, %c0_i32, %c0_i32_0, %c0_i32_1 : i32, i32, i32, i32, i32
  }
  func.func @transform_1(%arg0: i32, %arg1: i32) -> (i32, i32, i32) {
    %c0_i32 = arith.constant 0 : i32
    %c0_i32_0 = arith.constant 0 : i32
    %c0_i32_1 = arith.constant 0 : i32
    %c0_i32_2 = arith.constant 0 : i32
    return %c0_i32, %c0_i32_0, %c0_i32_1 : i32, i32, i32
  }
  func.func @transform_2(%arg0: i32, %arg1: i32) -> (i32, i32) {
    %c0_i32 = arith.constant 0 : i32
    %c0_i32_0 = arith.constant 0 : i32
    %c0_i32_1 = arith.constant 0 : i32
    return %c0_i32, %c0_i32_0 : i32, i32
  }
  func.func @transform_3(%arg0: i32, %arg1: i32) -> (i32, i32, i32, i32) {
    %c0_i32 = arith.constant 0 : i32
    %c0_i32_0 = arith.constant 0 : i32
    %c0_i32_1 = arith.constant 0 : i32
    return %arg0, %arg1, %c0_i32, %c0_i32_0 : i32, i32, i32, i32
  }
}

</mosaic_0001>

<bundles_post_ra>
// kernel: bev_hourglass_forward.13
= control target key start
LH: loop header
LB: loop body
LE: loop exit
PB: predicated region body
PF: predicated region fallthrough
CT: control target
= control target key end

     0   :  { %s2234_s12 = smov 0   ;;  %s2236_s13 = smov 0   ;;  %s2749_s0 = inlined_call_operand.vmem [shape: f32[2,1,18,18,128], index: 0, kind: input, shape index: {}]   ;;  %s2750_s1 = inlined_call_operand.vmem [shape: f32[9,128,128], index: 1, kind: input, shape index: {}]   ;;  %s2751_s2 = inlined_call_operand.vmem [shape: f32[2,128], index: 2, kind: input, shape index: {}]   ;;  %s2752_s3 = inlined_call_operand.vmem [shape: f32[2,16,16,128], index: 3, kind: output, shape index: {}]  }
   0x1   :  { %s2238_s14 = smov 0  }
   0x2 LB: > { %s25_s15 = sadd.s32 1, %s2204_s13  ;;  %p1218_p0 = scmp.ge.s32.totalorder %s2208_s14, 1  ;;  %s2208_s14 = sphi %s2238_s14, %s13_s14   ;;  %s2204_s13 = sphi %s2236_s13, %s2754_s13   ;;  %s2200_s12 = sphi %s2234_s12, %s2753_s12  }
   0x3   : > { %p27_p1 = scmp.ge.s32.totalorder %s25_s15, 2  ;;  %p157_p2 = scmp.lt.s32.totalorder %s2208_s14, 3 }
   0x5   : > { %s2756_s15 = smov (%p27_p1, %s25_s15), 0  ;;  %p158_p3 = pnand %p1218_p0, %p157_p2 }
   0x6   : > { %p190_p4 = scmp.lt.s32.totalorder (!%p158_p3), %s2200_s12, 1  ;;  %v2255_v0 = vld [vmem:[%s2751_s2] ss:$0 sm:$0xff] (!%p158_p3)  ;;  %v2260_v1 = vld [vmem:[%s2751_s2 + $0x1] ss:$0 sm:$0xff] (!%p158_p3)  ;;  %s2272_s28 = smov (!%p158_p3), 0  }
   0x7   : > { %161 = sbr.rel (%p158_p3) target bundleno = 404 (0x194), region = 32 }
   0xe   : > { %s2758_s12 = smov (!%p190_p4, %s2200_s12), 1 }
   0xf   : > { %s2149_s20 = smul.u32 432, %s2758_s12  ;;  %s1367_s21 = sshll.u32 %s2758_s12, 8 }
  0x10   : > { %s2265_s24 = scalar_lea.vmem %s2752_s3, %s1367_s21 }
  0x11   : > { %s2270_s27 = scalar_lea.vmem %s2749_s0, %s2149_s20 }
  0x12 LB: >> { %v1222_v2 = vld [vmem:[%s2750_s1 + $0x80] sm:$0xff]  ;;  %v1223_v3 = vld [vmem:[%s2750_s1 + $0x88] sm:$0xff]  ;;  %v1224_v7 = vld [vmem:[%s2750_s1 + $0x90] sm:$0xff]  ;;  %s218_s5 = smul.u32 24, %s2212_s28  ;;  %s1364_s10 = sshll.u32 %s2212_s28, 4  ;;  %s2212_s28 = sphi %s2272_s28, %s217_s28  }
  0x13   : >> { %v1274_v4 = vld [vmem:[%s2750_s1 + $0x200] sm:$0xff]  ;;  %v1845_v5 = vpack.c.bf16 %v1223_v3, %v1222_v2  ;;  %v1275_v6 = vld [vmem:[%s2750_s1 + $0x208] sm:$0xff]  ;;  %v1225_v8 = vld [vmem:[%s2750_s1 + $0x98] sm:$0xff]  ;;  %s1100_s11 = scalar_lea.vmem %s2265_s24, %s1364_s10  ;;  %s217_s28 = sadd.s32 1, %s2212_s28  }
  0x14   : >> { %v1973_v9 = vpack.c.bf16 %v1275_v6, %v1274_v4  ;;  %v1849_v10 = vpack.c.bf16 %v1225_v8, %v1224_v7  ;;  %v1276_v11 = vld [vmem:[%s2750_s1 + $0x210] sm:$0xff]  ;;  %v1277_v12 = vld [vmem:[%s2750_s1 + $0x218] sm:$0xff]  ;;  %v1226_v13 = vld [vmem:[%s2750_s1 + $0xa0] sm:$0xff]  ;;  %s2327_s17 = scalar_lea.vmem %s2270_s27, %s218_s5  ;;  %p214_p5 = scmp.ge.s32.totalorder %s217_s28, 16  }
  0x15   : >> { %1846 = vmatprep.subr.bf16.mxu1 %v1845_v5  ;;  %v1977_v14 = vpack.c.bf16 %v1277_v12, %v1276_v11  ;;  %v1227_v15 = vld [vmem:[%s2750_s1 + $0xa8] sm:$0xff]  ;;  %v1278_v16 = vld [vmem:[%s2750_s1 + $0x220] sm:$0xff]  ;;  %v1228_v20 = vld [vmem:[%s2750_s1 + $0xb0] sm:$0xff] }
  0x16   : >> { %v1279_v17 = vld [vmem:[%s2750_s1 + $0x228] sm:$0xff]  ;;  %1974 = vmatprep.subr.bf16.mxu0 %v1973_v9  ;;  %1848 = vmatpush3.bf16.msra.mxu1 %v1845_v5  ;;  %v1853_v18 = vpack.c.bf16 %v1227_v15, %v1226_v13  ;;  %v1229_v21 = vld [vmem:[%s2750_s1 + $0xb8] sm:$0xff]  ;;  %v1280_v22 = vld [vmem:[%s2750_s1 + $0x230] sm:$0xff] }
  0x17   : >> { %1976 = vmatpush3.bf16.msra.mxu0 %v1973_v9  ;;  %1850 = vmatprep.subr.bf16.mxu1 %v1849_v10  ;;  %v1981_v19 = vpack.c.bf16 %v1279_v17, %v1278_v16  ;;  %v1281_v23 = vld [vmem:[%s2750_s1 + $0x238] sm:$0xff]  ;;  %v1857_v24 = vpack.c.bf16 %v1229_v21, %v1228_v20  ;;  %v1230_v26 = vld [vmem:[%s2750_s1 + $0xc0] sm:$0xff]  ;;  %v1231_v27 = vld [vmem:[%s2750_s1 + $0xc8] sm:$0xff] }
  0x18   : >> { %1978 = vmatprep.subr.bf16.mxu0 %v1977_v14  ;;  %v1985_v25 = vpack.c.bf16 %v1281_v23, %v1280_v22  ;;  %v238_v28 = vld [vmem:[%s2327_s17 + $0x1] sm:$0xff]  ;;  %v1272_v31 = vld [vmem:[%s2327_s17 + $0x19] sm:$0xff]  ;;  %v1861_v32 = vpack.c.bf16 %v1231_v27, %v1230_v26  ;;  %v1232_v34 = vld [vmem:[%s2750_s1 + $0xd0] sm:$0xff] }
  0x19   : >> { %v1282_v29 = vld [vmem:[%s2750_s1 + $0x240] sm:$0xff]  ;;  %v1283_v30 = vld [vmem:[%s2750_s1 + $0x248] sm:$0xff]  ;;  %1562 = vmatprep.mubr.f32.mxu1 %v238_v28  ;;  %1702 = vmatprep.mubr.f32.mxu0 %v1272_v31  ;;  %v1233_v35 = vld [vmem:[%s2750_s1 + $0xd8] sm:$0xff] }
  0x1a   : >> { %1852 = vmatpush3.bf16.msra.mxu1 %v1849_v10  ;;  %v1989_v33 = vpack.c.bf16 %v1283_v30, %v1282_v29  ;;  %v1284_v36 = vld [vmem:[%s2750_s1 + $0x250] sm:$0xff]  ;;  %v1285_v37 = vld [vmem:[%s2750_s1 + $0x258] sm:$0xff]  ;;  %v1865_v38 = vpack.c.bf16 %v1233_v35, %v1232_v34  ;;  %v1234_v40 = vld [vmem:[%s2750_s1 + $0xe0] sm:$0xff] }
  0x1b   : >> { %1980 = vmatpush3.bf16.msra.mxu0 %v1977_v14  ;;  %1854 = vmatprep.subr.bf16.mxu1 %v1853_v18  ;;  %v1993_v39 = vpack.c.bf16 %v1285_v37, %v1284_v36  ;;  %v1235_v41 = vld [vmem:[%s2750_s1 + $0xe8] sm:$0xff]  ;;  %v1286_v42 = vld [vmem:[%s2750_s1 + $0x260] sm:$0xff]  ;;  %v1236_v46 = vld [vmem:[%s2750_s1 + $0xf0] sm:$0xff] }
  0x1c   : >> { %1982 = vmatprep.subr.bf16.mxu0 %v1981_v19  ;;  %v1287_v43 = vld [vmem:[%s2750_s1 + $0x268] sm:$0xff]  ;;  %v1869_v44 = vpack.c.bf16 %v1235_v41, %v1234_v40  ;;  %v1237_v47 = vld [vmem:[%s2750_s1 + $0xf8] sm:$0xff]  ;;  %v1288_v48 = vld [vmem:[%s2750_s1 + $0x270] sm:$0xff] }
  0x1d   : >> { %v1997_v45 = vpack.c.bf16 %v1287_v43, %v1286_v42  ;;  %v1289_v49 = vld [vmem:[%s2750_s1 + $0x278] sm:$0xff]  ;;  %v1873_v50 = vpack.c.bf16 %v1237_v47, %v1236_v46  ;;  %v222_v52 = vld [vmem:[%s2750_s1] sm:$0xff]  ;;  %v223_v53 = vld [vmem:[%s2750_s1 + $0x8] sm:$0xff] }
  0x1e   : >> { %1856 = vmatpush3.bf16.msra.mxu1 %v1853_v18  ;;  %v2001_v51 = vpack.c.bf16 %v1289_v49, %v1288_v48  ;;  %v1292_v54 = vld [vmem:[%s2750_s1 + $0x280] sm:$0xff]  ;;  %v1293_v55 = vld [vmem:[%s2750_s1 + $0x288] sm:$0xff]  ;;  %v1877_v56 = vpack.c.bf16 %v223_v53, %v222_v52  ;;  %v224_v58 = vld [vmem:[%s2750_s1 + $0x10] sm:$0xff] }
  0x1f   : >> { %1984 = vmatpush3.bf16.msra.mxu0 %v1981_v19  ;;  %1858 = vmatprep.subr.bf16.mxu1 %v1857_v24  ;;  %v2005_v57 = vpack.c.bf16 %v1293_v55, %v1292_v54  ;;  %v225_v59 = vld [vmem:[%s2750_s1 + $0x18] sm:$0xff]  ;;  %v1294_v60 = vld [vmem:[%s2750_s1 + $0x290] sm:$0xff]  ;;  %v1273_v63 = vld [vmem:[%s2327_s17 + $0x21] sm:$0xff] }
  0x20   : >> { %1986 = vmatprep.subr.bf16.mxu0 %v1985_v25  ;;  %v1295_v61 = vld [vmem:[%s2750_s1 + $0x298] sm:$0xff]  ;;  %v239_v62 = vld [vmem:[%s2327_s17 + $0x9] sm:$0xff]  ;;  %v1881_v2 = vpack.c.bf16 %v225_v59, %v224_v58  ;;  %v226_v4 = vld [vmem:[%s2750_s1 + $0x20] sm:$0xff] }
  0x21   : >> { %v2009_v3 = vpack.c.bf16 %v1295_v61, %v1294_v60  ;;  %v227_v5 = vld [vmem:[%s2750_s1 + $0x28] sm:$0xff]  ;;  %v1296_v6 = vld [vmem:[%s2750_s1 + $0x2a0] sm:$0xff]  ;;  %v228_v12 = vld [vmem:[%s2750_s1 + $0x30] sm:$0xff] }
  0x22   : >> { %1860 = vmatpush3.bf16.msra.mxu1 %v1857_v24  ;;  %v1297_v7 = vld [vmem:[%s2750_s1 + $0x2a8] sm:$0xff]  ;;  %v220_v8 = vld [vmem:[%s2327_s17] sm:$0xff]  ;;  %v1885_v10 = vpack.c.bf16 %v227_v5, %v226_v4  ;;  %v229_v13 = vld [vmem:[%s2750_s1 + $0x38] sm:$0xff] }
  0x23   : >> { %1988 = vmatpush3.bf16.msra.mxu0 %v1985_v25  ;;  %1862 = vmatprep.subr.bf16.mxu1 %v1861_v32  ;;  %v1290_v9 = vld [vmem:[%s2327_s17 + $0x1a] sm:$0xff]  ;;  %v2013_v11 = vpack.c.bf16 %v1297_v7, %v1296_v6  ;;  %v1298_v14 = vld [vmem:[%s2750_s1 + $0x2b0] sm:$0xff]  ;;  %v1889_v16 = vpack.c.bf16 %v229_v13, %v228_v12  ;;  %v231_v19 = vld [vmem:[%s2750_s1 + $0x48] sm:$0xff] }
  0x24   : >> { %1990 = vmatprep.subr.bf16.mxu0 %v1989_v33  ;;  %v1299_v15 = vld [vmem:[%s2750_s1 + $0x2b8] sm:$0xff]  ;;  %v230_v18 = vld [vmem:[%s2750_s1 + $0x40] sm:$0xff]  ;;  %v1301_v21 = vld [vmem:[%s2750_s1 + $0x2c8] sm:$0xff] }
  0x25   : >> { %v2017_v17 = vpack.c.bf16 %v1299_v15, %v1298_v14  ;;  %v1300_v20 = vld [vmem:[%s2750_s1 + $0x2c0] sm:$0xff]  ;;  %v1893_v22 = vpack.c.bf16 %v231_v19, %v230_v18  ;;  %v232_v24 = vld [vmem:[%s2750_s1 + $0x50] sm:$0xff]  ;;  %v233_v25 = vld [vmem:[%s2750_s1 + $0x58] sm:$0xff] }
  0x26   : >> { %1864 = vmatpush3.bf16.msra.mxu1 %v1861_v32  ;;  %v2021_v23 = vpack.c.bf16 %v1301_v21, %v1300_v20  ;;  %v1302_v26 = vld [vmem:[%s2750_s1 + $0x2d0] sm:$0xff]  ;;  %v1303_v27 = vld [vmem:[%s2750_s1 + $0x2d8] sm:$0xff]  ;;  %v1897_v28 = vpack.c.bf16 %v233_v25, %v232_v24  ;;  %v234_v30 = vld [vmem:[%s2750_s1 + $0x60] sm:$0xff] }
  0x27   : >> { %1992 = vmatpush3.bf16.msra.mxu0 %v1989_v33  ;;  %1866 = vmatprep.subr.bf16.mxu1 %v1865_v38  ;;  %v2025_v29 = vpack.c.bf16 %v1303_v27, %v1302_v26  ;;  %v235_v31 = vld [vmem:[%s2750_s1 + $0x68] sm:$0xff]  ;;  %v1304_v32 = vld [vmem:[%s2750_s1 + $0x2e0] sm:$0xff]  ;;  %v236_v36 = vld [vmem:[%s2750_s1 + $0x70] sm:$0xff] }
  0x28   : >> { %1994 = vmatprep.subr.bf16.mxu0 %v1993_v39  ;;  %v1305_v33 = vld [vmem:[%s2750_s1 + $0x2e8] sm:$0xff]  ;;  %v1901_v34 = vpack.c.bf16 %v235_v31, %v234_v30  ;;  %v237_v37 = vld [vmem:[%s2750_s1 + $0x78] sm:$0xff]  ;;  %v1238_v42 = vld [vmem:[%s2750_s1 + $0x100] sm:$0xff] }
  0x29   : >> { %v2029_v35 = vpack.c.bf16 %v1305_v33, %v1304_v32  ;;  %v1905_v40 = vpack.c.bf16 %v237_v37, %v236_v36  ;;  %v1239_v43 = vld [vmem:[%s2750_s1 + $0x108] sm:$0xff]  ;;  %v1240_v48 = vld [vmem:[%s2750_s1 + $0x110] sm:$0xff]  ;;  %v1241_v49 = vld [vmem:[%s2750_s1 + $0x118] sm:$0xff] }
  0x2a   : >> { %1868 = vmatpush3.bf16.msra.mxu1 %v1865_v38  ;;  %v1306_v38 = vld [vmem:[%s2750_s1 + $0x2f0] sm:$0xff]  ;;  %v1909_v46 = vpack.c.bf16 %v1239_v43, %v1238_v42  ;;  %v221_v52 = vld [vmem:[%s2327_s17 + $0x8] sm:$0xff]  ;;  %v1913_v54 = vpack.c.bf16 %v1241_v49, %v1240_v48  ;;  %v1314_v58 = vld [vmem:[%s2750_s1 + $0x320] sm:$0xff] }
  0x2b   : >> { %1996 = vmatpush3.bf16.msra.mxu0 %v1993_v39  ;;  %1870 = vmatprep.subr.bf16.mxu1 %v1869_v44  ;;  %v1307_v39 = vld [vmem:[%s2750_s1 + $0x2f8] sm:$0xff]  ;;  %v1291_v53 = vld [vmem:[%s2327_s17 + $0x22] sm:$0xff]  ;;  %v1308_v61 = vld [vmem:[%s2327_s17 + $0x30] sm:$0xff] }
  0x2c   : >> { %1998 = vmatprep.subr.bf16.mxu0 %v1997_v45  ;;  %v2033_v41 = vpack.c.bf16 %v1307_v39, %v1306_v38  ;;  %v1315_v59 = vld [vmem:[%s2750_s1 + $0x328] sm:$0xff]  ;;  %v1316_v4 = vld [vmem:[%s2750_s1 + $0x330] sm:$0xff]  ;;  %v1317_v5 = vld [vmem:[%s2750_s1 + $0x338] sm:$0xff] }
  0x2d   : >> { %v407_v60 = vld [vmem:[%s2327_s17 + $0x2] sm:$0xff]  ;;  %v2049_v7 = vpack.c.bf16 %v1317_v5, %v1316_v4  ;;  %v1248_v14 = vld [vmem:[%s2750_s1 + $0x150] sm:$0xff]  ;;  %v1249_v15 = vld [vmem:[%s2750_s1 + $0x158] sm:$0xff] }
  0x2e   : >> { %1872 = vmatpush3.bf16.msra.mxu1 %v1869_v44  ;;  %v1310_v44 = vld [vmem:[%s2750_s1 + $0x300] sm:$0xff]  ;;  %v1929_v18 = vpack.c.bf16 %v1249_v15, %v1248_v14  ;;  %v1251_v21 = vld [vmem:[%s2750_s1 + $0x168] sm:$0xff]  ;;  %v1252_v26 = vld [vmem:[%s2750_s1 + $0x170] sm:$0xff] }
  0x2f   : >> { %2000 = vmatpush3.bf16.msra.mxu0 %v1997_v45  ;;  %1874 = vmatprep.subr.bf16.mxu1 %v1873_v50  ;;  %v1311_v45 = vld [vmem:[%s2750_s1 + $0x308] sm:$0xff]  ;;  %v1250_v20 = vld [vmem:[%s2750_s1 + $0x160] sm:$0xff]  ;;  %v1253_v27 = vld [vmem:[%s2750_s1 + $0x178] sm:$0xff] }
  0x30   : >> { %2002 = vmatprep.subr.bf16.mxu0 %v2001_v51  ;;  %v2037_v47 = vpack.c.bf16 %v1311_v45, %v1310_v44  ;;  %v1933_v24 = vpack.c.bf16 %v1251_v21, %v1250_v20  ;;  %v1937_v30 = vpack.c.bf16 %v1253_v27, %v1252_v26  ;;  %v1256_v32 = vld [vmem:[%s2750_s1 + $0x180] sm:$0xff]  ;;  %v1257_v33 = vld [vmem:[%s2750_s1 + $0x188] sm:$0xff]  ;;  %v1258_v38 = vld [vmem:[%s2750_s1 + $0x190] sm:$0xff] }
  0x31   : >> { %v1941_v36 = vpack.c.bf16 %v1257_v33, %v1256_v32  ;;  %v1259_v39 = vld [vmem:[%s2750_s1 + $0x198] sm:$0xff]  ;;  %v408_v42 = vld [vmem:[%s2327_s17 + $0xa] sm:$0xff]  ;;  %v1332_v48 = vld [vmem:[%s2750_s1 + $0x3a0] sm:$0xff] }
  0x32   : >> { %1876 = vmatpush3.bf16.msra.mxu1 %v1873_v50  ;;  %v1312_v50 = vld [vmem:[%s2750_s1 + $0x310] sm:$0xff]  ;;  %v1309_v43 = vld [vmem:[%s2327_s17 + $0x38] sm:$0xff]  ;;  %v1945_v44 = vpack.c.bf16 %v1259_v39, %v1258_v38  ;;  %v1333_v49 = vld [vmem:[%s2750_s1 + $0x3a8] sm:$0xff] }
  0x33   : >> { %2004 = vmatpush3.bf16.msra.mxu0 %v2001_v51  ;;  %1878 = vmatprep.subr.bf16.mxu1 %v1877_v56  ;;  %v1313_v51 = vld [vmem:[%s2750_s1 + $0x318] sm:$0xff]  ;;  %v1266_v4 = vld [vmem:[%s2750_s1 + $0x1d0] sm:$0xff]  ;;  %v1255_v27 = vld [vmem:[%s2327_s17 + $0x20] sm:$0xff] }
  0x34   : >> { %2006 = vmatprep.subr.bf16.mxu0 %v2005_v57  ;;  %v2041_v55 = vpack.c.bf16 %v1313_v51, %v1312_v50  ;;  %v1254_v50 = vld [vmem:[%s2327_s17 + $0x18] sm:$0xff]  ;;  %v1351_v32 = vld [vmem:[%s2750_s1 + $0x428] sm:$0xff] }
  0x35   : >> { %1563 = vmatmul.mubr.f32.vlgmr.msra.gmra.mrb[0].mxu1 %v239_v62  ;;  %v1326_v51 = vld [vmem:[%s2327_s17 + $0x31] sm:$0xff]  ;;  %v1355_v38 = vld [vmem:[%s2750_s1 + $0x448] sm:$0xff] }
  0x36   : >> { %1880 = vmatpush3.bf16.msra.mxu1 %v1877_v56  ;;  %1703 = vmatmul.mubr.f32.vlgmr.msra.gmra.mrb[0].mxu0 %v1273_v63  ;;  %v1242_v56 = vld [vmem:[%s2750_s1 + $0x120] sm:$0xff]  ;;  %v2045_v63 = vpack.c.bf16 %v1315_v59, %v1314_v58  ;;  %v1267_v5 = vld [vmem:[%s2750_s1 + $0x1d8] sm:$0xff] }
  0x37   : >> { %2008 = vmatpush3.bf16.msra.mxu0 %v2005_v57  ;;  %1882 = vmatprep.subr.bf16.mxu1 %v1881_v2  ;;  %v1243_v57 = vld [vmem:[%s2750_s1 + $0x128] sm:$0xff]  ;;  %v1349_v26 = vld [vmem:[%s2750_s1 + $0x418] sm:$0xff] }
  0x38   : >> { %2010 = vmatprep.subr.bf16.mxu0 %v2009_v3  ;;  %1597 = vmatprep.mubr.f32.mxu1 %v220_v8  ;;  %v1917_v62 = vpack.c.bf16 %v1243_v57, %v1242_v56  ;;  %v1246_v8 = vld [vmem:[%s2750_s1 + $0x140] sm:$0xff]  ;;  %v1334_v56 = vld [vmem:[%s2750_s1 + $0x3b0] sm:$0xff]  ;;  %v1335_v57 = vld [vmem:[%s2750_s1 + $0x3b8] sm:$0xff] }
  0x39   : >> { %1737 = vmatprep.mubr.f32.mxu0 %v1290_v9  ;;  %v1247_v9 = vld [vmem:[%s2750_s1 + $0x148] sm:$0xff]  ;;  %v2081_v59 = vpack.c.bf16 %v1335_v57, %v1334_v56 }
  0x3a   : >> { %1884 = vmatpush3.bf16.msra.mxu1 %v1881_v2  ;;  %v1244_v2 = vld [vmem:[%s2750_s1 + $0x130] sm:$0xff]  ;;  %v1925_v12 = vpack.c.bf16 %v1247_v9, %v1246_v8  ;;  %v1961_v8 = vpack.c.bf16 %v1267_v5, %v1266_v4 }
  0x3b   : >> { %2012 = vmatpush3.bf16.msra.mxu0 %v2009_v3  ;;  %1886 = vmatprep.subr.bf16.mxu1 %v1885_v10  ;;  %v1245_v3 = vld [vmem:[%s2750_s1 + $0x138] sm:$0xff] }
  0x3c   : >> { %2014 = vmatprep.subr.bf16.mxu0 %v2013_v11  ;;  %v1921_v6 = vpack.c.bf16 %v1245_v3, %v1244_v2 }
  0x3e   : >> { %1888 = vmatpush3.bf16.msra.mxu1 %v1885_v10  ;;  %v1318_v10 = vld [vmem:[%s2750_s1 + $0x340] sm:$0xff] }
  0x3f   : >> { %2016 = vmatpush3.bf16.msra.mxu0 %v2013_v11  ;;  %1890 = vmatprep.subr.bf16.mxu1 %v1889_v16  ;;  %v1319_v11 = vld [vmem:[%s2750_s1 + $0x348] sm:$0xff] }
  0x40   : >> { %2018 = vmatprep.subr.bf16.mxu0 %v2017_v17  ;;  %v2053_v13 = vpack.c.bf16 %v1319_v11, %v1318_v10  ;;  %v1268_v10 = vld [vmem:[%s2750_s1 + $0x1e0] sm:$0xff]  ;;  %v1269_v11 = vld [vmem:[%s2750_s1 + $0x1e8] sm:$0xff] }
  0x41   : >> { %v1965_v14 = vpack.c.bf16 %v1269_v11, %v1268_v10 }
  0x42   : >> { %1892 = vmatpush3.bf16.msra.mxu1 %v1889_v16  ;;  %v1320_v16 = vld [vmem:[%s2750_s1 + $0x350] sm:$0xff] }
  0x43   : >> { %2020 = vmatpush3.bf16.msra.mxu0 %v2017_v17  ;;  %1894 = vmatprep.subr.bf16.mxu1 %v1893_v22  ;;  %v1321_v17 = vld [vmem:[%s2750_s1 + $0x358] sm:$0xff] }
  0x44   : >> { %2022 = vmatprep.subr.bf16.mxu0 %v2021_v23  ;;  %v2057_v19 = vpack.c.bf16 %v1321_v17, %v1320_v16  ;;  %v1270_v16 = vld [vmem:[%s2750_s1 + $0x1f0] sm:$0xff]  ;;  %v1271_v17 = vld [vmem:[%s2750_s1 + $0x1f8] sm:$0xff] }
  0x45   : >> { %v1969_v20 = vpack.c.bf16 %v1271_v17, %v1270_v16 }
  0x46   : >> { %1896 = vmatpush3.bf16.msra.mxu1 %v1893_v22  ;;  %v1322_v22 = vld [vmem:[%s2750_s1 + $0x360] sm:$0xff] }
  0x47   : >> { %2024 = vmatpush3.bf16.msra.mxu0 %v2021_v23  ;;  %1898 = vmatprep.subr.bf16.mxu1 %v1897_v28  ;;  %v1323_v23 = vld [vmem:[%s2750_s1 + $0x368] sm:$0xff] }
  0x48   : >> { %2026 = vmatprep.subr.bf16.mxu0 %v2025_v29  ;;  %v2061_v25 = vpack.c.bf16 %v1323_v23, %v1322_v22  ;;  %v1346_v22 = vld [vmem:[%s2750_s1 + $0x400] sm:$0xff]  ;;  %v1347_v23 = vld [vmem:[%s2750_s1 + $0x408] sm:$0xff] }
  0x4a   : >> { %1900 = vmatpush3.bf16.msra.mxu1 %v1897_v28  ;;  %v1324_v28 = vld [vmem:[%s2750_s1 + $0x370] sm:$0xff] }
  0x4b   : >> { %2028 = vmatpush3.bf16.msra.mxu0 %v2025_v29  ;;  %1902 = vmatprep.subr.bf16.mxu1 %v1901_v34  ;;  %v1325_v29 = vld [vmem:[%s2750_s1 + $0x378] sm:$0xff] }
  0x4c   : >> { %2030 = vmatprep.subr.bf16.mxu0 %v2029_v35  ;;  %v2065_v31 = vpack.c.bf16 %v1325_v29, %v1324_v28  ;;  %v1327_v28 = vld [vmem:[%s2327_s17 + $0x39] sm:$0xff] }
  0x4e   : >> { %1904 = vmatpush3.bf16.msra.mxu1 %v1901_v34  ;;  %v1328_v34 = vld [vmem:[%s2750_s1 + $0x380] sm:$0xff] }
  0x4f   : >> { %2032 = vmatpush3.bf16.msra.mxu0 %v2029_v35  ;;  %1906 = vmatprep.subr.bf16.mxu1 %v1905_v40  ;;  %v1329_v35 = vld [vmem:[%s2750_s1 + $0x388] sm:$0xff] }
  0x50   : >> { %2034 = vmatprep.subr.bf16.mxu0 %v2033_v41  ;;  %v2069_v37 = vpack.c.bf16 %v1329_v35, %v1328_v34  ;;  %v1352_v34 = vld [vmem:[%s2750_s1 + $0x430] sm:$0xff]  ;;  %v1353_v35 = vld [vmem:[%s2750_s1 + $0x438] sm:$0xff] }
  0x52   : >> { %1908 = vmatpush3.bf16.msra.mxu1 %v1905_v40  ;;  %v1330_v40 = vld [vmem:[%s2750_s1 + $0x390] sm:$0xff] }
  0x53   : >> { %2036 = vmatpush3.bf16.msra.mxu0 %v2033_v41  ;;  %1910 = vmatprep.subr.bf16.mxu1 %v1909_v46  ;;  %v1331_v41 = vld [vmem:[%s2750_s1 + $0x398] sm:$0xff] }
  0x54   : >> { %2038 = vmatprep.subr.bf16.mxu0 %v2037_v47  ;;  %v2073_v45 = vpack.c.bf16 %v1331_v41, %v1330_v40  ;;  %v1356_v40 = vld [vmem:[%s2750_s1 + $0x450] sm:$0xff]  ;;  %v1357_v41 = vld [vmem:[%s2750_s1 + $0x458] sm:$0xff] }
  0x55   : >> { %1598 = vmatmul.mubr.f32.vlgmr.msra.gmra.mrb[0].mxu1 %v221_v52 }
  0x56   : >> { %1912 = vmatpush3.bf16.msra.mxu1 %v1909_v46  ;;  %1738 = vmatmul.mubr.f32.vlgmr.msra.gmra.mrb[0].mxu0 %v1291_v53  ;;  %v1260_v46 = vld [vmem:[%s2750_s1 + $0x1a0] sm:$0xff]  ;;  %v2077_v53 = vpack.c.bf16 %v1333_v49, %v1332_v48 }
  0x57   : >> { %2040 = vmatpush3.bf16.msra.mxu0 %v2037_v47  ;;  %1914 = vmatprep.subr.bf16.mxu1 %v1913_v54  ;;  %v1261_v47 = vld [vmem:[%s2750_s1 + $0x1a8] sm:$0xff]  ;;  %v1345_v49 = vld [vmem:[%s2327_s17 + $0x3a] sm:$0xff] }
  0x58   : >> { %2042 = vmatprep.subr.bf16.mxu0 %v2041_v55  ;;  %1632 = vmatprep.mubr.f32.mxu1 %v407_v60  ;;  %v1949_v52 = vpack.c.bf16 %v1261_v47, %v1260_v46  ;;  %v1264_v60 = vld [vmem:[%s2750_s1 + $0x1c0] sm:$0xff]  ;;  %v1360_v46 = vld [vmem:[%s2750_s1 + $0x470] sm:$0xff]  ;;  %v1361_v47 = vld [vmem:[%s2750_s1 + $0x478] sm:$0xff] }
  0x59   : >> { %1772 = vmatprep.mubr.f32.mxu0 %v1308_v61  ;;  %v1265_v61 = vld [vmem:[%s2750_s1 + $0x1c8] sm:$0xff]  ;;  %v2129_v48 = vpack.c.bf16 %v1361_v47, %v1360_v46 }
  0x5a   : >> { %1916 = vmatpush3.bf16.msra.mxu1 %v1913_v54  ;;  %v1262_v54 = vld [vmem:[%s2750_s1 + $0x1b0] sm:$0xff]  ;;  %v1957_v2 = vpack.c.bf16 %v1265_v61, %v1264_v60 }
  0x5b   : >> { %2044 = vmatpush3.bf16.msra.mxu0 %v2041_v55  ;;  %1918 = vmatprep.subr.bf16.mxu1 %v1917_v62  ;;  %v1263_v55 = vld [vmem:[%s2750_s1 + $0x1b8] sm:$0xff] }
  0x5c   : >> { %2046 = vmatprep.subr.bf16.mxu0 %v2045_v63  ;;  %v1953_v58 = vpack.c.bf16 %v1263_v55, %v1262_v54 }
  0x5e   : >> { %1920 = vmatpush3.bf16.msra.mxu1 %v1917_v62  ;;  %v1336_v62 = vld [vmem:[%s2750_s1 + $0x3c0] sm:$0xff] }
  0x5f   : >> { %2048 = vmatpush3.bf16.msra.mxu0 %v2045_v63  ;;  %1922 = vmatprep.subr.bf16.mxu1 %v1921_v6  ;;  %v1337_v63 = vld [vmem:[%s2750_s1 + $0x3c8] sm:$0xff] }
  0x60   : >> { %2050 = vmatprep.subr.bf16.mxu0 %v2049_v7  ;;  %v2085_v3 = vpack.c.bf16 %v1337_v63, %v1336_v62 }
  0x62   : >> { %1924 = vmatpush3.bf16.msra.mxu1 %v1921_v6  ;;  %v1338_v6 = vld [vmem:[%s2750_s1 + $0x3d0] sm:$0xff] }
  0x63   : >> { %2052 = vmatpush3.bf16.msra.mxu0 %v2049_v7  ;;  %1926 = vmatprep.subr.bf16.mxu1 %v1925_v12  ;;  %v1339_v7 = vld [vmem:[%s2750_s1 + $0x3d8] sm:$0xff] }
  0x64   : >> { %2054 = vmatprep.subr.bf16.mxu0 %v2053_v13  ;;  %v2089_v9 = vpack.c.bf16 %v1339_v7, %v1338_v6 }
  0x66   : >> { %1928 = vmatpush3.bf16.msra.mxu1 %v1925_v12  ;;  %v1340_v12 = vld [vmem:[%s2750_s1 + $0x3e0] sm:$0xff] }
  0x67   : >> { %2056 = vmatpush3.bf16.msra.mxu0 %v2053_v13  ;;  %1930 = vmatprep.subr.bf16.mxu1 %v1929_v18  ;;  %v1341_v13 = vld [vmem:[%s2750_s1 + $0x3e8] sm:$0xff] }
  0x68   : >> { %2058 = vmatprep.subr.bf16.mxu0 %v2057_v19  ;;  %v2093_v15 = vpack.c.bf16 %v1341_v13, %v1340_v12 }
  0x6a   : >> { %1932 = vmatpush3.bf16.msra.mxu1 %v1929_v18  ;;  %v1342_v18 = vld [vmem:[%s2750_s1 + $0x3f0] sm:$0xff] }
  0x6b   : >> { %2060 = vmatpush3.bf16.msra.mxu0 %v2057_v19  ;;  %1934 = vmatprep.subr.bf16.mxu1 %v1933_v24  ;;  %v1343_v19 = vld [vmem:[%s2750_s1 + $0x3f8] sm:$0xff] }
  0x6c   : >> { %2062 = vmatprep.subr.bf16.mxu0 %v2061_v25  ;;  %v2097_v21 = vpack.c.bf16 %v1343_v19, %v1342_v18 }
  0x6e   : >> { %1936 = vmatpush3.bf16.msra.mxu1 %v1933_v24  ;;  %v2101_v24 = vpack.c.bf16 %v1347_v23, %v1346_v22 }
  0x6f   : >> { %2064 = vmatpush3.bf16.msra.mxu0 %v2061_v25  ;;  %1938 = vmatprep.subr.bf16.mxu1 %v1937_v30  ;;  %v1348_v25 = vld [vmem:[%s2750_s1 + $0x410] sm:$0xff] }
  0x70   : >> { %2066 = vmatprep.subr.bf16.mxu0 %v2065_v31  ;;  %v2105_v29 = vpack.c.bf16 %v1349_v26, %v1348_v25 }
  0x72   : >> { %1940 = vmatpush3.bf16.msra.mxu1 %v1937_v30  ;;  %v1344_v30 = vld [vmem:[%s2327_s17 + $0x32] sm:$0xff] }
  0x73   : >> { %2068 = vmatpush3.bf16.msra.mxu0 %v2065_v31  ;;  %1942 = vmatprep.subr.bf16.mxu1 %v1941_v36  ;;  %v1350_v31 = vld [vmem:[%s2750_s1 + $0x420] sm:$0xff] }
  0x74   : >> { %2070 = vmatprep.subr.bf16.mxu0 %v2069_v37  ;;  %v2109_v33 = vpack.c.bf16 %v1351_v32, %v1350_v31 }
  0x75   : >> { %1633 = vmatmul.mubr.f32.vlgmr.msra.gmra.mrb[0].mxu1 %v408_v42  ;;  %v2121_v42 = vpack.c.bf16 %v1357_v41, %v1356_v40 }
  0x76   : >> { %1944 = vmatpush3.bf16.msra.mxu1 %v1941_v36  ;;  %1773 = vmatmul.mubr.f32.vlgmr.msra.gmra.mrb[0].mxu0 %v1309_v43  ;;  %v2113_v36 = vpack.c.bf16 %v1353_v35, %v1352_v34  ;;  %v1358_v43 = vld [vmem:[%s2750_s1 + $0x460] sm:$0xff] }
  0x77   : >> { %2072 = vmatpush3.bf16.msra.mxu0 %v2069_v37  ;;  %1946 = vmatprep.subr.bf16.mxu1 %v1945_v44  ;;  %v1354_v37 = vld [vmem:[%s2750_s1 + $0x440] sm:$0xff] }
  0x78   : >> { %2074 = vmatprep.subr.bf16.mxu0 %v2073_v45  ;;  %1667 = vmatprep.mubr.f32.mxu1 %v1254_v50  ;;  %v2117_v39 = vpack.c.bf16 %v1355_v38, %v1354_v37 }
  0x79   : >> { %1807 = vmatprep.mubr.f32.mxu0 %v1326_v51 }
  0x7a   : >> { %1948 = vmatpush3.bf16.msra.mxu1 %v1945_v44  ;;  %v1359_v44 = vld [vmem:[%s2750_s1 + $0x468] sm:$0xff] }
  0x7b   : >> { %2076 = vmatpush3.bf16.msra.mxu0 %v2073_v45  ;;  %1950 = vmatprep.subr.bf16.mxu1 %v1949_v52  ;;  %v2125_v45 = vpack.c.bf16 %v1359_v44, %v1358_v43 }
  0x7c   : >> { %2078 = vmatprep.subr.bf16.mxu0 %v2077_v53 }
  0x7e   : >> { %1952 = vmatpush3.bf16.msra.mxu1 %v1949_v52 }
  0x7f   : >> { %2080 = vmatpush3.bf16.msra.mxu0 %v2077_v53  ;;  %1954 = vmatprep.subr.bf16.mxu1 %v1953_v58 }
  0x80   : >> { %2082 = vmatprep.subr.bf16.mxu0 %v2081_v59 }
  0x82   : >> { %1956 = vmatpush3.bf16.msra.mxu1 %v1953_v58 }
  0x83   : >> { %2084 = vmatpush3.bf16.msra.mxu0 %v2081_v59  ;;  %1958 = vmatprep.subr.bf16.mxu1 %v1957_v2 }
  0x84   : >> { %2086 = vmatprep.subr.bf16.mxu0 %v2085_v3 }
  0x86   : >> { %1960 = vmatpush3.bf16.msra.mxu1 %v1957_v2 }
  0x87   : >> { %2088 = vmatpush3.bf16.msra.mxu0 %v2085_v3  ;;  %1962 = vmatprep.subr.bf16.mxu1 %v1961_v8 }
  0x88   : >> { %2090 = vmatprep.subr.bf16.mxu0 %v2089_v9 }
  0x8a   : >> { %1964 = vmatpush3.bf16.msra.mxu1 %v1961_v8 }
  0x8b   : >> { %2092 = vmatpush3.bf16.msra.mxu0 %v2089_v9  ;;  %1966 = vmatprep.subr.bf16.mxu1 %v1965_v14 }
  0x8c   : >> { %2094 = vmatprep.subr.bf16.mxu0 %v2093_v15 }
  0x8e   : >> { %1968 = vmatpush3.bf16.msra.mxu1 %v1965_v14 }
  0x8f   : >> { %2096 = vmatpush3.bf16.msra.mxu0 %v2093_v15  ;;  %1970 = vmatprep.subr.bf16.mxu1 %v1969_v20 }
  0x90   : >> { %2098 = vmatprep.subr.bf16.mxu0 %v2097_v21 }
  0x92   : >> { %1972 = vmatpush3.bf16.msra.mxu1 %v1969_v20 }
  0x93   : >> { %2100 = vmatpush3.bf16.msra.mxu0 %v2097_v21 }
  0x94   : >> { %2102 = vmatprep.subr.bf16.mxu0 %v2101_v24 }
  0x95   : >> { %1668 = vmatmul.mubr.f32.vlgmr.msra.gmra.mrb[0].mxu1 %v1255_v27 }
  0x96   : >> { %1808 = vmatmul.mubr.f32.vlgmr.msra.gmra.mrb[0].mxu0 %v1327_v28 }
  0x97   : >> { %2104 = vmatpush3.bf16.msra.mxu0 %v2101_v24  ;;  %1842 = vmatprep.mubr.f32.mxu0 %v1344_v30 }
  0x98   : >> { %2106 = vmatprep.subr.bf16.mxu0 %v2105_v29 }
  0x9b   : >> { %2108 = vmatpush3.bf16.msra.mxu0 %v2105_v29 }
  0x9c   : >> { %2110 = vmatprep.subr.bf16.mxu0 %v2109_v33 }
  0x9f   : >> { %2112 = vmatpush3.bf16.msra.mxu0 %v2109_v33 }
  0xa0   : >> { %2114 = vmatprep.subr.bf16.mxu0 %v2113_v36 }
  0xa3   : >> { %2116 = vmatpush3.bf16.msra.mxu0 %v2113_v36 }
  0xa4   : >> { %2118 = vmatprep.subr.bf16.mxu0 %v2117_v39 }
  0xa7   : >> { %2120 = vmatpush3.bf16.msra.mxu0 %v2117_v39 }
  0xa8   : >> { %2122 = vmatprep.subr.bf16.mxu0 %v2121_v42 }
  0xab   : >> { %2124 = vmatpush3.bf16.msra.mxu0 %v2121_v42 }
  0xac   : >> { %2126 = vmatprep.subr.bf16.mxu0 %v2125_v45 }
  0xaf   : >> { %2128 = vmatpush3.bf16.msra.mxu0 %v2125_v45 }
  0xb0   : >> { %2130 = vmatprep.subr.bf16.mxu0 %v2129_v48 }
  0xb3   : >> { %2132 = vmatpush3.bf16.msra.mxu0 %v2129_v48 }
  0xb6   : >> { %1843 = vmatmul.mubr.f32.vlgmr.msra.gmra.mrb[0].mxu0 %v1345_v49 }
 0x168   : >> { %v1669_v50 = vpop.f32.mrb[0].mxu1 }
 0x169   : >> { %v591_v51 = vpop.f32.mrb[1].mxu1 }
 0x189   : >> { %v1844_v52 = vpop.f32.mrb[0].mxu0 }
 0x18a   : >> { %v2133_v53 = vadd.f32 %v1844_v52, %v1669_v50  ;;  %v1074_v54 = vpop.f32.mrb[1].mxu0 }
 0x18b   : >> { %v2134_v55 = vadd.f32 %v1074_v54, %v591_v51 }
 0x18c   : >> { %v1090_v56 = vmul.f32 %v2133_v53, %v2255_v0 }
 0x18d   : >> { %v1089_v57 = vmul.f32 %v2134_v55, %v2255_v0  ;;  %216 = sbr.rel (!%p214_p5) target bundleno = 18 (0x12), region = 81 }
 0x18e   : >> { %v1096_v58 = vadd.f32 %v2260_v1, %v1090_v56 }
 0x18f   : >> { %v1095_v59 = vadd.f32 %v2260_v1, %v1089_v57 }
 0x190   : >> { %v1098_v60 = vmax.f32 %v1096_v58, 0.0 }
 0x191   : >> { %v1097_v61 = vmax.f32 %v1095_v59, 0.0 }
 0x192   : >> { %1102 = vst [vmem:[%s1100_s11 + $0x8] sm:$0xff] %v1098_v60 }
 0x193   : >> { %1101 = vst [vmem:[%s1100_s11] sm:$0xff] %v1097_v61 }
 0x194 PF: > { %s13_s14 = sadd.s32 1, %s2208_s14   ;;  %s2753_s12 = smov %s2204_s13 }
 0x195   : > { %p10_p6 = scmp.ge.s32.totalorder %s13_s14, 4   ;;  %s2754_s13 = smov %s2756_s15 }
 0x197   :  { %12 = sbr.rel (!%p10_p6) target bundleno = 2 (0x2), region = 92 }

// kernel: bev_hourglass_forward.15
= control target key start
LH: loop header
LB: loop body
LE: loop exit
PB: predicated region body
PF: predicated region fallthrough
CT: control target
= control target key end

     0   :  { %s2082_s12 = smov 0   ;;  %s2084_s13 = smov 0   ;;  %s2676_s0 = inlined_call_operand.vmem [shape: f32[2,1,10,10,128], index: 0, kind: input, shape index: {}]   ;;  %s2677_s1 = inlined_call_operand.vmem [shape: f32[9,128,128], index: 1, kind: input, shape index: {}]   ;;  %s2678_s2 = inlined_call_operand.vmem [shape: f32[2,128], index: 2, kind: input, shape index: {}]   ;;  %s2679_s3 = inlined_call_operand.vmem [shape: f32[2,8,8,128], index: 3, kind: output, shape index: {}]  }
   0x1   :  { %s2086_s14 = smov 0  }
   0x2 LB: > { %s25_s15 = sadd.s32 1, %s2049_s13  ;;  %p1145_p0 = scmp.ge.s32.totalorder %s2053_s14, 1  ;;  %s2053_s14 = sphi %s2086_s14, %s13_s14   ;;  %s2049_s13 = sphi %s2084_s13, %s2681_s13   ;;  %s2045_s12 = sphi %s2082_s12, %s2680_s12  }
   0x3   : > { %p27_p1 = scmp.ge.s32.totalorder %s25_s15, 2  ;;  %p157_p2 = scmp.lt.s32.totalorder %s2053_s14, 3 }
   0x5   : > { %s2683_s15 = smov (%p27_p1, %s25_s15), 0  ;;  %p158_p3 = pnand %p1145_p0, %p157_p2 }
   0x6   : > { %p189_p4 = scmp.lt.s32.totalorder (!%p158_p3), %s2045_s12, 1  ;;  %v2103_v0 = vld [vmem:[%s2678_s2] ss:$0 sm:$0xff] (!%p158_p3)  ;;  %v2108_v1 = vld [vmem:[%s2678_s2 + $0x1] ss:$0 sm:$0xff] (!%p158_p3)  ;;  %s2120_s28 = smov (!%p158_p3), 0  }
   0x7   : > { %161 = sbr.rel (%p158_p3) target bundleno = 402 (0x192), region = 32 }
   0xe   : > { %s2685_s12 = smov (!%p189_p4, %s2045_s12), 1 }
   0xf   : > { %s1991_s20 = smul.u32 160, %s2685_s12  ;;  %s1291_s21 = sshll.u32 %s2685_s12, 6 }
  0x10   : > { %s2113_s24 = scalar_lea.vmem %s2679_s3, %s1291_s21 }
  0x11   : > { %s2118_s27 = scalar_lea.vmem %s2676_s0, %s1991_s20 }
  0x12 LB: >> { %v1150_v2 = vld [vmem:[%s2677_s1 + $0x80] sm:$0xff]  ;;  %v1151_v3 = vld [vmem:[%s2677_s1 + $0x88] sm:$0xff]  ;;  %v2059_v5 = vmov 0.0|0.0   ;;  %v1152_v8 = vld [vmem:[%s2677_s1 + $0x90] sm:$0xff]  ;;  %vm2060_vm0 = vmmov 0   ;;  %v2061_v13 = vmov 0.0   ;;  %s2057_s28 = sphi %s2120_s28, %s215_s28  }
  0x13   : >> { %v1201_v4 = vld [vmem:[%s2677_s1 + $0x200] sm:$0xff]  ;;  %1760 = vmatprep.subr.bf16.mxu1 %v2059_v5  ;;  %1856 = vmatprep.subr.bf16.mxu0 %v2059_v5  ;;  %v1761_v6 = vpack.c.bf16 %v1151_v3, %v1150_v2  ;;  %v1202_v7 = vld [vmem:[%s2677_s1 + $0x208] sm:$0xff]  ;;  %v1153_v9 = vld [vmem:[%s2677_s1 + $0x98] sm:$0xff]  ;;  %s1149_s30 = sshll.u32 %s2057_s28, 4  ;;  %s1288_s9 = sshll.u32 %s2057_s28, 3 }
  0x14   : >> { %v1857_v10 = vpack.c.bf16 %v1202_v7, %v1201_v4  ;;  %v1203_v11 = vld [vmem:[%s2677_s1 + $0x210] sm:$0xff]  ;;  %v1204_v12 = vld [vmem:[%s2677_s1 + $0x218] sm:$0xff]  ;;  %1477 = vmatprep.mubr.msk.f32.mxu1 %vm2060_vm0, %v2061_v13  ;;  %1617 = vmatprep.mubr.msk.f32.mxu0 %vm2060_vm0, %v2061_v13  ;;  %v1764_v14 = vpack.c.bf16 %v1153_v9, %v1152_v8  ;;  %v1154_v16 = vld [vmem:[%s2677_s1 + $0xa0] sm:$0xff]  ;;  %s2242_s4 = scalar_lea.vmem %s2118_s27, %s1149_s30  ;;  %s1034_s10 = scalar_lea.vmem %s2113_s24, %s1288_s9 }
  0x15   : >> { %1762 = vmatpush3.bf16.msra.mxu1 %v1761_v6  ;;  %v1860_v15 = vpack.c.bf16 %v1204_v12, %v1203_v11  ;;  %v1155_v17 = vld [vmem:[%s2677_s1 + $0xa8] sm:$0xff]  ;;  %v1205_v18 = vld [vmem:[%s2677_s1 + $0x220] sm:$0xff]  ;;  %v1156_v22 = vld [vmem:[%s2677_s1 + $0xb0] sm:$0xff]  ;;  %s215_s28 = sadd.s32 1, %s2057_s28  }
  0x16   : >> { %1858 = vmatpush3.bf16.msra.mxu0 %v1857_v10  ;;  %1763 = vmatprep.subr.bf16.mxu1 %v2059_v5  ;;  %v1206_v19 = vld [vmem:[%s2677_s1 + $0x228] sm:$0xff]  ;;  %v1767_v20 = vpack.c.bf16 %v1155_v17, %v1154_v16  ;;  %v1157_v23 = vld [vmem:[%s2677_s1 + $0xb8] sm:$0xff]  ;;  %v1207_v24 = vld [vmem:[%s2677_s1 + $0x230] sm:$0xff]  ;;  %p212_p5 = scmp.ge.s32.totalorder %s215_s28, 8  }
  0x17   : >> { %1859 = vmatprep.subr.bf16.mxu0 %v2059_v5  ;;  %v1863_v21 = vpack.c.bf16 %v1206_v19, %v1205_v18  ;;  %v1208_v25 = vld [vmem:[%s2677_s1 + $0x238] sm:$0xff]  ;;  %v1770_v26 = vpack.c.bf16 %v1157_v23, %v1156_v22  ;;  %v1158_v28 = vld [vmem:[%s2677_s1 + $0xc0] sm:$0xff]  ;;  %v1159_v29 = vld [vmem:[%s2677_s1 + $0xc8] sm:$0xff] }
  0x18   : >> { %v1866_v27 = vpack.c.bf16 %v1208_v25, %v1207_v24  ;;  %v1209_v30 = vld [vmem:[%s2677_s1 + $0x240] sm:$0xff]  ;;  %v1210_v31 = vld [vmem:[%s2677_s1 + $0x248] sm:$0xff]  ;;  %v1773_v32 = vpack.c.bf16 %v1159_v29, %v1158_v28  ;;  %v1160_v34 = vld [vmem:[%s2677_s1 + $0xd0] sm:$0xff] }
  0x19   : >> { %1765 = vmatpush3.bf16.msra.mxu1 %v1764_v14  ;;  %v1869_v33 = vpack.c.bf16 %v1210_v31, %v1209_v30  ;;  %v1161_v35 = vld [vmem:[%s2677_s1 + $0xd8] sm:$0xff]  ;;  %v1211_v36 = vld [vmem:[%s2677_s1 + $0x250] sm:$0xff]  ;;  %v1162_v40 = vld [vmem:[%s2677_s1 + $0xe0] sm:$0xff] }
  0x1a   : >> { %1861 = vmatpush3.bf16.msra.mxu0 %v1860_v15  ;;  %1766 = vmatprep.subr.bf16.mxu1 %v2059_v5  ;;  %v1212_v37 = vld [vmem:[%s2677_s1 + $0x258] sm:$0xff]  ;;  %v1776_v38 = vpack.c.bf16 %v1161_v35, %v1160_v34  ;;  %v1163_v41 = vld [vmem:[%s2677_s1 + $0xe8] sm:$0xff]  ;;  %v1213_v42 = vld [vmem:[%s2677_s1 + $0x260] sm:$0xff] }
  0x1b   : >> { %1862 = vmatprep.subr.bf16.mxu0 %v2059_v5  ;;  %v1872_v39 = vpack.c.bf16 %v1212_v37, %v1211_v36  ;;  %v1214_v43 = vld [vmem:[%s2677_s1 + $0x268] sm:$0xff]  ;;  %v1779_v44 = vpack.c.bf16 %v1163_v41, %v1162_v40  ;;  %v1164_v46 = vld [vmem:[%s2677_s1 + $0xf0] sm:$0xff]  ;;  %v1165_v47 = vld [vmem:[%s2677_s1 + $0xf8] sm:$0xff] }
  0x1c   : >> { %v1875_v45 = vpack.c.bf16 %v1214_v43, %v1213_v42  ;;  %v1215_v48 = vld [vmem:[%s2677_s1 + $0x270] sm:$0xff]  ;;  %v1216_v49 = vld [vmem:[%s2677_s1 + $0x278] sm:$0xff]  ;;  %v1782_v50 = vpack.c.bf16 %v1165_v47, %v1164_v46  ;;  %v219_v52 = vld [vmem:[%s2677_s1] sm:$0xff] }
  0x1d   : >> { %1768 = vmatpush3.bf16.msra.mxu1 %v1767_v20  ;;  %v1878_v51 = vpack.c.bf16 %v1216_v49, %v1215_v48  ;;  %v220_v53 = vld [vmem:[%s2677_s1 + $0x8] sm:$0xff]  ;;  %v1218_v54 = vld [vmem:[%s2677_s1 + $0x280] sm:$0xff]  ;;  %v1200_v58 = vld [vmem:[%s2242_s4 + $0x11] sm:$0xff] }
  0x1e   : >> { %1864 = vmatpush3.bf16.msra.mxu0 %v1863_v21  ;;  %1769 = vmatprep.subr.bf16.mxu1 %v2059_v5  ;;  %v1219_v55 = vld [vmem:[%s2677_s1 + $0x288] sm:$0xff]  ;;  %v1785_v57 = vpack.c.bf16 %v220_v53, %v219_v52  ;;  %v221_v60 = vld [vmem:[%s2677_s1 + $0x10] sm:$0xff]  ;;  %v222_v61 = vld [vmem:[%s2677_s1 + $0x18] sm:$0xff] }
  0x1f   : >> { %1865 = vmatprep.subr.bf16.mxu0 %v2059_v5  ;;  %v235_v56 = vld [vmem:[%s2242_s4 + $0x1] sm:$0xff]  ;;  %v1881_v59 = vpack.c.bf16 %v1219_v55, %v1218_v54  ;;  %v1220_v62 = vld [vmem:[%s2677_s1 + $0x290] sm:$0xff]  ;;  %v1221_v63 = vld [vmem:[%s2677_s1 + $0x298] sm:$0xff]  ;;  %v1788_v2 = vpack.c.bf16 %v222_v61, %v221_v60 }
  0x20   : >> { %v1884_v3 = vpack.c.bf16 %v1221_v63, %v1220_v62  ;;  %v223_v4 = vld [vmem:[%s2677_s1 + $0x20] sm:$0xff]  ;;  %v224_v6 = vld [vmem:[%s2677_s1 + $0x28] sm:$0xff]  ;;  %v225_v11 = vld [vmem:[%s2677_s1 + $0x30] sm:$0xff] }
  0x21   : >> { %1771 = vmatpush3.bf16.msra.mxu1 %v1770_v26  ;;  %v1222_v7 = vld [vmem:[%s2677_s1 + $0x2a0] sm:$0xff]  ;;  %v1223_v8 = vld [vmem:[%s2677_s1 + $0x2a8] sm:$0xff]  ;;  %v1791_v9 = vpack.c.bf16 %v224_v6, %v223_v4  ;;  %v226_v12 = vld [vmem:[%s2677_s1 + $0x38] sm:$0xff] }
  0x22   : >> { %1867 = vmatpush3.bf16.msra.mxu0 %v1866_v27  ;;  %1772 = vmatprep.subr.bf16.mxu1 %v2059_v5  ;;  %v1887_v10 = vpack.c.bf16 %v1223_v8, %v1222_v7  ;;  %v1224_v14 = vld [vmem:[%s2677_s1 + $0x2b0] sm:$0xff]  ;;  %v1225_v15 = vld [vmem:[%s2677_s1 + $0x2b8] sm:$0xff]  ;;  %v1794_v16 = vpack.c.bf16 %v226_v12, %v225_v11  ;;  %v227_v18 = vld [vmem:[%s2677_s1 + $0x40] sm:$0xff] }
  0x23   : >> { %1868 = vmatprep.subr.bf16.mxu0 %v2059_v5  ;;  %v1890_v17 = vpack.c.bf16 %v1225_v15, %v1224_v14  ;;  %v228_v19 = vld [vmem:[%s2677_s1 + $0x48] sm:$0xff]  ;;  %v1226_v20 = vld [vmem:[%s2677_s1 + $0x2c0] sm:$0xff]  ;;  %v229_v24 = vld [vmem:[%s2677_s1 + $0x50] sm:$0xff] }
  0x24   : >> { %v1227_v21 = vld [vmem:[%s2677_s1 + $0x2c8] sm:$0xff]  ;;  %v1797_v22 = vpack.c.bf16 %v228_v19, %v227_v18  ;;  %v230_v25 = vld [vmem:[%s2677_s1 + $0x58] sm:$0xff]  ;;  %v1228_v26 = vld [vmem:[%s2677_s1 + $0x2d0] sm:$0xff] }
  0x25   : >> { %1774 = vmatpush3.bf16.msra.mxu1 %v1773_v32  ;;  %v1893_v23 = vpack.c.bf16 %v1227_v21, %v1226_v20  ;;  %v1229_v27 = vld [vmem:[%s2677_s1 + $0x2d8] sm:$0xff]  ;;  %v1800_v28 = vpack.c.bf16 %v230_v25, %v229_v24  ;;  %v231_v30 = vld [vmem:[%s2677_s1 + $0x60] sm:$0xff]  ;;  %v232_v31 = vld [vmem:[%s2677_s1 + $0x68] sm:$0xff] }
  0x26   : >> { %1870 = vmatpush3.bf16.msra.mxu0 %v1869_v33  ;;  %1775 = vmatprep.subr.bf16.mxu1 %v2059_v5  ;;  %v1896_v29 = vpack.c.bf16 %v1229_v27, %v1228_v26  ;;  %v1230_v32 = vld [vmem:[%s2677_s1 + $0x2e0] sm:$0xff]  ;;  %v1231_v33 = vld [vmem:[%s2677_s1 + $0x2e8] sm:$0xff]  ;;  %v1803_v34 = vpack.c.bf16 %v232_v31, %v231_v30  ;;  %v233_v36 = vld [vmem:[%s2677_s1 + $0x70] sm:$0xff] }
  0x27   : >> { %1871 = vmatprep.subr.bf16.mxu0 %v2059_v5  ;;  %v1899_v35 = vpack.c.bf16 %v1231_v33, %v1230_v32  ;;  %v234_v37 = vld [vmem:[%s2677_s1 + $0x78] sm:$0xff]  ;;  %v1166_v42 = vld [vmem:[%s2677_s1 + $0x100] sm:$0xff]  ;;  %v1167_v43 = vld [vmem:[%s2677_s1 + $0x108] sm:$0xff] }
  0x28   : >> { %v1806_v40 = vpack.c.bf16 %v234_v37, %v233_v36  ;;  %v218_v46 = vld [vmem:[%s2242_s4] sm:$0xff]  ;;  %v1809_v47 = vpack.c.bf16 %v1167_v43, %v1166_v42  ;;  %v1217_v48 = vld [vmem:[%s2242_s4 + $0x12] sm:$0xff]  ;;  %v1175_v8 = vld [vmem:[%s2677_s1 + $0x148] sm:$0xff] }
  0x29   : >> { %1777 = vmatpush3.bf16.msra.mxu1 %v1776_v38  ;;  %v1232_v38 = vld [vmem:[%s2677_s1 + $0x2f0] sm:$0xff]  ;;  %v1239_v53 = vld [vmem:[%s2677_s1 + $0x318] sm:$0xff]  ;;  %v1174_v7 = vld [vmem:[%s2677_s1 + $0x140] sm:$0xff] }
  0x2a   : >> { %1873 = vmatpush3.bf16.msra.mxu0 %v1872_v39  ;;  %1778 = vmatprep.subr.bf16.mxu1 %v2059_v5  ;;  %v1233_v39 = vld [vmem:[%s2677_s1 + $0x2f8] sm:$0xff]  ;;  %v1238_v52 = vld [vmem:[%s2677_s1 + $0x310] sm:$0xff]  ;;  %v1821_v11 = vpack.c.bf16 %v1175_v8, %v1174_v7  ;;  %v1178_v20 = vld [vmem:[%s2677_s1 + $0x160] sm:$0xff] }
  0x2b   : >> { %1874 = vmatprep.subr.bf16.mxu0 %v2059_v5  ;;  %v1902_v41 = vpack.c.bf16 %v1233_v39, %v1232_v38  ;;  %v1908_v55 = vpack.c.bf16 %v1239_v53, %v1238_v52  ;;  %v1172_v62 = vld [vmem:[%s2677_s1 + $0x130] sm:$0xff]  ;;  %v1173_v63 = vld [vmem:[%s2677_s1 + $0x138] sm:$0xff]  ;;  %v1179_v21 = vld [vmem:[%s2677_s1 + $0x168] sm:$0xff] }
  0x2c   : >> { %v1818_v4 = vpack.c.bf16 %v1173_v63, %v1172_v62  ;;  %v1176_v14 = vld [vmem:[%s2677_s1 + $0x150] sm:$0xff]  ;;  %v1177_v15 = vld [vmem:[%s2677_s1 + $0x158] sm:$0xff]  ;;  %v1827_v24 = vpack.c.bf16 %v1179_v21, %v1178_v20  ;;  %v1184_v32 = vld [vmem:[%s2677_s1 + $0x180] sm:$0xff] }
  0x2d   : >> { %1780 = vmatpush3.bf16.msra.mxu1 %v1779_v44  ;;  %v1236_v44 = vld [vmem:[%s2677_s1 + $0x300] sm:$0xff]  ;;  %v1824_v18 = vpack.c.bf16 %v1177_v15, %v1176_v14  ;;  %v1180_v26 = vld [vmem:[%s2677_s1 + $0x170] sm:$0xff]  ;;  %v1181_v27 = vld [vmem:[%s2677_s1 + $0x178] sm:$0xff] }
  0x2e   : >> { %1876 = vmatpush3.bf16.msra.mxu0 %v1875_v45  ;;  %1781 = vmatprep.subr.bf16.mxu1 %v2059_v5  ;;  %v1237_v45 = vld [vmem:[%s2677_s1 + $0x308] sm:$0xff]  ;;  %v1830_v30 = vpack.c.bf16 %v1181_v27, %v1180_v26  ;;  %v1235_v38 = vld [vmem:[%s2242_s4 + $0x20] sm:$0xff]  ;;  %v1255_v42 = vld [vmem:[%s2677_s1 + $0x390] sm:$0xff] }
  0x2f   : >> { %1877 = vmatprep.subr.bf16.mxu0 %v2059_v5  ;;  %v1905_v49 = vpack.c.bf16 %v1237_v45, %v1236_v44  ;;  %v1185_v33 = vld [vmem:[%s2677_s1 + $0x188] sm:$0xff]  ;;  %v1256_v43 = vld [vmem:[%s2677_s1 + $0x398] sm:$0xff]  ;;  %v1190_v52 = vld [vmem:[%s2677_s1 + $0x1b0] sm:$0xff] }
  0x30   : >> { %v393_v36 = vld [vmem:[%s2242_s4 + $0x2] sm:$0xff]  ;;  %v1833_v37 = vpack.c.bf16 %v1185_v33, %v1184_v32  ;;  %v1932_v45 = vpack.c.bf16 %v1256_v43, %v1255_v42  ;;  %v1191_v53 = vld [vmem:[%s2677_s1 + $0x1b8] sm:$0xff]  ;;  %v1272_v27 = vld [vmem:[%s2677_s1 + $0x410] sm:$0xff] }
  0x31   : >> { %1783 = vmatpush3.bf16.msra.mxu1 %v1782_v50  ;;  %v1168_v50 = vld [vmem:[%s2677_s1 + $0x110] sm:$0xff]  ;;  %v1283_v42 = vld [vmem:[%s2677_s1 + $0x468] sm:$0xff] }
  0x32   : >> { %1879 = vmatpush3.bf16.msra.mxu0 %v1878_v51  ;;  %1784 = vmatprep.subr.bf16.mxu1 %v2059_v5  ;;  %v1169_v51 = vld [vmem:[%s2677_s1 + $0x118] sm:$0xff]  ;;  %v1276_v33 = vld [vmem:[%s2677_s1 + $0x430] sm:$0xff] }
  0x33   : >> { %1880 = vmatprep.subr.bf16.mxu0 %v2059_v5  ;;  %v1812_v54 = vpack.c.bf16 %v1169_v51, %v1168_v50 }
  0x34   : >> { %1478 = vmatmul.mubr.f32.vlgmr.msra.gmra.mrb[0].mxu1 %v235_v56  ;;  %v1170_v56 = vld [vmem:[%s2677_s1 + $0x120] sm:$0xff] }
  0x35   : >> { %1786 = vmatpush3.bf16.msra.mxu1 %v1785_v57  ;;  %1618 = vmatmul.mubr.f32.vlgmr.msra.gmra.mrb[0].mxu0 %v1200_v58  ;;  %v1171_v57 = vld [vmem:[%s2677_s1 + $0x128] sm:$0xff]  ;;  %v1240_v58 = vld [vmem:[%s2677_s1 + $0x320] sm:$0xff] }
  0x36   : >> { %1882 = vmatpush3.bf16.msra.mxu0 %v1881_v59  ;;  %1787 = vmatprep.subr.bf16.mxu1 %v2059_v5  ;;  %v1241_v59 = vld [vmem:[%s2677_s1 + $0x328] sm:$0xff]  ;;  %v1815_v60 = vpack.c.bf16 %v1171_v57, %v1170_v56  ;;  %v1842_v56 = vpack.c.bf16 %v1191_v53, %v1190_v52 }
  0x37   : >> { %1883 = vmatprep.subr.bf16.mxu0 %v2059_v5  ;;  %1512 = vmatprep.mubr.msk.f32.mxu1 %vm2060_vm0, %v2061_v13  ;;  %v1911_v61 = vpack.c.bf16 %v1241_v59, %v1240_v58  ;;  %v1192_v58 = vld [vmem:[%s2677_s1 + $0x1c0] sm:$0xff]  ;;  %v1193_v59 = vld [vmem:[%s2677_s1 + $0x1c8] sm:$0xff] }
  0x38   : >> { %1652 = vmatprep.mubr.msk.f32.mxu0 %vm2060_vm0, %v2061_v13  ;;  %v1845_v62 = vpack.c.bf16 %v1193_v59, %v1192_v58 }
  0x39   : >> { %1789 = vmatpush3.bf16.msra.mxu1 %v1788_v2  ;;  %v1242_v2 = vld [vmem:[%s2677_s1 + $0x330] sm:$0xff] }
  0x3a   : >> { %1885 = vmatpush3.bf16.msra.mxu0 %v1884_v3  ;;  %1790 = vmatprep.subr.bf16.mxu1 %v2059_v5  ;;  %v1243_v3 = vld [vmem:[%s2677_s1 + $0x338] sm:$0xff] }
  0x3b   : >> { %1886 = vmatprep.subr.bf16.mxu0 %v2059_v5  ;;  %v1914_v6 = vpack.c.bf16 %v1243_v3, %v1242_v2  ;;  %v1194_v2 = vld [vmem:[%s2677_s1 + $0x1d0] sm:$0xff]  ;;  %v1195_v3 = vld [vmem:[%s2677_s1 + $0x1d8] sm:$0xff] }
  0x3c   : >> { %v1848_v7 = vpack.c.bf16 %v1195_v3, %v1194_v2 }
  0x3d   : >> { %1792 = vmatpush3.bf16.msra.mxu1 %v1791_v9  ;;  %v1244_v9 = vld [vmem:[%s2677_s1 + $0x340] sm:$0xff] }
  0x3e   : >> { %1888 = vmatpush3.bf16.msra.mxu0 %v1887_v10  ;;  %1793 = vmatprep.subr.bf16.mxu1 %v2059_v5  ;;  %v1245_v10 = vld [vmem:[%s2677_s1 + $0x348] sm:$0xff] }
  0x3f   : >> { %1889 = vmatprep.subr.bf16.mxu0 %v2059_v5  ;;  %v1917_v12 = vpack.c.bf16 %v1245_v10, %v1244_v9  ;;  %v1196_v9 = vld [vmem:[%s2677_s1 + $0x1e0] sm:$0xff]  ;;  %v1197_v10 = vld [vmem:[%s2677_s1 + $0x1e8] sm:$0xff] }
  0x40   : >> { %v1851_v14 = vpack.c.bf16 %v1197_v10, %v1196_v9 }
  0x41   : >> { %1795 = vmatpush3.bf16.msra.mxu1 %v1794_v16  ;;  %v1246_v16 = vld [vmem:[%s2677_s1 + $0x350] sm:$0xff] }
  0x42   : >> { %1891 = vmatpush3.bf16.msra.mxu0 %v1890_v17  ;;  %1796 = vmatprep.subr.bf16.mxu1 %v2059_v5  ;;  %v1247_v17 = vld [vmem:[%s2677_s1 + $0x358] sm:$0xff] }
  0x43   : >> { %1892 = vmatprep.subr.bf16.mxu0 %v2059_v5  ;;  %v1920_v19 = vpack.c.bf16 %v1247_v17, %v1246_v16  ;;  %v1198_v16 = vld [vmem:[%s2677_s1 + $0x1f0] sm:$0xff]  ;;  %v1199_v17 = vld [vmem:[%s2677_s1 + $0x1f8] sm:$0xff] }
  0x44   : >> { %v1854_v20 = vpack.c.bf16 %v1199_v17, %v1198_v16 }
  0x45   : >> { %1798 = vmatpush3.bf16.msra.mxu1 %v1797_v22  ;;  %v1248_v22 = vld [vmem:[%s2677_s1 + $0x360] sm:$0xff] }
  0x46   : >> { %1894 = vmatpush3.bf16.msra.mxu0 %v1893_v23  ;;  %1799 = vmatprep.subr.bf16.mxu1 %v2059_v5  ;;  %v1249_v23 = vld [vmem:[%s2677_s1 + $0x368] sm:$0xff] }
  0x47   : >> { %1895 = vmatprep.subr.bf16.mxu0 %v2059_v5  ;;  %v1923_v25 = vpack.c.bf16 %v1249_v23, %v1248_v22  ;;  %v1270_v22 = vld [vmem:[%s2677_s1 + $0x400] sm:$0xff]  ;;  %v1271_v23 = vld [vmem:[%s2677_s1 + $0x408] sm:$0xff] }
  0x48   : >> { %v1953_v26 = vpack.c.bf16 %v1271_v23, %v1270_v22 }
  0x49   : >> { %1801 = vmatpush3.bf16.msra.mxu1 %v1800_v28  ;;  %v1250_v28 = vld [vmem:[%s2677_s1 + $0x370] sm:$0xff] }
  0x4a   : >> { %1897 = vmatpush3.bf16.msra.mxu0 %v1896_v29  ;;  %1802 = vmatprep.subr.bf16.mxu1 %v2059_v5  ;;  %v1251_v29 = vld [vmem:[%s2677_s1 + $0x378] sm:$0xff] }
  0x4b   : >> { %1898 = vmatprep.subr.bf16.mxu0 %v2059_v5  ;;  %v1926_v31 = vpack.c.bf16 %v1251_v29, %v1250_v28  ;;  %v1273_v28 = vld [vmem:[%s2677_s1 + $0x418] sm:$0xff] }
  0x4c   : >> { %v1956_v29 = vpack.c.bf16 %v1273_v28, %v1272_v27 }
  0x4d   : >> { %1804 = vmatpush3.bf16.msra.mxu1 %v1803_v34  ;;  %v1253_v34 = vld [vmem:[%s2677_s1 + $0x380] sm:$0xff] }
  0x4e   : >> { %1900 = vmatpush3.bf16.msra.mxu0 %v1899_v35  ;;  %1805 = vmatprep.subr.bf16.mxu1 %v2059_v5  ;;  %v1254_v35 = vld [vmem:[%s2677_s1 + $0x388] sm:$0xff] }
  0x4f   : >> { %1901 = vmatprep.subr.bf16.mxu0 %v2059_v5  ;;  %v1929_v39 = vpack.c.bf16 %v1254_v35, %v1253_v34  ;;  %v1278_v35 = vld [vmem:[%s2677_s1 + $0x440] sm:$0xff] }
  0x51   : >> { %1807 = vmatpush3.bf16.msra.mxu1 %v1806_v40  ;;  %v1186_v40 = vld [vmem:[%s2677_s1 + $0x190] sm:$0xff] }
  0x52   : >> { %1903 = vmatpush3.bf16.msra.mxu0 %v1902_v41  ;;  %1808 = vmatprep.subr.bf16.mxu1 %v2059_v5  ;;  %v1187_v41 = vld [vmem:[%s2677_s1 + $0x198] sm:$0xff] }
  0x53   : >> { %1904 = vmatprep.subr.bf16.mxu0 %v2059_v5  ;;  %v1836_v44 = vpack.c.bf16 %v1187_v41, %v1186_v40  ;;  %v1282_v41 = vld [vmem:[%s2677_s1 + $0x460] sm:$0xff] }
  0x54   : >> { %1513 = vmatmul.mubr.f32.vlgmr.msra.gmra.mrb[0].mxu1 %v218_v46  ;;  %v1188_v46 = vld [vmem:[%s2677_s1 + $0x1a0] sm:$0xff]  ;;  %v1971_v43 = vpack.c.bf16 %v1283_v42, %v1282_v41 }
  0x55   : >> { %1810 = vmatpush3.bf16.msra.mxu1 %v1809_v47  ;;  %1653 = vmatmul.mubr.f32.vlgmr.msra.gmra.mrb[0].mxu0 %v1217_v48  ;;  %v1189_v47 = vld [vmem:[%s2677_s1 + $0x1a8] sm:$0xff]  ;;  %v1257_v48 = vld [vmem:[%s2677_s1 + $0x3a0] sm:$0xff] }
  0x56   : >> { %1906 = vmatpush3.bf16.msra.mxu0 %v1905_v49  ;;  %1811 = vmatprep.subr.bf16.mxu1 %v2059_v5  ;;  %v1258_v49 = vld [vmem:[%s2677_s1 + $0x3a8] sm:$0xff]  ;;  %v1839_v50 = vpack.c.bf16 %v1189_v47, %v1188_v46 }
  0x57   : >> { %1907 = vmatprep.subr.bf16.mxu0 %v2059_v5  ;;  %1547 = vmatprep.mubr.msk.f32.mxu1 %vm2060_vm0, %v2061_v13  ;;  %v1935_v51 = vpack.c.bf16 %v1258_v49, %v1257_v48  ;;  %v1269_v47 = vld [vmem:[%s2242_s4 + $0x22] sm:$0xff] }
  0x58   : >> { %1687 = vmatprep.mubr.msk.f32.mxu0 %vm2060_vm0, %v2061_v13 }
  0x59   : >> { %1813 = vmatpush3.bf16.msra.mxu1 %v1812_v54  ;;  %v1259_v54 = vld [vmem:[%s2677_s1 + $0x3b0] sm:$0xff] }
  0x5a   : >> { %1909 = vmatpush3.bf16.msra.mxu0 %v1908_v55  ;;  %1814 = vmatprep.subr.bf16.mxu1 %v2059_v5  ;;  %v1260_v55 = vld [vmem:[%s2677_s1 + $0x3b8] sm:$0xff] }
  0x5b   : >> { %1910 = vmatprep.subr.bf16.mxu0 %v2059_v5  ;;  %v1938_v57 = vpack.c.bf16 %v1260_v55, %v1259_v54 }
  0x5d   : >> { %1816 = vmatpush3.bf16.msra.mxu1 %v1815_v60  ;;  %v1261_v60 = vld [vmem:[%s2677_s1 + $0x3c0] sm:$0xff] }
  0x5e   : >> { %1912 = vmatpush3.bf16.msra.mxu0 %v1911_v61  ;;  %1817 = vmatprep.subr.bf16.mxu1 %v2059_v5  ;;  %v1262_v61 = vld [vmem:[%s2677_s1 + $0x3c8] sm:$0xff] }
  0x5f   : >> { %1913 = vmatprep.subr.bf16.mxu0 %v2059_v5  ;;  %v1941_v63 = vpack.c.bf16 %v1262_v61, %v1261_v60 }
  0x61   : >> { %1819 = vmatpush3.bf16.msra.mxu1 %v1818_v4  ;;  %v1263_v4 = vld [vmem:[%s2677_s1 + $0x3d0] sm:$0xff] }
  0x62   : >> { %1915 = vmatpush3.bf16.msra.mxu0 %v1914_v6  ;;  %1820 = vmatprep.subr.bf16.mxu1 %v2059_v5  ;;  %v1264_v6 = vld [vmem:[%s2677_s1 + $0x3d8] sm:$0xff] }
  0x63   : >> { %1916 = vmatprep.subr.bf16.mxu0 %v2059_v5  ;;  %v1944_v8 = vpack.c.bf16 %v1264_v6, %v1263_v4 }
  0x65   : >> { %1822 = vmatpush3.bf16.msra.mxu1 %v1821_v11  ;;  %v1265_v11 = vld [vmem:[%s2677_s1 + $0x3e0] sm:$0xff] }
  0x66   : >> { %1918 = vmatpush3.bf16.msra.mxu0 %v1917_v12  ;;  %1823 = vmatprep.subr.bf16.mxu1 %v2059_v5  ;;  %v1266_v12 = vld [vmem:[%s2677_s1 + $0x3e8] sm:$0xff] }
  0x67   : >> { %1919 = vmatprep.subr.bf16.mxu0 %v2059_v5  ;;  %v1947_v15 = vpack.c.bf16 %v1266_v12, %v1265_v11 }
  0x69   : >> { %1825 = vmatpush3.bf16.msra.mxu1 %v1824_v18  ;;  %v1267_v18 = vld [vmem:[%s2677_s1 + $0x3f0] sm:$0xff] }
  0x6a   : >> { %1921 = vmatpush3.bf16.msra.mxu0 %v1920_v19  ;;  %1826 = vmatprep.subr.bf16.mxu1 %v2059_v5  ;;  %v1268_v19 = vld [vmem:[%s2677_s1 + $0x3f8] sm:$0xff] }
  0x6b   : >> { %1922 = vmatprep.subr.bf16.mxu0 %v2059_v5  ;;  %v1950_v21 = vpack.c.bf16 %v1268_v19, %v1267_v18 }
  0x6d   : >> { %1828 = vmatpush3.bf16.msra.mxu1 %v1827_v24  ;;  %v1183_v24 = vld [vmem:[%s2242_s4 + $0x10] sm:$0xff] }
  0x6e   : >> { %1924 = vmatpush3.bf16.msra.mxu0 %v1923_v25  ;;  %1829 = vmatprep.subr.bf16.mxu1 %v2059_v5  ;;  %v1252_v25 = vld [vmem:[%s2242_s4 + $0x21] sm:$0xff] }
  0x6f   : >> { %1925 = vmatprep.subr.bf16.mxu0 %v2059_v5 }
  0x71   : >> { %1831 = vmatpush3.bf16.msra.mxu1 %v1830_v30  ;;  %v1274_v30 = vld [vmem:[%s2677_s1 + $0x420] sm:$0xff] }
  0x72   : >> { %1927 = vmatpush3.bf16.msra.mxu0 %v1926_v31  ;;  %1832 = vmatprep.subr.bf16.mxu1 %v2059_v5  ;;  %v1275_v31 = vld [vmem:[%s2677_s1 + $0x428] sm:$0xff] }
  0x73   : >> { %1928 = vmatprep.subr.bf16.mxu0 %v2059_v5  ;;  %v1959_v32 = vpack.c.bf16 %v1275_v31, %v1274_v30 }
  0x74   : >> { %1548 = vmatmul.mubr.f32.vlgmr.msra.gmra.mrb[0].mxu1 %v393_v36  ;;  %v1279_v36 = vld [vmem:[%s2677_s1 + $0x448] sm:$0xff] }
  0x75   : >> { %1834 = vmatpush3.bf16.msra.mxu1 %v1833_v37  ;;  %1688 = vmatmul.mubr.f32.vlgmr.msra.gmra.mrb[0].mxu0 %v1235_v38  ;;  %v1965_v37 = vpack.c.bf16 %v1279_v36, %v1278_v35  ;;  %v1280_v38 = vld [vmem:[%s2677_s1 + $0x450] sm:$0xff] }
  0x76   : >> { %1930 = vmatpush3.bf16.msra.mxu0 %v1929_v39  ;;  %1835 = vmatprep.subr.bf16.mxu1 %v2059_v5  ;;  %v1281_v39 = vld [vmem:[%s2677_s1 + $0x458] sm:$0xff] }
  0x77   : >> { %1931 = vmatprep.subr.bf16.mxu0 %v2059_v5  ;;  %1582 = vmatprep.mubr.msk.f32.mxu1 %vm2060_vm0, %v2061_v13  ;;  %v1968_v40 = vpack.c.bf16 %v1281_v39, %v1280_v38 }
  0x78   : >> { %1722 = vmatprep.mubr.msk.f32.mxu0 %vm2060_vm0, %v2061_v13 }
  0x79   : >> { %1837 = vmatpush3.bf16.msra.mxu1 %v1836_v44  ;;  %v1284_v44 = vld [vmem:[%s2677_s1 + $0x470] sm:$0xff] }
  0x7a   : >> { %1933 = vmatpush3.bf16.msra.mxu0 %v1932_v45  ;;  %1838 = vmatprep.subr.bf16.mxu1 %v2059_v5  ;;  %v1285_v45 = vld [vmem:[%s2677_s1 + $0x478] sm:$0xff] }
  0x7b   : >> { %1934 = vmatprep.subr.bf16.mxu0 %v2059_v5  ;;  %v1974_v46 = vpack.c.bf16 %v1285_v45, %v1284_v44 }
  0x7d   : >> { %1840 = vmatpush3.bf16.msra.mxu1 %v1839_v50 }
  0x7e   : >> { %1936 = vmatpush3.bf16.msra.mxu0 %v1935_v51  ;;  %1841 = vmatprep.subr.bf16.mxu1 %v2059_v5 }
  0x7f   : >> { %1937 = vmatprep.subr.bf16.mxu0 %v2059_v5 }
  0x81   : >> { %1843 = vmatpush3.bf16.msra.mxu1 %v1842_v56 }
  0x82   : >> { %1939 = vmatpush3.bf16.msra.mxu0 %v1938_v57  ;;  %1844 = vmatprep.subr.bf16.mxu1 %v2059_v5 }
  0x83   : >> { %1940 = vmatprep.subr.bf16.mxu0 %v2059_v5 }
  0x85   : >> { %1846 = vmatpush3.bf16.msra.mxu1 %v1845_v62 }
  0x86   : >> { %1942 = vmatpush3.bf16.msra.mxu0 %v1941_v63  ;;  %1847 = vmatprep.subr.bf16.mxu1 %v2059_v5 }
  0x87   : >> { %1943 = vmatprep.subr.bf16.mxu0 %v2059_v5 }
  0x89   : >> { %1849 = vmatpush3.bf16.msra.mxu1 %v1848_v7 }
  0x8a   : >> { %1945 = vmatpush3.bf16.msra.mxu0 %v1944_v8  ;;  %1850 = vmatprep.subr.bf16.mxu1 %v2059_v5 }
  0x8b   : >> { %1946 = vmatprep.subr.bf16.mxu0 %v2059_v5 }
  0x8d   : >> { %1852 = vmatpush3.bf16.msra.mxu1 %v1851_v14 }
  0x8e   : >> { %1948 = vmatpush3.bf16.msra.mxu0 %v1947_v15  ;;  %1853 = vmatprep.subr.bf16.mxu1 %v2059_v5 }
  0x8f   : >> { %1949 = vmatprep.subr.bf16.mxu0 %v2059_v5 }
  0x91   : >> { %1855 = vmatpush3.bf16.msra.mxu1 %v1854_v20 }
  0x92   : >> { %1951 = vmatpush3.bf16.msra.mxu0 %v1950_v21 }
  0x93   : >> { %1952 = vmatprep.subr.bf16.mxu0 %v2059_v5 }
  0x94   : >> { %1583 = vmatmul.mubr.f32.vlgmr.msra.gmra.mrb[0].mxu1 %v1183_v24 }
  0x95   : >> { %1723 = vmatmul.mubr.f32.vlgmr.msra.gmra.mrb[0].mxu0 %v1252_v25 }
  0x96   : >> { %1954 = vmatpush3.bf16.msra.mxu0 %v1953_v26  ;;  %1757 = vmatprep.mubr.msk.f32.mxu0 %vm2060_vm0, %v2061_v13  ;;  %v1277_v13 = vld [vmem:[%s2677_s1 + $0x438] sm:$0xff] }
  0x97   : >> { %1955 = vmatprep.subr.bf16.mxu0 %v2059_v5  ;;  %v1962_v34 = vpack.c.bf16 %v1277_v13, %v1276_v33 }
  0x9a   : >> { %1957 = vmatpush3.bf16.msra.mxu0 %v1956_v29 }
  0x9b   : >> { %1958 = vmatprep.subr.bf16.mxu0 %v2059_v5 }
  0x9e   : >> { %1960 = vmatpush3.bf16.msra.mxu0 %v1959_v32 }
  0x9f   : >> { %1961 = vmatprep.subr.bf16.mxu0 %v2059_v5 }
  0xa2   : >> { %1963 = vmatpush3.bf16.msra.mxu0 %v1962_v34 }
  0xa3   : >> { %1964 = vmatprep.subr.bf16.mxu0 %v2059_v5 }
  0xa6   : >> { %1966 = vmatpush3.bf16.msra.mxu0 %v1965_v37 }
  0xa7   : >> { %1967 = vmatprep.subr.bf16.mxu0 %v2059_v5 }
  0xaa   : >> { %1969 = vmatpush3.bf16.msra.mxu0 %v1968_v40 }
  0xab   : >> { %1970 = vmatprep.subr.bf16.mxu0 %v2059_v5 }
  0xae   : >> { %1972 = vmatpush3.bf16.msra.mxu0 %v1971_v43 }
  0xaf   : >> { %1973 = vmatprep.subr.bf16.mxu0 %v2059_v5 }
  0xb2   : >> { %1975 = vmatpush3.bf16.msra.mxu0 %v1974_v46 }
  0xb5   : >> { %1758 = vmatmul.mubr.f32.vlgmr.msra.gmra.mrb[0].mxu0 %v1269_v47 }
 0x167   : >> { %v569_v48 = vpop.f32.mrb[0].mxu1 }
 0x168   : >> { %v1584_v49 = vpop.f32.mrb[1].mxu1 }
 0x188   : >> { %v1017_v50 = vpop.f32.mrb[0].mxu0 }
 0x189   : >> { %v1976_v51 = vadd.f32 %v1017_v50, %v569_v48  ;;  %v1759_v52 = vpop.f32.mrb[1].mxu0 }
 0x18b   : >> { %v1026_v53 = vmul.f32 %v1976_v51, %v2103_v0  ;;  %214 = sbr.rel (!%p212_p5) target bundleno = 18 (0x12), region = 81 }
 0x18d   : >> { %v1031_v54 = vadd.f32 %v2108_v1, %v1026_v53 }
 0x18f   : >> { %v1032_v55 = vmax.f32 %v1031_v54, 0.0 }
 0x191   : >> { %1035 = vst [vmem:[%s1034_s10] sm:$0xff] %v1032_v55 }
 0x192 PF: > { %s13_s14 = sadd.s32 1, %s2053_s14   ;;  %s2680_s12 = smov %s2049_s13 }
 0x193   : > { %p10_p6 = scmp.ge.s32.totalorder %s13_s14, 4   ;;  %s2681_s13 = smov %s2683_s15 }
 0x195   :  { %12 = sbr.rel (!%p10_p6) target bundleno = 2 (0x2), region = 92 }

// kernel: bev_hourglass_forward.14
= control target key start
LH: loop header
LB: loop body
LE: loop exit
PB: predicated region body
PF: predicated region fallthrough
CT: control target
= control target key end

     0   :  { %s2350_s21 = smov 0   ;;  %s2352_s22 = smov 0   ;;  %s2985_s0 = inlined_call_operand.vmem [shape: f32[2,1,9,9,128], index: 0, kind: input, shape index: {}]   ;;  %s2986_s1 = inlined_call_operand.vmem [shape: f32[2,1,9,9,128], index: 1, kind: input, shape index: {}]   ;;  %s2987_s2 = inlined_call_operand.vmem [shape: f32[2,1,9,9,128], index: 2, kind: input, shape index: {}]   ;;  %s2988_s3 = inlined_call_operand.vmem [shape: f32[2,1,9,9,128], index: 3, kind: input, shape index: {}]   ;;  %s2989_s4 = inlined_call_operand.vmem [shape: f32[9,128,128], index: 4, kind: input, shape index: {}]   ;;  %s2990_s5 = inlined_call_operand.vmem [shape: f32[2,128], index: 5, kind: input, shape index: {}]   ;;  %s2991_s6 = inlined_call_operand.vmem [shape: f32[2,8,8,128], index: 6, kind: output, shape index: {}]  }
   0x1   :  { %s2354_s23 = smov 0  }
   0x2 LB: > { %s28_s24 = sadd.s32 1, %s2302_s22  ;;  %p1398_p0 = scmp.ge.s32.totalorder %s2306_s23, 1  ;;  %s2306_s23 = sphi %s2354_s23, %s16_s23   ;;  %s2302_s22 = sphi %s2352_s22, %s2993_s22   ;;  %s2298_s21 = sphi %s2350_s21, %s2992_s21  }
   0x3   : > { %p30_p1 = scmp.ge.s32.totalorder %s28_s24, 2  ;;  %p280_p2 = scmp.lt.s32.totalorder %s2306_s23, 3 }
   0x5   : > { %s2995_s24 = smov (%p30_p1, %s28_s24), 0  ;;  %p281_p3 = pnand %p1398_p0, %p280_p2 }
   0x6   : > { %p345_p4 = scmp.lt.s32.totalorder (!%p281_p3), %s2298_s21, 1  ;;  %v2371_v0 = vld [vmem:[%s2990_s5] ss:$0 sm:$0xff] (!%p281_p3)  ;;  %v2376_v1 = vld [vmem:[%s2990_s5 + $0x1] ss:$0 sm:$0xff] (!%p281_p3)  ;;  %s2401_s25 = smov (!%p281_p3), 0  }
   0x7   : > { %284 = sbr.rel (%p281_p3) target bundleno = 403 (0x193), region = 44 }
   0xe   : > { %s2997_s21 = smov (!%p345_p4, %s2298_s21), 1 }
   0xf   : > { %s2378_s29 = smul.u32 144, %s2997_s21  ;;  %s1544_s30 = sshll.u32 %s2997_s21, 6 }
  0x10   : > { %s2383_s9 = scalar_lea.vmem %s2991_s6, %s1544_s30 }
  0x11   : > { %s353_s12 = scalar_lea.vmem %s2985_s0, %s2378_s29  ;;  %s362_s15 = scalar_lea.vmem %s2986_s1, %s2378_s29 }
  0x12   : > { %s371_s18 = scalar_lea.vmem %s2987_s2, %s2378_s29  ;;  %s380_s21 = scalar_lea.vmem %s2988_s3, %s2378_s29 }
  0x13 LB: >> { %v1406_v2 = vld [vmem:[%s2989_s4 + $0x80] sm:$0xff]  ;;  %v1407_v3 = vld [vmem:[%s2989_s4 + $0x88] sm:$0xff]  ;;  %v2312_v5 = vmov 0.0|0.0   ;;  %v1408_v8 = vld [vmem:[%s2989_s4 + $0x90] sm:$0xff]  ;;  %vm2313_vm0 = vmmov 0   ;;  %v2314_v13 = vmov 0.0   ;;  %s2310_s25 = sphi %s2401_s25, %s398_s25  }
  0x14   : >> { %v1454_v4 = vld [vmem:[%s2989_s4 + $0x200] sm:$0xff]  ;;  %2013 = vmatprep.subr.bf16.mxu1 %v2312_v5  ;;  %2109 = vmatprep.subr.bf16.mxu0 %v2312_v5  ;;  %v2014_v6 = vpack.c.bf16 %v1407_v3, %v1406_v2  ;;  %v1455_v7 = vld [vmem:[%s2989_s4 + $0x208] sm:$0xff]  ;;  %v1409_v9 = vld [vmem:[%s2989_s4 + $0x98] sm:$0xff]  ;;  %s2521_s13 = sshll.u32 %s2310_s25, 4  ;;  %s1541_s26 = sshll.u32 %s2310_s25, 3 }
  0x15   : >> { %v2110_v10 = vpack.c.bf16 %v1455_v7, %v1454_v4  ;;  %v1456_v11 = vld [vmem:[%s2989_s4 + $0x210] sm:$0xff]  ;;  %v1457_v12 = vld [vmem:[%s2989_s4 + $0x218] sm:$0xff]  ;;  %1730 = vmatprep.mubr.msk.f32.mxu1 %vm2313_vm0, %v2314_v13  ;;  %1870 = vmatprep.mubr.msk.f32.mxu0 %vm2313_vm0, %v2314_v13  ;;  %v2017_v14 = vpack.c.bf16 %v1409_v9, %v1408_v8  ;;  %v1410_v16 = vld [vmem:[%s2989_s4 + $0xa0] sm:$0xff]  ;;  %s2530_s17 = scalar_lea.vmem %s362_s15, %s2521_s13  ;;  %s756_s7 = scalar_lea.vmem %s380_s21, %s2521_s13 }
  0x16   : >> { %2015 = vmatpush3.bf16.msra.mxu1 %v2014_v6  ;;  %v2113_v15 = vpack.c.bf16 %v1457_v12, %v1456_v11  ;;  %v1411_v17 = vld [vmem:[%s2989_s4 + $0xa8] sm:$0xff]  ;;  %v1458_v18 = vld [vmem:[%s2989_s4 + $0x220] sm:$0xff]  ;;  %v1412_v22 = vld [vmem:[%s2989_s4 + $0xb0] sm:$0xff]  ;;  %s2661_s11 = scalar_lea.vmem %s353_s12, %s2521_s13  ;;  %s2676_s28 = scalar_lea.vmem %s371_s18, %s2521_s13 }
  0x17   : >> { %2111 = vmatpush3.bf16.msra.mxu0 %v2110_v10  ;;  %2016 = vmatprep.subr.bf16.mxu1 %v2312_v5  ;;  %v1459_v19 = vld [vmem:[%s2989_s4 + $0x228] sm:$0xff]  ;;  %v2020_v20 = vpack.c.bf16 %v1411_v17, %v1410_v16  ;;  %v1413_v23 = vld [vmem:[%s2989_s4 + $0xb8] sm:$0xff]  ;;  %v1460_v24 = vld [vmem:[%s2989_s4 + $0x230] sm:$0xff]  ;;  %s1218_s27 = scalar_lea.vmem %s2383_s9, %s1541_s26  ;;  %s398_s25 = sadd.s32 1, %s2310_s25  }
  0x18   : >> { %2112 = vmatprep.subr.bf16.mxu0 %v2312_v5  ;;  %v2116_v21 = vpack.c.bf16 %v1459_v19, %v1458_v18  ;;  %v1461_v25 = vld [vmem:[%s2989_s4 + $0x238] sm:$0xff]  ;;  %v2023_v26 = vpack.c.bf16 %v1413_v23, %v1412_v22  ;;  %v1414_v28 = vld [vmem:[%s2989_s4 + $0xc0] sm:$0xff]  ;;  %v1415_v29 = vld [vmem:[%s2989_s4 + $0xc8] sm:$0xff]  ;;  %p395_p5 = scmp.ge.s32.totalorder %s398_s25, 8  }
  0x19   : >> { %v2119_v27 = vpack.c.bf16 %v1461_v25, %v1460_v24  ;;  %v1462_v30 = vld [vmem:[%s2989_s4 + $0x240] sm:$0xff]  ;;  %v1463_v31 = vld [vmem:[%s2989_s4 + $0x248] sm:$0xff]  ;;  %v2026_v32 = vpack.c.bf16 %v1415_v29, %v1414_v28  ;;  %v1416_v34 = vld [vmem:[%s2989_s4 + $0xd0] sm:$0xff] }
  0x1a   : >> { %2018 = vmatpush3.bf16.msra.mxu1 %v2017_v14  ;;  %v2122_v33 = vpack.c.bf16 %v1463_v31, %v1462_v30  ;;  %v1417_v35 = vld [vmem:[%s2989_s4 + $0xd8] sm:$0xff]  ;;  %v1464_v36 = vld [vmem:[%s2989_s4 + $0x250] sm:$0xff]  ;;  %v1418_v40 = vld [vmem:[%s2989_s4 + $0xe0] sm:$0xff] }
  0x1b   : >> { %2114 = vmatpush3.bf16.msra.mxu0 %v2113_v15  ;;  %2019 = vmatprep.subr.bf16.mxu1 %v2312_v5  ;;  %v1465_v37 = vld [vmem:[%s2989_s4 + $0x258] sm:$0xff]  ;;  %v2029_v38 = vpack.c.bf16 %v1417_v35, %v1416_v34  ;;  %v1419_v41 = vld [vmem:[%s2989_s4 + $0xe8] sm:$0xff]  ;;  %v1466_v42 = vld [vmem:[%s2989_s4 + $0x260] sm:$0xff] }
  0x1c   : >> { %2115 = vmatprep.subr.bf16.mxu0 %v2312_v5  ;;  %v2125_v39 = vpack.c.bf16 %v1465_v37, %v1464_v36  ;;  %v1467_v43 = vld [vmem:[%s2989_s4 + $0x268] sm:$0xff]  ;;  %v2032_v44 = vpack.c.bf16 %v1419_v41, %v1418_v40  ;;  %v1420_v46 = vld [vmem:[%s2989_s4 + $0xf0] sm:$0xff]  ;;  %v1421_v47 = vld [vmem:[%s2989_s4 + $0xf8] sm:$0xff] }
  0x1d   : >> { %v2128_v45 = vpack.c.bf16 %v1467_v43, %v1466_v42  ;;  %v1468_v48 = vld [vmem:[%s2989_s4 + $0x270] sm:$0xff]  ;;  %v1469_v49 = vld [vmem:[%s2989_s4 + $0x278] sm:$0xff]  ;;  %v2035_v50 = vpack.c.bf16 %v1421_v47, %v1420_v46  ;;  %v402_v52 = vld [vmem:[%s2989_s4] sm:$0xff] }
  0x1e   : >> { %2021 = vmatpush3.bf16.msra.mxu1 %v2020_v20  ;;  %v2131_v51 = vpack.c.bf16 %v1469_v49, %v1468_v48  ;;  %v403_v53 = vld [vmem:[%s2989_s4 + $0x8] sm:$0xff]  ;;  %v1470_v54 = vld [vmem:[%s2989_s4 + $0x280] sm:$0xff]  ;;  %v404_v60 = vld [vmem:[%s2989_s4 + $0x10] sm:$0xff] }
  0x1f   : >> { %2117 = vmatpush3.bf16.msra.mxu0 %v2116_v21  ;;  %2022 = vmatprep.subr.bf16.mxu1 %v2312_v5  ;;  %v1471_v55 = vld [vmem:[%s2989_s4 + $0x288] sm:$0xff]  ;;  %v419_v56 = vld [vmem:[%s2530_s17] sm:$0xff]  ;;  %v2038_v57 = vpack.c.bf16 %v403_v53, %v402_v52  ;;  %v405_v61 = vld [vmem:[%s2989_s4 + $0x18] sm:$0xff] }
  0x20   : >> { %2118 = vmatprep.subr.bf16.mxu0 %v2312_v5  ;;  %v757_v58 = vld [vmem:[%s756_s7] sm:$0xff]  ;;  %v2134_v59 = vpack.c.bf16 %v1471_v55, %v1470_v54  ;;  %v1472_v62 = vld [vmem:[%s2989_s4 + $0x290] sm:$0xff]  ;;  %v1473_v63 = vld [vmem:[%s2989_s4 + $0x298] sm:$0xff]  ;;  %v2041_v2 = vpack.c.bf16 %v405_v61, %v404_v60 }
  0x21   : >> { %v2137_v3 = vpack.c.bf16 %v1473_v63, %v1472_v62  ;;  %v406_v4 = vld [vmem:[%s2989_s4 + $0x20] sm:$0xff]  ;;  %v407_v6 = vld [vmem:[%s2989_s4 + $0x28] sm:$0xff]  ;;  %v408_v11 = vld [vmem:[%s2989_s4 + $0x30] sm:$0xff] }
  0x22   : >> { %2024 = vmatpush3.bf16.msra.mxu1 %v2023_v26  ;;  %v1474_v7 = vld [vmem:[%s2989_s4 + $0x2a0] sm:$0xff]  ;;  %v1475_v8 = vld [vmem:[%s2989_s4 + $0x2a8] sm:$0xff]  ;;  %v2044_v9 = vpack.c.bf16 %v407_v6, %v406_v4  ;;  %v409_v12 = vld [vmem:[%s2989_s4 + $0x38] sm:$0xff] }
  0x23   : >> { %2120 = vmatpush3.bf16.msra.mxu0 %v2119_v27  ;;  %2025 = vmatprep.subr.bf16.mxu1 %v2312_v5  ;;  %v2140_v10 = vpack.c.bf16 %v1475_v8, %v1474_v7  ;;  %v1476_v14 = vld [vmem:[%s2989_s4 + $0x2b0] sm:$0xff]  ;;  %v1477_v15 = vld [vmem:[%s2989_s4 + $0x2b8] sm:$0xff]  ;;  %v2047_v16 = vpack.c.bf16 %v409_v12, %v408_v11  ;;  %v410_v18 = vld [vmem:[%s2989_s4 + $0x40] sm:$0xff] }
  0x24   : >> { %2121 = vmatprep.subr.bf16.mxu0 %v2312_v5  ;;  %v2143_v17 = vpack.c.bf16 %v1477_v15, %v1476_v14  ;;  %v411_v19 = vld [vmem:[%s2989_s4 + $0x48] sm:$0xff]  ;;  %v1478_v20 = vld [vmem:[%s2989_s4 + $0x2c0] sm:$0xff]  ;;  %v412_v24 = vld [vmem:[%s2989_s4 + $0x50] sm:$0xff] }
  0x25   : >> { %v1479_v21 = vld [vmem:[%s2989_s4 + $0x2c8] sm:$0xff]  ;;  %v2050_v22 = vpack.c.bf16 %v411_v19, %v410_v18  ;;  %v413_v25 = vld [vmem:[%s2989_s4 + $0x58] sm:$0xff]  ;;  %v1480_v26 = vld [vmem:[%s2989_s4 + $0x2d0] sm:$0xff] }
  0x26   : >> { %2027 = vmatpush3.bf16.msra.mxu1 %v2026_v32  ;;  %v2146_v23 = vpack.c.bf16 %v1479_v21, %v1478_v20  ;;  %v1481_v27 = vld [vmem:[%s2989_s4 + $0x2d8] sm:$0xff]  ;;  %v2053_v28 = vpack.c.bf16 %v413_v25, %v412_v24  ;;  %v414_v30 = vld [vmem:[%s2989_s4 + $0x60] sm:$0xff]  ;;  %v415_v31 = vld [vmem:[%s2989_s4 + $0x68] sm:$0xff] }
  0x27   : >> { %2123 = vmatpush3.bf16.msra.mxu0 %v2122_v33  ;;  %2028 = vmatprep.subr.bf16.mxu1 %v2312_v5  ;;  %v2149_v29 = vpack.c.bf16 %v1481_v27, %v1480_v26  ;;  %v1482_v32 = vld [vmem:[%s2989_s4 + $0x2e0] sm:$0xff]  ;;  %v1483_v33 = vld [vmem:[%s2989_s4 + $0x2e8] sm:$0xff]  ;;  %v2056_v34 = vpack.c.bf16 %v415_v31, %v414_v30  ;;  %v416_v36 = vld [vmem:[%s2989_s4 + $0x70] sm:$0xff] }
  0x28   : >> { %2124 = vmatprep.subr.bf16.mxu0 %v2312_v5  ;;  %v2152_v35 = vpack.c.bf16 %v1483_v33, %v1482_v32  ;;  %v417_v37 = vld [vmem:[%s2989_s4 + $0x78] sm:$0xff]  ;;  %v1422_v42 = vld [vmem:[%s2989_s4 + $0x100] sm:$0xff]  ;;  %v1423_v43 = vld [vmem:[%s2989_s4 + $0x108] sm:$0xff] }
  0x29   : >> { %v2059_v40 = vpack.c.bf16 %v417_v37, %v416_v36  ;;  %v401_v46 = vld [vmem:[%s2661_s11] sm:$0xff]  ;;  %v2062_v47 = vpack.c.bf16 %v1423_v43, %v1422_v42  ;;  %v1490_v52 = vld [vmem:[%s2989_s4 + $0x310] sm:$0xff]  ;;  %v1491_v53 = vld [vmem:[%s2989_s4 + $0x318] sm:$0xff] }
  0x2a   : >> { %2030 = vmatpush3.bf16.msra.mxu1 %v2029_v38  ;;  %v1484_v38 = vld [vmem:[%s2989_s4 + $0x2f0] sm:$0xff]  ;;  %v846_v48 = vld [vmem:[%s2676_s28 + $0x1] sm:$0xff]  ;;  %v2161_v55 = vpack.c.bf16 %v1491_v53, %v1490_v52  ;;  %v1429_v63 = vld [vmem:[%s2989_s4 + $0x138] sm:$0xff] }
  0x2b   : >> { %2126 = vmatpush3.bf16.msra.mxu0 %v2125_v39  ;;  %2031 = vmatprep.subr.bf16.mxu1 %v2312_v5  ;;  %v1485_v39 = vld [vmem:[%s2989_s4 + $0x2f8] sm:$0xff]  ;;  %v1428_v62 = vld [vmem:[%s2989_s4 + $0x130] sm:$0xff]  ;;  %v1430_v7 = vld [vmem:[%s2989_s4 + $0x140] sm:$0xff] }
  0x2c   : >> { %2127 = vmatprep.subr.bf16.mxu0 %v2312_v5  ;;  %v2155_v41 = vpack.c.bf16 %v1485_v39, %v1484_v38  ;;  %v2071_v4 = vpack.c.bf16 %v1429_v63, %v1428_v62  ;;  %v1431_v8 = vld [vmem:[%s2989_s4 + $0x148] sm:$0xff]  ;;  %v1432_v14 = vld [vmem:[%s2989_s4 + $0x150] sm:$0xff]  ;;  %v1433_v15 = vld [vmem:[%s2989_s4 + $0x158] sm:$0xff] }
  0x2d   : >> { %v2074_v11 = vpack.c.bf16 %v1431_v8, %v1430_v7  ;;  %v2077_v18 = vpack.c.bf16 %v1433_v15, %v1432_v14  ;;  %v1434_v20 = vld [vmem:[%s2989_s4 + $0x160] sm:$0xff]  ;;  %v1435_v21 = vld [vmem:[%s2989_s4 + $0x168] sm:$0xff]  ;;  %v1436_v26 = vld [vmem:[%s2989_s4 + $0x170] sm:$0xff] }
  0x2e   : >> { %2033 = vmatpush3.bf16.msra.mxu1 %v2032_v44  ;;  %v1488_v44 = vld [vmem:[%s2989_s4 + $0x300] sm:$0xff]  ;;  %v2080_v24 = vpack.c.bf16 %v1435_v21, %v1434_v20  ;;  %v1437_v27 = vld [vmem:[%s2989_s4 + $0x178] sm:$0xff]  ;;  %v1439_v33 = vld [vmem:[%s2989_s4 + $0x188] sm:$0xff] }
  0x2f   : >> { %2129 = vmatpush3.bf16.msra.mxu0 %v2128_v45  ;;  %2034 = vmatprep.subr.bf16.mxu1 %v2312_v5  ;;  %v1489_v45 = vld [vmem:[%s2989_s4 + $0x308] sm:$0xff]  ;;  %v2083_v30 = vpack.c.bf16 %v1437_v27, %v1436_v26  ;;  %v1438_v32 = vld [vmem:[%s2989_s4 + $0x180] sm:$0xff]  ;;  %v1487_v38 = vld [vmem:[%s2661_s11 + $0x10] sm:$0xff] }
  0x30   : >> { %2130 = vmatprep.subr.bf16.mxu0 %v2312_v5  ;;  %v2158_v49 = vpack.c.bf16 %v1489_v45, %v1488_v44  ;;  %v577_v36 = vld [vmem:[%s2661_s11 + $0x1] sm:$0xff]  ;;  %v2086_v37 = vpack.c.bf16 %v1439_v33, %v1438_v32  ;;  %v1508_v42 = vld [vmem:[%s2989_s4 + $0x390] sm:$0xff]  ;;  %v1509_v43 = vld [vmem:[%s2989_s4 + $0x398] sm:$0xff] }
  0x31   : >> { %v2185_v45 = vpack.c.bf16 %v1509_v43, %v1508_v42  ;;  %v1444_v52 = vld [vmem:[%s2989_s4 + $0x1b0] sm:$0xff]  ;;  %v1445_v53 = vld [vmem:[%s2989_s4 + $0x1b8] sm:$0xff]  ;;  %v1536_v42 = vld [vmem:[%s2989_s4 + $0x468] sm:$0xff] }
  0x32   : >> { %2036 = vmatpush3.bf16.msra.mxu1 %v2035_v50  ;;  %v1424_v50 = vld [vmem:[%s2989_s4 + $0x110] sm:$0xff] }
  0x33   : >> { %2132 = vmatpush3.bf16.msra.mxu0 %v2131_v51  ;;  %2037 = vmatprep.subr.bf16.mxu1 %v2312_v5  ;;  %v1425_v51 = vld [vmem:[%s2989_s4 + $0x118] sm:$0xff]  ;;  %v1525_v27 = vld [vmem:[%s2989_s4 + $0x410] sm:$0xff] }
  0x34   : >> { %2133 = vmatprep.subr.bf16.mxu0 %v2312_v5  ;;  %v2065_v54 = vpack.c.bf16 %v1425_v51, %v1424_v50  ;;  %v1529_v33 = vld [vmem:[%s2989_s4 + $0x430] sm:$0xff] }
  0x35   : >> { %1731 = vmatmul.mubr.f32.vlgmr.msra.gmra.mrb[0].mxu1 %v419_v56  ;;  %v1426_v56 = vld [vmem:[%s2989_s4 + $0x120] sm:$0xff] }
  0x36   : >> { %2039 = vmatpush3.bf16.msra.mxu1 %v2038_v57  ;;  %1871 = vmatmul.mubr.f32.vlgmr.msra.gmra.mrb[0].mxu0 %v757_v58  ;;  %v1427_v57 = vld [vmem:[%s2989_s4 + $0x128] sm:$0xff]  ;;  %v1492_v58 = vld [vmem:[%s2989_s4 + $0x320] sm:$0xff] }
  0x37   : >> { %2135 = vmatpush3.bf16.msra.mxu0 %v2134_v59  ;;  %2040 = vmatprep.subr.bf16.mxu1 %v2312_v5  ;;  %v1493_v59 = vld [vmem:[%s2989_s4 + $0x328] sm:$0xff]  ;;  %v2068_v60 = vpack.c.bf16 %v1427_v57, %v1426_v56  ;;  %v2095_v56 = vpack.c.bf16 %v1445_v53, %v1444_v52 }
  0x38   : >> { %2136 = vmatprep.subr.bf16.mxu0 %v2312_v5  ;;  %1765 = vmatprep.mubr.msk.f32.mxu1 %vm2313_vm0, %v2314_v13  ;;  %v2164_v61 = vpack.c.bf16 %v1493_v59, %v1492_v58  ;;  %v1446_v58 = vld [vmem:[%s2989_s4 + $0x1c0] sm:$0xff]  ;;  %v1447_v59 = vld [vmem:[%s2989_s4 + $0x1c8] sm:$0xff] }
  0x39   : >> { %1905 = vmatprep.mubr.msk.f32.mxu0 %vm2313_vm0, %v2314_v13  ;;  %v2098_v62 = vpack.c.bf16 %v1447_v59, %v1446_v58 }
  0x3a   : >> { %2042 = vmatpush3.bf16.msra.mxu1 %v2041_v2  ;;  %v1494_v2 = vld [vmem:[%s2989_s4 + $0x330] sm:$0xff] }
  0x3b   : >> { %2138 = vmatpush3.bf16.msra.mxu0 %v2137_v3  ;;  %2043 = vmatprep.subr.bf16.mxu1 %v2312_v5  ;;  %v1495_v3 = vld [vmem:[%s2989_s4 + $0x338] sm:$0xff] }
  0x3c   : >> { %2139 = vmatprep.subr.bf16.mxu0 %v2312_v5  ;;  %v2167_v6 = vpack.c.bf16 %v1495_v3, %v1494_v2  ;;  %v1448_v2 = vld [vmem:[%s2989_s4 + $0x1d0] sm:$0xff]  ;;  %v1449_v3 = vld [vmem:[%s2989_s4 + $0x1d8] sm:$0xff] }
  0x3d   : >> { %v2101_v7 = vpack.c.bf16 %v1449_v3, %v1448_v2 }
  0x3e   : >> { %2045 = vmatpush3.bf16.msra.mxu1 %v2044_v9  ;;  %v1496_v9 = vld [vmem:[%s2989_s4 + $0x340] sm:$0xff] }
  0x3f   : >> { %2141 = vmatpush3.bf16.msra.mxu0 %v2140_v10  ;;  %2046 = vmatprep.subr.bf16.mxu1 %v2312_v5  ;;  %v1497_v10 = vld [vmem:[%s2989_s4 + $0x348] sm:$0xff] }
  0x40   : >> { %2142 = vmatprep.subr.bf16.mxu0 %v2312_v5  ;;  %v2170_v12 = vpack.c.bf16 %v1497_v10, %v1496_v9  ;;  %v1450_v9 = vld [vmem:[%s2989_s4 + $0x1e0] sm:$0xff]  ;;  %v1451_v10 = vld [vmem:[%s2989_s4 + $0x1e8] sm:$0xff] }
  0x41   : >> { %v2104_v14 = vpack.c.bf16 %v1451_v10, %v1450_v9 }
  0x42   : >> { %2048 = vmatpush3.bf16.msra.mxu1 %v2047_v16  ;;  %v1498_v16 = vld [vmem:[%s2989_s4 + $0x350] sm:$0xff] }
  0x43   : >> { %2144 = vmatpush3.bf16.msra.mxu0 %v2143_v17  ;;  %2049 = vmatprep.subr.bf16.mxu1 %v2312_v5  ;;  %v1499_v17 = vld [vmem:[%s2989_s4 + $0x358] sm:$0xff] }
  0x44   : >> { %2145 = vmatprep.subr.bf16.mxu0 %v2312_v5  ;;  %v2173_v19 = vpack.c.bf16 %v1499_v17, %v1498_v16  ;;  %v1452_v16 = vld [vmem:[%s2989_s4 + $0x1f0] sm:$0xff]  ;;  %v1453_v17 = vld [vmem:[%s2989_s4 + $0x1f8] sm:$0xff] }
  0x45   : >> { %v2107_v20 = vpack.c.bf16 %v1453_v17, %v1452_v16 }
  0x46   : >> { %2051 = vmatpush3.bf16.msra.mxu1 %v2050_v22  ;;  %v1500_v22 = vld [vmem:[%s2989_s4 + $0x360] sm:$0xff] }
  0x47   : >> { %2147 = vmatpush3.bf16.msra.mxu0 %v2146_v23  ;;  %2052 = vmatprep.subr.bf16.mxu1 %v2312_v5  ;;  %v1501_v23 = vld [vmem:[%s2989_s4 + $0x368] sm:$0xff] }
  0x48   : >> { %2148 = vmatprep.subr.bf16.mxu0 %v2312_v5  ;;  %v2176_v25 = vpack.c.bf16 %v1501_v23, %v1500_v22  ;;  %v1523_v22 = vld [vmem:[%s2989_s4 + $0x400] sm:$0xff]  ;;  %v1524_v23 = vld [vmem:[%s2989_s4 + $0x408] sm:$0xff] }
  0x49   : >> { %v2206_v26 = vpack.c.bf16 %v1524_v23, %v1523_v22 }
  0x4a   : >> { %2054 = vmatpush3.bf16.msra.mxu1 %v2053_v28  ;;  %v1502_v28 = vld [vmem:[%s2989_s4 + $0x370] sm:$0xff] }
  0x4b   : >> { %2150 = vmatpush3.bf16.msra.mxu0 %v2149_v29  ;;  %2055 = vmatprep.subr.bf16.mxu1 %v2312_v5  ;;  %v1503_v29 = vld [vmem:[%s2989_s4 + $0x378] sm:$0xff] }
  0x4c   : >> { %2151 = vmatprep.subr.bf16.mxu0 %v2312_v5  ;;  %v2179_v31 = vpack.c.bf16 %v1503_v29, %v1502_v28  ;;  %v1526_v28 = vld [vmem:[%s2989_s4 + $0x418] sm:$0xff] }
  0x4d   : >> { %v2209_v29 = vpack.c.bf16 %v1526_v28, %v1525_v27 }
  0x4e   : >> { %2057 = vmatpush3.bf16.msra.mxu1 %v2056_v34  ;;  %v1506_v34 = vld [vmem:[%s2989_s4 + $0x380] sm:$0xff] }
  0x4f   : >> { %2153 = vmatpush3.bf16.msra.mxu0 %v2152_v35  ;;  %2058 = vmatprep.subr.bf16.mxu1 %v2312_v5  ;;  %v1507_v35 = vld [vmem:[%s2989_s4 + $0x388] sm:$0xff] }
  0x50   : >> { %2154 = vmatprep.subr.bf16.mxu0 %v2312_v5  ;;  %v2182_v39 = vpack.c.bf16 %v1507_v35, %v1506_v34  ;;  %v1531_v35 = vld [vmem:[%s2989_s4 + $0x440] sm:$0xff] }
  0x52   : >> { %2060 = vmatpush3.bf16.msra.mxu1 %v2059_v40  ;;  %v1440_v40 = vld [vmem:[%s2989_s4 + $0x190] sm:$0xff] }
  0x53   : >> { %2156 = vmatpush3.bf16.msra.mxu0 %v2155_v41  ;;  %2061 = vmatprep.subr.bf16.mxu1 %v2312_v5  ;;  %v1441_v41 = vld [vmem:[%s2989_s4 + $0x198] sm:$0xff] }
  0x54   : >> { %2157 = vmatprep.subr.bf16.mxu0 %v2312_v5  ;;  %v2089_v44 = vpack.c.bf16 %v1441_v41, %v1440_v40  ;;  %v1535_v41 = vld [vmem:[%s2989_s4 + $0x460] sm:$0xff] }
  0x55   : >> { %1766 = vmatmul.mubr.f32.vlgmr.msra.gmra.mrb[0].mxu1 %v401_v46  ;;  %v1442_v46 = vld [vmem:[%s2989_s4 + $0x1a0] sm:$0xff]  ;;  %v2224_v43 = vpack.c.bf16 %v1536_v42, %v1535_v41 }
  0x56   : >> { %2063 = vmatpush3.bf16.msra.mxu1 %v2062_v47  ;;  %1906 = vmatmul.mubr.f32.vlgmr.msra.gmra.mrb[0].mxu0 %v846_v48  ;;  %v1443_v47 = vld [vmem:[%s2989_s4 + $0x1a8] sm:$0xff]  ;;  %v1510_v48 = vld [vmem:[%s2989_s4 + $0x3a0] sm:$0xff] }
  0x57   : >> { %2159 = vmatpush3.bf16.msra.mxu0 %v2158_v49  ;;  %2064 = vmatprep.subr.bf16.mxu1 %v2312_v5  ;;  %v1511_v49 = vld [vmem:[%s2989_s4 + $0x3a8] sm:$0xff]  ;;  %v2092_v50 = vpack.c.bf16 %v1443_v47, %v1442_v46  ;;  %v1522_v47 = vld [vmem:[%s2661_s11 + $0x11] sm:$0xff] }
  0x58   : >> { %2160 = vmatprep.subr.bf16.mxu0 %v2312_v5  ;;  %1800 = vmatprep.mubr.msk.f32.mxu1 %vm2313_vm0, %v2314_v13  ;;  %v2188_v51 = vpack.c.bf16 %v1511_v49, %v1510_v48 }
  0x59   : >> { %1940 = vmatprep.mubr.msk.f32.mxu0 %vm2313_vm0, %v2314_v13 }
  0x5a   : >> { %2066 = vmatpush3.bf16.msra.mxu1 %v2065_v54  ;;  %v1512_v54 = vld [vmem:[%s2989_s4 + $0x3b0] sm:$0xff] }
  0x5b   : >> { %2162 = vmatpush3.bf16.msra.mxu0 %v2161_v55  ;;  %2067 = vmatprep.subr.bf16.mxu1 %v2312_v5  ;;  %v1513_v55 = vld [vmem:[%s2989_s4 + $0x3b8] sm:$0xff] }
  0x5c   : >> { %2163 = vmatprep.subr.bf16.mxu0 %v2312_v5  ;;  %v2191_v57 = vpack.c.bf16 %v1513_v55, %v1512_v54 }
  0x5e   : >> { %2069 = vmatpush3.bf16.msra.mxu1 %v2068_v60  ;;  %v1514_v60 = vld [vmem:[%s2989_s4 + $0x3c0] sm:$0xff] }
  0x5f   : >> { %2165 = vmatpush3.bf16.msra.mxu0 %v2164_v61  ;;  %2070 = vmatprep.subr.bf16.mxu1 %v2312_v5  ;;  %v1515_v61 = vld [vmem:[%s2989_s4 + $0x3c8] sm:$0xff] }
  0x60   : >> { %2166 = vmatprep.subr.bf16.mxu0 %v2312_v5  ;;  %v2194_v63 = vpack.c.bf16 %v1515_v61, %v1514_v60 }
  0x62   : >> { %2072 = vmatpush3.bf16.msra.mxu1 %v2071_v4  ;;  %v1516_v4 = vld [vmem:[%s2989_s4 + $0x3d0] sm:$0xff] }
  0x63   : >> { %2168 = vmatpush3.bf16.msra.mxu0 %v2167_v6  ;;  %2073 = vmatprep.subr.bf16.mxu1 %v2312_v5  ;;  %v1517_v6 = vld [vmem:[%s2989_s4 + $0x3d8] sm:$0xff] }
  0x64   : >> { %2169 = vmatprep.subr.bf16.mxu0 %v2312_v5  ;;  %v2197_v8 = vpack.c.bf16 %v1517_v6, %v1516_v4 }
  0x66   : >> { %2075 = vmatpush3.bf16.msra.mxu1 %v2074_v11  ;;  %v1518_v11 = vld [vmem:[%s2989_s4 + $0x3e0] sm:$0xff] }
  0x67   : >> { %2171 = vmatpush3.bf16.msra.mxu0 %v2170_v12  ;;  %2076 = vmatprep.subr.bf16.mxu1 %v2312_v5  ;;  %v1519_v12 = vld [vmem:[%s2989_s4 + $0x3e8] sm:$0xff] }
  0x68   : >> { %2172 = vmatprep.subr.bf16.mxu0 %v2312_v5  ;;  %v2200_v15 = vpack.c.bf16 %v1519_v12, %v1518_v11 }
  0x6a   : >> { %2078 = vmatpush3.bf16.msra.mxu1 %v2077_v18  ;;  %v1520_v18 = vld [vmem:[%s2989_s4 + $0x3f0] sm:$0xff] }
  0x6b   : >> { %2174 = vmatpush3.bf16.msra.mxu0 %v2173_v19  ;;  %2079 = vmatprep.subr.bf16.mxu1 %v2312_v5  ;;  %v1521_v19 = vld [vmem:[%s2989_s4 + $0x3f8] sm:$0xff] }
  0x6c   : >> { %2175 = vmatprep.subr.bf16.mxu0 %v2312_v5  ;;  %v2203_v21 = vpack.c.bf16 %v1521_v19, %v1520_v18 }
  0x6e   : >> { %2081 = vmatpush3.bf16.msra.mxu1 %v2080_v24  ;;  %v667_v24 = vld [vmem:[%s2676_s28] sm:$0xff] }
  0x6f   : >> { %2177 = vmatpush3.bf16.msra.mxu0 %v2176_v25  ;;  %2082 = vmatprep.subr.bf16.mxu1 %v2312_v5  ;;  %v1505_v25 = vld [vmem:[%s2530_s17 + $0x10] sm:$0xff] }
  0x70   : >> { %2178 = vmatprep.subr.bf16.mxu0 %v2312_v5 }
  0x72   : >> { %2084 = vmatpush3.bf16.msra.mxu1 %v2083_v30  ;;  %v1527_v30 = vld [vmem:[%s2989_s4 + $0x420] sm:$0xff] }
  0x73   : >> { %2180 = vmatpush3.bf16.msra.mxu0 %v2179_v31  ;;  %2085 = vmatprep.subr.bf16.mxu1 %v2312_v5  ;;  %v1528_v31 = vld [vmem:[%s2989_s4 + $0x428] sm:$0xff] }
  0x74   : >> { %2181 = vmatprep.subr.bf16.mxu0 %v2312_v5  ;;  %v2212_v32 = vpack.c.bf16 %v1528_v31, %v1527_v30 }
  0x75   : >> { %1801 = vmatmul.mubr.f32.vlgmr.msra.gmra.mrb[0].mxu1 %v577_v36  ;;  %v1532_v36 = vld [vmem:[%s2989_s4 + $0x448] sm:$0xff] }
  0x76   : >> { %2087 = vmatpush3.bf16.msra.mxu1 %v2086_v37  ;;  %1941 = vmatmul.mubr.f32.vlgmr.msra.gmra.mrb[0].mxu0 %v1487_v38  ;;  %v2218_v37 = vpack.c.bf16 %v1532_v36, %v1531_v35  ;;  %v1533_v38 = vld [vmem:[%s2989_s4 + $0x450] sm:$0xff] }
  0x77   : >> { %2183 = vmatpush3.bf16.msra.mxu0 %v2182_v39  ;;  %2088 = vmatprep.subr.bf16.mxu1 %v2312_v5  ;;  %v1534_v39 = vld [vmem:[%s2989_s4 + $0x458] sm:$0xff] }
  0x78   : >> { %2184 = vmatprep.subr.bf16.mxu0 %v2312_v5  ;;  %1835 = vmatprep.mubr.msk.f32.mxu1 %vm2313_vm0, %v2314_v13  ;;  %v2221_v40 = vpack.c.bf16 %v1534_v39, %v1533_v38 }
  0x79   : >> { %1975 = vmatprep.mubr.msk.f32.mxu0 %vm2313_vm0, %v2314_v13 }
  0x7a   : >> { %2090 = vmatpush3.bf16.msra.mxu1 %v2089_v44  ;;  %v1537_v44 = vld [vmem:[%s2989_s4 + $0x470] sm:$0xff] }
  0x7b   : >> { %2186 = vmatpush3.bf16.msra.mxu0 %v2185_v45  ;;  %2091 = vmatprep.subr.bf16.mxu1 %v2312_v5  ;;  %v1538_v45 = vld [vmem:[%s2989_s4 + $0x478] sm:$0xff] }
  0x7c   : >> { %2187 = vmatprep.subr.bf16.mxu0 %v2312_v5  ;;  %v2227_v46 = vpack.c.bf16 %v1538_v45, %v1537_v44 }
  0x7e   : >> { %2093 = vmatpush3.bf16.msra.mxu1 %v2092_v50 }
  0x7f   : >> { %2189 = vmatpush3.bf16.msra.mxu0 %v2188_v51  ;;  %2094 = vmatprep.subr.bf16.mxu1 %v2312_v5 }
  0x80   : >> { %2190 = vmatprep.subr.bf16.mxu0 %v2312_v5 }
  0x82   : >> { %2096 = vmatpush3.bf16.msra.mxu1 %v2095_v56 }
  0x83   : >> { %2192 = vmatpush3.bf16.msra.mxu0 %v2191_v57  ;;  %2097 = vmatprep.subr.bf16.mxu1 %v2312_v5 }
  0x84   : >> { %2193 = vmatprep.subr.bf16.mxu0 %v2312_v5 }
  0x86   : >> { %2099 = vmatpush3.bf16.msra.mxu1 %v2098_v62 }
  0x87   : >> { %2195 = vmatpush3.bf16.msra.mxu0 %v2194_v63  ;;  %2100 = vmatprep.subr.bf16.mxu1 %v2312_v5 }
  0x88   : >> { %2196 = vmatprep.subr.bf16.mxu0 %v2312_v5 }
  0x8a   : >> { %2102 = vmatpush3.bf16.msra.mxu1 %v2101_v7 }
  0x8b   : >> { %2198 = vmatpush3.bf16.msra.mxu0 %v2197_v8  ;;  %2103 = vmatprep.subr.bf16.mxu1 %v2312_v5 }
  0x8c   : >> { %2199 = vmatprep.subr.bf16.mxu0 %v2312_v5 }
  0x8e   : >> { %2105 = vmatpush3.bf16.msra.mxu1 %v2104_v14 }
  0x8f   : >> { %2201 = vmatpush3.bf16.msra.mxu0 %v2200_v15  ;;  %2106 = vmatprep.subr.bf16.mxu1 %v2312_v5 }
  0x90   : >> { %2202 = vmatprep.subr.bf16.mxu0 %v2312_v5 }
  0x92   : >> { %2108 = vmatpush3.bf16.msra.mxu1 %v2107_v20 }
  0x93   : >> { %2204 = vmatpush3.bf16.msra.mxu0 %v2203_v21 }
  0x94   : >> { %2205 = vmatprep.subr.bf16.mxu0 %v2312_v5 }
  0x95   : >> { %1836 = vmatmul.mubr.f32.vlgmr.msra.gmra.mrb[0].mxu1 %v667_v24 }
  0x96   : >> { %1976 = vmatmul.mubr.f32.vlgmr.msra.gmra.mrb[0].mxu0 %v1505_v25 }
  0x97   : >> { %2207 = vmatpush3.bf16.msra.mxu0 %v2206_v26  ;;  %2010 = vmatprep.mubr.msk.f32.mxu0 %vm2313_vm0, %v2314_v13  ;;  %v1530_v13 = vld [vmem:[%s2989_s4 + $0x438] sm:$0xff] }
  0x98   : >> { %2208 = vmatprep.subr.bf16.mxu0 %v2312_v5  ;;  %v2215_v34 = vpack.c.bf16 %v1530_v13, %v1529_v33 }
  0x9b   : >> { %2210 = vmatpush3.bf16.msra.mxu0 %v2209_v29 }
  0x9c   : >> { %2211 = vmatprep.subr.bf16.mxu0 %v2312_v5 }
  0x9f   : >> { %2213 = vmatpush3.bf16.msra.mxu0 %v2212_v32 }
  0xa0   : >> { %2214 = vmatprep.subr.bf16.mxu0 %v2312_v5 }
  0xa3   : >> { %2216 = vmatpush3.bf16.msra.mxu0 %v2215_v34 }
  0xa4   : >> { %2217 = vmatprep.subr.bf16.mxu0 %v2312_v5 }
  0xa7   : >> { %2219 = vmatpush3.bf16.msra.mxu0 %v2218_v37 }
  0xa8   : >> { %2220 = vmatprep.subr.bf16.mxu0 %v2312_v5 }
  0xab   : >> { %2222 = vmatpush3.bf16.msra.mxu0 %v2221_v40 }
  0xac   : >> { %2223 = vmatprep.subr.bf16.mxu0 %v2312_v5 }
  0xaf   : >> { %2225 = vmatpush3.bf16.msra.mxu0 %v2224_v43 }
  0xb0   : >> { %2226 = vmatprep.subr.bf16.mxu0 %v2312_v5 }
  0xb3   : >> { %2228 = vmatpush3.bf16.msra.mxu0 %v2227_v46 }
  0xb6   : >> { %2011 = vmatmul.mubr.f32.vlgmr.msra.gmra.mrb[0].mxu0 %v1522_v47 }
 0x168   : >> { %v751_v48 = vpop.f32.mrb[0].mxu1 }
 0x169   : >> { %v1837_v49 = vpop.f32.mrb[1].mxu1 }
 0x189   : >> { %v1201_v50 = vpop.f32.mrb[0].mxu0 }
 0x18a   : >> { %v2229_v51 = vadd.f32 %v1201_v50, %v751_v48  ;;  %v2012_v52 = vpop.f32.mrb[1].mxu0 }
 0x18c   : >> { %v1210_v53 = vmul.f32 %v2229_v51, %v2371_v0  ;;  %397 = sbr.rel (!%p395_p5) target bundleno = 19 (0x13), region = 105 }
 0x18e   : >> { %v1215_v54 = vadd.f32 %v2376_v1, %v1210_v53 }
 0x190   : >> { %v1216_v55 = vmax.f32 %v1215_v54, 0.0 }
 0x192   : >> { %1219 = vst [vmem:[%s1218_s27] sm:$0xff] %v1216_v55 }
 0x193 PF: > { %s16_s23 = sadd.s32 1, %s2306_s23   ;;  %s2992_s21 = smov %s2302_s22 }
 0x194   : > { %p13_p6 = scmp.ge.s32.totalorder %s16_s23, 4   ;;  %s2993_s22 = smov %s2995_s24 }
 0x196   :  { %15 = sbr.rel (!%p13_p6) target bundleno = 2 (0x2), region = 116 }

// kernel: bev_hourglass_forward.16
= control target key start
LH: loop header
LB: loop body
LE: loop exit
PB: predicated region body
PF: predicated region fallthrough
CT: control target
= control target key end

     0   :  { %s2350_s21 = smov 0   ;;  %s2352_s22 = smov 0   ;;  %s2985_s0 = inlined_call_operand.vmem [shape: f32[2,1,5,5,128], index: 0, kind: input, shape index: {}]   ;;  %s2986_s1 = inlined_call_operand.vmem [shape: f32[2,1,5,5,128], index: 1, kind: input, shape index: {}]   ;;  %s2987_s2 = inlined_call_operand.vmem [shape: f32[2,1,5,5,128], index: 2, kind: input, shape index: {}]   ;;  %s2988_s3 = inlined_call_operand.vmem [shape: f32[2,1,5,5,128], index: 3, kind: input, shape index: {}]   ;;  %s2989_s4 = inlined_call_operand.vmem [shape: f32[9,128,128], index: 4, kind: input, shape index: {}]   ;;  %s2990_s5 = inlined_call_operand.vmem [shape: f32[2,128], index: 5, kind: input, shape index: {}]   ;;  %s2991_s6 = inlined_call_operand.vmem [shape: f32[2,4,4,128], index: 6, kind: output, shape index: {}]  }
   0x1   :  { %s2354_s23 = smov 0  }
   0x2 LB: > { %s28_s24 = sadd.s32 1, %s2302_s22  ;;  %p1398_p0 = scmp.ge.s32.totalorder %s2306_s23, 1  ;;  %s2306_s23 = sphi %s2354_s23, %s16_s23   ;;  %s2302_s22 = sphi %s2352_s22, %s2993_s22   ;;  %s2298_s21 = sphi %s2350_s21, %s2992_s21  }
   0x3   : > { %p30_p1 = scmp.ge.s32.totalorder %s28_s24, 2  ;;  %p280_p2 = scmp.lt.s32.totalorder %s2306_s23, 3 }
   0x5   : > { %s2995_s24 = smov (%p30_p1, %s28_s24), 0  ;;  %p281_p3 = pnand %p1398_p0, %p280_p2 }
   0x6   : > { %p345_p4 = scmp.lt.s32.totalorder (!%p281_p3), %s2298_s21, 1  ;;  %v2371_v0 = vld [vmem:[%s2990_s5] ss:$0 sm:$0xff] (!%p281_p3)  ;;  %v2376_v1 = vld [vmem:[%s2990_s5 + $0x1] ss:$0 sm:$0xff] (!%p281_p3)  ;;  %s2401_s25 = smov (!%p281_p3), 0  }
   0x7   : > { %284 = sbr.rel (%p281_p3) target bundleno = 403 (0x193), region = 44 }
   0xe   : > { %s2997_s21 = smov (!%p345_p4, %s2298_s21), 1 }
   0xf   : > { %s2378_s29 = smul.u32 40, %s2997_s21  ;;  %s1544_s30 = sshll.u32 %s2997_s21, 4 }
  0x10   : > { %s2383_s9 = scalar_lea.vmem %s2991_s6, %s1544_s30 }
  0x11   : > { %s353_s12 = scalar_lea.vmem %s2985_s0, %s2378_s29  ;;  %s362_s15 = scalar_lea.vmem %s2986_s1, %s2378_s29 }
  0x12   : > { %s371_s18 = scalar_lea.vmem %s2987_s2, %s2378_s29  ;;  %s380_s21 = scalar_lea.vmem %s2988_s3, %s2378_s29 }
  0x13 LB: >> { %v1406_v2 = vld [vmem:[%s2989_s4 + $0x80] sm:$0xff]  ;;  %v1407_v3 = vld [vmem:[%s2989_s4 + $0x88] sm:$0xff]  ;;  %v2312_v5 = vmov 0.0|0.0   ;;  %v1408_v8 = vld [vmem:[%s2989_s4 + $0x90] sm:$0xff]  ;;  %vm2313_vm0 = vmmov 0   ;;  %v2314_v13 = vmov 0.0   ;;  %s2310_s25 = sphi %s2401_s25, %s398_s25  }
  0x14   : >> { %v1454_v4 = vld [vmem:[%s2989_s4 + $0x200] sm:$0xff]  ;;  %2013 = vmatprep.subr.bf16.mxu1 %v2312_v5  ;;  %2109 = vmatprep.subr.bf16.mxu0 %v2312_v5  ;;  %v2014_v6 = vpack.c.bf16 %v1407_v3, %v1406_v2  ;;  %v1455_v7 = vld [vmem:[%s2989_s4 + $0x208] sm:$0xff]  ;;  %v1409_v9 = vld [vmem:[%s2989_s4 + $0x98] sm:$0xff]  ;;  %s2521_s13 = sshll.u32 %s2310_s25, 3  ;;  %s1541_s26 = sshll.u32 %s2310_s25, 2 }
  0x15   : >> { %v2110_v10 = vpack.c.bf16 %v1455_v7, %v1454_v4  ;;  %v1456_v11 = vld [vmem:[%s2989_s4 + $0x210] sm:$0xff]  ;;  %v1457_v12 = vld [vmem:[%s2989_s4 + $0x218] sm:$0xff]  ;;  %1730 = vmatprep.mubr.msk.f32.mxu1 %vm2313_vm0, %v2314_v13  ;;  %1870 = vmatprep.mubr.msk.f32.mxu0 %vm2313_vm0, %v2314_v13  ;;  %v2017_v14 = vpack.c.bf16 %v1409_v9, %v1408_v8  ;;  %v1410_v16 = vld [vmem:[%s2989_s4 + $0xa0] sm:$0xff]  ;;  %s2530_s17 = scalar_lea.vmem %s362_s15, %s2521_s13  ;;  %s756_s7 = scalar_lea.vmem %s380_s21, %s2521_s13 }
  0x16   : >> { %2015 = vmatpush3.bf16.msra.mxu1 %v2014_v6  ;;  %v2113_v15 = vpack.c.bf16 %v1457_v12, %v1456_v11  ;;  %v1411_v17 = vld [vmem:[%s2989_s4 + $0xa8] sm:$0xff]  ;;  %v1458_v18 = vld [vmem:[%s2989_s4 + $0x220] sm:$0xff]  ;;  %v1412_v22 = vld [vmem:[%s2989_s4 + $0xb0] sm:$0xff]  ;;  %s2661_s11 = scalar_lea.vmem %s353_s12, %s2521_s13  ;;  %s2676_s28 = scalar_lea.vmem %s371_s18, %s2521_s13 }
  0x17   : >> { %2111 = vmatpush3.bf16.msra.mxu0 %v2110_v10  ;;  %2016 = vmatprep.subr.bf16.mxu1 %v2312_v5  ;;  %v1459_v19 = vld [vmem:[%s2989_s4 + $0x228] sm:$0xff]  ;;  %v2020_v20 = vpack.c.bf16 %v1411_v17, %v1410_v16  ;;  %v1413_v23 = vld [vmem:[%s2989_s4 + $0xb8] sm:$0xff]  ;;  %v1460_v24 = vld [vmem:[%s2989_s4 + $0x230] sm:$0xff]  ;;  %s1218_s27 = scalar_lea.vmem %s2383_s9, %s1541_s26  ;;  %s398_s25 = sadd.s32 1, %s2310_s25  }
  0x18   : >> { %2112 = vmatprep.subr.bf16.mxu0 %v2312_v5  ;;  %v2116_v21 = vpack.c.bf16 %v1459_v19, %v1458_v18  ;;  %v1461_v25 = vld [vmem:[%s2989_s4 + $0x238] sm:$0xff]  ;;  %v2023_v26 = vpack.c.bf16 %v1413_v23, %v1412_v22  ;;  %v1414_v28 = vld [vmem:[%s2989_s4 + $0xc0] sm:$0xff]  ;;  %v1415_v29 = vld [vmem:[%s2989_s4 + $0xc8] sm:$0xff]  ;;  %p395_p5 = scmp.ge.s32.totalorder %s398_s25, 4  }
  0x19   : >> { %v2119_v27 = vpack.c.bf16 %v1461_v25, %v1460_v24  ;;  %v1462_v30 = vld [vmem:[%s2989_s4 + $0x240] sm:$0xff]  ;;  %v1463_v31 = vld [vmem:[%s2989_s4 + $0x248] sm:$0xff]  ;;  %v2026_v32 = vpack.c.bf16 %v1415_v29, %v1414_v28  ;;  %v1416_v34 = vld [vmem:[%s2989_s4 + $0xd0] sm:$0xff] }
  0x1a   : >> { %2018 = vmatpush3.bf16.msra.mxu1 %v2017_v14  ;;  %v2122_v33 = vpack.c.bf16 %v1463_v31, %v1462_v30  ;;  %v1417_v35 = vld [vmem:[%s2989_s4 + $0xd8] sm:$0xff]  ;;  %v1464_v36 = vld [vmem:[%s2989_s4 + $0x250] sm:$0xff]  ;;  %v1418_v40 = vld [vmem:[%s2989_s4 + $0xe0] sm:$0xff] }
  0x1b   : >> { %2114 = vmatpush3.bf16.msra.mxu0 %v2113_v15  ;;  %2019 = vmatprep.subr.bf16.mxu1 %v2312_v5  ;;  %v1465_v37 = vld [vmem:[%s2989_s4 + $0x258] sm:$0xff]  ;;  %v2029_v38 = vpack.c.bf16 %v1417_v35, %v1416_v34  ;;  %v1419_v41 = vld [vmem:[%s2989_s4 + $0xe8] sm:$0xff]  ;;  %v1466_v42 = vld [vmem:[%s2989_s4 + $0x260] sm:$0xff] }
  0x1c   : >> { %2115 = vmatprep.subr.bf16.mxu0 %v2312_v5  ;;  %v2125_v39 = vpack.c.bf16 %v1465_v37, %v1464_v36  ;;  %v1467_v43 = vld [vmem:[%s2989_s4 + $0x268] sm:$0xff]  ;;  %v2032_v44 = vpack.c.bf16 %v1419_v41, %v1418_v40  ;;  %v1420_v46 = vld [vmem:[%s2989_s4 + $0xf0] sm:$0xff]  ;;  %v1421_v47 = vld [vmem:[%s2989_s4 + $0xf8] sm:$0xff] }
  0x1d   : >> { %v2128_v45 = vpack.c.bf16 %v1467_v43, %v1466_v42  ;;  %v1468_v48 = vld [vmem:[%s2989_s4 + $0x270] sm:$0xff]  ;;  %v1469_v49 = vld [vmem:[%s2989_s4 + $0x278] sm:$0xff]  ;;  %v2035_v50 = vpack.c.bf16 %v1421_v47, %v1420_v46  ;;  %v402_v52 = vld [vmem:[%s2989_s4] sm:$0xff] }
  0x1e   : >> { %2021 = vmatpush3.bf16.msra.mxu1 %v2020_v20  ;;  %v2131_v51 = vpack.c.bf16 %v1469_v49, %v1468_v48  ;;  %v403_v53 = vld [vmem:[%s2989_s4 + $0x8] sm:$0xff]  ;;  %v1470_v54 = vld [vmem:[%s2989_s4 + $0x280] sm:$0xff]  ;;  %v404_v60 = vld [vmem:[%s2989_s4 + $0x10] sm:$0xff] }
  0x1f   : >> { %2117 = vmatpush3.bf16.msra.mxu0 %v2116_v21  ;;  %2022 = vmatprep.subr.bf16.mxu1 %v2312_v5  ;;  %v1471_v55 = vld [vmem:[%s2989_s4 + $0x288] sm:$0xff]  ;;  %v419_v56 = vld [vmem:[%s2530_s17] sm:$0xf]  ;;  %v2038_v57 = vpack.c.bf16 %v403_v53, %v402_v52  ;;  %v405_v61 = vld [vmem:[%s2989_s4 + $0x18] sm:$0xff] }
  0x20   : >> { %2118 = vmatprep.subr.bf16.mxu0 %v2312_v5  ;;  %v757_v58 = vld [vmem:[%s756_s7] sm:$0xf]  ;;  %v2134_v59 = vpack.c.bf16 %v1471_v55, %v1470_v54  ;;  %v1472_v62 = vld [vmem:[%s2989_s4 + $0x290] sm:$0xff]  ;;  %v1473_v63 = vld [vmem:[%s2989_s4 + $0x298] sm:$0xff]  ;;  %v2041_v2 = vpack.c.bf16 %v405_v61, %v404_v60 }
  0x21   : >> { %v2137_v3 = vpack.c.bf16 %v1473_v63, %v1472_v62  ;;  %v406_v4 = vld [vmem:[%s2989_s4 + $0x20] sm:$0xff]  ;;  %v407_v6 = vld [vmem:[%s2989_s4 + $0x28] sm:$0xff]  ;;  %v408_v11 = vld [vmem:[%s2989_s4 + $0x30] sm:$0xff] }
  0x22   : >> { %2024 = vmatpush3.bf16.msra.mxu1 %v2023_v26  ;;  %v1474_v7 = vld [vmem:[%s2989_s4 + $0x2a0] sm:$0xff]  ;;  %v1475_v8 = vld [vmem:[%s2989_s4 + $0x2a8] sm:$0xff]  ;;  %v2044_v9 = vpack.c.bf16 %v407_v6, %v406_v4  ;;  %v409_v12 = vld [vmem:[%s2989_s4 + $0x38] sm:$0xff] }
  0x23   : >> { %2120 = vmatpush3.bf16.msra.mxu0 %v2119_v27  ;;  %2025 = vmatprep.subr.bf16.mxu1 %v2312_v5  ;;  %v2140_v10 = vpack.c.bf16 %v1475_v8, %v1474_v7  ;;  %v1476_v14 = vld [vmem:[%s2989_s4 + $0x2b0] sm:$0xff]  ;;  %v1477_v15 = vld [vmem:[%s2989_s4 + $0x2b8] sm:$0xff]  ;;  %v2047_v16 = vpack.c.bf16 %v409_v12, %v408_v11  ;;  %v410_v18 = vld [vmem:[%s2989_s4 + $0x40] sm:$0xff] }
  0x24   : >> { %2121 = vmatprep.subr.bf16.mxu0 %v2312_v5  ;;  %v2143_v17 = vpack.c.bf16 %v1477_v15, %v1476_v14  ;;  %v411_v19 = vld [vmem:[%s2989_s4 + $0x48] sm:$0xff]  ;;  %v1478_v20 = vld [vmem:[%s2989_s4 + $0x2c0] sm:$0xff]  ;;  %v412_v24 = vld [vmem:[%s2989_s4 + $0x50] sm:$0xff] }
  0x25   : >> { %v1479_v21 = vld [vmem:[%s2989_s4 + $0x2c8] sm:$0xff]  ;;  %v2050_v22 = vpack.c.bf16 %v411_v19, %v410_v18  ;;  %v413_v25 = vld [vmem:[%s2989_s4 + $0x58] sm:$0xff]  ;;  %v1480_v26 = vld [vmem:[%s2989_s4 + $0x2d0] sm:$0xff] }
  0x26   : >> { %2027 = vmatpush3.bf16.msra.mxu1 %v2026_v32  ;;  %v2146_v23 = vpack.c.bf16 %v1479_v21, %v1478_v20  ;;  %v1481_v27 = vld [vmem:[%s2989_s4 + $0x2d8] sm:$0xff]  ;;  %v2053_v28 = vpack.c.bf16 %v413_v25, %v412_v24  ;;  %v414_v30 = vld [vmem:[%s2989_s4 + $0x60] sm:$0xff]  ;;  %v415_v31 = vld [vmem:[%s2989_s4 + $0x68] sm:$0xff] }
  0x27   : >> { %2123 = vmatpush3.bf16.msra.mxu0 %v2122_v33  ;;  %2028 = vmatprep.subr.bf16.mxu1 %v2312_v5  ;;  %v2149_v29 = vpack.c.bf16 %v1481_v27, %v1480_v26  ;;  %v1482_v32 = vld [vmem:[%s2989_s4 + $0x2e0] sm:$0xff]  ;;  %v1483_v33 = vld [vmem:[%s2989_s4 + $0x2e8] sm:$0xff]  ;;  %v2056_v34 = vpack.c.bf16 %v415_v31, %v414_v30  ;;  %v416_v36 = vld [vmem:[%s2989_s4 + $0x70] sm:$0xff] }
  0x28   : >> { %2124 = vmatprep.subr.bf16.mxu0 %v2312_v5  ;;  %v2152_v35 = vpack.c.bf16 %v1483_v33, %v1482_v32  ;;  %v417_v37 = vld [vmem:[%s2989_s4 + $0x78] sm:$0xff]  ;;  %v1422_v42 = vld [vmem:[%s2989_s4 + $0x100] sm:$0xff]  ;;  %v1423_v43 = vld [vmem:[%s2989_s4 + $0x108] sm:$0xff] }
  0x29   : >> { %v2059_v40 = vpack.c.bf16 %v417_v37, %v416_v36  ;;  %v401_v46 = vld [vmem:[%s2661_s11] sm:$0xf]  ;;  %v2062_v47 = vpack.c.bf16 %v1423_v43, %v1422_v42  ;;  %v1490_v52 = vld [vmem:[%s2989_s4 + $0x310] sm:$0xff]  ;;  %v1491_v53 = vld [vmem:[%s2989_s4 + $0x318] sm:$0xff] }
  0x2a   : >> { %2030 = vmatpush3.bf16.msra.mxu1 %v2029_v38  ;;  %v1484_v38 = vld [vmem:[%s2989_s4 + $0x2f0] sm:$0xff]  ;;  %v846_v48 = vld [vmem:[%s2676_s28 + $0x1] sm:$0xf]  ;;  %v2161_v55 = vpack.c.bf16 %v1491_v53, %v1490_v52  ;;  %v1429_v63 = vld [vmem:[%s2989_s4 + $0x138] sm:$0xff] }
  0x2b   : >> { %2126 = vmatpush3.bf16.msra.mxu0 %v2125_v39  ;;  %2031 = vmatprep.subr.bf16.mxu1 %v2312_v5  ;;  %v1485_v39 = vld [vmem:[%s2989_s4 + $0x2f8] sm:$0xff]  ;;  %v1428_v62 = vld [vmem:[%s2989_s4 + $0x130] sm:$0xff]  ;;  %v1430_v7 = vld [vmem:[%s2989_s4 + $0x140] sm:$0xff] }
  0x2c   : >> { %2127 = vmatprep.subr.bf16.mxu0 %v2312_v5  ;;  %v2155_v41 = vpack.c.bf16 %v1485_v39, %v1484_v38  ;;  %v2071_v4 = vpack.c.bf16 %v1429_v63, %v1428_v62  ;;  %v1431_v8 = vld [vmem:[%s2989_s4 + $0x148] sm:$0xff]  ;;  %v1432_v14 = vld [vmem:[%s2989_s4 + $0x150] sm:$0xff]  ;;  %v1433_v15 = vld [vmem:[%s2989_s4 + $0x158] sm:$0xff] }
  0x2d   : >> { %v2074_v11 = vpack.c.bf16 %v1431_v8, %v1430_v7  ;;  %v2077_v18 = vpack.c.bf16 %v1433_v15, %v1432_v14  ;;  %v1434_v20 = vld [vmem:[%s2989_s4 + $0x160] sm:$0xff]  ;;  %v1435_v21 = vld [vmem:[%s2989_s4 + $0x168] sm:$0xff]  ;;  %v1436_v26 = vld [vmem:[%s2989_s4 + $0x170] sm:$0xff] }
  0x2e   : >> { %2033 = vmatpush3.bf16.msra.mxu1 %v2032_v44  ;;  %v1488_v44 = vld [vmem:[%s2989_s4 + $0x300] sm:$0xff]  ;;  %v2080_v24 = vpack.c.bf16 %v1435_v21, %v1434_v20  ;;  %v1437_v27 = vld [vmem:[%s2989_s4 + $0x178] sm:$0xff]  ;;  %v1439_v33 = vld [vmem:[%s2989_s4 + $0x188] sm:$0xff] }
  0x2f   : >> { %2129 = vmatpush3.bf16.msra.mxu0 %v2128_v45  ;;  %2034 = vmatprep.subr.bf16.mxu1 %v2312_v5  ;;  %v1489_v45 = vld [vmem:[%s2989_s4 + $0x308] sm:$0xff]  ;;  %v2083_v30 = vpack.c.bf16 %v1437_v27, %v1436_v26  ;;  %v1438_v32 = vld [vmem:[%s2989_s4 + $0x180] sm:$0xff]  ;;  %v1508_v42 = vld [vmem:[%s2989_s4 + $0x390] sm:$0xff] }
  0x30   : >> { %2130 = vmatprep.subr.bf16.mxu0 %v2312_v5  ;;  %v2158_v49 = vpack.c.bf16 %v1489_v45, %v1488_v44  ;;  %v577_v36 = vld [vmem:[%s2661_s11 + $0x1] sm:$0xf]  ;;  %v2086_v37 = vpack.c.bf16 %v1439_v33, %v1438_v32  ;;  %v1487_v38 = vld [vmem:[%s2661_s11 + $0x8] sm:$0xf]  ;;  %v1509_v43 = vld [vmem:[%s2989_s4 + $0x398] sm:$0xff] }
  0x31   : >> { %v2185_v45 = vpack.c.bf16 %v1509_v43, %v1508_v42  ;;  %v1444_v52 = vld [vmem:[%s2989_s4 + $0x1b0] sm:$0xff]  ;;  %v1445_v53 = vld [vmem:[%s2989_s4 + $0x1b8] sm:$0xff]  ;;  %v1536_v42 = vld [vmem:[%s2989_s4 + $0x468] sm:$0xff] }
  0x32   : >> { %2036 = vmatpush3.bf16.msra.mxu1 %v2035_v50  ;;  %v1424_v50 = vld [vmem:[%s2989_s4 + $0x110] sm:$0xff] }
  0x33   : >> { %2132 = vmatpush3.bf16.msra.mxu0 %v2131_v51  ;;  %2037 = vmatprep.subr.bf16.mxu1 %v2312_v5  ;;  %v1425_v51 = vld [vmem:[%s2989_s4 + $0x118] sm:$0xff]  ;;  %v1525_v27 = vld [vmem:[%s2989_s4 + $0x410] sm:$0xff] }
  0x34   : >> { %2133 = vmatprep.subr.bf16.mxu0 %v2312_v5  ;;  %v2065_v54 = vpack.c.bf16 %v1425_v51, %v1424_v50  ;;  %v1529_v33 = vld [vmem:[%s2989_s4 + $0x430] sm:$0xff] }
  0x35   : >> { %1731 = vmatmul.mubr.f32.vlgmr.msra.gmra.mrb[0].mxu1 %v419_v56  ;;  %v1426_v56 = vld [vmem:[%s2989_s4 + $0x120] sm:$0xff] }
  0x36   : >> { %2039 = vmatpush3.bf16.msra.mxu1 %v2038_v57  ;;  %1871 = vmatmul.mubr.f32.vlgmr.msra.gmra.mrb[0].mxu0 %v757_v58  ;;  %v1427_v57 = vld [vmem:[%s2989_s4 + $0x128] sm:$0xff]  ;;  %v1492_v58 = vld [vmem:[%s2989_s4 + $0x320] sm:$0xff] }
  0x37   : >> { %2135 = vmatpush3.bf16.msra.mxu0 %v2134_v59  ;;  %2040 = vmatprep.subr.bf16.mxu1 %v2312_v5  ;;  %v1493_v59 = vld [vmem:[%s2989_s4 + $0x328] sm:$0xff]  ;;  %v2068_v60 = vpack.c.bf16 %v1427_v57, %v1426_v56  ;;  %v2095_v56 = vpack.c.bf16 %v1445_v53, %v1444_v52 }
  0x38   : >> { %2136 = vmatprep.subr.bf16.mxu0 %v2312_v5  ;;  %1765 = vmatprep.mubr.msk.f32.mxu1 %vm2313_vm0, %v2314_v13  ;;  %v2164_v61 = vpack.c.bf16 %v1493_v59, %v1492_v58  ;;  %v1446_v58 = vld [vmem:[%s2989_s4 + $0x1c0] sm:$0xff]  ;;  %v1447_v59 = vld [vmem:[%s2989_s4 + $0x1c8] sm:$0xff] }
  0x39   : >> { %1905 = vmatprep.mubr.msk.f32.mxu0 %vm2313_vm0, %v2314_v13  ;;  %v2098_v62 = vpack.c.bf16 %v1447_v59, %v1446_v58 }
  0x3a   : >> { %2042 = vmatpush3.bf16.msra.mxu1 %v2041_v2  ;;  %v1494_v2 = vld [vmem:[%s2989_s4 + $0x330] sm:$0xff] }
  0x3b   : >> { %2138 = vmatpush3.bf16.msra.mxu0 %v2137_v3  ;;  %2043 = vmatprep.subr.bf16.mxu1 %v2312_v5  ;;  %v1495_v3 = vld [vmem:[%s2989_s4 + $0x338] sm:$0xff] }
  0x3c   : >> { %2139 = vmatprep.subr.bf16.mxu0 %v2312_v5  ;;  %v2167_v6 = vpack.c.bf16 %v1495_v3, %v1494_v2  ;;  %v1448_v2 = vld [vmem:[%s2989_s4 + $0x1d0] sm:$0xff]  ;;  %v1449_v3 = vld [vmem:[%s2989_s4 + $0x1d8] sm:$0xff] }
  0x3d   : >> { %v2101_v7 = vpack.c.bf16 %v1449_v3, %v1448_v2 }
  0x3e   : >> { %2045 = vmatpush3.bf16.msra.mxu1 %v2044_v9  ;;  %v1496_v9 = vld [vmem:[%s2989_s4 + $0x340] sm:$0xff] }
  0x3f   : >> { %2141 = vmatpush3.bf16.msra.mxu0 %v2140_v10  ;;  %2046 = vmatprep.subr.bf16.mxu1 %v2312_v5  ;;  %v1497_v10 = vld [vmem:[%s2989_s4 + $0x348] sm:$0xff] }
  0x40   : >> { %2142 = vmatprep.subr.bf16.mxu0 %v2312_v5  ;;  %v2170_v12 = vpack.c.bf16 %v1497_v10, %v1496_v9  ;;  %v1450_v9 = vld [vmem:[%s2989_s4 + $0x1e0] sm:$0xff]  ;;  %v1451_v10 = vld [vmem:[%s2989_s4 + $0x1e8] sm:$0xff] }
  0x41   : >> { %v2104_v14 = vpack.c.bf16 %v1451_v10, %v1450_v9 }
  0x42   : >> { %2048 = vmatpush3.bf16.msra.mxu1 %v2047_v16  ;;  %v1498_v16 = vld [vmem:[%s2989_s4 + $0x350] sm:$0xff] }
  0x43   : >> { %2144 = vmatpush3.bf16.msra.mxu0 %v2143_v17  ;;  %2049 = vmatprep.subr.bf16.mxu1 %v2312_v5  ;;  %v1499_v17 = vld [vmem:[%s2989_s4 + $0x358] sm:$0xff] }
  0x44   : >> { %2145 = vmatprep.subr.bf16.mxu0 %v2312_v5  ;;  %v2173_v19 = vpack.c.bf16 %v1499_v17, %v1498_v16  ;;  %v1452_v16 = vld [vmem:[%s2989_s4 + $0x1f0] sm:$0xff]  ;;  %v1453_v17 = vld [vmem:[%s2989_s4 + $0x1f8] sm:$0xff] }
  0x45   : >> { %v2107_v20 = vpack.c.bf16 %v1453_v17, %v1452_v16 }
  0x46   : >> { %2051 = vmatpush3.bf16.msra.mxu1 %v2050_v22  ;;  %v1500_v22 = vld [vmem:[%s2989_s4 + $0x360] sm:$0xff] }
  0x47   : >> { %2147 = vmatpush3.bf16.msra.mxu0 %v2146_v23  ;;  %2052 = vmatprep.subr.bf16.mxu1 %v2312_v5  ;;  %v1501_v23 = vld [vmem:[%s2989_s4 + $0x368] sm:$0xff] }
  0x48   : >> { %2148 = vmatprep.subr.bf16.mxu0 %v2312_v5  ;;  %v2176_v25 = vpack.c.bf16 %v1501_v23, %v1500_v22  ;;  %v1523_v22 = vld [vmem:[%s2989_s4 + $0x400] sm:$0xff]  ;;  %v1524_v23 = vld [vmem:[%s2989_s4 + $0x408] sm:$0xff] }
  0x49   : >> { %v2206_v26 = vpack.c.bf16 %v1524_v23, %v1523_v22 }
  0x4a   : >> { %2054 = vmatpush3.bf16.msra.mxu1 %v2053_v28  ;;  %v1502_v28 = vld [vmem:[%s2989_s4 + $0x370] sm:$0xff] }
  0x4b   : >> { %2150 = vmatpush3.bf16.msra.mxu0 %v2149_v29  ;;  %2055 = vmatprep.subr.bf16.mxu1 %v2312_v5  ;;  %v1503_v29 = vld [vmem:[%s2989_s4 + $0x378] sm:$0xff] }
  0x4c   : >> { %2151 = vmatprep.subr.bf16.mxu0 %v2312_v5  ;;  %v2179_v31 = vpack.c.bf16 %v1503_v29, %v1502_v28  ;;  %v1526_v28 = vld [vmem:[%s2989_s4 + $0x418] sm:$0xff] }
  0x4d   : >> { %v2209_v29 = vpack.c.bf16 %v1526_v28, %v1525_v27 }
  0x4e   : >> { %2057 = vmatpush3.bf16.msra.mxu1 %v2056_v34  ;;  %v1506_v34 = vld [vmem:[%s2989_s4 + $0x380] sm:$0xff] }
  0x4f   : >> { %2153 = vmatpush3.bf16.msra.mxu0 %v2152_v35  ;;  %2058 = vmatprep.subr.bf16.mxu1 %v2312_v5  ;;  %v1507_v35 = vld [vmem:[%s2989_s4 + $0x388] sm:$0xff] }
  0x50   : >> { %2154 = vmatprep.subr.bf16.mxu0 %v2312_v5  ;;  %v2182_v39 = vpack.c.bf16 %v1507_v35, %v1506_v34  ;;  %v1531_v35 = vld [vmem:[%s2989_s4 + $0x440] sm:$0xff] }
  0x52   : >> { %2060 = vmatpush3.bf16.msra.mxu1 %v2059_v40  ;;  %v1440_v40 = vld [vmem:[%s2989_s4 + $0x190] sm:$0xff] }
  0x53   : >> { %2156 = vmatpush3.bf16.msra.mxu0 %v2155_v41  ;;  %2061 = vmatprep.subr.bf16.mxu1 %v2312_v5  ;;  %v1441_v41 = vld [vmem:[%s2989_s4 + $0x198] sm:$0xff] }
  0x54   : >> { %2157 = vmatprep.subr.bf16.mxu0 %v2312_v5  ;;  %v2089_v44 = vpack.c.bf16 %v1441_v41, %v1440_v40  ;;  %v1535_v41 = vld [vmem:[%s2989_s4 + $0x460] sm:$0xff] }
  0x55   : >> { %1766 = vmatmul.mubr.f32.vlgmr.msra.gmra.mrb[0].mxu1 %v401_v46  ;;  %v1442_v46 = vld [vmem:[%s2989_s4 + $0x1a0] sm:$0xff]  ;;  %v2224_v43 = vpack.c.bf16 %v1536_v42, %v1535_v41 }
  0x56   : >> { %2063 = vmatpush3.bf16.msra.mxu1 %v2062_v47  ;;  %1906 = vmatmul.mubr.f32.vlgmr.msra.gmra.mrb[0].mxu0 %v846_v48  ;;  %v1443_v47 = vld [vmem:[%s2989_s4 + $0x1a8] sm:$0xff]  ;;  %v1510_v48 = vld [vmem:[%s2989_s4 + $0x3a0] sm:$0xff] }
  0x57   : >> { %2159 = vmatpush3.bf16.msra.mxu0 %v2158_v49  ;;  %2064 = vmatprep.subr.bf16.mxu1 %v2312_v5  ;;  %v1511_v49 = vld [vmem:[%s2989_s4 + $0x3a8] sm:$0xff]  ;;  %v2092_v50 = vpack.c.bf16 %v1443_v47, %v1442_v46 }
  0x58   : >> { %2160 = vmatprep.subr.bf16.mxu0 %v2312_v5  ;;  %1800 = vmatprep.mubr.msk.f32.mxu1 %vm2313_vm0, %v2314_v13  ;;  %v2188_v51 = vpack.c.bf16 %v1511_v49, %v1510_v48  ;;  %v1522_v47 = vld [vmem:[%s2661_s11 + $0x9] sm:$0xf] }
  0x59   : >> { %1940 = vmatprep.mubr.msk.f32.mxu0 %vm2313_vm0, %v2314_v13 }
  0x5a   : >> { %2066 = vmatpush3.bf16.msra.mxu1 %v2065_v54  ;;  %v1512_v54 = vld [vmem:[%s2989_s4 + $0x3b0] sm:$0xff] }
  0x5b   : >> { %2162 = vmatpush3.bf16.msra.mxu0 %v2161_v55  ;;  %2067 = vmatprep.subr.bf16.mxu1 %v2312_v5  ;;  %v1513_v55 = vld [vmem:[%s2989_s4 + $0x3b8] sm:$0xff] }
  0x5c   : >> { %2163 = vmatprep.subr.bf16.mxu0 %v2312_v5  ;;  %v2191_v57 = vpack.c.bf16 %v1513_v55, %v1512_v54 }
  0x5e   : >> { %2069 = vmatpush3.bf16.msra.mxu1 %v2068_v60  ;;  %v1514_v60 = vld [vmem:[%s2989_s4 + $0x3c0] sm:$0xff] }
  0x5f   : >> { %2165 = vmatpush3.bf16.msra.mxu0 %v2164_v61  ;;  %2070 = vmatprep.subr.bf16.mxu1 %v2312_v5  ;;  %v1515_v61 = vld [vmem:[%s2989_s4 + $0x3c8] sm:$0xff] }
  0x60   : >> { %2166 = vmatprep.subr.bf16.mxu0 %v2312_v5  ;;  %v2194_v63 = vpack.c.bf16 %v1515_v61, %v1514_v60 }
  0x62   : >> { %2072 = vmatpush3.bf16.msra.mxu1 %v2071_v4  ;;  %v1516_v4 = vld [vmem:[%s2989_s4 + $0x3d0] sm:$0xff] }
  0x63   : >> { %2168 = vmatpush3.bf16.msra.mxu0 %v2167_v6  ;;  %2073 = vmatprep.subr.bf16.mxu1 %v2312_v5  ;;  %v1517_v6 = vld [vmem:[%s2989_s4 + $0x3d8] sm:$0xff] }
  0x64   : >> { %2169 = vmatprep.subr.bf16.mxu0 %v2312_v5  ;;  %v2197_v8 = vpack.c.bf16 %v1517_v6, %v1516_v4 }
  0x66   : >> { %2075 = vmatpush3.bf16.msra.mxu1 %v2074_v11  ;;  %v1518_v11 = vld [vmem:[%s2989_s4 + $0x3e0] sm:$0xff] }
  0x67   : >> { %2171 = vmatpush3.bf16.msra.mxu0 %v2170_v12  ;;  %2076 = vmatprep.subr.bf16.mxu1 %v2312_v5  ;;  %v1519_v12 = vld [vmem:[%s2989_s4 + $0x3e8] sm:$0xff] }
  0x68   : >> { %2172 = vmatprep.subr.bf16.mxu0 %v2312_v5  ;;  %v2200_v15 = vpack.c.bf16 %v1519_v12, %v1518_v11 }
  0x6a   : >> { %2078 = vmatpush3.bf16.msra.mxu1 %v2077_v18  ;;  %v1520_v18 = vld [vmem:[%s2989_s4 + $0x3f0] sm:$0xff] }
  0x6b   : >> { %2174 = vmatpush3.bf16.msra.mxu0 %v2173_v19  ;;  %2079 = vmatprep.subr.bf16.mxu1 %v2312_v5  ;;  %v1521_v19 = vld [vmem:[%s2989_s4 + $0x3f8] sm:$0xff] }
  0x6c   : >> { %2175 = vmatprep.subr.bf16.mxu0 %v2312_v5  ;;  %v2203_v21 = vpack.c.bf16 %v1521_v19, %v1520_v18 }
  0x6e   : >> { %2081 = vmatpush3.bf16.msra.mxu1 %v2080_v24  ;;  %v667_v24 = vld [vmem:[%s2676_s28] sm:$0xf] }
  0x6f   : >> { %2177 = vmatpush3.bf16.msra.mxu0 %v2176_v25  ;;  %2082 = vmatprep.subr.bf16.mxu1 %v2312_v5  ;;  %v1505_v25 = vld [vmem:[%s2530_s17 + $0x8] sm:$0xf] }
  0x70   : >> { %2178 = vmatprep.subr.bf16.mxu0 %v2312_v5 }
  0x72   : >> { %2084 = vmatpush3.bf16.msra.mxu1 %v2083_v30  ;;  %v1527_v30 = vld [vmem:[%s2989_s4 + $0x420] sm:$0xff] }
  0x73   : >> { %2180 = vmatpush3.bf16.msra.mxu0 %v2179_v31  ;;  %2085 = vmatprep.subr.bf16.mxu1 %v2312_v5  ;;  %v1528_v31 = vld [vmem:[%s2989_s4 + $0x428] sm:$0xff] }
  0x74   : >> { %2181 = vmatprep.subr.bf16.mxu0 %v2312_v5  ;;  %v2212_v32 = vpack.c.bf16 %v1528_v31, %v1527_v30 }
  0x75   : >> { %1801 = vmatmul.mubr.f32.vlgmr.msra.gmra.mrb[0].mxu1 %v577_v36  ;;  %v1532_v36 = vld [vmem:[%s2989_s4 + $0x448] sm:$0xff] }
  0x76   : >> { %2087 = vmatpush3.bf16.msra.mxu1 %v2086_v37  ;;  %1941 = vmatmul.mubr.f32.vlgmr.msra.gmra.mrb[0].mxu0 %v1487_v38  ;;  %v2218_v37 = vpack.c.bf16 %v1532_v36, %v1531_v35  ;;  %v1533_v38 = vld [vmem:[%s2989_s4 + $0x450] sm:$0xff] }
  0x77   : >> { %2183 = vmatpush3.bf16.msra.mxu0 %v2182_v39  ;;  %2088 = vmatprep.subr.bf16.mxu1 %v2312_v5  ;;  %v1534_v39 = vld [vmem:[%s2989_s4 + $0x458] sm:$0xff] }
  0x78   : >> { %2184 = vmatprep.subr.bf16.mxu0 %v2312_v5  ;;  %1835 = vmatprep.mubr.msk.f32.mxu1 %vm2313_vm0, %v2314_v13  ;;  %v2221_v40 = vpack.c.bf16 %v1534_v39, %v1533_v38 }
  0x79   : >> { %1975 = vmatprep.mubr.msk.f32.mxu0 %vm2313_vm0, %v2314_v13 }
  0x7a   : >> { %2090 = vmatpush3.bf16.msra.mxu1 %v2089_v44  ;;  %v1537_v44 = vld [vmem:[%s2989_s4 + $0x470] sm:$0xff] }
  0x7b   : >> { %2186 = vmatpush3.bf16.msra.mxu0 %v2185_v45  ;;  %2091 = vmatprep.subr.bf16.mxu1 %v2312_v5  ;;  %v1538_v45 = vld [vmem:[%s2989_s4 + $0x478] sm:$0xff] }
  0x7c   : >> { %2187 = vmatprep.subr.bf16.mxu0 %v2312_v5  ;;  %v2227_v46 = vpack.c.bf16 %v1538_v45, %v1537_v44 }
  0x7e   : >> { %2093 = vmatpush3.bf16.msra.mxu1 %v2092_v50 }
  0x7f   : >> { %2189 = vmatpush3.bf16.msra.mxu0 %v2188_v51  ;;  %2094 = vmatprep.subr.bf16.mxu1 %v2312_v5 }
  0x80   : >> { %2190 = vmatprep.subr.bf16.mxu0 %v2312_v5 }
  0x82   : >> { %2096 = vmatpush3.bf16.msra.mxu1 %v2095_v56 }
  0x83   : >> { %2192 = vmatpush3.bf16.msra.mxu0 %v2191_v57  ;;  %2097 = vmatprep.subr.bf16.mxu1 %v2312_v5 }
  0x84   : >> { %2193 = vmatprep.subr.bf16.mxu0 %v2312_v5 }
  0x86   : >> { %2099 = vmatpush3.bf16.msra.mxu1 %v2098_v62 }
  0x87   : >> { %2195 = vmatpush3.bf16.msra.mxu0 %v2194_v63  ;;  %2100 = vmatprep.subr.bf16.mxu1 %v2312_v5 }
  0x88   : >> { %2196 = vmatprep.subr.bf16.mxu0 %v2312_v5 }
  0x8a   : >> { %2102 = vmatpush3.bf16.msra.mxu1 %v2101_v7 }
  0x8b   : >> { %2198 = vmatpush3.bf16.msra.mxu0 %v2197_v8  ;;  %2103 = vmatprep.subr.bf16.mxu1 %v2312_v5 }
  0x8c   : >> { %2199 = vmatprep.subr.bf16.mxu0 %v2312_v5 }
  0x8e   : >> { %2105 = vmatpush3.bf16.msra.mxu1 %v2104_v14 }
  0x8f   : >> { %2201 = vmatpush3.bf16.msra.mxu0 %v2200_v15  ;;  %2106 = vmatprep.subr.bf16.mxu1 %v2312_v5 }
  0x90   : >> { %2202 = vmatprep.subr.bf16.mxu0 %v2312_v5 }
  0x92   : >> { %2108 = vmatpush3.bf16.msra.mxu1 %v2107_v20 }
  0x93   : >> { %2204 = vmatpush3.bf16.msra.mxu0 %v2203_v21 }
  0x94   : >> { %2205 = vmatprep.subr.bf16.mxu0 %v2312_v5 }
  0x95   : >> { %1836 = vmatmul.mubr.f32.vlgmr.msra.gmra.mrb[0].mxu1 %v667_v24 }
  0x96   : >> { %1976 = vmatmul.mubr.f32.vlgmr.msra.gmra.mrb[0].mxu0 %v1505_v25 }
  0x97   : >> { %2207 = vmatpush3.bf16.msra.mxu0 %v2206_v26  ;;  %2010 = vmatprep.mubr.msk.f32.mxu0 %vm2313_vm0, %v2314_v13  ;;  %v1530_v13 = vld [vmem:[%s2989_s4 + $0x438] sm:$0xff] }
  0x98   : >> { %2208 = vmatprep.subr.bf16.mxu0 %v2312_v5  ;;  %v2215_v34 = vpack.c.bf16 %v1530_v13, %v1529_v33 }
  0x9b   : >> { %2210 = vmatpush3.bf16.msra.mxu0 %v2209_v29 }
  0x9c   : >> { %2211 = vmatprep.subr.bf16.mxu0 %v2312_v5 }
  0x9f   : >> { %2213 = vmatpush3.bf16.msra.mxu0 %v2212_v32 }
  0xa0   : >> { %2214 = vmatprep.subr.bf16.mxu0 %v2312_v5 }
  0xa3   : >> { %2216 = vmatpush3.bf16.msra.mxu0 %v2215_v34 }
  0xa4   : >> { %2217 = vmatprep.subr.bf16.mxu0 %v2312_v5 }
  0xa7   : >> { %2219 = vmatpush3.bf16.msra.mxu0 %v2218_v37 }
  0xa8   : >> { %2220 = vmatprep.subr.bf16.mxu0 %v2312_v5 }
  0xab   : >> { %2222 = vmatpush3.bf16.msra.mxu0 %v2221_v40 }
  0xac   : >> { %2223 = vmatprep.subr.bf16.mxu0 %v2312_v5 }
  0xaf   : >> { %2225 = vmatpush3.bf16.msra.mxu0 %v2224_v43 }
  0xb0   : >> { %2226 = vmatprep.subr.bf16.mxu0 %v2312_v5 }
  0xb3   : >> { %2228 = vmatpush3.bf16.msra.mxu0 %v2227_v46 }
  0xb6   : >> { %2011 = vmatmul.mubr.f32.vlgmr.msra.gmra.mrb[0].mxu0 %v1522_v47 }
 0x168   : >> { %v751_v48 = vpop.f32.mrb[0].mxu1 }
 0x169   : >> { %v1837_v49 = vpop.f32.mrb[1].mxu1 }
 0x189   : >> { %v1201_v50 = vpop.f32.mrb[0].mxu0 }
 0x18a   : >> { %v2229_v51 = vadd.f32 %v1201_v50, %v751_v48  ;;  %v2012_v52 = vpop.f32.mrb[1].mxu0 }
 0x18c   : >> { %v1210_v53 = vmul.f32 %v2229_v51, %v2371_v0  ;;  %397 = sbr.rel (!%p395_p5) target bundleno = 19 (0x13), region = 105 }
 0x18e   : >> { %v1215_v54 = vadd.f32 %v2376_v1, %v1210_v53 }
 0x190   : >> { %v1216_v55 = vmax.f32 %v1215_v54, 0.0 }
 0x192   : >> { %1219 = vst [vmem:[%s1218_s27] sm:$0xf] %v1216_v55 }
 0x193 PF: > { %s16_s23 = sadd.s32 1, %s2306_s23   ;;  %s2992_s21 = smov %s2302_s22 }
 0x194   : > { %p13_p6 = scmp.ge.s32.totalorder %s16_s23, 4   ;;  %s2993_s22 = smov %s2995_s24 }
 0x196   :  { %15 = sbr.rel (!%p13_p6) target bundleno = 2 (0x2), region = 116 }

// kernel: bev_hourglass_forward.20
= control target key start
LH: loop header
LB: loop body
LE: loop exit
PB: predicated region body
PF: predicated region fallthrough
CT: control target
= control target key end

     0   :  { %s883_s15 = smov 0   ;;  %s885_s16 = smov 0   ;;  %s1062_s0 = inlined_call_operand.vmem [shape: f32[2,1,5,5,128], index: 0, kind: input, shape index: {}]   ;;  %s1063_s1 = inlined_call_operand.vmem [shape: f32[2,128,128], index: 1, kind: input, shape index: {}]   ;;  %s1064_s2 = inlined_call_operand.vmem [shape: f32[2,128], index: 2, kind: input, shape index: {}]   ;;  %s1065_s3 = inlined_call_operand.vmem [shape: f32[2,4,4,128], index: 3, kind: input, shape index: {}]   ;;  %s1066_s4 = inlined_call_operand.vmem [shape: f32[2,4,4,128], index: 4, kind: output, shape index: {}]  }
   0x1   :  { %s887_s17 = smov 0  }
   0x2 LB: > { %s26_s18 = sadd.s32 1, %s845_s16  ;;  %p602_p0 = scmp.ge.s32.totalorder %s849_s17, 1  ;;  %s849_s17 = sphi %s887_s17, %s14_s17   ;;  %s845_s16 = sphi %s885_s16, %s1068_s16   ;;  %s841_s15 = sphi %s883_s15, %s1067_s15  }
   0x3   : > { %p28_p1 = scmp.ge.s32.totalorder %s26_s18, 2  ;;  %p199_p2 = scmp.lt.s32.totalorder %s849_s17, 3 }
   0x5   : > { %s1070_s18 = smov (%p28_p1, %s26_s18), 0  ;;  %p200_p3 = pnand %p602_p0, %p199_p2 }
   0x6   : > { %p242_p4 = scmp.lt.s32.totalorder (!%p200_p3), %s841_s15, 1  ;;  %v904_v0 = vld [vmem:[%s1064_s2] ss:$0 sm:$0xff] (!%p200_p3)  ;;  %v909_v1 = vld [vmem:[%s1064_s2 + $0x1] ss:$0 sm:$0xff] (!%p200_p3)  ;;  %s926_s8 = smov (!%p200_p3), 0  }
   0x7   : > { %203 = sbr.rel (%p200_p3) target bundleno = 276 (0x114), region = 36 }
   0xe   : > { %s1072_s15 = smov (!%p242_p4, %s841_s15), 1 }
   0xf   : > { %s787_s23 = smul.u32 40, %s1072_s15  ;;  %s632_s24 = sshll.u32 %s1072_s15, 4 }
  0x10   : > { %s914_s27 = scalar_lea.vmem %s1065_s3, %s632_s24  ;;  %s919_s30 = scalar_lea.vmem %s1066_s4, %s632_s24 }
  0x11   : > { %s924_s7 = scalar_lea.vmem %s1062_s0, %s787_s23 }
  0x12 LB: >> { %v611_v2 = vld [vmem:[%s1063_s1 + $0x80] sm:$0xff]  ;;  %v612_v3 = vld [vmem:[%s1063_s1 + $0x88] sm:$0xff]  ;;  %v855_v5 = vmov 0.0|0.0   ;;  %v613_v8 = vld [vmem:[%s1063_s1 + $0x90] sm:$0xff]  ;;  %vm856_vm0 = vmmov 0   ;;  %v857_v13 = vmov 0.0   ;;  %s853_s8 = sphi %s926_s8, %s278_s8  }
  0x13   : >> { %v282_v4 = vld [vmem:[%s1063_s1] sm:$0xff]  ;;  %738 = vmatprep.subr.bf16.mxu1 %v855_v5  ;;  %762 = vmatprep.subr.bf16.mxu0 %v855_v5  ;;  %v739_v6 = vpack.c.bf16 %v612_v3, %v611_v2  ;;  %v283_v7 = vld [vmem:[%s1063_s1 + $0x8] sm:$0xff]  ;;  %v614_v9 = vld [vmem:[%s1063_s1 + $0x98] sm:$0xff]  ;;  %s608_s19 = sshll.u32 %s853_s8, 3  ;;  %s629_s21 = sshll.u32 %s853_s8, 2 }
  0x14   : >> { %v763_v10 = vpack.c.bf16 %v283_v7, %v282_v4  ;;  %v284_v11 = vld [vmem:[%s1063_s1 + $0x10] sm:$0xff]  ;;  %v285_v12 = vld [vmem:[%s1063_s1 + $0x18] sm:$0xff]  ;;  %700 = vmatprep.mubr.msk.f32.mxu1 %vm856_vm0, %v857_v13  ;;  %735 = vmatprep.mubr.msk.f32.mxu0 %vm856_vm0, %v857_v13  ;;  %v742_v14 = vpack.c.bf16 %v614_v9, %v613_v8  ;;  %v615_v16 = vld [vmem:[%s1063_s1 + $0xa0] sm:$0xff]  ;;  %s280_s20 = scalar_lea.vmem %s924_s7, %s608_s19  ;;  %s470_s22 = scalar_lea.vmem %s914_s27, %s629_s21 }
  0x15   : >> { %740 = vmatpush3.bf16.msra.mxu1 %v739_v6  ;;  %v766_v15 = vpack.c.bf16 %v285_v12, %v284_v11  ;;  %v616_v17 = vld [vmem:[%s1063_s1 + $0xa8] sm:$0xff]  ;;  %v286_v18 = vld [vmem:[%s1063_s1 + $0x20] sm:$0xff]  ;;  %v617_v22 = vld [vmem:[%s1063_s1 + $0xb0] sm:$0xff]  ;;  %s474_s23 = scalar_lea.vmem %s919_s30, %s629_s21  ;;  %s278_s8 = sadd.s32 1, %s853_s8  }
  0x16   : >> { %764 = vmatpush3.bf16.msra.mxu0 %v763_v10  ;;  %741 = vmatprep.subr.bf16.mxu1 %v855_v5  ;;  %v287_v19 = vld [vmem:[%s1063_s1 + $0x28] sm:$0xff]  ;;  %v745_v20 = vpack.c.bf16 %v616_v17, %v615_v16  ;;  %v618_v23 = vld [vmem:[%s1063_s1 + $0xb8] sm:$0xff]  ;;  %v288_v24 = vld [vmem:[%s1063_s1 + $0x30] sm:$0xff]  ;;  %p275_p5 = scmp.ge.s32.totalorder %s278_s8, 4  }
  0x17   : >> { %765 = vmatprep.subr.bf16.mxu0 %v855_v5  ;;  %v769_v21 = vpack.c.bf16 %v287_v19, %v286_v18  ;;  %v289_v25 = vld [vmem:[%s1063_s1 + $0x38] sm:$0xff]  ;;  %v748_v26 = vpack.c.bf16 %v618_v23, %v617_v22  ;;  %v619_v28 = vld [vmem:[%s1063_s1 + $0xc0] sm:$0xff]  ;;  %v620_v29 = vld [vmem:[%s1063_s1 + $0xc8] sm:$0xff] }
  0x18   : >> { %v772_v27 = vpack.c.bf16 %v289_v25, %v288_v24  ;;  %v290_v30 = vld [vmem:[%s1063_s1 + $0x40] sm:$0xff]  ;;  %v291_v31 = vld [vmem:[%s1063_s1 + $0x48] sm:$0xff]  ;;  %v751_v32 = vpack.c.bf16 %v620_v29, %v619_v28  ;;  %v621_v34 = vld [vmem:[%s1063_s1 + $0xd0] sm:$0xff] }
  0x19   : >> { %743 = vmatpush3.bf16.msra.mxu1 %v742_v14  ;;  %v775_v33 = vpack.c.bf16 %v291_v31, %v290_v30  ;;  %v622_v35 = vld [vmem:[%s1063_s1 + $0xd8] sm:$0xff]  ;;  %v292_v36 = vld [vmem:[%s1063_s1 + $0x50] sm:$0xff]  ;;  %v623_v40 = vld [vmem:[%s1063_s1 + $0xe0] sm:$0xff] }
  0x1a   : >> { %767 = vmatpush3.bf16.msra.mxu0 %v766_v15  ;;  %744 = vmatprep.subr.bf16.mxu1 %v855_v5  ;;  %v293_v37 = vld [vmem:[%s1063_s1 + $0x58] sm:$0xff]  ;;  %v754_v38 = vpack.c.bf16 %v622_v35, %v621_v34  ;;  %v624_v41 = vld [vmem:[%s1063_s1 + $0xe8] sm:$0xff]  ;;  %v294_v42 = vld [vmem:[%s1063_s1 + $0x60] sm:$0xff] }
  0x1b   : >> { %768 = vmatprep.subr.bf16.mxu0 %v855_v5  ;;  %v778_v39 = vpack.c.bf16 %v293_v37, %v292_v36  ;;  %v295_v43 = vld [vmem:[%s1063_s1 + $0x68] sm:$0xff]  ;;  %v757_v44 = vpack.c.bf16 %v624_v41, %v623_v40  ;;  %v625_v46 = vld [vmem:[%s1063_s1 + $0xf0] sm:$0xff]  ;;  %v626_v47 = vld [vmem:[%s1063_s1 + $0xf8] sm:$0xff] }
  0x1c   : >> { %v781_v45 = vpack.c.bf16 %v295_v43, %v294_v42  ;;  %v296_v48 = vld [vmem:[%s1063_s1 + $0x70] sm:$0xff]  ;;  %v297_v49 = vld [vmem:[%s1063_s1 + $0x78] sm:$0xff]  ;;  %v760_v50 = vpack.c.bf16 %v626_v47, %v625_v46  ;;  %v610_v52 = vld [vmem:[%s280_s20 + $0x8] sm:$0xf] }
  0x1d   : >> { %746 = vmatpush3.bf16.msra.mxu1 %v745_v20  ;;  %v784_v51 = vpack.c.bf16 %v297_v49, %v296_v48  ;;  %v281_v53 = vld [vmem:[%s280_s20] sm:$0xf] }
  0x1e   : >> { %770 = vmatpush3.bf16.msra.mxu0 %v769_v21  ;;  %747 = vmatprep.subr.bf16.mxu1 %v855_v5  ;;  %v471_v60 = vld [vmem:[%s470_s22] sm:$0xf] }
  0x1f   : >> { %771 = vmatprep.subr.bf16.mxu0 %v855_v5 }
  0x21   : >> { %749 = vmatpush3.bf16.msra.mxu1 %v748_v26 }
  0x22   : >> { %773 = vmatpush3.bf16.msra.mxu0 %v772_v27  ;;  %750 = vmatprep.subr.bf16.mxu1 %v855_v5 }
  0x23   : >> { %774 = vmatprep.subr.bf16.mxu0 %v855_v5 }
  0x25   : >> { %752 = vmatpush3.bf16.msra.mxu1 %v751_v32 }
  0x26   : >> { %776 = vmatpush3.bf16.msra.mxu0 %v775_v33  ;;  %753 = vmatprep.subr.bf16.mxu1 %v855_v5 }
  0x27   : >> { %777 = vmatprep.subr.bf16.mxu0 %v855_v5 }
  0x29   : >> { %755 = vmatpush3.bf16.msra.mxu1 %v754_v38 }
  0x2a   : >> { %779 = vmatpush3.bf16.msra.mxu0 %v778_v39  ;;  %756 = vmatprep.subr.bf16.mxu1 %v855_v5 }
  0x2b   : >> { %780 = vmatprep.subr.bf16.mxu0 %v855_v5 }
  0x2d   : >> { %758 = vmatpush3.bf16.msra.mxu1 %v757_v44 }
  0x2e   : >> { %782 = vmatpush3.bf16.msra.mxu0 %v781_v45  ;;  %759 = vmatprep.subr.bf16.mxu1 %v855_v5 }
  0x2f   : >> { %783 = vmatprep.subr.bf16.mxu0 %v855_v5 }
  0x31   : >> { %761 = vmatpush3.bf16.msra.mxu1 %v760_v50 }
  0x32   : >> { %785 = vmatpush3.bf16.msra.mxu0 %v784_v51 }
  0x34   : >> { %701 = vmatmul.mubr.f32.vlgmr.msra.gmra.mrb[0].mxu1 %v610_v52 }
  0x35   : >> { %736 = vmatmul.mubr.f32.vlgmr.msra.gmra.mrb[0].mxu0 %v281_v53 }
 0x107   : >> { %v385_v54 = vpop.f32.mrb[0].mxu1 }
 0x108   : >> { %v455_v55 = vpop.f32.mrb[0].mxu0  ;;  %v702_v56 = vpop.f32.mrb[1].mxu1 }
 0x109   : >> { %v456_v57 = vadd.f32 %v455_v55, %v385_v54  ;;  %v737_v58 = vpop.f32.mrb[1].mxu0 }
 0x10b   : >> { %v463_v59 = vmul.f32 %v904_v0, %v456_v57 }
 0x10d   : >> { %v468_v61 = vadd.f32 %v909_v1, %v463_v59  ;;  %277 = sbr.rel (!%p275_p5) target bundleno = 18 (0x12), region = 81 }
 0x10f   : >> { %v472_v62 = vadd.f32 %v471_v60, %v468_v61 }
 0x111   : >> { %v473_v63 = vmax.f32 %v472_v62, 0.0 }
 0x113   : >> { %475 = vst [vmem:[%s474_s23] sm:$0xf] %v473_v63 }
 0x114 PF: > { %s14_s17 = sadd.s32 1, %s849_s17   ;;  %s1067_s15 = smov %s845_s16 }
 0x115   : > { %p11_p6 = scmp.ge.s32.totalorder %s14_s17, 4   ;;  %s1068_s16 = smov %s1070_s18 }
 0x117   :  { %13 = sbr.rel (!%p11_p6) target bundleno = 2 (0x2), region = 92 }

// kernel: bev_hourglass_forward.21
= control target key start
LH: loop header
LB: loop body
LE: loop exit
PB: predicated region body
PF: predicated region fallthrough
CT: control target
= control target key end

     0   :  { %s1250_s15 = smov 0   ;;  %s1252_s16 = smov 0   ;;  %s1555_s0 = inlined_call_operand.vmem [shape: f32[2,1,5,5,128], index: 0, kind: input, shape index: {}]   ;;  %s1556_s1 = inlined_call_operand.vmem [shape: f32[4,128,128], index: 1, kind: input, shape index: {}]   ;;  %s1557_s2 = inlined_call_operand.vmem [shape: f32[2,128], index: 2, kind: input, shape index: {}]   ;;  %s1558_s3 = inlined_call_operand.vmem [shape: f32[2,4,4,128], index: 3, kind: input, shape index: {}]   ;;  %s1559_s4 = inlined_call_operand.vmem [shape: f32[2,4,4,128], index: 4, kind: output, shape index: {}]  }
   0x1   :  { %s1254_s17 = smov 0  }
   0x2 LB: > { %s26_s18 = sadd.s32 1, %s1212_s16  ;;  %p780_p0 = scmp.ge.s32.totalorder %s1216_s17, 1  ;;  %s1216_s17 = sphi %s1254_s17, %s14_s17   ;;  %s1212_s16 = sphi %s1252_s16, %s1561_s16   ;;  %s1208_s15 = sphi %s1250_s15, %s1560_s15  }
   0x3   : > { %p28_p1 = scmp.ge.s32.totalorder %s26_s18, 2  ;;  %p199_p2 = scmp.lt.s32.totalorder %s1216_s17, 3 }
   0x5   : > { %s1563_s18 = smov (%p28_p1, %s26_s18), 0  ;;  %p200_p3 = pnand %p780_p0, %p199_p2 }
   0x6   : > { %p242_p4 = scmp.lt.s32.totalorder (!%p200_p3), %s1208_s15, 1  ;;  %v1271_v0 = vld [vmem:[%s1557_s2] ss:$0 sm:$0xff] (!%p200_p3)  ;;  %v1276_v1 = vld [vmem:[%s1557_s2 + $0x1] ss:$0 sm:$0xff] (!%p200_p3)  ;;  %s1293_s8 = smov (!%p200_p3), 0  }
   0x7   : > { %203 = sbr.rel (%p200_p3) target bundleno = 308 (0x134), region = 36 }
   0xe   : > { %s1565_s15 = smov (!%p242_p4, %s1208_s15), 1 }
   0xf   : > { %s1154_s23 = smul.u32 40, %s1565_s15  ;;  %s843_s24 = sshll.u32 %s1565_s15, 4 }
  0x10   : > { %s1281_s27 = scalar_lea.vmem %s1558_s3, %s843_s24  ;;  %s1286_s30 = scalar_lea.vmem %s1559_s4, %s843_s24 }
  0x11   : > { %s1291_s7 = scalar_lea.vmem %s1555_s0, %s1154_s23 }
  0x12 LB: >> { %v787_v2 = vld [vmem:[%s1556_s1 + $0x80] sm:$0xff]  ;;  %v788_v3 = vld [vmem:[%s1556_s1 + $0x88] sm:$0xff]  ;;  %v1222_v5 = vmov 0.0|0.0   ;;  %v789_v8 = vld [vmem:[%s1556_s1 + $0x90] sm:$0xff]  ;;  %vm1223_vm0 = vmmov 0   ;;  %v1224_v13 = vmov 0.0   ;;  %s1220_s8 = sphi %s1293_s8, %s278_s8  }
  0x13   : >> { %v805_v4 = vld [vmem:[%s1556_s1 + $0x100] sm:$0xff]  ;;  %1053 = vmatprep.subr.bf16.mxu1 %v1222_v5  ;;  %1101 = vmatprep.subr.bf16.mxu0 %v1222_v5  ;;  %v1054_v6 = vpack.c.bf16 %v788_v3, %v787_v2  ;;  %v806_v7 = vld [vmem:[%s1556_s1 + $0x108] sm:$0xff]  ;;  %v790_v9 = vld [vmem:[%s1556_s1 + $0x98] sm:$0xff]  ;;  %s786_s19 = sshll.u32 %s1220_s8, 3  ;;  %s840_s9 = sshll.u32 %s1220_s8, 2 }
  0x14   : >> { %v1102_v10 = vpack.c.bf16 %v806_v7, %v805_v4  ;;  %v807_v11 = vld [vmem:[%s1556_s1 + $0x110] sm:$0xff]  ;;  %v808_v12 = vld [vmem:[%s1556_s1 + $0x118] sm:$0xff]  ;;  %945 = vmatprep.mubr.msk.f32.mxu1 %vm1223_vm0, %v1224_v13  ;;  %1015 = vmatprep.mubr.msk.f32.mxu0 %vm1223_vm0, %v1224_v13  ;;  %v1057_v14 = vpack.c.bf16 %v790_v9, %v789_v8  ;;  %v791_v16 = vld [vmem:[%s1556_s1 + $0xa0] sm:$0xff]  ;;  %s1415_s20 = scalar_lea.vmem %s1291_s7, %s786_s19  ;;  %s648_s10 = scalar_lea.vmem %s1281_s27, %s840_s9 }
  0x15   : >> { %1055 = vmatpush3.bf16.msra.mxu1 %v1054_v6  ;;  %v1105_v15 = vpack.c.bf16 %v808_v12, %v807_v11  ;;  %v792_v17 = vld [vmem:[%s1556_s1 + $0xa8] sm:$0xff]  ;;  %v809_v18 = vld [vmem:[%s1556_s1 + $0x120] sm:$0xff]  ;;  %v793_v22 = vld [vmem:[%s1556_s1 + $0xb0] sm:$0xff]  ;;  %s652_s11 = scalar_lea.vmem %s1286_s30, %s840_s9  ;;  %s278_s8 = sadd.s32 1, %s1220_s8  }
  0x16   : >> { %1103 = vmatpush3.bf16.msra.mxu0 %v1102_v10  ;;  %1056 = vmatprep.subr.bf16.mxu1 %v1222_v5  ;;  %v810_v19 = vld [vmem:[%s1556_s1 + $0x128] sm:$0xff]  ;;  %v1060_v20 = vpack.c.bf16 %v792_v17, %v791_v16  ;;  %v794_v23 = vld [vmem:[%s1556_s1 + $0xb8] sm:$0xff]  ;;  %v811_v24 = vld [vmem:[%s1556_s1 + $0x130] sm:$0xff]  ;;  %p275_p5 = scmp.ge.s32.totalorder %s278_s8, 4  }
  0x17   : >> { %1104 = vmatprep.subr.bf16.mxu0 %v1222_v5  ;;  %v1108_v21 = vpack.c.bf16 %v810_v19, %v809_v18  ;;  %v812_v25 = vld [vmem:[%s1556_s1 + $0x138] sm:$0xff]  ;;  %v1063_v26 = vpack.c.bf16 %v794_v23, %v793_v22  ;;  %v795_v28 = vld [vmem:[%s1556_s1 + $0xc0] sm:$0xff]  ;;  %v796_v29 = vld [vmem:[%s1556_s1 + $0xc8] sm:$0xff] }
  0x18   : >> { %v1111_v27 = vpack.c.bf16 %v812_v25, %v811_v24  ;;  %v813_v30 = vld [vmem:[%s1556_s1 + $0x140] sm:$0xff]  ;;  %v814_v31 = vld [vmem:[%s1556_s1 + $0x148] sm:$0xff]  ;;  %v1066_v32 = vpack.c.bf16 %v796_v29, %v795_v28  ;;  %v797_v34 = vld [vmem:[%s1556_s1 + $0xd0] sm:$0xff] }
  0x19   : >> { %1058 = vmatpush3.bf16.msra.mxu1 %v1057_v14  ;;  %v1114_v33 = vpack.c.bf16 %v814_v31, %v813_v30  ;;  %v798_v35 = vld [vmem:[%s1556_s1 + $0xd8] sm:$0xff]  ;;  %v815_v36 = vld [vmem:[%s1556_s1 + $0x150] sm:$0xff]  ;;  %v799_v40 = vld [vmem:[%s1556_s1 + $0xe0] sm:$0xff] }
  0x1a   : >> { %1106 = vmatpush3.bf16.msra.mxu0 %v1105_v15  ;;  %1059 = vmatprep.subr.bf16.mxu1 %v1222_v5  ;;  %v816_v37 = vld [vmem:[%s1556_s1 + $0x158] sm:$0xff]  ;;  %v1069_v38 = vpack.c.bf16 %v798_v35, %v797_v34  ;;  %v800_v41 = vld [vmem:[%s1556_s1 + $0xe8] sm:$0xff]  ;;  %v817_v42 = vld [vmem:[%s1556_s1 + $0x160] sm:$0xff] }
  0x1b   : >> { %1107 = vmatprep.subr.bf16.mxu0 %v1222_v5  ;;  %v1117_v39 = vpack.c.bf16 %v816_v37, %v815_v36  ;;  %v818_v43 = vld [vmem:[%s1556_s1 + $0x168] sm:$0xff]  ;;  %v1072_v44 = vpack.c.bf16 %v800_v41, %v799_v40  ;;  %v801_v46 = vld [vmem:[%s1556_s1 + $0xf0] sm:$0xff]  ;;  %v802_v47 = vld [vmem:[%s1556_s1 + $0xf8] sm:$0xff] }
  0x1c   : >> { %v1120_v45 = vpack.c.bf16 %v818_v43, %v817_v42  ;;  %v819_v48 = vld [vmem:[%s1556_s1 + $0x170] sm:$0xff]  ;;  %v820_v49 = vld [vmem:[%s1556_s1 + $0x178] sm:$0xff]  ;;  %v1075_v50 = vpack.c.bf16 %v802_v47, %v801_v46  ;;  %v282_v52 = vld [vmem:[%s1556_s1] sm:$0xff] }
  0x1d   : >> { %1061 = vmatpush3.bf16.msra.mxu1 %v1060_v20  ;;  %v1123_v51 = vpack.c.bf16 %v820_v49, %v819_v48  ;;  %v283_v53 = vld [vmem:[%s1556_s1 + $0x8] sm:$0xff]  ;;  %v822_v54 = vld [vmem:[%s1556_s1 + $0x180] sm:$0xff]  ;;  %v284_v60 = vld [vmem:[%s1556_s1 + $0x10] sm:$0xff] }
  0x1e   : >> { %1109 = vmatpush3.bf16.msra.mxu0 %v1108_v21  ;;  %1062 = vmatprep.subr.bf16.mxu1 %v1222_v5  ;;  %v823_v55 = vld [vmem:[%s1556_s1 + $0x188] sm:$0xff]  ;;  %v298_v56 = vld [vmem:[%s1415_s20 + $0x1] sm:$0xf]  ;;  %v1078_v57 = vpack.c.bf16 %v283_v53, %v282_v52  ;;  %v285_v61 = vld [vmem:[%s1556_s1 + $0x18] sm:$0xff] }
  0x1f   : >> { %1110 = vmatprep.subr.bf16.mxu0 %v1222_v5  ;;  %v804_v58 = vld [vmem:[%s1415_s20 + $0x8] sm:$0xf]  ;;  %v1126_v59 = vpack.c.bf16 %v823_v55, %v822_v54  ;;  %v824_v62 = vld [vmem:[%s1556_s1 + $0x190] sm:$0xff]  ;;  %v825_v63 = vld [vmem:[%s1556_s1 + $0x198] sm:$0xff]  ;;  %v1081_v2 = vpack.c.bf16 %v285_v61, %v284_v60 }
  0x20   : >> { %v1129_v3 = vpack.c.bf16 %v825_v63, %v824_v62  ;;  %v286_v4 = vld [vmem:[%s1556_s1 + $0x20] sm:$0xff]  ;;  %v287_v6 = vld [vmem:[%s1556_s1 + $0x28] sm:$0xff]  ;;  %v288_v11 = vld [vmem:[%s1556_s1 + $0x30] sm:$0xff] }
  0x21   : >> { %1064 = vmatpush3.bf16.msra.mxu1 %v1063_v26  ;;  %v826_v7 = vld [vmem:[%s1556_s1 + $0x1a0] sm:$0xff]  ;;  %v827_v8 = vld [vmem:[%s1556_s1 + $0x1a8] sm:$0xff]  ;;  %v1084_v9 = vpack.c.bf16 %v287_v6, %v286_v4  ;;  %v289_v12 = vld [vmem:[%s1556_s1 + $0x38] sm:$0xff] }
  0x22   : >> { %1112 = vmatpush3.bf16.msra.mxu0 %v1111_v27  ;;  %1065 = vmatprep.subr.bf16.mxu1 %v1222_v5  ;;  %v1132_v10 = vpack.c.bf16 %v827_v8, %v826_v7  ;;  %v829_v14 = vld [vmem:[%s1556_s1 + $0x1b8] sm:$0xff]  ;;  %v1087_v15 = vpack.c.bf16 %v289_v12, %v288_v11  ;;  %v290_v17 = vld [vmem:[%s1556_s1 + $0x40] sm:$0xff]  ;;  %v291_v18 = vld [vmem:[%s1556_s1 + $0x48] sm:$0xff] }
  0x23   : >> { %1113 = vmatprep.subr.bf16.mxu0 %v1222_v5  ;;  %v830_v19 = vld [vmem:[%s1556_s1 + $0x1c0] sm:$0xff]  ;;  %v831_v20 = vld [vmem:[%s1556_s1 + $0x1c8] sm:$0xff]  ;;  %v1090_v21 = vpack.c.bf16 %v291_v18, %v290_v17  ;;  %v292_v23 = vld [vmem:[%s1556_s1 + $0x50] sm:$0xff] }
  0x24   : >> { %v1138_v22 = vpack.c.bf16 %v831_v20, %v830_v19  ;;  %v293_v24 = vld [vmem:[%s1556_s1 + $0x58] sm:$0xff]  ;;  %v832_v25 = vld [vmem:[%s1556_s1 + $0x1d0] sm:$0xff]  ;;  %v294_v29 = vld [vmem:[%s1556_s1 + $0x60] sm:$0xff] }
  0x25   : >> { %1067 = vmatpush3.bf16.msra.mxu1 %v1066_v32  ;;  %v833_v26 = vld [vmem:[%s1556_s1 + $0x1d8] sm:$0xff]  ;;  %v1093_v27 = vpack.c.bf16 %v293_v24, %v292_v23  ;;  %v295_v30 = vld [vmem:[%s1556_s1 + $0x68] sm:$0xff]  ;;  %v834_v31 = vld [vmem:[%s1556_s1 + $0x1e0] sm:$0xff] }
  0x26   : >> { %1115 = vmatpush3.bf16.msra.mxu0 %v1114_v33  ;;  %1068 = vmatprep.subr.bf16.mxu1 %v1222_v5  ;;  %v1141_v28 = vpack.c.bf16 %v833_v26, %v832_v25  ;;  %v835_v32 = vld [vmem:[%s1556_s1 + $0x1e8] sm:$0xff]  ;;  %v1096_v33 = vpack.c.bf16 %v295_v30, %v294_v29  ;;  %v296_v35 = vld [vmem:[%s1556_s1 + $0x70] sm:$0xff]  ;;  %v297_v36 = vld [vmem:[%s1556_s1 + $0x78] sm:$0xff] }
  0x27   : >> { %1116 = vmatprep.subr.bf16.mxu0 %v1222_v5  ;;  %v1144_v34 = vpack.c.bf16 %v835_v32, %v834_v31  ;;  %v836_v37 = vld [vmem:[%s1556_s1 + $0x1f0] sm:$0xff]  ;;  %v281_v41 = vld [vmem:[%s1415_s20] sm:$0xf]  ;;  %v821_v42 = vld [vmem:[%s1415_s20 + $0x9] sm:$0xf] }
  0x28   : >> { %v649_v49 = vld [vmem:[%s648_s10] sm:$0xf] }
  0x29   : >> { %1070 = vmatpush3.bf16.msra.mxu1 %v1069_v38  ;;  %v837_v38 = vld [vmem:[%s1556_s1 + $0x1f8] sm:$0xff] }
  0x2a   : >> { %1118 = vmatpush3.bf16.msra.mxu0 %v1117_v39  ;;  %1071 = vmatprep.subr.bf16.mxu1 %v1222_v5  ;;  %v1099_v39 = vpack.c.bf16 %v297_v36, %v296_v35  ;;  %v1147_v40 = vpack.c.bf16 %v837_v38, %v836_v37 }
  0x2b   : >> { %1119 = vmatprep.subr.bf16.mxu0 %v1222_v5 }
  0x2d   : >> { %1073 = vmatpush3.bf16.msra.mxu1 %v1072_v44 }
  0x2e   : >> { %1121 = vmatpush3.bf16.msra.mxu0 %v1120_v45  ;;  %1074 = vmatprep.subr.bf16.mxu1 %v1222_v5 }
  0x2f   : >> { %1122 = vmatprep.subr.bf16.mxu0 %v1222_v5 }
  0x31   : >> { %1076 = vmatpush3.bf16.msra.mxu1 %v1075_v50 }
  0x32   : >> { %1124 = vmatpush3.bf16.msra.mxu0 %v1123_v51  ;;  %1077 = vmatprep.subr.bf16.mxu1 %v1222_v5 }
  0x33   : >> { %1125 = vmatprep.subr.bf16.mxu0 %v1222_v5 }
  0x34   : >> { %946 = vmatmul.mubr.f32.vlgmr.msra.gmra.mrb[0].mxu1 %v298_v56 }
  0x35   : >> { %1079 = vmatpush3.bf16.msra.mxu1 %v1078_v57  ;;  %1016 = vmatmul.mubr.f32.vlgmr.msra.gmra.mrb[0].mxu0 %v804_v58 }
  0x36   : >> { %1127 = vmatpush3.bf16.msra.mxu0 %v1126_v59  ;;  %1080 = vmatprep.subr.bf16.mxu1 %v1222_v5 }
  0x37   : >> { %1128 = vmatprep.subr.bf16.mxu0 %v1222_v5  ;;  %980 = vmatprep.mubr.msk.f32.mxu1 %vm1223_vm0, %v1224_v13 }
  0x38   : >> { %1050 = vmatprep.mubr.msk.f32.mxu0 %vm1223_vm0, %v1224_v13  ;;  %v828_v13 = vld [vmem:[%s1556_s1 + $0x1b0] sm:$0xff] }
  0x39   : >> { %1082 = vmatpush3.bf16.msra.mxu1 %v1081_v2  ;;  %v1135_v16 = vpack.c.bf16 %v829_v14, %v828_v13 }
  0x3a   : >> { %1130 = vmatpush3.bf16.msra.mxu0 %v1129_v3  ;;  %1083 = vmatprep.subr.bf16.mxu1 %v1222_v5 }
  0x3b   : >> { %1131 = vmatprep.subr.bf16.mxu0 %v1222_v5 }
  0x3d   : >> { %1085 = vmatpush3.bf16.msra.mxu1 %v1084_v9 }
  0x3e   : >> { %1133 = vmatpush3.bf16.msra.mxu0 %v1132_v10  ;;  %1086 = vmatprep.subr.bf16.mxu1 %v1222_v5 }
  0x3f   : >> { %1134 = vmatprep.subr.bf16.mxu0 %v1222_v5 }
  0x41   : >> { %1088 = vmatpush3.bf16.msra.mxu1 %v1087_v15 }
  0x42   : >> { %1136 = vmatpush3.bf16.msra.mxu0 %v1135_v16  ;;  %1089 = vmatprep.subr.bf16.mxu1 %v1222_v5 }
  0x43   : >> { %1137 = vmatprep.subr.bf16.mxu0 %v1222_v5 }
  0x45   : >> { %1091 = vmatpush3.bf16.msra.mxu1 %v1090_v21 }
  0x46   : >> { %1139 = vmatpush3.bf16.msra.mxu0 %v1138_v22  ;;  %1092 = vmatprep.subr.bf16.mxu1 %v1222_v5 }
  0x47   : >> { %1140 = vmatprep.subr.bf16.mxu0 %v1222_v5 }
  0x49   : >> { %1094 = vmatpush3.bf16.msra.mxu1 %v1093_v27 }
  0x4a   : >> { %1142 = vmatpush3.bf16.msra.mxu0 %v1141_v28  ;;  %1095 = vmatprep.subr.bf16.mxu1 %v1222_v5 }
  0x4b   : >> { %1143 = vmatprep.subr.bf16.mxu0 %v1222_v5 }
  0x4d   : >> { %1097 = vmatpush3.bf16.msra.mxu1 %v1096_v33 }
  0x4e   : >> { %1145 = vmatpush3.bf16.msra.mxu0 %v1144_v34  ;;  %1098 = vmatprep.subr.bf16.mxu1 %v1222_v5 }
  0x4f   : >> { %1146 = vmatprep.subr.bf16.mxu0 %v1222_v5 }
  0x51   : >> { %1100 = vmatpush3.bf16.msra.mxu1 %v1099_v39 }
  0x52   : >> { %1148 = vmatpush3.bf16.msra.mxu0 %v1147_v40 }
  0x54   : >> { %981 = vmatmul.mubr.f32.vlgmr.msra.gmra.mrb[0].mxu1 %v281_v41 }
  0x55   : >> { %1051 = vmatmul.mubr.f32.vlgmr.msra.gmra.mrb[0].mxu0 %v821_v42 }
 0x127   : >> { %v452_v43 = vpop.f32.mrb[0].mxu1 }
 0x128   : >> { %v632_v44 = vpop.f32.mrb[0].mxu0  ;;  %v982_v45 = vpop.f32.mrb[1].mxu1 }
 0x129   : >> { %v1149_v46 = vadd.f32 %v632_v44, %v452_v43  ;;  %v1052_v47 = vpop.f32.mrb[1].mxu0 }
 0x12b   : >> { %v641_v48 = vmul.f32 %v1149_v46, %v1271_v0 }
 0x12d   : >> { %v646_v50 = vadd.f32 %v1276_v1, %v641_v48  ;;  %277 = sbr.rel (!%p275_p5) target bundleno = 18 (0x12), region = 83 }
 0x12f   : >> { %v650_v5 = vadd.f32 %v649_v49, %v646_v50 }
 0x131   : >> { %v651_v51 = vmax.f32 %v650_v5, 0.0 }
 0x133   : >> { %653 = vst [vmem:[%s652_s11] sm:$0xf] %v651_v51 }
 0x134 PF: > { %s14_s17 = sadd.s32 1, %s1216_s17   ;;  %s1560_s15 = smov %s1212_s16 }
 0x135   : > { %p11_p6 = scmp.ge.s32.totalorder %s14_s17, 4   ;;  %s1561_s16 = smov %s1563_s18 }
 0x137   :  { %13 = sbr.rel (!%p11_p6) target bundleno = 2 (0x2), region = 94 }

// kernel: bev_hourglass_forward.17
= control target key start
LH: loop header
LB: loop body
LE: loop exit
PB: predicated region body
PF: predicated region fallthrough
CT: control target
= control target key end

     0   :  { %s2082_s12 = smov 0   ;;  %s2084_s13 = smov 0   ;;  %s2676_s0 = inlined_call_operand.vmem [shape: f32[2,1,6,6,128], index: 0, kind: input, shape index: {}]   ;;  %s2677_s1 = inlined_call_operand.vmem [shape: f32[9,128,128], index: 1, kind: input, shape index: {}]   ;;  %s2678_s2 = inlined_call_operand.vmem [shape: f32[2,128], index: 2, kind: input, shape index: {}]   ;;  %s2679_s3 = inlined_call_operand.vmem [shape: f32[2,4,4,128], index: 3, kind: output, shape index: {}]  }
   0x1   :  { %s2086_s14 = smov 0  }
   0x2 LB: > { %s25_s15 = sadd.s32 1, %s2049_s13  ;;  %p1145_p0 = scmp.ge.s32.totalorder %s2053_s14, 1  ;;  %s2053_s14 = sphi %s2086_s14, %s13_s14   ;;  %s2049_s13 = sphi %s2084_s13, %s2681_s13   ;;  %s2045_s12 = sphi %s2082_s12, %s2680_s12  }
   0x3   : > { %p27_p1 = scmp.ge.s32.totalorder %s25_s15, 2  ;;  %p157_p2 = scmp.lt.s32.totalorder %s2053_s14, 3 }
   0x5   : > { %s2683_s15 = smov (%p27_p1, %s25_s15), 0  ;;  %p158_p3 = pnand %p1145_p0, %p157_p2 }
   0x6   : > { %p189_p4 = scmp.lt.s32.totalorder (!%p158_p3), %s2045_s12, 1  ;;  %v2103_v0 = vld [vmem:[%s2678_s2] ss:$0 sm:$0xff] (!%p158_p3)  ;;  %v2108_v1 = vld [vmem:[%s2678_s2 + $0x1] ss:$0 sm:$0xff] (!%p158_p3)  ;;  %s2120_s28 = smov (!%p158_p3), 0  }
   0x7   : > { %161 = sbr.rel (%p158_p3) target bundleno = 402 (0x192), region = 32 }
   0xe   : > { %s2685_s12 = smov (!%p189_p4, %s2045_s12), 1 }
   0xf   : > { %s1991_s20 = smul.u32 48, %s2685_s12  ;;  %s1291_s21 = sshll.u32 %s2685_s12, 4 }
  0x10   : > { %s2113_s24 = scalar_lea.vmem %s2679_s3, %s1291_s21 }
  0x11   : > { %s2118_s27 = scalar_lea.vmem %s2676_s0, %s1991_s20 }
  0x12 LB: >> { %v1150_v2 = vld [vmem:[%s2677_s1 + $0x80] sm:$0xff]  ;;  %v1151_v3 = vld [vmem:[%s2677_s1 + $0x88] sm:$0xff]  ;;  %v2059_v5 = vmov 0.0|0.0   ;;  %v1152_v8 = vld [vmem:[%s2677_s1 + $0x90] sm:$0xff]  ;;  %vm2060_vm0 = vmmov 0   ;;  %v2061_v13 = vmov 0.0   ;;  %s2057_s28 = sphi %s2120_s28, %s215_s28  }
  0x13   : >> { %v1201_v4 = vld [vmem:[%s2677_s1 + $0x200] sm:$0xff]  ;;  %1760 = vmatprep.subr.bf16.mxu1 %v2059_v5  ;;  %1856 = vmatprep.subr.bf16.mxu0 %v2059_v5  ;;  %v1761_v6 = vpack.c.bf16 %v1151_v3, %v1150_v2  ;;  %v1202_v7 = vld [vmem:[%s2677_s1 + $0x208] sm:$0xff]  ;;  %v1153_v9 = vld [vmem:[%s2677_s1 + $0x98] sm:$0xff]  ;;  %s1149_s30 = sshll.u32 %s2057_s28, 3  ;;  %s1288_s9 = sshll.u32 %s2057_s28, 2 }
  0x14   : >> { %v1857_v10 = vpack.c.bf16 %v1202_v7, %v1201_v4  ;;  %v1203_v11 = vld [vmem:[%s2677_s1 + $0x210] sm:$0xff]  ;;  %v1204_v12 = vld [vmem:[%s2677_s1 + $0x218] sm:$0xff]  ;;  %1477 = vmatprep.mubr.msk.f32.mxu1 %vm2060_vm0, %v2061_v13  ;;  %1617 = vmatprep.mubr.msk.f32.mxu0 %vm2060_vm0, %v2061_v13  ;;  %v1764_v14 = vpack.c.bf16 %v1153_v9, %v1152_v8  ;;  %v1154_v16 = vld [vmem:[%s2677_s1 + $0xa0] sm:$0xff]  ;;  %s2242_s4 = scalar_lea.vmem %s2118_s27, %s1149_s30  ;;  %s1034_s10 = scalar_lea.vmem %s2113_s24, %s1288_s9 }
  0x15   : >> { %1762 = vmatpush3.bf16.msra.mxu1 %v1761_v6  ;;  %v1860_v15 = vpack.c.bf16 %v1204_v12, %v1203_v11  ;;  %v1155_v17 = vld [vmem:[%s2677_s1 + $0xa8] sm:$0xff]  ;;  %v1205_v18 = vld [vmem:[%s2677_s1 + $0x220] sm:$0xff]  ;;  %v1156_v22 = vld [vmem:[%s2677_s1 + $0xb0] sm:$0xff]  ;;  %s215_s28 = sadd.s32 1, %s2057_s28  }
  0x16   : >> { %1858 = vmatpush3.bf16.msra.mxu0 %v1857_v10  ;;  %1763 = vmatprep.subr.bf16.mxu1 %v2059_v5  ;;  %v1206_v19 = vld [vmem:[%s2677_s1 + $0x228] sm:$0xff]  ;;  %v1767_v20 = vpack.c.bf16 %v1155_v17, %v1154_v16  ;;  %v1157_v23 = vld [vmem:[%s2677_s1 + $0xb8] sm:$0xff]  ;;  %v1207_v24 = vld [vmem:[%s2677_s1 + $0x230] sm:$0xff]  ;;  %p212_p5 = scmp.ge.s32.totalorder %s215_s28, 4  }
  0x17   : >> { %1859 = vmatprep.subr.bf16.mxu0 %v2059_v5  ;;  %v1863_v21 = vpack.c.bf16 %v1206_v19, %v1205_v18  ;;  %v1208_v25 = vld [vmem:[%s2677_s1 + $0x238] sm:$0xff]  ;;  %v1770_v26 = vpack.c.bf16 %v1157_v23, %v1156_v22  ;;  %v1158_v28 = vld [vmem:[%s2677_s1 + $0xc0] sm:$0xff]  ;;  %v1159_v29 = vld [vmem:[%s2677_s1 + $0xc8] sm:$0xff] }
  0x18   : >> { %v1866_v27 = vpack.c.bf16 %v1208_v25, %v1207_v24  ;;  %v1209_v30 = vld [vmem:[%s2677_s1 + $0x240] sm:$0xff]  ;;  %v1210_v31 = vld [vmem:[%s2677_s1 + $0x248] sm:$0xff]  ;;  %v1773_v32 = vpack.c.bf16 %v1159_v29, %v1158_v28  ;;  %v1160_v34 = vld [vmem:[%s2677_s1 + $0xd0] sm:$0xff] }
  0x19   : >> { %1765 = vmatpush3.bf16.msra.mxu1 %v1764_v14  ;;  %v1869_v33 = vpack.c.bf16 %v1210_v31, %v1209_v30  ;;  %v1161_v35 = vld [vmem:[%s2677_s1 + $0xd8] sm:$0xff]  ;;  %v1211_v36 = vld [vmem:[%s2677_s1 + $0x250] sm:$0xff]  ;;  %v1162_v40 = vld [vmem:[%s2677_s1 + $0xe0] sm:$0xff] }
  0x1a   : >> { %1861 = vmatpush3.bf16.msra.mxu0 %v1860_v15  ;;  %1766 = vmatprep.subr.bf16.mxu1 %v2059_v5  ;;  %v1212_v37 = vld [vmem:[%s2677_s1 + $0x258] sm:$0xff]  ;;  %v1776_v38 = vpack.c.bf16 %v1161_v35, %v1160_v34  ;;  %v1163_v41 = vld [vmem:[%s2677_s1 + $0xe8] sm:$0xff]  ;;  %v1213_v42 = vld [vmem:[%s2677_s1 + $0x260] sm:$0xff] }
  0x1b   : >> { %1862 = vmatprep.subr.bf16.mxu0 %v2059_v5  ;;  %v1872_v39 = vpack.c.bf16 %v1212_v37, %v1211_v36  ;;  %v1214_v43 = vld [vmem:[%s2677_s1 + $0x268] sm:$0xff]  ;;  %v1779_v44 = vpack.c.bf16 %v1163_v41, %v1162_v40  ;;  %v1164_v46 = vld [vmem:[%s2677_s1 + $0xf0] sm:$0xff]  ;;  %v1165_v47 = vld [vmem:[%s2677_s1 + $0xf8] sm:$0xff] }
  0x1c   : >> { %v1875_v45 = vpack.c.bf16 %v1214_v43, %v1213_v42  ;;  %v1215_v48 = vld [vmem:[%s2677_s1 + $0x270] sm:$0xff]  ;;  %v1216_v49 = vld [vmem:[%s2677_s1 + $0x278] sm:$0xff]  ;;  %v1782_v50 = vpack.c.bf16 %v1165_v47, %v1164_v46  ;;  %v219_v52 = vld [vmem:[%s2677_s1] sm:$0xff] }
  0x1d   : >> { %1768 = vmatpush3.bf16.msra.mxu1 %v1767_v20  ;;  %v1878_v51 = vpack.c.bf16 %v1216_v49, %v1215_v48  ;;  %v220_v53 = vld [vmem:[%s2677_s1 + $0x8] sm:$0xff]  ;;  %v1218_v54 = vld [vmem:[%s2677_s1 + $0x280] sm:$0xff]  ;;  %v221_v60 = vld [vmem:[%s2677_s1 + $0x10] sm:$0xff] }
  0x1e   : >> { %1864 = vmatpush3.bf16.msra.mxu0 %v1863_v21  ;;  %1769 = vmatprep.subr.bf16.mxu1 %v2059_v5  ;;  %v1219_v55 = vld [vmem:[%s2677_s1 + $0x288] sm:$0xff]  ;;  %v235_v56 = vld [vmem:[%s2242_s4 + $0x1] sm:$0xf]  ;;  %v1785_v57 = vpack.c.bf16 %v220_v53, %v219_v52  ;;  %v222_v61 = vld [vmem:[%s2677_s1 + $0x18] sm:$0xff] }
  0x1f   : >> { %1865 = vmatprep.subr.bf16.mxu0 %v2059_v5  ;;  %v1200_v58 = vld [vmem:[%s2242_s4 + $0x9] sm:$0xf]  ;;  %v1881_v59 = vpack.c.bf16 %v1219_v55, %v1218_v54  ;;  %v1220_v62 = vld [vmem:[%s2677_s1 + $0x290] sm:$0xff]  ;;  %v1221_v63 = vld [vmem:[%s2677_s1 + $0x298] sm:$0xff]  ;;  %v1788_v2 = vpack.c.bf16 %v222_v61, %v221_v60 }
  0x20   : >> { %v1884_v3 = vpack.c.bf16 %v1221_v63, %v1220_v62  ;;  %v223_v4 = vld [vmem:[%s2677_s1 + $0x20] sm:$0xff]  ;;  %v224_v6 = vld [vmem:[%s2677_s1 + $0x28] sm:$0xff]  ;;  %v225_v11 = vld [vmem:[%s2677_s1 + $0x30] sm:$0xff] }
  0x21   : >> { %1771 = vmatpush3.bf16.msra.mxu1 %v1770_v26  ;;  %v1222_v7 = vld [vmem:[%s2677_s1 + $0x2a0] sm:$0xff]  ;;  %v1223_v8 = vld [vmem:[%s2677_s1 + $0x2a8] sm:$0xff]  ;;  %v1791_v9 = vpack.c.bf16 %v224_v6, %v223_v4  ;;  %v226_v12 = vld [vmem:[%s2677_s1 + $0x38] sm:$0xff] }
  0x22   : >> { %1867 = vmatpush3.bf16.msra.mxu0 %v1866_v27  ;;  %1772 = vmatprep.subr.bf16.mxu1 %v2059_v5  ;;  %v1887_v10 = vpack.c.bf16 %v1223_v8, %v1222_v7  ;;  %v1224_v14 = vld [vmem:[%s2677_s1 + $0x2b0] sm:$0xff]  ;;  %v1225_v15 = vld [vmem:[%s2677_s1 + $0x2b8] sm:$0xff]  ;;  %v1794_v16 = vpack.c.bf16 %v226_v12, %v225_v11  ;;  %v227_v18 = vld [vmem:[%s2677_s1 + $0x40] sm:$0xff] }
  0x23   : >> { %1868 = vmatprep.subr.bf16.mxu0 %v2059_v5  ;;  %v1890_v17 = vpack.c.bf16 %v1225_v15, %v1224_v14  ;;  %v228_v19 = vld [vmem:[%s2677_s1 + $0x48] sm:$0xff]  ;;  %v1226_v20 = vld [vmem:[%s2677_s1 + $0x2c0] sm:$0xff]  ;;  %v229_v24 = vld [vmem:[%s2677_s1 + $0x50] sm:$0xff] }
  0x24   : >> { %v1227_v21 = vld [vmem:[%s2677_s1 + $0x2c8] sm:$0xff]  ;;  %v1797_v22 = vpack.c.bf16 %v228_v19, %v227_v18  ;;  %v230_v25 = vld [vmem:[%s2677_s1 + $0x58] sm:$0xff]  ;;  %v1228_v26 = vld [vmem:[%s2677_s1 + $0x2d0] sm:$0xff] }
  0x25   : >> { %1774 = vmatpush3.bf16.msra.mxu1 %v1773_v32  ;;  %v1893_v23 = vpack.c.bf16 %v1227_v21, %v1226_v20  ;;  %v1229_v27 = vld [vmem:[%s2677_s1 + $0x2d8] sm:$0xff]  ;;  %v1800_v28 = vpack.c.bf16 %v230_v25, %v229_v24  ;;  %v231_v30 = vld [vmem:[%s2677_s1 + $0x60] sm:$0xff]  ;;  %v232_v31 = vld [vmem:[%s2677_s1 + $0x68] sm:$0xff] }
  0x26   : >> { %1870 = vmatpush3.bf16.msra.mxu0 %v1869_v33  ;;  %1775 = vmatprep.subr.bf16.mxu1 %v2059_v5  ;;  %v1896_v29 = vpack.c.bf16 %v1229_v27, %v1228_v26  ;;  %v1230_v32 = vld [vmem:[%s2677_s1 + $0x2e0] sm:$0xff]  ;;  %v1231_v33 = vld [vmem:[%s2677_s1 + $0x2e8] sm:$0xff]  ;;  %v1803_v34 = vpack.c.bf16 %v232_v31, %v231_v30  ;;  %v233_v36 = vld [vmem:[%s2677_s1 + $0x70] sm:$0xff] }
  0x27   : >> { %1871 = vmatprep.subr.bf16.mxu0 %v2059_v5  ;;  %v1899_v35 = vpack.c.bf16 %v1231_v33, %v1230_v32  ;;  %v234_v37 = vld [vmem:[%s2677_s1 + $0x78] sm:$0xff]  ;;  %v1166_v42 = vld [vmem:[%s2677_s1 + $0x100] sm:$0xff]  ;;  %v1167_v43 = vld [vmem:[%s2677_s1 + $0x108] sm:$0xff] }
  0x28   : >> { %v1806_v40 = vpack.c.bf16 %v234_v37, %v233_v36  ;;  %v218_v46 = vld [vmem:[%s2242_s4] sm:$0xf]  ;;  %v1809_v47 = vpack.c.bf16 %v1167_v43, %v1166_v42  ;;  %v1217_v48 = vld [vmem:[%s2242_s4 + $0xa] sm:$0xf]  ;;  %v1238_v52 = vld [vmem:[%s2677_s1 + $0x310] sm:$0xff] }
  0x29   : >> { %1777 = vmatpush3.bf16.msra.mxu1 %v1776_v38  ;;  %v1232_v38 = vld [vmem:[%s2677_s1 + $0x2f0] sm:$0xff]  ;;  %v1239_v53 = vld [vmem:[%s2677_s1 + $0x318] sm:$0xff]  ;;  %v1174_v7 = vld [vmem:[%s2677_s1 + $0x140] sm:$0xff] }
  0x2a   : >> { %1873 = vmatpush3.bf16.msra.mxu0 %v1872_v39  ;;  %1778 = vmatprep.subr.bf16.mxu1 %v2059_v5  ;;  %v1233_v39 = vld [vmem:[%s2677_s1 + $0x2f8] sm:$0xff]  ;;  %v1908_v55 = vpack.c.bf16 %v1239_v53, %v1238_v52  ;;  %v1172_v62 = vld [vmem:[%s2677_s1 + $0x130] sm:$0xff]  ;;  %v1175_v8 = vld [vmem:[%s2677_s1 + $0x148] sm:$0xff] }
  0x2b   : >> { %1874 = vmatprep.subr.bf16.mxu0 %v2059_v5  ;;  %v1902_v41 = vpack.c.bf16 %v1233_v39, %v1232_v38  ;;  %v1173_v63 = vld [vmem:[%s2677_s1 + $0x138] sm:$0xff]  ;;  %v1821_v11 = vpack.c.bf16 %v1175_v8, %v1174_v7  ;;  %v1176_v14 = vld [vmem:[%s2677_s1 + $0x150] sm:$0xff]  ;;  %v1178_v20 = vld [vmem:[%s2677_s1 + $0x160] sm:$0xff] }
  0x2c   : >> { %v1818_v4 = vpack.c.bf16 %v1173_v63, %v1172_v62  ;;  %v1177_v15 = vld [vmem:[%s2677_s1 + $0x158] sm:$0xff]  ;;  %v1179_v21 = vld [vmem:[%s2677_s1 + $0x168] sm:$0xff]  ;;  %v1180_v26 = vld [vmem:[%s2677_s1 + $0x170] sm:$0xff] }
  0x2d   : >> { %1780 = vmatpush3.bf16.msra.mxu1 %v1779_v44  ;;  %v1236_v44 = vld [vmem:[%s2677_s1 + $0x300] sm:$0xff]  ;;  %v1824_v18 = vpack.c.bf16 %v1177_v15, %v1176_v14  ;;  %v1827_v24 = vpack.c.bf16 %v1179_v21, %v1178_v20  ;;  %v1181_v27 = vld [vmem:[%s2677_s1 + $0x178] sm:$0xff]  ;;  %v1185_v33 = vld [vmem:[%s2677_s1 + $0x188] sm:$0xff] }
  0x2e   : >> { %1876 = vmatpush3.bf16.msra.mxu0 %v1875_v45  ;;  %1781 = vmatprep.subr.bf16.mxu1 %v2059_v5  ;;  %v1237_v45 = vld [vmem:[%s2677_s1 + $0x308] sm:$0xff]  ;;  %v1830_v30 = vpack.c.bf16 %v1181_v27, %v1180_v26  ;;  %v1184_v32 = vld [vmem:[%s2677_s1 + $0x180] sm:$0xff]  ;;  %v1235_v38 = vld [vmem:[%s2242_s4 + $0x10] sm:$0xf] }
  0x2f   : >> { %1877 = vmatprep.subr.bf16.mxu0 %v2059_v5  ;;  %v1905_v49 = vpack.c.bf16 %v1237_v45, %v1236_v44  ;;  %v393_v36 = vld [vmem:[%s2242_s4 + $0x2] sm:$0xf]  ;;  %v1833_v37 = vpack.c.bf16 %v1185_v33, %v1184_v32  ;;  %v1255_v42 = vld [vmem:[%s2677_s1 + $0x390] sm:$0xff]  ;;  %v1256_v43 = vld [vmem:[%s2677_s1 + $0x398] sm:$0xff] }
  0x30   : >> { %v1932_v45 = vpack.c.bf16 %v1256_v43, %v1255_v42  ;;  %v1190_v52 = vld [vmem:[%s2677_s1 + $0x1b0] sm:$0xff]  ;;  %v1191_v53 = vld [vmem:[%s2677_s1 + $0x1b8] sm:$0xff]  ;;  %v1283_v42 = vld [vmem:[%s2677_s1 + $0x468] sm:$0xff] }
  0x31   : >> { %1783 = vmatpush3.bf16.msra.mxu1 %v1782_v50  ;;  %v1168_v50 = vld [vmem:[%s2677_s1 + $0x110] sm:$0xff] }
  0x32   : >> { %1879 = vmatpush3.bf16.msra.mxu0 %v1878_v51  ;;  %1784 = vmatprep.subr.bf16.mxu1 %v2059_v5  ;;  %v1169_v51 = vld [vmem:[%s2677_s1 + $0x118] sm:$0xff]  ;;  %v1272_v27 = vld [vmem:[%s2677_s1 + $0x410] sm:$0xff] }
  0x33   : >> { %1880 = vmatprep.subr.bf16.mxu0 %v2059_v5  ;;  %v1812_v54 = vpack.c.bf16 %v1169_v51, %v1168_v50  ;;  %v1276_v33 = vld [vmem:[%s2677_s1 + $0x430] sm:$0xff] }
  0x34   : >> { %1478 = vmatmul.mubr.f32.vlgmr.msra.gmra.mrb[0].mxu1 %v235_v56  ;;  %v1170_v56 = vld [vmem:[%s2677_s1 + $0x120] sm:$0xff] }
  0x35   : >> { %1786 = vmatpush3.bf16.msra.mxu1 %v1785_v57  ;;  %1618 = vmatmul.mubr.f32.vlgmr.msra.gmra.mrb[0].mxu0 %v1200_v58  ;;  %v1171_v57 = vld [vmem:[%s2677_s1 + $0x128] sm:$0xff]  ;;  %v1240_v58 = vld [vmem:[%s2677_s1 + $0x320] sm:$0xff] }
  0x36   : >> { %1882 = vmatpush3.bf16.msra.mxu0 %v1881_v59  ;;  %1787 = vmatprep.subr.bf16.mxu1 %v2059_v5  ;;  %v1241_v59 = vld [vmem:[%s2677_s1 + $0x328] sm:$0xff]  ;;  %v1815_v60 = vpack.c.bf16 %v1171_v57, %v1170_v56  ;;  %v1842_v56 = vpack.c.bf16 %v1191_v53, %v1190_v52 }
  0x37   : >> { %1883 = vmatprep.subr.bf16.mxu0 %v2059_v5  ;;  %1512 = vmatprep.mubr.msk.f32.mxu1 %vm2060_vm0, %v2061_v13  ;;  %v1911_v61 = vpack.c.bf16 %v1241_v59, %v1240_v58  ;;  %v1192_v58 = vld [vmem:[%s2677_s1 + $0x1c0] sm:$0xff]  ;;  %v1193_v59 = vld [vmem:[%s2677_s1 + $0x1c8] sm:$0xff] }
  0x38   : >> { %1652 = vmatprep.mubr.msk.f32.mxu0 %vm2060_vm0, %v2061_v13  ;;  %v1845_v62 = vpack.c.bf16 %v1193_v59, %v1192_v58 }
  0x39   : >> { %1789 = vmatpush3.bf16.msra.mxu1 %v1788_v2  ;;  %v1242_v2 = vld [vmem:[%s2677_s1 + $0x330] sm:$0xff] }
  0x3a   : >> { %1885 = vmatpush3.bf16.msra.mxu0 %v1884_v3  ;;  %1790 = vmatprep.subr.bf16.mxu1 %v2059_v5  ;;  %v1243_v3 = vld [vmem:[%s2677_s1 + $0x338] sm:$0xff] }
  0x3b   : >> { %1886 = vmatprep.subr.bf16.mxu0 %v2059_v5  ;;  %v1914_v6 = vpack.c.bf16 %v1243_v3, %v1242_v2  ;;  %v1194_v2 = vld [vmem:[%s2677_s1 + $0x1d0] sm:$0xff]  ;;  %v1195_v3 = vld [vmem:[%s2677_s1 + $0x1d8] sm:$0xff] }
  0x3c   : >> { %v1848_v7 = vpack.c.bf16 %v1195_v3, %v1194_v2 }
  0x3d   : >> { %1792 = vmatpush3.bf16.msra.mxu1 %v1791_v9  ;;  %v1244_v9 = vld [vmem:[%s2677_s1 + $0x340] sm:$0xff] }
  0x3e   : >> { %1888 = vmatpush3.bf16.msra.mxu0 %v1887_v10  ;;  %1793 = vmatprep.subr.bf16.mxu1 %v2059_v5  ;;  %v1245_v10 = vld [vmem:[%s2677_s1 + $0x348] sm:$0xff] }
  0x3f   : >> { %1889 = vmatprep.subr.bf16.mxu0 %v2059_v5  ;;  %v1917_v12 = vpack.c.bf16 %v1245_v10, %v1244_v9  ;;  %v1196_v9 = vld [vmem:[%s2677_s1 + $0x1e0] sm:$0xff]  ;;  %v1197_v10 = vld [vmem:[%s2677_s1 + $0x1e8] sm:$0xff] }
  0x40   : >> { %v1851_v14 = vpack.c.bf16 %v1197_v10, %v1196_v9 }
  0x41   : >> { %1795 = vmatpush3.bf16.msra.mxu1 %v1794_v16  ;;  %v1246_v16 = vld [vmem:[%s2677_s1 + $0x350] sm:$0xff] }
  0x42   : >> { %1891 = vmatpush3.bf16.msra.mxu0 %v1890_v17  ;;  %1796 = vmatprep.subr.bf16.mxu1 %v2059_v5  ;;  %v1247_v17 = vld [vmem:[%s2677_s1 + $0x358] sm:$0xff] }
  0x43   : >> { %1892 = vmatprep.subr.bf16.mxu0 %v2059_v5  ;;  %v1920_v19 = vpack.c.bf16 %v1247_v17, %v1246_v16  ;;  %v1198_v16 = vld [vmem:[%s2677_s1 + $0x1f0] sm:$0xff]  ;;  %v1199_v17 = vld [vmem:[%s2677_s1 + $0x1f8] sm:$0xff] }
  0x44   : >> { %v1854_v20 = vpack.c.bf16 %v1199_v17, %v1198_v16 }
  0x45   : >> { %1798 = vmatpush3.bf16.msra.mxu1 %v1797_v22  ;;  %v1248_v22 = vld [vmem:[%s2677_s1 + $0x360] sm:$0xff] }
  0x46   : >> { %1894 = vmatpush3.bf16.msra.mxu0 %v1893_v23  ;;  %1799 = vmatprep.subr.bf16.mxu1 %v2059_v5  ;;  %v1249_v23 = vld [vmem:[%s2677_s1 + $0x368] sm:$0xff] }
  0x47   : >> { %1895 = vmatprep.subr.bf16.mxu0 %v2059_v5  ;;  %v1923_v25 = vpack.c.bf16 %v1249_v23, %v1248_v22  ;;  %v1270_v22 = vld [vmem:[%s2677_s1 + $0x400] sm:$0xff]  ;;  %v1271_v23 = vld [vmem:[%s2677_s1 + $0x408] sm:$0xff] }
  0x48   : >> { %v1953_v26 = vpack.c.bf16 %v1271_v23, %v1270_v22 }
  0x49   : >> { %1801 = vmatpush3.bf16.msra.mxu1 %v1800_v28  ;;  %v1250_v28 = vld [vmem:[%s2677_s1 + $0x370] sm:$0xff] }
  0x4a   : >> { %1897 = vmatpush3.bf16.msra.mxu0 %v1896_v29  ;;  %1802 = vmatprep.subr.bf16.mxu1 %v2059_v5  ;;  %v1251_v29 = vld [vmem:[%s2677_s1 + $0x378] sm:$0xff] }
  0x4b   : >> { %1898 = vmatprep.subr.bf16.mxu0 %v2059_v5  ;;  %v1926_v31 = vpack.c.bf16 %v1251_v29, %v1250_v28  ;;  %v1273_v28 = vld [vmem:[%s2677_s1 + $0x418] sm:$0xff] }
  0x4c   : >> { %v1956_v29 = vpack.c.bf16 %v1273_v28, %v1272_v27 }
  0x4d   : >> { %1804 = vmatpush3.bf16.msra.mxu1 %v1803_v34  ;;  %v1253_v34 = vld [vmem:[%s2677_s1 + $0x380] sm:$0xff] }
  0x4e   : >> { %1900 = vmatpush3.bf16.msra.mxu0 %v1899_v35  ;;  %1805 = vmatprep.subr.bf16.mxu1 %v2059_v5  ;;  %v1254_v35 = vld [vmem:[%s2677_s1 + $0x388] sm:$0xff] }
  0x4f   : >> { %1901 = vmatprep.subr.bf16.mxu0 %v2059_v5  ;;  %v1929_v39 = vpack.c.bf16 %v1254_v35, %v1253_v34  ;;  %v1278_v35 = vld [vmem:[%s2677_s1 + $0x440] sm:$0xff] }
  0x51   : >> { %1807 = vmatpush3.bf16.msra.mxu1 %v1806_v40  ;;  %v1186_v40 = vld [vmem:[%s2677_s1 + $0x190] sm:$0xff] }
  0x52   : >> { %1903 = vmatpush3.bf16.msra.mxu0 %v1902_v41  ;;  %1808 = vmatprep.subr.bf16.mxu1 %v2059_v5  ;;  %v1187_v41 = vld [vmem:[%s2677_s1 + $0x198] sm:$0xff] }
  0x53   : >> { %1904 = vmatprep.subr.bf16.mxu0 %v2059_v5  ;;  %v1836_v44 = vpack.c.bf16 %v1187_v41, %v1186_v40  ;;  %v1282_v41 = vld [vmem:[%s2677_s1 + $0x460] sm:$0xff] }
  0x54   : >> { %1513 = vmatmul.mubr.f32.vlgmr.msra.gmra.mrb[0].mxu1 %v218_v46  ;;  %v1188_v46 = vld [vmem:[%s2677_s1 + $0x1a0] sm:$0xff]  ;;  %v1971_v43 = vpack.c.bf16 %v1283_v42, %v1282_v41 }
  0x55   : >> { %1810 = vmatpush3.bf16.msra.mxu1 %v1809_v47  ;;  %1653 = vmatmul.mubr.f32.vlgmr.msra.gmra.mrb[0].mxu0 %v1217_v48  ;;  %v1189_v47 = vld [vmem:[%s2677_s1 + $0x1a8] sm:$0xff]  ;;  %v1257_v48 = vld [vmem:[%s2677_s1 + $0x3a0] sm:$0xff] }
  0x56   : >> { %1906 = vmatpush3.bf16.msra.mxu0 %v1905_v49  ;;  %1811 = vmatprep.subr.bf16.mxu1 %v2059_v5  ;;  %v1258_v49 = vld [vmem:[%s2677_s1 + $0x3a8] sm:$0xff]  ;;  %v1839_v50 = vpack.c.bf16 %v1189_v47, %v1188_v46  ;;  %v1269_v47 = vld [vmem:[%s2242_s4 + $0x12] sm:$0xf] }
  0x57   : >> { %1907 = vmatprep.subr.bf16.mxu0 %v2059_v5  ;;  %1547 = vmatprep.mubr.msk.f32.mxu1 %vm2060_vm0, %v2061_v13  ;;  %v1935_v51 = vpack.c.bf16 %v1258_v49, %v1257_v48 }
  0x58   : >> { %1687 = vmatprep.mubr.msk.f32.mxu0 %vm2060_vm0, %v2061_v13 }
  0x59   : >> { %1813 = vmatpush3.bf16.msra.mxu1 %v1812_v54  ;;  %v1259_v54 = vld [vmem:[%s2677_s1 + $0x3b0] sm:$0xff] }
  0x5a   : >> { %1909 = vmatpush3.bf16.msra.mxu0 %v1908_v55  ;;  %1814 = vmatprep.subr.bf16.mxu1 %v2059_v5  ;;  %v1260_v55 = vld [vmem:[%s2677_s1 + $0x3b8] sm:$0xff] }
  0x5b   : >> { %1910 = vmatprep.subr.bf16.mxu0 %v2059_v5  ;;  %v1938_v57 = vpack.c.bf16 %v1260_v55, %v1259_v54 }
  0x5d   : >> { %1816 = vmatpush3.bf16.msra.mxu1 %v1815_v60  ;;  %v1261_v60 = vld [vmem:[%s2677_s1 + $0x3c0] sm:$0xff] }
  0x5e   : >> { %1912 = vmatpush3.bf16.msra.mxu0 %v1911_v61  ;;  %1817 = vmatprep.subr.bf16.mxu1 %v2059_v5  ;;  %v1262_v61 = vld [vmem:[%s2677_s1 + $0x3c8] sm:$0xff] }
  0x5f   : >> { %1913 = vmatprep.subr.bf16.mxu0 %v2059_v5  ;;  %v1941_v63 = vpack.c.bf16 %v1262_v61, %v1261_v60 }
  0x61   : >> { %1819 = vmatpush3.bf16.msra.mxu1 %v1818_v4  ;;  %v1263_v4 = vld [vmem:[%s2677_s1 + $0x3d0] sm:$0xff] }
  0x62   : >> { %1915 = vmatpush3.bf16.msra.mxu0 %v1914_v6  ;;  %1820 = vmatprep.subr.bf16.mxu1 %v2059_v5  ;;  %v1264_v6 = vld [vmem:[%s2677_s1 + $0x3d8] sm:$0xff] }
  0x63   : >> { %1916 = vmatprep.subr.bf16.mxu0 %v2059_v5  ;;  %v1944_v8 = vpack.c.bf16 %v1264_v6, %v1263_v4 }
  0x65   : >> { %1822 = vmatpush3.bf16.msra.mxu1 %v1821_v11  ;;  %v1265_v11 = vld [vmem:[%s2677_s1 + $0x3e0] sm:$0xff] }
  0x66   : >> { %1918 = vmatpush3.bf16.msra.mxu0 %v1917_v12  ;;  %1823 = vmatprep.subr.bf16.mxu1 %v2059_v5  ;;  %v1266_v12 = vld [vmem:[%s2677_s1 + $0x3e8] sm:$0xff] }
  0x67   : >> { %1919 = vmatprep.subr.bf16.mxu0 %v2059_v5  ;;  %v1947_v15 = vpack.c.bf16 %v1266_v12, %v1265_v11 }
  0x69   : >> { %1825 = vmatpush3.bf16.msra.mxu1 %v1824_v18  ;;  %v1267_v18 = vld [vmem:[%s2677_s1 + $0x3f0] sm:$0xff] }
  0x6a   : >> { %1921 = vmatpush3.bf16.msra.mxu0 %v1920_v19  ;;  %1826 = vmatprep.subr.bf16.mxu1 %v2059_v5  ;;  %v1268_v19 = vld [vmem:[%s2677_s1 + $0x3f8] sm:$0xff] }
  0x6b   : >> { %1922 = vmatprep.subr.bf16.mxu0 %v2059_v5  ;;  %v1950_v21 = vpack.c.bf16 %v1268_v19, %v1267_v18 }
  0x6d   : >> { %1828 = vmatpush3.bf16.msra.mxu1 %v1827_v24  ;;  %v1183_v24 = vld [vmem:[%s2242_s4 + $0x8] sm:$0xf] }
  0x6e   : >> { %1924 = vmatpush3.bf16.msra.mxu0 %v1923_v25  ;;  %1829 = vmatprep.subr.bf16.mxu1 %v2059_v5  ;;  %v1252_v25 = vld [vmem:[%s2242_s4 + $0x11] sm:$0xf] }
  0x6f   : >> { %1925 = vmatprep.subr.bf16.mxu0 %v2059_v5 }
  0x71   : >> { %1831 = vmatpush3.bf16.msra.mxu1 %v1830_v30  ;;  %v1274_v30 = vld [vmem:[%s2677_s1 + $0x420] sm:$0xff] }
  0x72   : >> { %1927 = vmatpush3.bf16.msra.mxu0 %v1926_v31  ;;  %1832 = vmatprep.subr.bf16.mxu1 %v2059_v5  ;;  %v1275_v31 = vld [vmem:[%s2677_s1 + $0x428] sm:$0xff] }
  0x73   : >> { %1928 = vmatprep.subr.bf16.mxu0 %v2059_v5  ;;  %v1959_v32 = vpack.c.bf16 %v1275_v31, %v1274_v30 }
  0x74   : >> { %1548 = vmatmul.mubr.f32.vlgmr.msra.gmra.mrb[0].mxu1 %v393_v36  ;;  %v1279_v36 = vld [vmem:[%s2677_s1 + $0x448] sm:$0xff] }
  0x75   : >> { %1834 = vmatpush3.bf16.msra.mxu1 %v1833_v37  ;;  %1688 = vmatmul.mubr.f32.vlgmr.msra.gmra.mrb[0].mxu0 %v1235_v38  ;;  %v1965_v37 = vpack.c.bf16 %v1279_v36, %v1278_v35  ;;  %v1280_v38 = vld [vmem:[%s2677_s1 + $0x450] sm:$0xff] }
  0x76   : >> { %1930 = vmatpush3.bf16.msra.mxu0 %v1929_v39  ;;  %1835 = vmatprep.subr.bf16.mxu1 %v2059_v5  ;;  %v1281_v39 = vld [vmem:[%s2677_s1 + $0x458] sm:$0xff] }
  0x77   : >> { %1931 = vmatprep.subr.bf16.mxu0 %v2059_v5  ;;  %1582 = vmatprep.mubr.msk.f32.mxu1 %vm2060_vm0, %v2061_v13  ;;  %v1968_v40 = vpack.c.bf16 %v1281_v39, %v1280_v38 }
  0x78   : >> { %1722 = vmatprep.mubr.msk.f32.mxu0 %vm2060_vm0, %v2061_v13 }
  0x79   : >> { %1837 = vmatpush3.bf16.msra.mxu1 %v1836_v44  ;;  %v1284_v44 = vld [vmem:[%s2677_s1 + $0x470] sm:$0xff] }
  0x7a   : >> { %1933 = vmatpush3.bf16.msra.mxu0 %v1932_v45  ;;  %1838 = vmatprep.subr.bf16.mxu1 %v2059_v5  ;;  %v1285_v45 = vld [vmem:[%s2677_s1 + $0x478] sm:$0xff] }
  0x7b   : >> { %1934 = vmatprep.subr.bf16.mxu0 %v2059_v5  ;;  %v1974_v46 = vpack.c.bf16 %v1285_v45, %v1284_v44 }
  0x7d   : >> { %1840 = vmatpush3.bf16.msra.mxu1 %v1839_v50 }
  0x7e   : >> { %1936 = vmatpush3.bf16.msra.mxu0 %v1935_v51  ;;  %1841 = vmatprep.subr.bf16.mxu1 %v2059_v5 }
  0x7f   : >> { %1937 = vmatprep.subr.bf16.mxu0 %v2059_v5 }
  0x81   : >> { %1843 = vmatpush3.bf16.msra.mxu1 %v1842_v56 }
  0x82   : >> { %1939 = vmatpush3.bf16.msra.mxu0 %v1938_v57  ;;  %1844 = vmatprep.subr.bf16.mxu1 %v2059_v5 }
  0x83   : >> { %1940 = vmatprep.subr.bf16.mxu0 %v2059_v5 }
  0x85   : >> { %1846 = vmatpush3.bf16.msra.mxu1 %v1845_v62 }
  0x86   : >> { %1942 = vmatpush3.bf16.msra.mxu0 %v1941_v63  ;;  %1847 = vmatprep.subr.bf16.mxu1 %v2059_v5 }
  0x87   : >> { %1943 = vmatprep.subr.bf16.mxu0 %v2059_v5 }
  0x89   : >> { %1849 = vmatpush3.bf16.msra.mxu1 %v1848_v7 }
  0x8a   : >> { %1945 = vmatpush3.bf16.msra.mxu0 %v1944_v8  ;;  %1850 = vmatprep.subr.bf16.mxu1 %v2059_v5 }
  0x8b   : >> { %1946 = vmatprep.subr.bf16.mxu0 %v2059_v5 }
  0x8d   : >> { %1852 = vmatpush3.bf16.msra.mxu1 %v1851_v14 }
  0x8e   : >> { %1948 = vmatpush3.bf16.msra.mxu0 %v1947_v15  ;;  %1853 = vmatprep.subr.bf16.mxu1 %v2059_v5 }
  0x8f   : >> { %1949 = vmatprep.subr.bf16.mxu0 %v2059_v5 }
  0x91   : >> { %1855 = vmatpush3.bf16.msra.mxu1 %v1854_v20 }
  0x92   : >> { %1951 = vmatpush3.bf16.msra.mxu0 %v1950_v21 }
  0x93   : >> { %1952 = vmatprep.subr.bf16.mxu0 %v2059_v5 }
  0x94   : >> { %1583 = vmatmul.mubr.f32.vlgmr.msra.gmra.mrb[0].mxu1 %v1183_v24 }
  0x95   : >> { %1723 = vmatmul.mubr.f32.vlgmr.msra.gmra.mrb[0].mxu0 %v1252_v25 }
  0x96   : >> { %1954 = vmatpush3.bf16.msra.mxu0 %v1953_v26  ;;  %1757 = vmatprep.mubr.msk.f32.mxu0 %vm2060_vm0, %v2061_v13  ;;  %v1277_v13 = vld [vmem:[%s2677_s1 + $0x438] sm:$0xff] }
  0x97   : >> { %1955 = vmatprep.subr.bf16.mxu0 %v2059_v5  ;;  %v1962_v34 = vpack.c.bf16 %v1277_v13, %v1276_v33 }
  0x9a   : >> { %1957 = vmatpush3.bf16.msra.mxu0 %v1956_v29 }
  0x9b   : >> { %1958 = vmatprep.subr.bf16.mxu0 %v2059_v5 }
  0x9e   : >> { %1960 = vmatpush3.bf16.msra.mxu0 %v1959_v32 }
  0x9f   : >> { %1961 = vmatprep.subr.bf16.mxu0 %v2059_v5 }
  0xa2   : >> { %1963 = vmatpush3.bf16.msra.mxu0 %v1962_v34 }
  0xa3   : >> { %1964 = vmatprep.subr.bf16.mxu0 %v2059_v5 }
  0xa6   : >> { %1966 = vmatpush3.bf16.msra.mxu0 %v1965_v37 }
  0xa7   : >> { %1967 = vmatprep.subr.bf16.mxu0 %v2059_v5 }
  0xaa   : >> { %1969 = vmatpush3.bf16.msra.mxu0 %v1968_v40 }
  0xab   : >> { %1970 = vmatprep.subr.bf16.mxu0 %v2059_v5 }
  0xae   : >> { %1972 = vmatpush3.bf16.msra.mxu0 %v1971_v43 }
  0xaf   : >> { %1973 = vmatprep.subr.bf16.mxu0 %v2059_v5 }
  0xb2   : >> { %1975 = vmatpush3.bf16.msra.mxu0 %v1974_v46 }
  0xb5   : >> { %1758 = vmatmul.mubr.f32.vlgmr.msra.gmra.mrb[0].mxu0 %v1269_v47 }
 0x167   : >> { %v569_v48 = vpop.f32.mrb[0].mxu1 }
 0x168   : >> { %v1584_v49 = vpop.f32.mrb[1].mxu1 }
 0x188   : >> { %v1017_v50 = vpop.f32.mrb[0].mxu0 }
 0x189   : >> { %v1976_v51 = vadd.f32 %v1017_v50, %v569_v48  ;;  %v1759_v52 = vpop.f32.mrb[1].mxu0 }
 0x18b   : >> { %v1026_v53 = vmul.f32 %v1976_v51, %v2103_v0  ;;  %214 = sbr.rel (!%p212_p5) target bundleno = 18 (0x12), region = 81 }
 0x18d   : >> { %v1031_v54 = vadd.f32 %v2108_v1, %v1026_v53 }
 0x18f   : >> { %v1032_v55 = vmax.f32 %v1031_v54, 0.0 }
 0x191   : >> { %1035 = vst [vmem:[%s1034_s10] sm:$0xf] %v1032_v55 }
 0x192 PF: > { %s13_s14 = sadd.s32 1, %s2053_s14   ;;  %s2680_s12 = smov %s2049_s13 }
 0x193   : > { %p10_p6 = scmp.ge.s32.totalorder %s13_s14, 4   ;;  %s2681_s13 = smov %s2683_s15 }
 0x195   :  { %12 = sbr.rel (!%p10_p6) target bundleno = 2 (0x2), region = 92 }

// kernel: bev_hourglass_forward.19
= control target key start
LH: loop header
LB: loop body
LE: loop exit
PB: predicated region body
PF: predicated region fallthrough
CT: control target
= control target key end

     0   :  { %s875_s15 = smov 0   ;;  %s877_s16 = smov 0   ;;  %s1054_s0 = inlined_call_operand.vmem [shape: f32[2,1,5,5,128], index: 0, kind: input, shape index: {}]   ;;  %s1055_s1 = inlined_call_operand.vmem [shape: f32[2,128,128], index: 1, kind: input, shape index: {}]   ;;  %s1056_s2 = inlined_call_operand.vmem [shape: f32[2,128], index: 2, kind: input, shape index: {}]   ;;  %s1057_s3 = inlined_call_operand.vmem [shape: f32[2,4,4,128], index: 3, kind: input, shape index: {}]   ;;  %s1058_s4 = inlined_call_operand.vmem [shape: f32[2,4,4,128], index: 4, kind: output, shape index: {}]  }
   0x1   :  { %s879_s17 = smov 0  }
   0x2 LB: > { %s26_s18 = sadd.s32 1, %s837_s16  ;;  %p596_p0 = scmp.ge.s32.totalorder %s841_s17, 1  ;;  %s841_s17 = sphi %s879_s17, %s14_s17   ;;  %s837_s16 = sphi %s877_s16, %s1060_s16   ;;  %s833_s15 = sphi %s875_s15, %s1059_s15  }
   0x3   : > { %p28_p1 = scmp.ge.s32.totalorder %s26_s18, 2  ;;  %p199_p2 = scmp.lt.s32.totalorder %s841_s17, 3 }
   0x5   : > { %s1062_s18 = smov (%p28_p1, %s26_s18), 0  ;;  %p200_p3 = pnand %p596_p0, %p199_p2 }
   0x6   : > { %p242_p4 = scmp.lt.s32.totalorder (!%p200_p3), %s833_s15, 1  ;;  %v896_v0 = vld [vmem:[%s1056_s2] ss:$0 sm:$0xff] (!%p200_p3)  ;;  %v901_v1 = vld [vmem:[%s1056_s2 + $0x1] ss:$0 sm:$0xff] (!%p200_p3)  ;;  %s918_s8 = smov (!%p200_p3), 0  }
   0x7   : > { %203 = sbr.rel (%p200_p3) target bundleno = 276 (0x114), region = 36 }
   0xe   : > { %s1064_s15 = smov (!%p242_p4, %s833_s15), 1 }
   0xf   : > { %s779_s23 = smul.u32 40, %s1064_s15  ;;  %s624_s24 = sshll.u32 %s1064_s15, 4 }
  0x10   : > { %s906_s27 = scalar_lea.vmem %s1057_s3, %s624_s24  ;;  %s911_s30 = scalar_lea.vmem %s1058_s4, %s624_s24 }
  0x11   : > { %s916_s7 = scalar_lea.vmem %s1054_s0, %s779_s23 }
  0x12 LB: >> { %v603_v2 = vld [vmem:[%s1055_s1 + $0x80] sm:$0xff]  ;;  %v604_v3 = vld [vmem:[%s1055_s1 + $0x88] sm:$0xff]  ;;  %v847_v5 = vmov 0.0|0.0   ;;  %v605_v8 = vld [vmem:[%s1055_s1 + $0x90] sm:$0xff]  ;;  %vm848_vm0 = vmmov 0   ;;  %v849_v13 = vmov 0.0   ;;  %s845_s8 = sphi %s918_s8, %s278_s8  }
  0x13   : >> { %v282_v4 = vld [vmem:[%s1055_s1] sm:$0xff]  ;;  %730 = vmatprep.subr.bf16.mxu1 %v847_v5  ;;  %754 = vmatprep.subr.bf16.mxu0 %v847_v5  ;;  %v731_v6 = vpack.c.bf16 %v604_v3, %v603_v2  ;;  %v283_v7 = vld [vmem:[%s1055_s1 + $0x8] sm:$0xff]  ;;  %v606_v9 = vld [vmem:[%s1055_s1 + $0x98] sm:$0xff]  ;;  %s602_s19 = sshll.u32 %s845_s8, 3  ;;  %s621_s21 = sshll.u32 %s845_s8, 2 }
  0x14   : >> { %v755_v10 = vpack.c.bf16 %v283_v7, %v282_v4  ;;  %v284_v11 = vld [vmem:[%s1055_s1 + $0x10] sm:$0xff]  ;;  %v285_v12 = vld [vmem:[%s1055_s1 + $0x18] sm:$0xff]  ;;  %692 = vmatprep.mubr.msk.f32.mxu1 %vm848_vm0, %v849_v13  ;;  %727 = vmatprep.mubr.msk.f32.mxu0 %vm848_vm0, %v849_v13  ;;  %v734_v14 = vpack.c.bf16 %v606_v9, %v605_v8  ;;  %v607_v16 = vld [vmem:[%s1055_s1 + $0xa0] sm:$0xff]  ;;  %s280_s20 = scalar_lea.vmem %s916_s7, %s602_s19  ;;  %s467_s22 = scalar_lea.vmem %s906_s27, %s621_s21 }
  0x15   : >> { %732 = vmatpush3.bf16.msra.mxu1 %v731_v6  ;;  %v758_v15 = vpack.c.bf16 %v285_v12, %v284_v11  ;;  %v608_v17 = vld [vmem:[%s1055_s1 + $0xa8] sm:$0xff]  ;;  %v286_v18 = vld [vmem:[%s1055_s1 + $0x20] sm:$0xff]  ;;  %v609_v22 = vld [vmem:[%s1055_s1 + $0xb0] sm:$0xff]  ;;  %s471_s23 = scalar_lea.vmem %s911_s30, %s621_s21  ;;  %s278_s8 = sadd.s32 1, %s845_s8  }
  0x16   : >> { %756 = vmatpush3.bf16.msra.mxu0 %v755_v10  ;;  %733 = vmatprep.subr.bf16.mxu1 %v847_v5  ;;  %v287_v19 = vld [vmem:[%s1055_s1 + $0x28] sm:$0xff]  ;;  %v737_v20 = vpack.c.bf16 %v608_v17, %v607_v16  ;;  %v610_v23 = vld [vmem:[%s1055_s1 + $0xb8] sm:$0xff]  ;;  %v288_v24 = vld [vmem:[%s1055_s1 + $0x30] sm:$0xff]  ;;  %p275_p5 = scmp.ge.s32.totalorder %s278_s8, 4  }
  0x17   : >> { %757 = vmatprep.subr.bf16.mxu0 %v847_v5  ;;  %v761_v21 = vpack.c.bf16 %v287_v19, %v286_v18  ;;  %v289_v25 = vld [vmem:[%s1055_s1 + $0x38] sm:$0xff]  ;;  %v740_v26 = vpack.c.bf16 %v610_v23, %v609_v22  ;;  %v611_v28 = vld [vmem:[%s1055_s1 + $0xc0] sm:$0xff]  ;;  %v612_v29 = vld [vmem:[%s1055_s1 + $0xc8] sm:$0xff] }
  0x18   : >> { %v764_v27 = vpack.c.bf16 %v289_v25, %v288_v24  ;;  %v290_v30 = vld [vmem:[%s1055_s1 + $0x40] sm:$0xff]  ;;  %v291_v31 = vld [vmem:[%s1055_s1 + $0x48] sm:$0xff]  ;;  %v743_v32 = vpack.c.bf16 %v612_v29, %v611_v28  ;;  %v613_v34 = vld [vmem:[%s1055_s1 + $0xd0] sm:$0xff] }
  0x19   : >> { %735 = vmatpush3.bf16.msra.mxu1 %v734_v14  ;;  %v767_v33 = vpack.c.bf16 %v291_v31, %v290_v30  ;;  %v614_v35 = vld [vmem:[%s1055_s1 + $0xd8] sm:$0xff]  ;;  %v292_v36 = vld [vmem:[%s1055_s1 + $0x50] sm:$0xff]  ;;  %v615_v40 = vld [vmem:[%s1055_s1 + $0xe0] sm:$0xff] }
  0x1a   : >> { %759 = vmatpush3.bf16.msra.mxu0 %v758_v15  ;;  %736 = vmatprep.subr.bf16.mxu1 %v847_v5  ;;  %v293_v37 = vld [vmem:[%s1055_s1 + $0x58] sm:$0xff]  ;;  %v746_v38 = vpack.c.bf16 %v614_v35, %v613_v34  ;;  %v616_v41 = vld [vmem:[%s1055_s1 + $0xe8] sm:$0xff]  ;;  %v294_v42 = vld [vmem:[%s1055_s1 + $0x60] sm:$0xff] }
  0x1b   : >> { %760 = vmatprep.subr.bf16.mxu0 %v847_v5  ;;  %v770_v39 = vpack.c.bf16 %v293_v37, %v292_v36  ;;  %v295_v43 = vld [vmem:[%s1055_s1 + $0x68] sm:$0xff]  ;;  %v749_v44 = vpack.c.bf16 %v616_v41, %v615_v40  ;;  %v617_v46 = vld [vmem:[%s1055_s1 + $0xf0] sm:$0xff]  ;;  %v618_v47 = vld [vmem:[%s1055_s1 + $0xf8] sm:$0xff] }
  0x1c   : >> { %v773_v45 = vpack.c.bf16 %v295_v43, %v294_v42  ;;  %v296_v48 = vld [vmem:[%s1055_s1 + $0x70] sm:$0xff]  ;;  %v297_v49 = vld [vmem:[%s1055_s1 + $0x78] sm:$0xff]  ;;  %v752_v50 = vpack.c.bf16 %v618_v47, %v617_v46  ;;  %v298_v52 = vld [vmem:[%s280_s20 + $0x1] sm:$0xf] }
  0x1d   : >> { %738 = vmatpush3.bf16.msra.mxu1 %v737_v20  ;;  %v776_v51 = vpack.c.bf16 %v297_v49, %v296_v48  ;;  %v281_v53 = vld [vmem:[%s280_s20] sm:$0xf] }
  0x1e   : >> { %762 = vmatpush3.bf16.msra.mxu0 %v761_v21  ;;  %739 = vmatprep.subr.bf16.mxu1 %v847_v5  ;;  %v468_v60 = vld [vmem:[%s467_s22] sm:$0xf] }
  0x1f   : >> { %763 = vmatprep.subr.bf16.mxu0 %v847_v5 }
  0x21   : >> { %741 = vmatpush3.bf16.msra.mxu1 %v740_v26 }
  0x22   : >> { %765 = vmatpush3.bf16.msra.mxu0 %v764_v27  ;;  %742 = vmatprep.subr.bf16.mxu1 %v847_v5 }
  0x23   : >> { %766 = vmatprep.subr.bf16.mxu0 %v847_v5 }
  0x25   : >> { %744 = vmatpush3.bf16.msra.mxu1 %v743_v32 }
  0x26   : >> { %768 = vmatpush3.bf16.msra.mxu0 %v767_v33  ;;  %745 = vmatprep.subr.bf16.mxu1 %v847_v5 }
  0x27   : >> { %769 = vmatprep.subr.bf16.mxu0 %v847_v5 }
  0x29   : >> { %747 = vmatpush3.bf16.msra.mxu1 %v746_v38 }
  0x2a   : >> { %771 = vmatpush3.bf16.msra.mxu0 %v770_v39  ;;  %748 = vmatprep.subr.bf16.mxu1 %v847_v5 }
  0x2b   : >> { %772 = vmatprep.subr.bf16.mxu0 %v847_v5 }
  0x2d   : >> { %750 = vmatpush3.bf16.msra.mxu1 %v749_v44 }
  0x2e   : >> { %774 = vmatpush3.bf16.msra.mxu0 %v773_v45  ;;  %751 = vmatprep.subr.bf16.mxu1 %v847_v5 }
  0x2f   : >> { %775 = vmatprep.subr.bf16.mxu0 %v847_v5 }
  0x31   : >> { %753 = vmatpush3.bf16.msra.mxu1 %v752_v50 }
  0x32   : >> { %777 = vmatpush3.bf16.msra.mxu0 %v776_v51 }
  0x34   : >> { %693 = vmatmul.mubr.f32.vlgmr.msra.gmra.mrb[0].mxu1 %v298_v52 }
  0x35   : >> { %728 = vmatmul.mubr.f32.vlgmr.msra.gmra.mrb[0].mxu0 %v281_v53 }
 0x107   : >> { %v382_v54 = vpop.f32.mrb[0].mxu1 }
 0x108   : >> { %v452_v55 = vpop.f32.mrb[0].mxu0  ;;  %v694_v56 = vpop.f32.mrb[1].mxu1 }
 0x109   : >> { %v453_v57 = vadd.f32 %v452_v55, %v382_v54  ;;  %v729_v58 = vpop.f32.mrb[1].mxu0 }
 0x10b   : >> { %v460_v59 = vmul.f32 %v896_v0, %v453_v57 }
 0x10d   : >> { %v465_v61 = vadd.f32 %v901_v1, %v460_v59  ;;  %277 = sbr.rel (!%p275_p5) target bundleno = 18 (0x12), region = 80 }
 0x10f   : >> { %v469_v62 = vadd.f32 %v468_v60, %v465_v61 }
 0x111   : >> { %v470_v63 = vmax.f32 %v469_v62, 0.0 }
 0x113   : >> { %472 = vst [vmem:[%s471_s23] sm:$0xf] %v470_v63 }
 0x114 PF: > { %s14_s17 = sadd.s32 1, %s841_s17   ;;  %s1059_s15 = smov %s837_s16 }
 0x115   : > { %p11_p6 = scmp.ge.s32.totalorder %s14_s17, 4   ;;  %s1060_s16 = smov %s1062_s18 }
 0x117   :  { %13 = sbr.rel (!%p11_p6) target bundleno = 2 (0x2), region = 91 }

// kernel: bev_hourglass_forward.18
= control target key start
LH: loop header
LB: loop body
LE: loop exit
PB: predicated region body
PF: predicated region fallthrough
CT: control target
= control target key end

     0   :  { %s694_s15 = smov 0   ;;  %s696_s16 = smov 0   ;;  %s809_s0 = inlined_call_operand.vmem [shape: f32[2,1,5,5,128], index: 0, kind: input, shape index: {}]   ;;  %s810_s1 = inlined_call_operand.vmem [shape: f32[1,128,128], index: 1, kind: input, shape index: {}]   ;;  %s811_s2 = inlined_call_operand.vmem [shape: f32[2,128], index: 2, kind: input, shape index: {}]   ;;  %s812_s3 = inlined_call_operand.vmem [shape: f32[2,4,4,128], index: 3, kind: input, shape index: {}]   ;;  %s813_s4 = inlined_call_operand.vmem [shape: f32[2,4,4,128], index: 4, kind: output, shape index: {}]  }
   0x1   :  { %s698_s17 = smov 0  }
   0x2 LB: > { %s26_s18 = sadd.s32 1, %s656_s16  ;;  %p508_p0 = scmp.ge.s32.totalorder %s660_s17, 1  ;;  %s660_s17 = sphi %s698_s17, %s14_s17   ;;  %s656_s16 = sphi %s696_s16, %s815_s16   ;;  %s652_s15 = sphi %s694_s15, %s814_s15  }
   0x3   : > { %p28_p1 = scmp.ge.s32.totalorder %s26_s18, 2  ;;  %p199_p2 = scmp.lt.s32.totalorder %s660_s17, 3 }
   0x5   : > { %s817_s18 = smov (%p28_p1, %s26_s18), 0  ;;  %p200_p3 = pnand %p508_p0, %p199_p2 }
   0x6   : > { %p242_p4 = scmp.lt.s32.totalorder (!%p200_p3), %s652_s15, 1  ;;  %v715_v0 = vld [vmem:[%s811_s2] ss:$0 sm:$0xff] (!%p200_p3)  ;;  %v720_v1 = vld [vmem:[%s811_s2 + $0x1] ss:$0 sm:$0xff] (!%p200_p3)  ;;  %s737_s8 = smov (!%p200_p3), 0  }
   0x7   : > { %203 = sbr.rel (%p200_p3) target bundleno = 273 (0x111), region = 36 }
   0xe   : > { %s819_s15 = smov (!%p242_p4, %s652_s15), 1 }
   0xf   : > { %s598_s23 = smul.u32 40, %s819_s15  ;;  %s520_s24 = sshll.u32 %s819_s15, 4 }
  0x10   : > { %s725_s27 = scalar_lea.vmem %s812_s3, %s520_s24  ;;  %s730_s30 = scalar_lea.vmem %s813_s4, %s520_s24 }
  0x11   : > { %s735_s7 = scalar_lea.vmem %s809_s0, %s598_s23 }
  0x12 LB: >> { %v282_v2 = vld [vmem:[%s810_s1] sm:$0xff]  ;;  %v283_v3 = vld [vmem:[%s810_s1 + $0x8] sm:$0xff]  ;;  %v284_v4 = vld [vmem:[%s810_s1 + $0x10] sm:$0xff]  ;;  %v666_v5 = vmov 0.0|0.0   ;;  %vm667_vm0 = vmmov 0   ;;  %v668_v8 = vmov 0.0   ;;  %s664_s8 = sphi %s737_s8, %s278_s8  }
  0x13   : >> { %574 = vmatprep.subr.bf16.mxu0 %v666_v5  ;;  %v575_v6 = vpack.c.bf16 %v283_v3, %v282_v2  ;;  %v285_v7 = vld [vmem:[%s810_s1 + $0x18] sm:$0xff]  ;;  %571 = vmatprep.mubr.msk.f32.mxu0 %vm667_vm0, %v668_v8  ;;  %v286_v10 = vld [vmem:[%s810_s1 + $0x20] sm:$0xff]  ;;  %v287_v11 = vld [vmem:[%s810_s1 + $0x28] sm:$0xff]  ;;  %s514_s25 = sshll.u32 %s664_s8, 3  ;;  %s517_s28 = sshll.u32 %s664_s8, 2 }
  0x14   : >> { %v578_v9 = vpack.c.bf16 %v285_v7, %v284_v4  ;;  %v581_v12 = vpack.c.bf16 %v287_v11, %v286_v10  ;;  %v288_v13 = vld [vmem:[%s810_s1 + $0x30] sm:$0xff]  ;;  %v289_v14 = vld [vmem:[%s810_s1 + $0x38] sm:$0xff]  ;;  %v290_v16 = vld [vmem:[%s810_s1 + $0x40] sm:$0xff]  ;;  %s280_s26 = scalar_lea.vmem %s735_s7, %s514_s25  ;;  %s379_s29 = scalar_lea.vmem %s725_s27, %s517_s28 }
  0x15   : >> { %576 = vmatpush3.bf16.msra.mxu0 %v575_v6  ;;  %v584_v15 = vpack.c.bf16 %v289_v14, %v288_v13  ;;  %v291_v17 = vld [vmem:[%s810_s1 + $0x48] sm:$0xff]  ;;  %v292_v19 = vld [vmem:[%s810_s1 + $0x50] sm:$0xff]  ;;  %v293_v20 = vld [vmem:[%s810_s1 + $0x58] sm:$0xff]  ;;  %s383_s5 = scalar_lea.vmem %s730_s30, %s517_s28  ;;  %s278_s8 = sadd.s32 1, %s664_s8  }
  0x16   : >> { %577 = vmatprep.subr.bf16.mxu0 %v666_v5  ;;  %v587_v18 = vpack.c.bf16 %v291_v17, %v290_v16  ;;  %v590_v21 = vpack.c.bf16 %v293_v20, %v292_v19  ;;  %v294_v22 = vld [vmem:[%s810_s1 + $0x60] sm:$0xff]  ;;  %v295_v23 = vld [vmem:[%s810_s1 + $0x68] sm:$0xff]  ;;  %v296_v25 = vld [vmem:[%s810_s1 + $0x70] sm:$0xff]  ;;  %p275_p5 = scmp.ge.s32.totalorder %s278_s8, 4  }
  0x17   : >> { %v593_v24 = vpack.c.bf16 %v295_v23, %v294_v22  ;;  %v297_v26 = vld [vmem:[%s810_s1 + $0x78] sm:$0xff]  ;;  %v281_v28 = vld [vmem:[%s280_s26] sm:$0xf] }
  0x18   : >> { %v596_v27 = vpack.c.bf16 %v297_v26, %v296_v25  ;;  %v380_v32 = vld [vmem:[%s379_s29] sm:$0xf] }
  0x19   : >> { %579 = vmatpush3.bf16.msra.mxu0 %v578_v9 }
  0x1a   : >> { %580 = vmatprep.subr.bf16.mxu0 %v666_v5 }
  0x1d   : >> { %582 = vmatpush3.bf16.msra.mxu0 %v581_v12 }
  0x1e   : >> { %583 = vmatprep.subr.bf16.mxu0 %v666_v5 }
  0x21   : >> { %585 = vmatpush3.bf16.msra.mxu0 %v584_v15 }
  0x22   : >> { %586 = vmatprep.subr.bf16.mxu0 %v666_v5 }
  0x25   : >> { %588 = vmatpush3.bf16.msra.mxu0 %v587_v18 }
  0x26   : >> { %589 = vmatprep.subr.bf16.mxu0 %v666_v5 }
  0x29   : >> { %591 = vmatpush3.bf16.msra.mxu0 %v590_v21 }
  0x2a   : >> { %592 = vmatprep.subr.bf16.mxu0 %v666_v5 }
  0x2d   : >> { %594 = vmatpush3.bf16.msra.mxu0 %v593_v24 }
  0x2e   : >> { %595 = vmatprep.subr.bf16.mxu0 %v666_v5 }
  0x31   : >> { %597 = vmatpush3.bf16.msra.mxu0 %v596_v27 }
  0x34   : >> { %572 = vmatmul.mubr.f32.vlgmr.msra.gmra.mrb[0].mxu0 %v281_v28 }
 0x107   : >> { %v364_v29 = vpop.f32.mrb[0].mxu0 }
 0x108   : >> { %v372_v30 = vmul.f32 %v715_v0, %v364_v29  ;;  %v573_v31 = vpop.f32.mrb[1].mxu0 }
 0x10a   : >> { %v377_v33 = vadd.f32 %v720_v1, %v372_v30  ;;  %277 = sbr.rel (!%p275_p5) target bundleno = 18 (0x12), region = 79 }
 0x10c   : >> { %v381_v34 = vadd.f32 %v380_v32, %v377_v33 }
 0x10e   : >> { %v382_v35 = vmax.f32 %v381_v34, 0.0 }
 0x110   : >> { %384 = vst [vmem:[%s383_s5] sm:$0xf] %v382_v35 }
 0x111 PF: > { %s14_s17 = sadd.s32 1, %s660_s17   ;;  %s814_s15 = smov %s656_s16 }
 0x112   : > { %p11_p6 = scmp.ge.s32.totalorder %s14_s17, 4   ;;  %s815_s16 = smov %s817_s18 }
 0x114   :  { %13 = sbr.rel (!%p11_p6) target bundleno = 2 (0x2), region = 90 }

// kernel: bev_hourglass_forward.24
= control target key start
LH: loop header
LB: loop body
LE: loop exit
PB: predicated region body
PF: predicated region fallthrough
CT: control target
= control target key end

     0   :  { %s788_s12 = smov 0   ;;  %s790_s13 = smov 0   ;;  %s961_s0 = inlined_call_operand.vmem [shape: f32[2,1,9,9,128], index: 0, kind: input, shape index: {}]   ;;  %s962_s1 = inlined_call_operand.vmem [shape: f32[2,128,128], index: 1, kind: input, shape index: {}]   ;;  %s963_s2 = inlined_call_operand.vmem [shape: f32[2,128], index: 2, kind: input, shape index: {}]   ;;  %s964_s3 = inlined_call_operand.vmem [shape: f32[2,8,8,128], index: 3, kind: output, shape index: {}]  }
   0x1   :  { %s792_s14 = smov 0  }
   0x2 LB: > { %s25_s15 = sadd.s32 1, %s755_s13  ;;  %p515_p0 = scmp.ge.s32.totalorder %s759_s14, 1  ;;  %s759_s14 = sphi %s792_s14, %s13_s14   ;;  %s755_s13 = sphi %s790_s13, %s966_s13   ;;  %s751_s12 = sphi %s788_s12, %s965_s12  }
   0x3   : > { %p27_p1 = scmp.ge.s32.totalorder %s25_s15, 2  ;;  %p157_p2 = scmp.lt.s32.totalorder %s759_s14, 3 }
   0x5   : > { %s968_s15 = smov (%p27_p1, %s25_s15), 0  ;;  %p158_p3 = pnand %p515_p0, %p157_p2 }
   0x6   : > { %p189_p4 = scmp.lt.s32.totalorder (!%p158_p3), %s751_s12, 1  ;;  %v809_v0 = vld [vmem:[%s963_s2] ss:$0 sm:$0xff] (!%p158_p3)  ;;  %v814_v1 = vld [vmem:[%s963_s2 + $0x1] ss:$0 sm:$0xff] (!%p158_p3)  ;;  %s826_s28 = smov (!%p158_p3), 0  }
   0x7   : > { %161 = sbr.rel (%p158_p3) target bundleno = 272 (0x110), region = 32 }
   0xe   : > { %s970_s12 = smov (!%p189_p4, %s751_s12), 1 }
   0xf   : > { %s697_s20 = smul.u32 144, %s970_s12  ;;  %s543_s21 = sshll.u32 %s970_s12, 6 }
  0x10   : > { %s819_s24 = scalar_lea.vmem %s964_s3, %s543_s21 }
  0x11   : > { %s824_s27 = scalar_lea.vmem %s961_s0, %s697_s20 }
  0x12 LB: >> { %v522_v2 = vld [vmem:[%s962_s1 + $0x80] sm:$0xff]  ;;  %v523_v3 = vld [vmem:[%s962_s1 + $0x88] sm:$0xff]  ;;  %v765_v5 = vmov 0.0|0.0   ;;  %v524_v8 = vld [vmem:[%s962_s1 + $0x90] sm:$0xff]  ;;  %vm766_vm0 = vmmov 0   ;;  %v767_v13 = vmov 0.0   ;;  %s763_s28 = sphi %s826_s28, %s215_s28  }
  0x13   : >> { %v219_v4 = vld [vmem:[%s962_s1] sm:$0xff]  ;;  %648 = vmatprep.subr.bf16.mxu1 %v765_v5  ;;  %672 = vmatprep.subr.bf16.mxu0 %v765_v5  ;;  %v649_v6 = vpack.c.bf16 %v523_v3, %v522_v2  ;;  %v220_v7 = vld [vmem:[%s962_s1 + $0x8] sm:$0xff]  ;;  %v525_v9 = vld [vmem:[%s962_s1 + $0x98] sm:$0xff]  ;;  %s519_s30 = sshll.u32 %s763_s28, 4  ;;  %s540_s5 = sshll.u32 %s763_s28, 3 }
  0x14   : >> { %v673_v10 = vpack.c.bf16 %v220_v7, %v219_v4  ;;  %v221_v11 = vld [vmem:[%s962_s1 + $0x10] sm:$0xff]  ;;  %v222_v12 = vld [vmem:[%s962_s1 + $0x18] sm:$0xff]  ;;  %610 = vmatprep.mubr.msk.f32.mxu1 %vm766_vm0, %v767_v13  ;;  %645 = vmatprep.mubr.msk.f32.mxu0 %vm766_vm0, %v767_v13  ;;  %v652_v14 = vpack.c.bf16 %v525_v9, %v524_v8  ;;  %v526_v16 = vld [vmem:[%s962_s1 + $0xa0] sm:$0xff]  ;;  %s217_s4 = scalar_lea.vmem %s824_s27, %s519_s30  ;;  %s407_s6 = scalar_lea.vmem %s819_s24, %s540_s5 }
  0x15   : >> { %650 = vmatpush3.bf16.msra.mxu1 %v649_v6  ;;  %v676_v15 = vpack.c.bf16 %v222_v12, %v221_v11  ;;  %v527_v17 = vld [vmem:[%s962_s1 + $0xa8] sm:$0xff]  ;;  %v223_v18 = vld [vmem:[%s962_s1 + $0x20] sm:$0xff]  ;;  %v528_v22 = vld [vmem:[%s962_s1 + $0xb0] sm:$0xff]  ;;  %s215_s28 = sadd.s32 1, %s763_s28  }
  0x16   : >> { %674 = vmatpush3.bf16.msra.mxu0 %v673_v10  ;;  %651 = vmatprep.subr.bf16.mxu1 %v765_v5  ;;  %v224_v19 = vld [vmem:[%s962_s1 + $0x28] sm:$0xff]  ;;  %v655_v20 = vpack.c.bf16 %v527_v17, %v526_v16  ;;  %v529_v23 = vld [vmem:[%s962_s1 + $0xb8] sm:$0xff]  ;;  %v225_v24 = vld [vmem:[%s962_s1 + $0x30] sm:$0xff]  ;;  %p212_p5 = scmp.ge.s32.totalorder %s215_s28, 8  }
  0x17   : >> { %675 = vmatprep.subr.bf16.mxu0 %v765_v5  ;;  %v679_v21 = vpack.c.bf16 %v224_v19, %v223_v18  ;;  %v226_v25 = vld [vmem:[%s962_s1 + $0x38] sm:$0xff]  ;;  %v658_v26 = vpack.c.bf16 %v529_v23, %v528_v22  ;;  %v530_v28 = vld [vmem:[%s962_s1 + $0xc0] sm:$0xff]  ;;  %v531_v29 = vld [vmem:[%s962_s1 + $0xc8] sm:$0xff] }
  0x18   : >> { %v682_v27 = vpack.c.bf16 %v226_v25, %v225_v24  ;;  %v227_v30 = vld [vmem:[%s962_s1 + $0x40] sm:$0xff]  ;;  %v228_v31 = vld [vmem:[%s962_s1 + $0x48] sm:$0xff]  ;;  %v661_v32 = vpack.c.bf16 %v531_v29, %v530_v28  ;;  %v532_v34 = vld [vmem:[%s962_s1 + $0xd0] sm:$0xff] }
  0x19   : >> { %653 = vmatpush3.bf16.msra.mxu1 %v652_v14  ;;  %v685_v33 = vpack.c.bf16 %v228_v31, %v227_v30  ;;  %v533_v35 = vld [vmem:[%s962_s1 + $0xd8] sm:$0xff]  ;;  %v229_v36 = vld [vmem:[%s962_s1 + $0x50] sm:$0xff]  ;;  %v534_v40 = vld [vmem:[%s962_s1 + $0xe0] sm:$0xff] }
  0x1a   : >> { %677 = vmatpush3.bf16.msra.mxu0 %v676_v15  ;;  %654 = vmatprep.subr.bf16.mxu1 %v765_v5  ;;  %v230_v37 = vld [vmem:[%s962_s1 + $0x58] sm:$0xff]  ;;  %v664_v38 = vpack.c.bf16 %v533_v35, %v532_v34  ;;  %v535_v41 = vld [vmem:[%s962_s1 + $0xe8] sm:$0xff]  ;;  %v231_v42 = vld [vmem:[%s962_s1 + $0x60] sm:$0xff] }
  0x1b   : >> { %678 = vmatprep.subr.bf16.mxu0 %v765_v5  ;;  %v688_v39 = vpack.c.bf16 %v230_v37, %v229_v36  ;;  %v232_v43 = vld [vmem:[%s962_s1 + $0x68] sm:$0xff]  ;;  %v667_v44 = vpack.c.bf16 %v535_v41, %v534_v40  ;;  %v536_v46 = vld [vmem:[%s962_s1 + $0xf0] sm:$0xff]  ;;  %v537_v47 = vld [vmem:[%s962_s1 + $0xf8] sm:$0xff] }
  0x1c   : >> { %v691_v45 = vpack.c.bf16 %v232_v43, %v231_v42  ;;  %v233_v48 = vld [vmem:[%s962_s1 + $0x70] sm:$0xff]  ;;  %v234_v49 = vld [vmem:[%s962_s1 + $0x78] sm:$0xff]  ;;  %v670_v50 = vpack.c.bf16 %v537_v47, %v536_v46  ;;  %v218_v53 = vld [vmem:[%s217_s4] sm:$0xff] }
  0x1d   : >> { %656 = vmatpush3.bf16.msra.mxu1 %v655_v20  ;;  %v694_v51 = vpack.c.bf16 %v234_v49, %v233_v48  ;;  %v521_v52 = vld [vmem:[%s217_s4 + $0x10] sm:$0xff] }
  0x1e   : >> { %680 = vmatpush3.bf16.msra.mxu0 %v679_v21  ;;  %657 = vmatprep.subr.bf16.mxu1 %v765_v5 }
  0x1f   : >> { %681 = vmatprep.subr.bf16.mxu0 %v765_v5 }
  0x21   : >> { %659 = vmatpush3.bf16.msra.mxu1 %v658_v26 }
  0x22   : >> { %683 = vmatpush3.bf16.msra.mxu0 %v682_v27  ;;  %660 = vmatprep.subr.bf16.mxu1 %v765_v5 }
  0x23   : >> { %684 = vmatprep.subr.bf16.mxu0 %v765_v5 }
  0x25   : >> { %662 = vmatpush3.bf16.msra.mxu1 %v661_v32 }
  0x26   : >> { %686 = vmatpush3.bf16.msra.mxu0 %v685_v33  ;;  %663 = vmatprep.subr.bf16.mxu1 %v765_v5 }
  0x27   : >> { %687 = vmatprep.subr.bf16.mxu0 %v765_v5 }
  0x29   : >> { %665 = vmatpush3.bf16.msra.mxu1 %v664_v38 }
  0x2a   : >> { %689 = vmatpush3.bf16.msra.mxu0 %v688_v39  ;;  %666 = vmatprep.subr.bf16.mxu1 %v765_v5 }
  0x2b   : >> { %690 = vmatprep.subr.bf16.mxu0 %v765_v5 }
  0x2d   : >> { %668 = vmatpush3.bf16.msra.mxu1 %v667_v44 }
  0x2e   : >> { %692 = vmatpush3.bf16.msra.mxu0 %v691_v45  ;;  %669 = vmatprep.subr.bf16.mxu1 %v765_v5 }
  0x2f   : >> { %693 = vmatprep.subr.bf16.mxu0 %v765_v5 }
  0x31   : >> { %671 = vmatpush3.bf16.msra.mxu1 %v670_v50 }
  0x32   : >> { %695 = vmatpush3.bf16.msra.mxu0 %v694_v51 }
  0x34   : >> { %611 = vmatmul.mubr.f32.vlgmr.msra.gmra.mrb[0].mxu1 %v521_v52 }
  0x35   : >> { %646 = vmatmul.mubr.f32.vlgmr.msra.gmra.mrb[0].mxu0 %v218_v53 }
 0x107   : >> { %v322_v54 = vpop.f32.mrb[0].mxu1 }
 0x108   : >> { %v392_v55 = vpop.f32.mrb[0].mxu0  ;;  %v612_v56 = vpop.f32.mrb[1].mxu1 }
 0x109   : >> { %v393_v57 = vadd.f32 %v392_v55, %v322_v54  ;;  %v647_v58 = vpop.f32.mrb[1].mxu0  ;;  %214 = sbr.rel (!%p212_p5) target bundleno = 18 (0x12), region = 73 }
 0x10b   : >> { %v400_v59 = vmul.f32 %v809_v0, %v393_v57 }
 0x10d   : >> { %v405_v60 = vadd.f32 %v814_v1, %v400_v59 }
 0x10f   : >> { %408 = vst [vmem:[%s407_s6] sm:$0xff] %v405_v60 }
 0x110 PF: > { %s13_s14 = sadd.s32 1, %s759_s14   ;;  %s965_s12 = smov %s755_s13 }
 0x111   : > { %p10_p6 = scmp.ge.s32.totalorder %s13_s14, 4   ;;  %s966_s13 = smov %s968_s15 }
 0x113   :  { %12 = sbr.rel (!%p10_p6) target bundleno = 2 (0x2), region = 84 }

// kernel: bev_hourglass_forward.25
= control target key start
LH: loop header
LB: loop body
LE: loop exit
PB: predicated region body
PF: predicated region fallthrough
CT: control target
= control target key end

     0   :  { %s1155_s12 = smov 0   ;;  %s1157_s13 = smov 0   ;;  %s1454_s0 = inlined_call_operand.vmem [shape: f32[2,1,9,9,128], index: 0, kind: input, shape index: {}]   ;;  %s1455_s1 = inlined_call_operand.vmem [shape: f32[4,128,128], index: 1, kind: input, shape index: {}]   ;;  %s1456_s2 = inlined_call_operand.vmem [shape: f32[2,128], index: 2, kind: input, shape index: {}]   ;;  %s1457_s3 = inlined_call_operand.vmem [shape: f32[2,8,8,128], index: 3, kind: output, shape index: {}]  }
   0x1   :  { %s1159_s14 = smov 0  }
   0x2 LB: > { %s25_s15 = sadd.s32 1, %s1122_s13  ;;  %p693_p0 = scmp.ge.s32.totalorder %s1126_s14, 1  ;;  %s1126_s14 = sphi %s1159_s14, %s13_s14   ;;  %s1122_s13 = sphi %s1157_s13, %s1459_s13   ;;  %s1118_s12 = sphi %s1155_s12, %s1458_s12  }
   0x3   : > { %p27_p1 = scmp.ge.s32.totalorder %s25_s15, 2  ;;  %p157_p2 = scmp.lt.s32.totalorder %s1126_s14, 3 }
   0x5   : > { %s1461_s15 = smov (%p27_p1, %s25_s15), 0  ;;  %p158_p3 = pnand %p693_p0, %p157_p2 }
   0x6   : > { %p189_p4 = scmp.lt.s32.totalorder (!%p158_p3), %s1118_s12, 1  ;;  %v1176_v0 = vld [vmem:[%s1456_s2] ss:$0 sm:$0xff] (!%p158_p3)  ;;  %v1181_v1 = vld [vmem:[%s1456_s2 + $0x1] ss:$0 sm:$0xff] (!%p158_p3)  ;;  %s1193_s28 = smov (!%p158_p3), 0  }
   0x7   : > { %161 = sbr.rel (%p158_p3) target bundleno = 304 (0x130), region = 32 }
   0xe   : > { %s1463_s12 = smov (!%p189_p4, %s1118_s12), 1 }
   0xf   : > { %s1064_s20 = smul.u32 144, %s1463_s12  ;;  %s754_s21 = sshll.u32 %s1463_s12, 6 }
  0x10   : > { %s1186_s24 = scalar_lea.vmem %s1457_s3, %s754_s21 }
  0x11   : > { %s1191_s27 = scalar_lea.vmem %s1454_s0, %s1064_s20 }
  0x12 LB: >> { %v698_v2 = vld [vmem:[%s1455_s1 + $0x80] sm:$0xff]  ;;  %v699_v3 = vld [vmem:[%s1455_s1 + $0x88] sm:$0xff]  ;;  %v1132_v5 = vmov 0.0|0.0   ;;  %v700_v8 = vld [vmem:[%s1455_s1 + $0x90] sm:$0xff]  ;;  %vm1133_vm0 = vmmov 0   ;;  %v1134_v13 = vmov 0.0   ;;  %s1130_s28 = sphi %s1193_s28, %s215_s28  }
  0x13   : >> { %v716_v4 = vld [vmem:[%s1455_s1 + $0x100] sm:$0xff]  ;;  %963 = vmatprep.subr.bf16.mxu1 %v1132_v5  ;;  %1011 = vmatprep.subr.bf16.mxu0 %v1132_v5  ;;  %v964_v6 = vpack.c.bf16 %v699_v3, %v698_v2  ;;  %v717_v7 = vld [vmem:[%s1455_s1 + $0x108] sm:$0xff]  ;;  %v701_v9 = vld [vmem:[%s1455_s1 + $0x98] sm:$0xff]  ;;  %s697_s30 = sshll.u32 %s1130_s28, 4  ;;  %s751_s9 = sshll.u32 %s1130_s28, 3 }
  0x14   : >> { %v1012_v10 = vpack.c.bf16 %v717_v7, %v716_v4  ;;  %v718_v11 = vld [vmem:[%s1455_s1 + $0x110] sm:$0xff]  ;;  %v719_v12 = vld [vmem:[%s1455_s1 + $0x118] sm:$0xff]  ;;  %855 = vmatprep.mubr.msk.f32.mxu1 %vm1133_vm0, %v1134_v13  ;;  %925 = vmatprep.mubr.msk.f32.mxu0 %vm1133_vm0, %v1134_v13  ;;  %v967_v14 = vpack.c.bf16 %v701_v9, %v700_v8  ;;  %v702_v16 = vld [vmem:[%s1455_s1 + $0xa0] sm:$0xff]  ;;  %s1315_s4 = scalar_lea.vmem %s1191_s27, %s697_s30  ;;  %s585_s10 = scalar_lea.vmem %s1186_s24, %s751_s9 }
  0x15   : >> { %965 = vmatpush3.bf16.msra.mxu1 %v964_v6  ;;  %v1015_v15 = vpack.c.bf16 %v719_v12, %v718_v11  ;;  %v703_v17 = vld [vmem:[%s1455_s1 + $0xa8] sm:$0xff]  ;;  %v720_v18 = vld [vmem:[%s1455_s1 + $0x120] sm:$0xff]  ;;  %v704_v22 = vld [vmem:[%s1455_s1 + $0xb0] sm:$0xff]  ;;  %s215_s28 = sadd.s32 1, %s1130_s28  }
  0x16   : >> { %1013 = vmatpush3.bf16.msra.mxu0 %v1012_v10  ;;  %966 = vmatprep.subr.bf16.mxu1 %v1132_v5  ;;  %v721_v19 = vld [vmem:[%s1455_s1 + $0x128] sm:$0xff]  ;;  %v970_v20 = vpack.c.bf16 %v703_v17, %v702_v16  ;;  %v705_v23 = vld [vmem:[%s1455_s1 + $0xb8] sm:$0xff]  ;;  %v722_v24 = vld [vmem:[%s1455_s1 + $0x130] sm:$0xff]  ;;  %p212_p5 = scmp.ge.s32.totalorder %s215_s28, 8  }
  0x17   : >> { %1014 = vmatprep.subr.bf16.mxu0 %v1132_v5  ;;  %v1018_v21 = vpack.c.bf16 %v721_v19, %v720_v18  ;;  %v723_v25 = vld [vmem:[%s1455_s1 + $0x138] sm:$0xff]  ;;  %v973_v26 = vpack.c.bf16 %v705_v23, %v704_v22  ;;  %v706_v28 = vld [vmem:[%s1455_s1 + $0xc0] sm:$0xff]  ;;  %v707_v29 = vld [vmem:[%s1455_s1 + $0xc8] sm:$0xff] }
  0x18   : >> { %v1021_v27 = vpack.c.bf16 %v723_v25, %v722_v24  ;;  %v724_v30 = vld [vmem:[%s1455_s1 + $0x140] sm:$0xff]  ;;  %v725_v31 = vld [vmem:[%s1455_s1 + $0x148] sm:$0xff]  ;;  %v976_v32 = vpack.c.bf16 %v707_v29, %v706_v28  ;;  %v708_v34 = vld [vmem:[%s1455_s1 + $0xd0] sm:$0xff] }
  0x19   : >> { %968 = vmatpush3.bf16.msra.mxu1 %v967_v14  ;;  %v1024_v33 = vpack.c.bf16 %v725_v31, %v724_v30  ;;  %v709_v35 = vld [vmem:[%s1455_s1 + $0xd8] sm:$0xff]  ;;  %v726_v36 = vld [vmem:[%s1455_s1 + $0x150] sm:$0xff]  ;;  %v710_v40 = vld [vmem:[%s1455_s1 + $0xe0] sm:$0xff] }
  0x1a   : >> { %1016 = vmatpush3.bf16.msra.mxu0 %v1015_v15  ;;  %969 = vmatprep.subr.bf16.mxu1 %v1132_v5  ;;  %v727_v37 = vld [vmem:[%s1455_s1 + $0x158] sm:$0xff]  ;;  %v979_v38 = vpack.c.bf16 %v709_v35, %v708_v34  ;;  %v711_v41 = vld [vmem:[%s1455_s1 + $0xe8] sm:$0xff]  ;;  %v728_v42 = vld [vmem:[%s1455_s1 + $0x160] sm:$0xff] }
  0x1b   : >> { %1017 = vmatprep.subr.bf16.mxu0 %v1132_v5  ;;  %v1027_v39 = vpack.c.bf16 %v727_v37, %v726_v36  ;;  %v729_v43 = vld [vmem:[%s1455_s1 + $0x168] sm:$0xff]  ;;  %v982_v44 = vpack.c.bf16 %v711_v41, %v710_v40  ;;  %v712_v46 = vld [vmem:[%s1455_s1 + $0xf0] sm:$0xff]  ;;  %v713_v47 = vld [vmem:[%s1455_s1 + $0xf8] sm:$0xff] }
  0x1c   : >> { %v1030_v45 = vpack.c.bf16 %v729_v43, %v728_v42  ;;  %v730_v48 = vld [vmem:[%s1455_s1 + $0x170] sm:$0xff]  ;;  %v731_v49 = vld [vmem:[%s1455_s1 + $0x178] sm:$0xff]  ;;  %v985_v50 = vpack.c.bf16 %v713_v47, %v712_v46  ;;  %v219_v52 = vld [vmem:[%s1455_s1] sm:$0xff] }
  0x1d   : >> { %971 = vmatpush3.bf16.msra.mxu1 %v970_v20  ;;  %v1033_v51 = vpack.c.bf16 %v731_v49, %v730_v48  ;;  %v220_v53 = vld [vmem:[%s1455_s1 + $0x8] sm:$0xff]  ;;  %v733_v54 = vld [vmem:[%s1455_s1 + $0x180] sm:$0xff]  ;;  %v715_v58 = vld [vmem:[%s1315_s4 + $0x10] sm:$0xff] }
  0x1e   : >> { %1019 = vmatpush3.bf16.msra.mxu0 %v1018_v21  ;;  %972 = vmatprep.subr.bf16.mxu1 %v1132_v5  ;;  %v734_v55 = vld [vmem:[%s1455_s1 + $0x188] sm:$0xff]  ;;  %v988_v57 = vpack.c.bf16 %v220_v53, %v219_v52  ;;  %v221_v60 = vld [vmem:[%s1455_s1 + $0x10] sm:$0xff]  ;;  %v222_v61 = vld [vmem:[%s1455_s1 + $0x18] sm:$0xff] }
  0x1f   : >> { %1020 = vmatprep.subr.bf16.mxu0 %v1132_v5  ;;  %v235_v56 = vld [vmem:[%s1315_s4 + $0x1] sm:$0xff]  ;;  %v1036_v59 = vpack.c.bf16 %v734_v55, %v733_v54  ;;  %v735_v62 = vld [vmem:[%s1455_s1 + $0x190] sm:$0xff]  ;;  %v736_v63 = vld [vmem:[%s1455_s1 + $0x198] sm:$0xff]  ;;  %v991_v2 = vpack.c.bf16 %v222_v61, %v221_v60 }
  0x20   : >> { %v1039_v3 = vpack.c.bf16 %v736_v63, %v735_v62  ;;  %v223_v4 = vld [vmem:[%s1455_s1 + $0x20] sm:$0xff]  ;;  %v224_v6 = vld [vmem:[%s1455_s1 + $0x28] sm:$0xff]  ;;  %v225_v11 = vld [vmem:[%s1455_s1 + $0x30] sm:$0xff] }
  0x21   : >> { %974 = vmatpush3.bf16.msra.mxu1 %v973_v26  ;;  %v737_v7 = vld [vmem:[%s1455_s1 + $0x1a0] sm:$0xff]  ;;  %v738_v8 = vld [vmem:[%s1455_s1 + $0x1a8] sm:$0xff]  ;;  %v994_v9 = vpack.c.bf16 %v224_v6, %v223_v4  ;;  %v226_v12 = vld [vmem:[%s1455_s1 + $0x38] sm:$0xff] }
  0x22   : >> { %1022 = vmatpush3.bf16.msra.mxu0 %v1021_v27  ;;  %975 = vmatprep.subr.bf16.mxu1 %v1132_v5  ;;  %v1042_v10 = vpack.c.bf16 %v738_v8, %v737_v7  ;;  %v740_v14 = vld [vmem:[%s1455_s1 + $0x1b8] sm:$0xff]  ;;  %v997_v15 = vpack.c.bf16 %v226_v12, %v225_v11  ;;  %v227_v17 = vld [vmem:[%s1455_s1 + $0x40] sm:$0xff]  ;;  %v228_v18 = vld [vmem:[%s1455_s1 + $0x48] sm:$0xff] }
  0x23   : >> { %1023 = vmatprep.subr.bf16.mxu0 %v1132_v5  ;;  %v741_v19 = vld [vmem:[%s1455_s1 + $0x1c0] sm:$0xff]  ;;  %v742_v20 = vld [vmem:[%s1455_s1 + $0x1c8] sm:$0xff]  ;;  %v1000_v21 = vpack.c.bf16 %v228_v18, %v227_v17  ;;  %v229_v23 = vld [vmem:[%s1455_s1 + $0x50] sm:$0xff] }
  0x24   : >> { %v1048_v22 = vpack.c.bf16 %v742_v20, %v741_v19  ;;  %v230_v24 = vld [vmem:[%s1455_s1 + $0x58] sm:$0xff]  ;;  %v743_v25 = vld [vmem:[%s1455_s1 + $0x1d0] sm:$0xff]  ;;  %v231_v29 = vld [vmem:[%s1455_s1 + $0x60] sm:$0xff] }
  0x25   : >> { %977 = vmatpush3.bf16.msra.mxu1 %v976_v32  ;;  %v744_v26 = vld [vmem:[%s1455_s1 + $0x1d8] sm:$0xff]  ;;  %v1003_v27 = vpack.c.bf16 %v230_v24, %v229_v23  ;;  %v232_v30 = vld [vmem:[%s1455_s1 + $0x68] sm:$0xff]  ;;  %v745_v31 = vld [vmem:[%s1455_s1 + $0x1e0] sm:$0xff] }
  0x26   : >> { %1025 = vmatpush3.bf16.msra.mxu0 %v1024_v33  ;;  %978 = vmatprep.subr.bf16.mxu1 %v1132_v5  ;;  %v1051_v28 = vpack.c.bf16 %v744_v26, %v743_v25  ;;  %v746_v32 = vld [vmem:[%s1455_s1 + $0x1e8] sm:$0xff]  ;;  %v1006_v33 = vpack.c.bf16 %v232_v30, %v231_v29  ;;  %v233_v35 = vld [vmem:[%s1455_s1 + $0x70] sm:$0xff]  ;;  %v234_v36 = vld [vmem:[%s1455_s1 + $0x78] sm:$0xff] }
  0x27   : >> { %1026 = vmatprep.subr.bf16.mxu0 %v1132_v5  ;;  %v1054_v34 = vpack.c.bf16 %v746_v32, %v745_v31  ;;  %v747_v37 = vld [vmem:[%s1455_s1 + $0x1f0] sm:$0xff]  ;;  %v218_v41 = vld [vmem:[%s1315_s4] sm:$0xff] }
  0x28   : >> { %v732_v42 = vld [vmem:[%s1315_s4 + $0x11] sm:$0xff] }
  0x29   : >> { %980 = vmatpush3.bf16.msra.mxu1 %v979_v38  ;;  %v748_v38 = vld [vmem:[%s1455_s1 + $0x1f8] sm:$0xff] }
  0x2a   : >> { %1028 = vmatpush3.bf16.msra.mxu0 %v1027_v39  ;;  %981 = vmatprep.subr.bf16.mxu1 %v1132_v5  ;;  %v1009_v39 = vpack.c.bf16 %v234_v36, %v233_v35  ;;  %v1057_v40 = vpack.c.bf16 %v748_v38, %v747_v37 }
  0x2b   : >> { %1029 = vmatprep.subr.bf16.mxu0 %v1132_v5 }
  0x2d   : >> { %983 = vmatpush3.bf16.msra.mxu1 %v982_v44 }
  0x2e   : >> { %1031 = vmatpush3.bf16.msra.mxu0 %v1030_v45  ;;  %984 = vmatprep.subr.bf16.mxu1 %v1132_v5 }
  0x2f   : >> { %1032 = vmatprep.subr.bf16.mxu0 %v1132_v5 }
  0x31   : >> { %986 = vmatpush3.bf16.msra.mxu1 %v985_v50 }
  0x32   : >> { %1034 = vmatpush3.bf16.msra.mxu0 %v1033_v51  ;;  %987 = vmatprep.subr.bf16.mxu1 %v1132_v5 }
  0x33   : >> { %1035 = vmatprep.subr.bf16.mxu0 %v1132_v5 }
  0x34   : >> { %856 = vmatmul.mubr.f32.vlgmr.msra.gmra.mrb[0].mxu1 %v235_v56 }
  0x35   : >> { %989 = vmatpush3.bf16.msra.mxu1 %v988_v57  ;;  %926 = vmatmul.mubr.f32.vlgmr.msra.gmra.mrb[0].mxu0 %v715_v58 }
  0x36   : >> { %1037 = vmatpush3.bf16.msra.mxu0 %v1036_v59  ;;  %990 = vmatprep.subr.bf16.mxu1 %v1132_v5 }
  0x37   : >> { %1038 = vmatprep.subr.bf16.mxu0 %v1132_v5  ;;  %890 = vmatprep.mubr.msk.f32.mxu1 %vm1133_vm0, %v1134_v13 }
  0x38   : >> { %960 = vmatprep.mubr.msk.f32.mxu0 %vm1133_vm0, %v1134_v13  ;;  %v739_v13 = vld [vmem:[%s1455_s1 + $0x1b0] sm:$0xff] }
  0x39   : >> { %992 = vmatpush3.bf16.msra.mxu1 %v991_v2  ;;  %v1045_v16 = vpack.c.bf16 %v740_v14, %v739_v13 }
  0x3a   : >> { %1040 = vmatpush3.bf16.msra.mxu0 %v1039_v3  ;;  %993 = vmatprep.subr.bf16.mxu1 %v1132_v5 }
  0x3b   : >> { %1041 = vmatprep.subr.bf16.mxu0 %v1132_v5 }
  0x3d   : >> { %995 = vmatpush3.bf16.msra.mxu1 %v994_v9 }
  0x3e   : >> { %1043 = vmatpush3.bf16.msra.mxu0 %v1042_v10  ;;  %996 = vmatprep.subr.bf16.mxu1 %v1132_v5 }
  0x3f   : >> { %1044 = vmatprep.subr.bf16.mxu0 %v1132_v5 }
  0x41   : >> { %998 = vmatpush3.bf16.msra.mxu1 %v997_v15 }
  0x42   : >> { %1046 = vmatpush3.bf16.msra.mxu0 %v1045_v16  ;;  %999 = vmatprep.subr.bf16.mxu1 %v1132_v5 }
  0x43   : >> { %1047 = vmatprep.subr.bf16.mxu0 %v1132_v5 }
  0x45   : >> { %1001 = vmatpush3.bf16.msra.mxu1 %v1000_v21 }
  0x46   : >> { %1049 = vmatpush3.bf16.msra.mxu0 %v1048_v22  ;;  %1002 = vmatprep.subr.bf16.mxu1 %v1132_v5 }
  0x47   : >> { %1050 = vmatprep.subr.bf16.mxu0 %v1132_v5 }
  0x49   : >> { %1004 = vmatpush3.bf16.msra.mxu1 %v1003_v27 }
  0x4a   : >> { %1052 = vmatpush3.bf16.msra.mxu0 %v1051_v28  ;;  %1005 = vmatprep.subr.bf16.mxu1 %v1132_v5 }
  0x4b   : >> { %1053 = vmatprep.subr.bf16.mxu0 %v1132_v5 }
  0x4d   : >> { %1007 = vmatpush3.bf16.msra.mxu1 %v1006_v33 }
  0x4e   : >> { %1055 = vmatpush3.bf16.msra.mxu0 %v1054_v34  ;;  %1008 = vmatprep.subr.bf16.mxu1 %v1132_v5 }
  0x4f   : >> { %1056 = vmatprep.subr.bf16.mxu0 %v1132_v5 }
  0x51   : >> { %1010 = vmatpush3.bf16.msra.mxu1 %v1009_v39 }
  0x52   : >> { %1058 = vmatpush3.bf16.msra.mxu0 %v1057_v40 }
  0x54   : >> { %891 = vmatmul.mubr.f32.vlgmr.msra.gmra.mrb[0].mxu1 %v218_v41 }
  0x55   : >> { %961 = vmatmul.mubr.f32.vlgmr.msra.gmra.mrb[0].mxu0 %v732_v42 }
 0x127   : >> { %v389_v43 = vpop.f32.mrb[0].mxu1 }
 0x128   : >> { %v569_v44 = vpop.f32.mrb[0].mxu0  ;;  %v892_v45 = vpop.f32.mrb[1].mxu1 }
 0x129   : >> { %v1059_v46 = vadd.f32 %v569_v44, %v389_v43  ;;  %v962_v47 = vpop.f32.mrb[1].mxu0  ;;  %214 = sbr.rel (!%p212_p5) target bundleno = 18 (0x12), region = 75 }
 0x12b   : >> { %v578_v48 = vmul.f32 %v1059_v46, %v1176_v0 }
 0x12d   : >> { %v583_v49 = vadd.f32 %v1181_v1, %v578_v48 }
 0x12f   : >> { %586 = vst [vmem:[%s585_s10] sm:$0xff] %v583_v49 }
 0x130 PF: > { %s13_s14 = sadd.s32 1, %s1126_s14   ;;  %s1458_s12 = smov %s1122_s13 }
 0x131   : > { %p10_p6 = scmp.ge.s32.totalorder %s13_s14, 4   ;;  %s1459_s13 = smov %s1461_s15 }
 0x133   :  { %12 = sbr.rel (!%p10_p6) target bundleno = 2 (0x2), region = 86 }

// kernel: bev_hourglass_forward.22
= control target key start
LH: loop header
LB: loop body
LE: loop exit
PB: predicated region body
PF: predicated region fallthrough
CT: control target
= control target key end

     0   :  { %s599_s12 = smov 0   ;;  %s601_s13 = smov 0   ;;  %s708_s0 = inlined_call_operand.vmem [shape: f32[2,1,9,9,128], index: 0, kind: input, shape index: {}]   ;;  %s709_s1 = inlined_call_operand.vmem [shape: f32[1,128,128], index: 1, kind: input, shape index: {}]   ;;  %s710_s2 = inlined_call_operand.vmem [shape: f32[2,128], index: 2, kind: input, shape index: {}]   ;;  %s711_s3 = inlined_call_operand.vmem [shape: f32[2,8,8,128], index: 3, kind: output, shape index: {}]  }
   0x1   :  { %s603_s14 = smov 0  }
   0x2 LB: > { %s25_s15 = sadd.s32 1, %s566_s13  ;;  %p421_p0 = scmp.ge.s32.totalorder %s570_s14, 1  ;;  %s570_s14 = sphi %s603_s14, %s13_s14   ;;  %s566_s13 = sphi %s601_s13, %s713_s13   ;;  %s562_s12 = sphi %s599_s12, %s712_s12  }
   0x3   : > { %p27_p1 = scmp.ge.s32.totalorder %s25_s15, 2  ;;  %p157_p2 = scmp.lt.s32.totalorder %s570_s14, 3 }
   0x5   : > { %s715_s15 = smov (%p27_p1, %s25_s15), 0  ;;  %p158_p3 = pnand %p421_p0, %p157_p2 }
   0x6   : > { %p189_p4 = scmp.lt.s32.totalorder (!%p158_p3), %s562_s12, 1  ;;  %v620_v0 = vld [vmem:[%s710_s2] ss:$0 sm:$0xff] (!%p158_p3)  ;;  %v625_v1 = vld [vmem:[%s710_s2 + $0x1] ss:$0 sm:$0xff] (!%p158_p3)  ;;  %s637_s28 = smov (!%p158_p3), 0  }
   0x7   : > { %161 = sbr.rel (%p158_p3) target bundleno = 269 (0x10d), region = 32 }
   0xe   : > { %s717_s12 = smov (!%p189_p4, %s562_s12), 1 }
   0xf   : > { %s508_s20 = smul.u32 144, %s717_s12  ;;  %s431_s21 = sshll.u32 %s717_s12, 6 }
  0x10   : > { %s630_s24 = scalar_lea.vmem %s711_s3, %s431_s21 }
  0x11   : > { %s635_s27 = scalar_lea.vmem %s708_s0, %s508_s20 }
  0x12 LB: >> { %v219_v2 = vld [vmem:[%s709_s1] sm:$0xff]  ;;  %v220_v3 = vld [vmem:[%s709_s1 + $0x8] sm:$0xff]  ;;  %v221_v4 = vld [vmem:[%s709_s1 + $0x10] sm:$0xff]  ;;  %v576_v5 = vmov 0.0|0.0   ;;  %vm577_vm0 = vmmov 0   ;;  %v578_v8 = vmov 0.0   ;;  %s574_s28 = sphi %s637_s28, %s215_s28  }
  0x13   : >> { %484 = vmatprep.subr.bf16.mxu0 %v576_v5  ;;  %v485_v6 = vpack.c.bf16 %v220_v3, %v219_v2  ;;  %v222_v7 = vld [vmem:[%s709_s1 + $0x18] sm:$0xff]  ;;  %481 = vmatprep.mubr.msk.f32.mxu0 %vm577_vm0, %v578_v8  ;;  %v223_v10 = vld [vmem:[%s709_s1 + $0x20] sm:$0xff]  ;;  %v224_v11 = vld [vmem:[%s709_s1 + $0x28] sm:$0xff]  ;;  %s425_s16 = sshll.u32 %s574_s28, 4  ;;  %s428_s18 = sshll.u32 %s574_s28, 3 }
  0x14   : >> { %v488_v9 = vpack.c.bf16 %v222_v7, %v221_v4  ;;  %v491_v12 = vpack.c.bf16 %v224_v11, %v223_v10  ;;  %v225_v13 = vld [vmem:[%s709_s1 + $0x30] sm:$0xff]  ;;  %v226_v14 = vld [vmem:[%s709_s1 + $0x38] sm:$0xff]  ;;  %v227_v16 = vld [vmem:[%s709_s1 + $0x40] sm:$0xff]  ;;  %s217_s17 = scalar_lea.vmem %s635_s27, %s425_s16  ;;  %s316_s19 = scalar_lea.vmem %s630_s24, %s428_s18 }
  0x15   : >> { %486 = vmatpush3.bf16.msra.mxu0 %v485_v6  ;;  %v494_v15 = vpack.c.bf16 %v226_v14, %v225_v13  ;;  %v228_v17 = vld [vmem:[%s709_s1 + $0x48] sm:$0xff]  ;;  %v229_v19 = vld [vmem:[%s709_s1 + $0x50] sm:$0xff]  ;;  %v230_v20 = vld [vmem:[%s709_s1 + $0x58] sm:$0xff]  ;;  %s215_s28 = sadd.s32 1, %s574_s28  }
  0x16   : >> { %487 = vmatprep.subr.bf16.mxu0 %v576_v5  ;;  %v497_v18 = vpack.c.bf16 %v228_v17, %v227_v16  ;;  %v500_v21 = vpack.c.bf16 %v230_v20, %v229_v19  ;;  %v231_v22 = vld [vmem:[%s709_s1 + $0x60] sm:$0xff]  ;;  %v232_v23 = vld [vmem:[%s709_s1 + $0x68] sm:$0xff]  ;;  %v233_v25 = vld [vmem:[%s709_s1 + $0x70] sm:$0xff]  ;;  %p212_p5 = scmp.ge.s32.totalorder %s215_s28, 8  }
  0x17   : >> { %v503_v24 = vpack.c.bf16 %v232_v23, %v231_v22  ;;  %v234_v26 = vld [vmem:[%s709_s1 + $0x78] sm:$0xff]  ;;  %v218_v28 = vld [vmem:[%s217_s17] sm:$0xff] }
  0x18   : >> { %v506_v27 = vpack.c.bf16 %v234_v26, %v233_v25 }
  0x19   : >> { %489 = vmatpush3.bf16.msra.mxu0 %v488_v9 }
  0x1a   : >> { %490 = vmatprep.subr.bf16.mxu0 %v576_v5 }
  0x1d   : >> { %492 = vmatpush3.bf16.msra.mxu0 %v491_v12 }
  0x1e   : >> { %493 = vmatprep.subr.bf16.mxu0 %v576_v5 }
  0x21   : >> { %495 = vmatpush3.bf16.msra.mxu0 %v494_v15 }
  0x22   : >> { %496 = vmatprep.subr.bf16.mxu0 %v576_v5 }
  0x25   : >> { %498 = vmatpush3.bf16.msra.mxu0 %v497_v18 }
  0x26   : >> { %499 = vmatprep.subr.bf16.mxu0 %v576_v5 }
  0x29   : >> { %501 = vmatpush3.bf16.msra.mxu0 %v500_v21 }
  0x2a   : >> { %502 = vmatprep.subr.bf16.mxu0 %v576_v5 }
  0x2d   : >> { %504 = vmatpush3.bf16.msra.mxu0 %v503_v24 }
  0x2e   : >> { %505 = vmatprep.subr.bf16.mxu0 %v576_v5 }
  0x31   : >> { %507 = vmatpush3.bf16.msra.mxu0 %v506_v27 }
  0x34   : >> { %482 = vmatmul.mubr.f32.vlgmr.msra.gmra.mrb[0].mxu0 %v218_v28 }
 0x106   : > { %214 = sbr.rel (!%p212_p5) target bundleno = 18 (0x12), region = 71 }
 0x107   : >> { %v301_v29 = vpop.f32.mrb[0].mxu0 }
 0x108   : >> { %v309_v30 = vmul.f32 %v620_v0, %v301_v29  ;;  %v483_v31 = vpop.f32.mrb[1].mxu0 }
 0x10a   : >> { %v314_v32 = vadd.f32 %v625_v1, %v309_v30 }
 0x10c   : >> { %317 = vst [vmem:[%s316_s19] sm:$0xff] %v314_v32 }
 0x10d PF: > { %s13_s14 = sadd.s32 1, %s570_s14   ;;  %s712_s12 = smov %s566_s13 }
 0x10e   : > { %p10_p6 = scmp.ge.s32.totalorder %s13_s14, 4   ;;  %s713_s13 = smov %s715_s15 }
 0x110   :  { %12 = sbr.rel (!%p10_p6) target bundleno = 2 (0x2), region = 82 }

// kernel: bev_hourglass_forward.23
= control target key start
LH: loop header
LB: loop body
LE: loop exit
PB: predicated region body
PF: predicated region fallthrough
CT: control target
= control target key end

     0   :  { %s780_s12 = smov 0   ;;  %s782_s13 = smov 0   ;;  %s953_s0 = inlined_call_operand.vmem [shape: f32[2,1,9,9,128], index: 0, kind: input, shape index: {}]   ;;  %s954_s1 = inlined_call_operand.vmem [shape: f32[2,128,128], index: 1, kind: input, shape index: {}]   ;;  %s955_s2 = inlined_call_operand.vmem [shape: f32[2,128], index: 2, kind: input, shape index: {}]   ;;  %s956_s3 = inlined_call_operand.vmem [shape: f32[2,8,8,128], index: 3, kind: output, shape index: {}]  }
   0x1   :  { %s784_s14 = smov 0  }
   0x2 LB: > { %s25_s15 = sadd.s32 1, %s747_s13  ;;  %p509_p0 = scmp.ge.s32.totalorder %s751_s14, 1  ;;  %s751_s14 = sphi %s784_s14, %s13_s14   ;;  %s747_s13 = sphi %s782_s13, %s958_s13   ;;  %s743_s12 = sphi %s780_s12, %s957_s12  }
   0x3   : > { %p27_p1 = scmp.ge.s32.totalorder %s25_s15, 2  ;;  %p157_p2 = scmp.lt.s32.totalorder %s751_s14, 3 }
   0x5   : > { %s960_s15 = smov (%p27_p1, %s25_s15), 0  ;;  %p158_p3 = pnand %p509_p0, %p157_p2 }
   0x6   : > { %p189_p4 = scmp.lt.s32.totalorder (!%p158_p3), %s743_s12, 1  ;;  %v801_v0 = vld [vmem:[%s955_s2] ss:$0 sm:$0xff] (!%p158_p3)  ;;  %v806_v1 = vld [vmem:[%s955_s2 + $0x1] ss:$0 sm:$0xff] (!%p158_p3)  ;;  %s818_s28 = smov (!%p158_p3), 0  }
   0x7   : > { %161 = sbr.rel (%p158_p3) target bundleno = 272 (0x110), region = 32 }
   0xe   : > { %s962_s12 = smov (!%p189_p4, %s743_s12), 1 }
   0xf   : > { %s689_s20 = smul.u32 144, %s962_s12  ;;  %s535_s21 = sshll.u32 %s962_s12, 6 }
  0x10   : > { %s811_s24 = scalar_lea.vmem %s956_s3, %s535_s21 }
  0x11   : > { %s816_s27 = scalar_lea.vmem %s953_s0, %s689_s20 }
  0x12 LB: >> { %v514_v2 = vld [vmem:[%s954_s1 + $0x80] sm:$0xff]  ;;  %v515_v3 = vld [vmem:[%s954_s1 + $0x88] sm:$0xff]  ;;  %v757_v5 = vmov 0.0|0.0   ;;  %v516_v8 = vld [vmem:[%s954_s1 + $0x90] sm:$0xff]  ;;  %vm758_vm0 = vmmov 0   ;;  %v759_v13 = vmov 0.0   ;;  %s755_s28 = sphi %s818_s28, %s215_s28  }
  0x13   : >> { %v219_v4 = vld [vmem:[%s954_s1] sm:$0xff]  ;;  %640 = vmatprep.subr.bf16.mxu1 %v757_v5  ;;  %664 = vmatprep.subr.bf16.mxu0 %v757_v5  ;;  %v641_v6 = vpack.c.bf16 %v515_v3, %v514_v2  ;;  %v220_v7 = vld [vmem:[%s954_s1 + $0x8] sm:$0xff]  ;;  %v517_v9 = vld [vmem:[%s954_s1 + $0x98] sm:$0xff]  ;;  %s513_s30 = sshll.u32 %s755_s28, 4  ;;  %s532_s5 = sshll.u32 %s755_s28, 3 }
  0x14   : >> { %v665_v10 = vpack.c.bf16 %v220_v7, %v219_v4  ;;  %v221_v11 = vld [vmem:[%s954_s1 + $0x10] sm:$0xff]  ;;  %v222_v12 = vld [vmem:[%s954_s1 + $0x18] sm:$0xff]  ;;  %602 = vmatprep.mubr.msk.f32.mxu1 %vm758_vm0, %v759_v13  ;;  %637 = vmatprep.mubr.msk.f32.mxu0 %vm758_vm0, %v759_v13  ;;  %v644_v14 = vpack.c.bf16 %v517_v9, %v516_v8  ;;  %v518_v16 = vld [vmem:[%s954_s1 + $0xa0] sm:$0xff]  ;;  %s217_s4 = scalar_lea.vmem %s816_s27, %s513_s30  ;;  %s404_s6 = scalar_lea.vmem %s811_s24, %s532_s5 }
  0x15   : >> { %642 = vmatpush3.bf16.msra.mxu1 %v641_v6  ;;  %v668_v15 = vpack.c.bf16 %v222_v12, %v221_v11  ;;  %v519_v17 = vld [vmem:[%s954_s1 + $0xa8] sm:$0xff]  ;;  %v223_v18 = vld [vmem:[%s954_s1 + $0x20] sm:$0xff]  ;;  %v520_v22 = vld [vmem:[%s954_s1 + $0xb0] sm:$0xff]  ;;  %s215_s28 = sadd.s32 1, %s755_s28  }
  0x16   : >> { %666 = vmatpush3.bf16.msra.mxu0 %v665_v10  ;;  %643 = vmatprep.subr.bf16.mxu1 %v757_v5  ;;  %v224_v19 = vld [vmem:[%s954_s1 + $0x28] sm:$0xff]  ;;  %v647_v20 = vpack.c.bf16 %v519_v17, %v518_v16  ;;  %v521_v23 = vld [vmem:[%s954_s1 + $0xb8] sm:$0xff]  ;;  %v225_v24 = vld [vmem:[%s954_s1 + $0x30] sm:$0xff]  ;;  %p212_p5 = scmp.ge.s32.totalorder %s215_s28, 8  }
  0x17   : >> { %667 = vmatprep.subr.bf16.mxu0 %v757_v5  ;;  %v671_v21 = vpack.c.bf16 %v224_v19, %v223_v18  ;;  %v226_v25 = vld [vmem:[%s954_s1 + $0x38] sm:$0xff]  ;;  %v650_v26 = vpack.c.bf16 %v521_v23, %v520_v22  ;;  %v522_v28 = vld [vmem:[%s954_s1 + $0xc0] sm:$0xff]  ;;  %v523_v29 = vld [vmem:[%s954_s1 + $0xc8] sm:$0xff] }
  0x18   : >> { %v674_v27 = vpack.c.bf16 %v226_v25, %v225_v24  ;;  %v227_v30 = vld [vmem:[%s954_s1 + $0x40] sm:$0xff]  ;;  %v228_v31 = vld [vmem:[%s954_s1 + $0x48] sm:$0xff]  ;;  %v653_v32 = vpack.c.bf16 %v523_v29, %v522_v28  ;;  %v524_v34 = vld [vmem:[%s954_s1 + $0xd0] sm:$0xff] }
  0x19   : >> { %645 = vmatpush3.bf16.msra.mxu1 %v644_v14  ;;  %v677_v33 = vpack.c.bf16 %v228_v31, %v227_v30  ;;  %v525_v35 = vld [vmem:[%s954_s1 + $0xd8] sm:$0xff]  ;;  %v229_v36 = vld [vmem:[%s954_s1 + $0x50] sm:$0xff]  ;;  %v526_v40 = vld [vmem:[%s954_s1 + $0xe0] sm:$0xff] }
  0x1a   : >> { %669 = vmatpush3.bf16.msra.mxu0 %v668_v15  ;;  %646 = vmatprep.subr.bf16.mxu1 %v757_v5  ;;  %v230_v37 = vld [vmem:[%s954_s1 + $0x58] sm:$0xff]  ;;  %v656_v38 = vpack.c.bf16 %v525_v35, %v524_v34  ;;  %v527_v41 = vld [vmem:[%s954_s1 + $0xe8] sm:$0xff]  ;;  %v231_v42 = vld [vmem:[%s954_s1 + $0x60] sm:$0xff] }
  0x1b   : >> { %670 = vmatprep.subr.bf16.mxu0 %v757_v5  ;;  %v680_v39 = vpack.c.bf16 %v230_v37, %v229_v36  ;;  %v232_v43 = vld [vmem:[%s954_s1 + $0x68] sm:$0xff]  ;;  %v659_v44 = vpack.c.bf16 %v527_v41, %v526_v40  ;;  %v528_v46 = vld [vmem:[%s954_s1 + $0xf0] sm:$0xff]  ;;  %v529_v47 = vld [vmem:[%s954_s1 + $0xf8] sm:$0xff] }
  0x1c   : >> { %v683_v45 = vpack.c.bf16 %v232_v43, %v231_v42  ;;  %v233_v48 = vld [vmem:[%s954_s1 + $0x70] sm:$0xff]  ;;  %v234_v49 = vld [vmem:[%s954_s1 + $0x78] sm:$0xff]  ;;  %v662_v50 = vpack.c.bf16 %v529_v47, %v528_v46  ;;  %v235_v52 = vld [vmem:[%s217_s4 + $0x1] sm:$0xff] }
  0x1d   : >> { %648 = vmatpush3.bf16.msra.mxu1 %v647_v20  ;;  %v686_v51 = vpack.c.bf16 %v234_v49, %v233_v48  ;;  %v218_v53 = vld [vmem:[%s217_s4] sm:$0xff] }
  0x1e   : >> { %672 = vmatpush3.bf16.msra.mxu0 %v671_v21  ;;  %649 = vmatprep.subr.bf16.mxu1 %v757_v5 }
  0x1f   : >> { %673 = vmatprep.subr.bf16.mxu0 %v757_v5 }
  0x21   : >> { %651 = vmatpush3.bf16.msra.mxu1 %v650_v26 }
  0x22   : >> { %675 = vmatpush3.bf16.msra.mxu0 %v674_v27  ;;  %652 = vmatprep.subr.bf16.mxu1 %v757_v5 }
  0x23   : >> { %676 = vmatprep.subr.bf16.mxu0 %v757_v5 }
  0x25   : >> { %654 = vmatpush3.bf16.msra.mxu1 %v653_v32 }
  0x26   : >> { %678 = vmatpush3.bf16.msra.mxu0 %v677_v33  ;;  %655 = vmatprep.subr.bf16.mxu1 %v757_v5 }
  0x27   : >> { %679 = vmatprep.subr.bf16.mxu0 %v757_v5 }
  0x29   : >> { %657 = vmatpush3.bf16.msra.mxu1 %v656_v38 }
  0x2a   : >> { %681 = vmatpush3.bf16.msra.mxu0 %v680_v39  ;;  %658 = vmatprep.subr.bf16.mxu1 %v757_v5 }
  0x2b   : >> { %682 = vmatprep.subr.bf16.mxu0 %v757_v5 }
  0x2d   : >> { %660 = vmatpush3.bf16.msra.mxu1 %v659_v44 }
  0x2e   : >> { %684 = vmatpush3.bf16.msra.mxu0 %v683_v45  ;;  %661 = vmatprep.subr.bf16.mxu1 %v757_v5 }
  0x2f   : >> { %685 = vmatprep.subr.bf16.mxu0 %v757_v5 }
  0x31   : >> { %663 = vmatpush3.bf16.msra.mxu1 %v662_v50 }
  0x32   : >> { %687 = vmatpush3.bf16.msra.mxu0 %v686_v51 }
  0x34   : >> { %603 = vmatmul.mubr.f32.vlgmr.msra.gmra.mrb[0].mxu1 %v235_v52 }
  0x35   : >> { %638 = vmatmul.mubr.f32.vlgmr.msra.gmra.mrb[0].mxu0 %v218_v53 }
 0x107   : >> { %v319_v54 = vpop.f32.mrb[0].mxu1 }
 0x108   : >> { %v389_v55 = vpop.f32.mrb[0].mxu0  ;;  %v604_v56 = vpop.f32.mrb[1].mxu1 }
 0x109   : >> { %v390_v57 = vadd.f32 %v389_v55, %v319_v54  ;;  %v639_v58 = vpop.f32.mrb[1].mxu0  ;;  %214 = sbr.rel (!%p212_p5) target bundleno = 18 (0x12), region = 72 }
 0x10b   : >> { %v397_v59 = vmul.f32 %v801_v0, %v390_v57 }
 0x10d   : >> { %v402_v60 = vadd.f32 %v806_v1, %v397_v59 }
 0x10f   : >> { %405 = vst [vmem:[%s404_s6] sm:$0xff] %v402_v60 }
 0x110 PF: > { %s13_s14 = sadd.s32 1, %s751_s14   ;;  %s957_s12 = smov %s747_s13 }
 0x111   : > { %p10_p6 = scmp.ge.s32.totalorder %s13_s14, 4   ;;  %s958_s13 = smov %s960_s15 }
 0x113   :  { %12 = sbr.rel (!%p10_p6) target bundleno = 2 (0x2), region = 83 }

</bundles_post_ra>
